<compile_context>
chip_gen: v7x
topology: tpu7x:2x2x1
jax: 0.10.0
libtpu: 0.0.40
codegen_flags: <defaults>
</compile_context>

<pallas_src>
import jax
import jax.numpy as jnp
from jax import lax
from jax.experimental import pallas as pl
from jax.experimental.pallas import tpu as pltpu

# ----- small config, consistent with the Transformer_s constructor arguments -----
D_MODEL = 32      # == d_word_vec (residual constraint in the module)
N_HEAD = 4
D_K = 8
D_V = 8
D_INNER = 64
N_LAYERS = 2
LN_EPS = 1e-6

HDK = N_HEAD * D_K            # 32
HDV = N_HEAD * D_V            # 32
INV_TEMP = 1.0 / (float(D_K) ** 0.5)
NEG_INF = -1e9


# ---------------------------- in-kernel helpers ----------------------------

def _mm(a, w):
    """MXU matmul, bf16 operands, f32 accumulation."""
    return jnp.dot(a.astype(jnp.bfloat16), w.astype(jnp.bfloat16),
                   preferred_element_type=jnp.float32)


def _layernorm(x, g, b):
    mu = jnp.mean(x, axis=-1, keepdims=True)
    var = jnp.mean((x - mu) ** 2, axis=-1, keepdims=True)
    return (x - mu) * lax.rsqrt(var + LN_EPS) * g + b


def _softmax_masked(s, maskf):
    # masked_fill(mask == 0, -1e9) then softmax along the key axis
    s = jnp.where(maskf > 0.5, s, NEG_INF)
    s = s - jnp.max(s, axis=-1, keepdims=True)
    e = jnp.exp(s)
    return e * pl.reciprocal(jnp.sum(e, axis=-1, keepdims=True), approx=True)


def _multihead(q, k, v, maskf, fc_w, store_attn):
    """q:(Lq,H*dk) k:(Lk,H*dk) v:(Lk,H*dv) (q already scaled by 1/temperature)."""
    heads = []
    for h in range(N_HEAD):
        qh = q[:, h * D_K:(h + 1) * D_K]
        kh = k[:, h * D_K:(h + 1) * D_K]
        vh = v[:, h * D_V:(h + 1) * D_V]
        # q @ k^T without an explicit transpose (contract dim 1 vs dim 1)
        s = lax.dot_general(qh.astype(jnp.bfloat16), kh.astype(jnp.bfloat16),
                            (((1,), (1,)), ((), ())),
                            preferred_element_type=jnp.float32)
        attn = _softmax_masked(s, maskf)
        if store_attn is not None:
            store_attn(h, attn)
        heads.append(_mm(attn, vh))
    o = jnp.concatenate(heads, axis=-1)        # (Lq, H*dv)
    return _mm(o, fc_w)                        # (Lq, D)


def _positional_encoding(seq, w1, b1, w2, b2):
    """seq:(L, 2+D) -> x + MLP([pos0,pos1]) without a K=2 matmul."""
    p0 = seq[:, 0:1]
    p1 = seq[:, 1:2]
    x = seq[:, 2:]
    h = p0 * w1[0:1, :] + p1 * w1[1:2, :] + b1
    h = jnp.maximum(h, 0.0)
    pe = _mm(h, w2) + b2
    return x + pe


# ---------------------------- fused encoder kernel ----------------------------

def _encoder_kernel(seq_ref, maskf_ref,
                    pos_w1_ref, pos_b1_ref, pos_w2_ref, pos_b2_ref,
                    ln_g_ref, ln_b_ref,
                    qkv_w_ref, fc_w_ref, at_g_ref, at_b_ref,
                    f1_w_ref, f1_b_ref, f2_w_ref, f2_b_ref, ff_g_ref, ff_b_ref,
                    out_ref, attn_ref):
    seq = seq_ref[0]                                      # (Ls, 2 + D)
    Ls = seq.shape[0]

    x = _positional_encoding(seq, pos_w1_ref[...], pos_b1_ref[...],
                             pos_w2_ref[...], pos_b2_ref[...])
    x = _layernorm(x, ln_g_ref[...], ln_b_ref[...])       # dropout == identity (eval)

    maskf = jnp.broadcast_to(maskf_ref[0], (Ls, Ls))      # (1,Ls) -> (Lq,Lk)

    for l in range(N_LAYERS):
        # ---- self attention ----
        residual = x
        qkv = _mm(x, qkv_w_ref[l])                        # (Ls, 3*H*dk)
        q = qkv[:, 0:HDK] * INV_TEMP
        k = qkv[:, HDK:2 * HDK]
        v = qkv[:, 2 * HDK:2 * HDK + HDV]

        def store(h, a, l=l):
            attn_ref[l, 0, h] = a

        o = _multihead(q, k, v, maskf, fc_w_ref[l], store)
        x = _layernorm(o + residual, at_g_ref[l], at_b_ref[l])

        # ---- position-wise FFN ----
        residual = x
        hdn = jnp.maximum(_mm(x, f1_w_ref[l]) + f1_b_ref[l], 0.0)
        y = _mm(hdn, f2_w_ref[l]) + f2_b_ref[l]
        x = _layernorm(y + residual, ff_g_ref[l], ff_b_ref[l])

    out_ref[0] = x


# ---------------------------- fused decoder kernel ----------------------------

def _decoder_kernel(seq_ref, enc_ref, slf_maskf_ref, src_maskf_ref,
                    pos_w1_ref, pos_b1_ref, pos_w2_ref, pos_b2_ref,
                    ln_g_ref, ln_b_ref,
                    s_qkv_ref, s_fc_ref, s_g_ref, s_b_ref,
                    c_q_ref, c_kv_ref, c_fc_ref, c_g_ref, c_b_ref,
                    f1_w_ref, f1_b_ref, f2_w_ref, f2_b_ref, ff_g_ref, ff_b_ref,
                    out_ref, enc_attn_ref):
    seq = seq_ref[0]                                      # (Lt, 2 + D)
    enc = enc_ref[0]                                      # (Ls, D)
    Lt = seq.shape[0]
    Ls = enc.shape[0]

    x = _positional_encoding(seq, pos_w1_ref[...], pos_b1_ref[...],
                             pos_w2_ref[...], pos_b2_ref[...])
    x = _layernorm(x, ln_g_ref[...], ln_b_ref[...])       # dropout == identity (eval)

    slf_mask = slf_maskf_ref[0]                           # (Lt, Lt) pad & causal
    cross_mask = jnp.broadcast_to(src_maskf_ref[0], (Lt, Ls))

    for l in range(N_LAYERS):
        # ---- masked self attention (maps not returned by Transformer_s.forward) ----
        residual = x
        qkv = _mm(x, s_qkv_ref[l])
        q = qkv[:, 0:HDK] * INV_TEMP
        k = qkv[:, HDK:2 * HDK]
        v = qkv[:, 2 * HDK:2 * HDK + HDV]
        o = _multihead(q, k, v, slf_mask, s_fc_ref[l], None)
        x = _layernorm(o + residual, s_g_ref[l], s_b_ref[l])

        # ---- encoder-decoder cross attention ----
        residual = x
        q = _mm(x, c_q_ref[l]) * INV_TEMP                 # (Lt, H*dk)
        kv = _mm(enc, c_kv_ref[l])                        # (Ls, 2*H*dk)
        k = kv[:, 0:HDK]
        v = kv[:, HDK:HDK + HDV]

        def store(h, a, l=l):
            enc_attn_ref[l, 0, h] = a

        o = _multihead(q, k, v, cross_mask, c_fc_ref[l], store)
        x = _layernorm(o + residual, c_g_ref[l], c_b_ref[l])

        # ---- position-wise FFN ----
        residual = x
        hdn = jnp.maximum(_mm(x, f1_w_ref[l]) + f1_b_ref[l], 0.0)
        y = _mm(hdn, f2_w_ref[l]) + f2_b_ref[l]
        x = _layernorm(y + residual, ff_g_ref[l], ff_b_ref[l])

    out_ref[0] = x


# ---------------------------- pallas_call wrappers ----------------------------

def _const_map(ndim):
    return lambda b: (0,) * ndim


def _batch_map(ndim):
    return lambda b: (b,) + (0,) * (ndim - 1)


def _full_spec(arr):
    return pl.BlockSpec(arr.shape, _const_map(arr.ndim))


def _batch_spec(arr):
    return pl.BlockSpec((1,) + tuple(arr.shape[1:]), _batch_map(arr.ndim))


def run_encoder(p, src_seq, src_maskf):
    B, Ls, _ = src_seq.shape
    weights = [p['pos_w1'], p['pos_b1'], p['pos_w2'], p['pos_b2'], p['ln_g'], p['ln_b'],
               p['slf_qkv'], p['slf_fc'], p['slf_ln_g'], p['slf_ln_b'],
               p['ffn_w1'], p['ffn_b1'], p['ffn_w2'], p['ffn_b2'],
               p['ffn_ln_g'], p['ffn_ln_b']]
    in_specs = ([_batch_spec(src_seq), _batch_spec(src_maskf)]
                + [_full_spec(w) for w in weights])
    out_shape = (jax.ShapeDtypeStruct((B, Ls, D_MODEL), jnp.float32),
                 jax.ShapeDtypeStruct((N_LAYERS, B, N_HEAD, Ls, Ls), jnp.float32))
    out_specs = (pl.BlockSpec((1, Ls, D_MODEL), lambda b: (b, 0, 0)),
                 pl.BlockSpec((N_LAYERS, 1, N_HEAD, Ls, Ls),
                              lambda b: (0, b, 0, 0, 0)))
    return pl.pallas_call(
        _encoder_kernel,
        out_shape=out_shape,
        grid=(B,),
        in_specs=in_specs,
        out_specs=out_specs,
        compiler_params=pltpu.CompilerParams(dimension_semantics=("parallel",)),
    )(src_seq, src_maskf, *weights)


def run_decoder(p, trg_seq, trg_maskf, enc_output, src_maskf):
    B, Lt, _ = trg_seq.shape
    Ls = enc_output.shape[1]
    weights = [p['pos_w1'], p['pos_b1'], p['pos_w2'], p['pos_b2'], p['ln_g'], p['ln_b'],
               p['slf_qkv'], p['slf_fc'], p['slf_ln_g'], p['slf_ln_b'],
               p['enc_q'], p['enc_kv'], p['enc_fc'], p['enc_ln_g'], p['enc_ln_b'],
               p['ffn_w1'], p['ffn_b1'], p['ffn_w2'], p['ffn_b2'],
               p['ffn_ln_g'], p['ffn_ln_b']]
    in_specs = ([_batch_spec(trg_seq), _batch_spec(enc_output),
                 _batch_spec(trg_maskf), _batch_spec(src_maskf)]
                + [_full_spec(w) for w in weights])
    out_shape = (jax.ShapeDtypeStruct((B, Lt, D_MODEL), jnp.float32),
                 jax.ShapeDtypeStruct((N_LAYERS, B, N_HEAD, Lt, Ls), jnp.float32))
    out_specs = (pl.BlockSpec((1, Lt, D_MODEL), lambda b: (b, 0, 0)),
                 pl.BlockSpec((N_LAYERS, 1, N_HEAD, Lt, Ls),
                              lambda b: (0, b, 0, 0, 0)))
    return pl.pallas_call(
        _decoder_kernel,
        out_shape=out_shape,
        grid=(B,),
        in_specs=in_specs,
        out_specs=out_specs,
        compiler_params=pltpu.CompilerParams(dimension_semantics=("parallel",)),
    )(trg_seq, enc_output, trg_maskf, src_maskf, *weights)


# ---------------------------- model forward (2 pallas_calls total) ----------------------------

def get_pad_mask(seq_feat, pad_idx):
    return (seq_feat != pad_idx)[:, None, :]                 # (B, 1, L)


def get_subsequent_mask(seq_feat):
    L = seq_feat.shape[1]
    return jnp.tril(jnp.ones((1, L, L), dtype=bool))          # 1 - triu(diag=1)


def transformer_s_forward(params, src_seq, trg_seq, src_pad_idx=0.0, trg_pad_idx=0.0):
    src_mask = get_pad_mask(src_seq[:, :, 0], src_pad_idx)                  # (B,1,Ls)
    t = trg_seq[:, :, 0]
    trg_mask = get_pad_mask(t, trg_pad_idx) & get_subsequent_mask(t)        # (B,Lt,Lt)
    src_maskf = src_mask.astype(jnp.float32)
    trg_maskf = trg_mask.astype(jnp.float32)

    enc_output, enc_slf_attn = run_encoder(params['encoder'], src_seq, src_maskf)
    dec_output, dec_enc_attn = run_decoder(params['decoder'], trg_seq, trg_maskf,
                                           enc_output, src_maskf)

    enc_slf_list = [enc_slf_attn[l] for l in range(N_LAYERS)]
    dec_enc_list = [dec_enc_attn[l] for l in range(N_LAYERS)]
    return dec_output.reshape(-1, D_MODEL), enc_slf_list, dec_enc_list


# ---------------------------- deterministic parameter init ----------------------------

def xavier(key, shape):
    fan_in, fan_out = shape
    limit = (6.0 / (fan_in + fan_out)) ** 0.5
    return jax.random.uniform(key, shape, jnp.float32, -limit, limit)


def init_params(key):
    it = iter(jax.random.split(key, 256))
    nk = lambda: next(it)
    bf = jnp.bfloat16

    def fused_qkv():
        # three independent xavier matrices (matches per-parameter init), fused for one MXU pass
        return jnp.concatenate([xavier(nk(), (D_MODEL, HDK)),
                                xavier(nk(), (D_MODEL, HDK)),
                                xavier(nk(), (D_MODEL, HDV))], axis=1)

    def fused_kv():
        return jnp.concatenate([xavier(nk(), (D_MODEL, HDK)),
                                xavier(nk(), (D_MODEL, HDV))], axis=1)

    def stack(fn):
        return jnp.stack([fn() for _ in range(N_LAYERS)])

    def common():
        return dict(
            pos_w1=xavier(nk(), (2, D_MODEL)),
            pos_b1=jnp.zeros((1, D_MODEL), jnp.float32),
            pos_w2=xavier(nk(), (D_MODEL, D_MODEL)).astype(bf),
            pos_b2=jnp.zeros((1, D_MODEL), jnp.float32),
            ln_g=jnp.ones((1, D_MODEL), jnp.float32),
            ln_b=jnp.zeros((1, D_MODEL), jnp.float32),
            ffn_w1=stack(lambda: xavier(nk(), (D_MODEL, D_INNER))).astype(bf),
            ffn_b1=jnp.zeros((N_LAYERS, 1, D_INNER), jnp.float32),
            ffn_w2=stack(lambda: xavier(nk(), (D_INNER, D_MODEL))).astype(bf),
            ffn_b2=jnp.zeros((N_LAYERS, 1, D_MODEL), jnp.float32),
            ffn_ln_g=jnp.ones((N_LAYERS, 1, D_MODEL), jnp.float32),
            ffn_ln_b=jnp.zeros((N_LAYERS, 1, D_MODEL), jnp.float32),
        )

    enc = common()
    enc.update(
        slf_qkv=stack(fused_qkv).astype(bf),
        slf_fc=stack(lambda: xavier(nk(), (HDV, D_MODEL))).astype(bf),
        slf_ln_g=jnp.ones((N_LAYERS, 1, D_MODEL), jnp.float32),
        slf_ln_b=jnp.zeros((N_LAYERS, 1, D_MODEL), jnp.float32),
    )

    dec = common()
    dec.update(
        slf_qkv=stack(fused_qkv).astype(bf),
        slf_fc=stack(lambda: xavier(nk(), (HDV, D_MODEL))).astype(bf),
        slf_ln_g=jnp.ones((N_LAYERS, 1, D_MODEL), jnp.float32),
        slf_ln_b=jnp.zeros((N_LAYERS, 1, D_MODEL), jnp.float32),
        enc_q=stack(lambda: xavier(nk(), (D_MODEL, HDK))).astype(bf),
        enc_kv=stack(fused_kv).astype(bf),
        enc_fc=stack(lambda: xavier(nk(), (HDV, D_MODEL))).astype(bf),
        enc_ln_g=jnp.ones((N_LAYERS, 1, D_MODEL), jnp.float32),
        enc_ln_b=jnp.zeros((N_LAYERS, 1, D_MODEL), jnp.float32),
    )
    return dict(encoder=enc, decoder=dec)


# ---------------------------- main ----------------------------

if __name__ == "__main__":
    key = jax.random.PRNGKey(0)
    kp, ks, kt = jax.random.split(key, 3)
    params = init_params(kp)

    B, LS, LT = 2, 16, 8
    # input last dim = 2 position coords + d_model features (as PositionalEncoding implies)
    src_seq = jax.random.normal(ks, (B, LS, D_MODEL + 2), jnp.float32)
    trg_seq = jax.random.normal(kt, (B, LT, D_MODEL + 2), jnp.float32)
    # create a couple of padded positions (pad_idx = 0.0 compared on feature 0)
    src_seq = src_seq.at[:, -2:, 0].set(0.0)
    trg_seq = trg_seq.at[1, -1, 0].set(0.0)

    fwd = jax.jit(transformer_s_forward)
    logits, enc_attn_list, dec_enc_attn_list = fwd(params, src_seq, trg_seq)

    jax.block_until_ready(logits)
    for a in enc_attn_list + dec_enc_attn_list:
        jax.block_until_ready(a)

    assert logits.shape == (B * LT, D_MODEL), logits.shape
    assert not bool(jnp.any(jnp.isnan(logits)))
    assert len(enc_attn_list) == N_LAYERS and len(dec_enc_attn_list) == N_LAYERS
    assert enc_attn_list[0].shape == (B, N_HEAD, LS, LS)
    assert dec_enc_attn_list[0].shape == (B, N_HEAD, LT, LS)
    print("KERNEL_OK")
</pallas_src>

<mosaic_0001>
module attributes {stable_mosaic.version = 11 : i64} {
  func.func @_encoder_kernel(%arg0: i32, %arg1: memref<1x16x34xf32, #tpu.memory_space<vmem>>, %arg2: memref<1x1x16xf32, #tpu.memory_space<vmem>>, %arg3: memref<2x32xf32, #tpu.memory_space<vmem>>, %arg4: memref<1x32xf32, #tpu.memory_space<vmem>>, %arg5: memref<32x32xbf16, #tpu.memory_space<vmem>>, %arg6: memref<1x32xf32, #tpu.memory_space<vmem>>, %arg7: memref<1x32xf32, #tpu.memory_space<vmem>>, %arg8: memref<1x32xf32, #tpu.memory_space<vmem>>, %arg9: memref<2x32x96xbf16, #tpu.memory_space<vmem>>, %arg10: memref<2x32x32xbf16, #tpu.memory_space<vmem>>, %arg11: memref<2x1x32xf32, #tpu.memory_space<vmem>>, %arg12: memref<2x1x32xf32, #tpu.memory_space<vmem>>, %arg13: memref<2x32x64xbf16, #tpu.memory_space<vmem>>, %arg14: memref<2x1x64xf32, #tpu.memory_space<vmem>>, %arg15: memref<2x64x32xbf16, #tpu.memory_space<vmem>>, %arg16: memref<2x1x32xf32, #tpu.memory_space<vmem>>, %arg17: memref<2x1x32xf32, #tpu.memory_space<vmem>>, %arg18: memref<2x1x32xf32, #tpu.memory_space<vmem>>, %arg19: memref<1x16x32xf32, #tpu.memory_space<vmem>>, %arg20: memref<2x1x4x16x16xf32, #tpu.memory_space<vmem>>) attributes {dimension_semantics = [#tpu.dimension_semantics<parallel>], iteration_bounds = array<i64: 2>, scalar_prefetch = 0 : i64, scratch_operands = 0 : i64, tpu.core_type = #tpu.core_type<tc>, window_params = [{transform_indices = @transform_0, window_bounds = array<i64: 1, 16, 34>}, {transform_indices = @transform_1, window_bounds = array<i64: 1, 1, 16>}, {pipeline_mode = #tpu.pipeline_mode<synchronous>, transform_indices = @transform_2, window_bounds = array<i64: 2, 32>}, {pipeline_mode = #tpu.pipeline_mode<synchronous>, transform_indices = @transform_3, window_bounds = array<i64: 1, 32>}, {pipeline_mode = #tpu.pipeline_mode<synchronous>, transform_indices = @transform_4, window_bounds = array<i64: 32, 32>}, {pipeline_mode = #tpu.pipeline_mode<synchronous>, transform_indices = @transform_5, window_bounds = array<i64: 1, 32>}, {pipeline_mode = #tpu.pipeline_mode<synchronous>, transform_indices = @transform_6, window_bounds = array<i64: 1, 32>}, {pipeline_mode = #tpu.pipeline_mode<synchronous>, transform_indices = @transform_7, window_bounds = array<i64: 1, 32>}, {pipeline_mode = #tpu.pipeline_mode<synchronous>, transform_indices = @transform_8, window_bounds = array<i64: 2, 32, 96>}, {pipeline_mode = #tpu.pipeline_mode<synchronous>, transform_indices = @transform_9, window_bounds = array<i64: 2, 32, 32>}, {pipeline_mode = #tpu.pipeline_mode<synchronous>, transform_indices = @transform_10, window_bounds = array<i64: 2, 1, 32>}, {pipeline_mode = #tpu.pipeline_mode<synchronous>, transform_indices = @transform_11, window_bounds = array<i64: 2, 1, 32>}, {pipeline_mode = #tpu.pipeline_mode<synchronous>, transform_indices = @transform_12, window_bounds = array<i64: 2, 32, 64>}, {pipeline_mode = #tpu.pipeline_mode<synchronous>, transform_indices = @transform_13, window_bounds = array<i64: 2, 1, 64>}, {pipeline_mode = #tpu.pipeline_mode<synchronous>, transform_indices = @transform_14, window_bounds = array<i64: 2, 64, 32>}, {pipeline_mode = #tpu.pipeline_mode<synchronous>, transform_indices = @transform_15, window_bounds = array<i64: 2, 1, 32>}, {pipeline_mode = #tpu.pipeline_mode<synchronous>, transform_indices = @transform_16, window_bounds = array<i64: 2, 1, 32>}, {pipeline_mode = #tpu.pipeline_mode<synchronous>, transform_indices = @transform_17, window_bounds = array<i64: 2, 1, 32>}, {transform_indices = @transform_18, window_bounds = array<i64: 1, 16, 32>}, {transform_indices = @transform_19, window_bounds = array<i64: 2, 1, 4, 16, 16>}]} {
    %c0 = arith.constant 0 : index
    %c0_0 = arith.constant 0 : index
    %c0_1 = arith.constant 0 : index
    %0 = vector.load %arg1[%c0, %c0_0, %c0_1] : memref<1x16x34xf32, #tpu.memory_space<vmem>>, vector<1x16x34xf32>
    %1 = vector.shape_cast %0 : vector<1x16x34xf32> to vector<16x34xf32>
    %c0_2 = arith.constant 0 : index
    %c0_3 = arith.constant 0 : index
    %2 = vector.load %arg3[%c0_2, %c0_3] : memref<2x32xf32, #tpu.memory_space<vmem>>, vector<2x32xf32>
    %c0_4 = arith.constant 0 : index
    %c0_5 = arith.constant 0 : index
    %3 = vector.load %arg4[%c0_4, %c0_5] : memref<1x32xf32, #tpu.memory_space<vmem>>, vector<1x32xf32>
    %c0_6 = arith.constant 0 : index
    %c0_7 = arith.constant 0 : index
    %4 = vector.load %arg5[%c0_6, %c0_7] : memref<32x32xbf16, #tpu.memory_space<vmem>>, vector<32x32xbf16>
    %c0_8 = arith.constant 0 : index
    %c0_9 = arith.constant 0 : index
    %5 = vector.load %arg6[%c0_8, %c0_9] : memref<1x32xf32, #tpu.memory_space<vmem>>, vector<1x32xf32>
    %6 = vector.extract_strided_slice %1 {offsets = [0, 0], sizes = [16, 1], strides = [1, 1]} : vector<16x34xf32> to vector<16x1xf32>
    %7 = vector.extract_strided_slice %1 {offsets = [0, 1], sizes = [16, 1], strides = [1, 1]} : vector<16x34xf32> to vector<16x1xf32>
    %8 = vector.extract_strided_slice %1 {offsets = [0, 2], sizes = [16, 32], strides = [1, 1]} : vector<16x34xf32> to vector<16x32xf32>
    %9 = vector.extract_strided_slice %2 {offsets = [0, 0], sizes = [1, 32], strides = [1, 1]} : vector<2x32xf32> to vector<1x32xf32>
    %10 = vector.broadcast %6 : vector<16x1xf32> to vector<16x32xf32>
    %11 = vector.broadcast %9 : vector<1x32xf32> to vector<16x32xf32>
    %12 = arith.mulf %10, %11 : vector<16x32xf32>
    %13 = vector.extract_strided_slice %2 {offsets = [1, 0], sizes = [1, 32], strides = [1, 1]} : vector<2x32xf32> to vector<1x32xf32>
    %14 = vector.broadcast %7 : vector<16x1xf32> to vector<16x32xf32>
    %15 = vector.broadcast %13 : vector<1x32xf32> to vector<16x32xf32>
    %16 = arith.mulf %14, %15 : vector<16x32xf32>
    %17 = arith.addf %12, %16 : vector<16x32xf32>
    %18 = vector.broadcast %3 : vector<1x32xf32> to vector<16x32xf32>
    %19 = arith.addf %17, %18 : vector<16x32xf32>
    %cst = arith.constant 0.000000e+00 : f32
    %20 = vector.broadcast %cst : f32 to vector<16x32xf32>
    %21 = arith.maximumf %19, %20 : vector<16x32xf32>
    %22 = arith.truncf %21 : vector<16x32xf32> to vector<16x32xbf16>
    %cst_10 = arith.constant dense<0.000000e+00> : vector<16x32xf32>
    %23 = tpu.matmul %22, %4, %cst_10 {dimension_numbers = #tpu.dot_dimension_numbers<[1], [0], [0], [1], [0, 0, 1, 1], [], []>} : vector<16x32xbf16>, vector<32x32xbf16>, vector<16x32xf32> -> vector<16x32xf32>
    %24 = vector.broadcast %5 : vector<1x32xf32> to vector<16x32xf32>
    %25 = arith.addf %23, %24 : vector<16x32xf32>
    %26 = arith.addf %8, %25 : vector<16x32xf32>
    %c0_11 = arith.constant 0 : index
    %c0_12 = arith.constant 0 : index
    %27 = vector.load %arg7[%c0_11, %c0_12] : memref<1x32xf32, #tpu.memory_space<vmem>>, vector<1x32xf32>
    %c0_13 = arith.constant 0 : index
    %c0_14 = arith.constant 0 : index
    %28 = vector.load %arg8[%c0_13, %c0_14] : memref<1x32xf32, #tpu.memory_space<vmem>>, vector<1x32xf32>
    %cst_15 = arith.constant dense<0.000000e+00> : vector<16xf32>
    %29 = vector.multi_reduction <add>, %26, %cst_15 [1] : vector<16x32xf32> to vector<16xf32>
    %30 = vector.shape_cast %29 : vector<16xf32> to vector<16x1xf32>
    %cst_16 = arith.constant 3.200000e+01 : f32
    %31 = vector.broadcast %cst_16 : f32 to vector<16x1xf32>
    %32 = arith.divf %30, %31 : vector<16x1xf32>
    %33 = vector.broadcast %32 : vector<16x1xf32> to vector<16x32xf32>
    %34 = arith.subf %26, %33 : vector<16x32xf32>
    %35 = arith.mulf %34, %34 : vector<16x32xf32>
    %cst_17 = arith.constant dense<0.000000e+00> : vector<16xf32>
    %36 = vector.multi_reduction <add>, %35, %cst_17 [1] : vector<16x32xf32> to vector<16xf32>
    %37 = vector.shape_cast %36 : vector<16xf32> to vector<16x1xf32>
    %cst_18 = arith.constant 3.200000e+01 : f32
    %38 = vector.broadcast %cst_18 : f32 to vector<16x1xf32>
    %39 = arith.divf %37, %38 : vector<16x1xf32>
    %40 = vector.broadcast %32 : vector<16x1xf32> to vector<16x32xf32>
    %41 = arith.subf %26, %40 : vector<16x32xf32>
    %cst_19 = arith.constant 9.99999997E-7 : f32
    %42 = vector.broadcast %cst_19 : f32 to vector<16x1xf32>
    %43 = arith.addf %39, %42 : vector<16x1xf32>
    %44 = math.rsqrt %43 : vector<16x1xf32>
    %45 = vector.broadcast %44 : vector<16x1xf32> to vector<16x32xf32>
    %46 = arith.mulf %41, %45 : vector<16x32xf32>
    %47 = vector.broadcast %27 : vector<1x32xf32> to vector<16x32xf32>
    %48 = arith.mulf %46, %47 : vector<16x32xf32>
    %49 = vector.broadcast %28 : vector<1x32xf32> to vector<16x32xf32>
    %50 = arith.addf %48, %49 : vector<16x32xf32>
    %c0_20 = arith.constant 0 : index
    %c0_21 = arith.constant 0 : index
    %c0_22 = arith.constant 0 : index
    %51 = vector.load %arg2[%c0_20, %c0_21, %c0_22] : memref<1x1x16xf32, #tpu.memory_space<vmem>>, vector<1x1x16xf32>
    %52 = vector.shape_cast %51 : vector<1x1x16xf32> to vector<1x16xf32>
    %53 = vector.shape_cast %52 : vector<1x16xf32> to vector<1x16xf32>
    %54 = vector.broadcast %53 : vector<1x16xf32> to vector<16x16xf32>
    %c0_23 = arith.constant 0 : index
    %c0_24 = arith.constant 0 : index
    %c0_25 = arith.constant 0 : index
    %55 = vector.load %arg9[%c0_23, %c0_24, %c0_25] : memref<2x32x96xbf16, #tpu.memory_space<vmem>>, vector<1x32x96xbf16>
    %56 = vector.shape_cast %55 : vector<1x32x96xbf16> to vector<32x96xbf16>
    %57 = arith.truncf %50 : vector<16x32xf32> to vector<16x32xbf16>
    %cst_26 = arith.constant dense<0.000000e+00> : vector<16x96xf32>
    %58 = tpu.matmul %57, %56, %cst_26 {dimension_numbers = #tpu.dot_dimension_numbers<[1], [0], [0], [1], [0, 0, 1, 1], [], []>} : vector<16x32xbf16>, vector<32x96xbf16>, vector<16x96xf32> -> vector<16x96xf32>
    %59 = vector.extract_strided_slice %58 {offsets = [0, 0], sizes = [16, 32], strides = [1, 1]} : vector<16x96xf32> to vector<16x32xf32>
    %cst_27 = arith.constant 0.353553385 : f32
    %60 = vector.broadcast %cst_27 : f32 to vector<16x32xf32>
    %61 = arith.mulf %59, %60 : vector<16x32xf32>
    %62 = vector.extract_strided_slice %58 {offsets = [0, 32], sizes = [16, 32], strides = [1, 1]} : vector<16x96xf32> to vector<16x32xf32>
    %63 = vector.extract_strided_slice %58 {offsets = [0, 64], sizes = [16, 32], strides = [1, 1]} : vector<16x96xf32> to vector<16x32xf32>
    %c0_28 = arith.constant 0 : index
    %c0_29 = arith.constant 0 : index
    %c0_30 = arith.constant 0 : index
    %64 = vector.load %arg10[%c0_28, %c0_29, %c0_30] : memref<2x32x32xbf16, #tpu.memory_space<vmem>>, vector<1x32x32xbf16>
    %65 = vector.shape_cast %64 : vector<1x32x32xbf16> to vector<32x32xbf16>
    %66 = vector.extract_strided_slice %61 {offsets = [0, 0], sizes = [16, 8], strides = [1, 1]} : vector<16x32xf32> to vector<16x8xf32>
    %67 = vector.extract_strided_slice %62 {offsets = [0, 0], sizes = [16, 8], strides = [1, 1]} : vector<16x32xf32> to vector<16x8xf32>
    %68 = vector.extract_strided_slice %63 {offsets = [0, 0], sizes = [16, 8], strides = [1, 1]} : vector<16x32xf32> to vector<16x8xf32>
    %69 = arith.truncf %66 : vector<16x8xf32> to vector<16x8xbf16>
    %70 = arith.truncf %67 : vector<16x8xf32> to vector<16x8xbf16>
    %cst_31 = arith.constant dense<0.000000e+00> : vector<16x16xf32>
    %71 = tpu.matmul %69, %70, %cst_31 {dimension_numbers = #tpu.dot_dimension_numbers<[1], [1], [0], [0], [0, 0, 1, 0], [], []>} : vector<16x8xbf16>, vector<16x8xbf16>, vector<16x16xf32> -> vector<16x16xf32>
    %cst_32 = arith.constant 5.000000e-01 : f32
    %72 = vector.broadcast %cst_32 : f32 to vector<16x16xf32>
    %73 = arith.cmpf ogt, %54, %72 : vector<16x16xf32>
    %cst_33 = arith.constant -1.000000e+09 : f32
    %74 = vector.broadcast %cst_33 : f32 to vector<16x16xf32>
    %75 = arith.select %73, %71, %74 : vector<16x16xi1>, vector<16x16xf32>
    %cst_34 = arith.constant dense<0xFF800000> : vector<16xf32>
    %76 = vector.multi_reduction <maximumf>, %75, %cst_34 [1] : vector<16x16xf32> to vector<16xf32>
    %77 = vector.shape_cast %76 : vector<16xf32> to vector<16x1xf32>
    %78 = vector.broadcast %77 : vector<16x1xf32> to vector<16x16xf32>
    %79 = arith.subf %75, %78 : vector<16x16xf32>
    %80 = math.exp %79 : vector<16x16xf32>
    %cst_35 = arith.constant dense<0.000000e+00> : vector<16xf32>
    %81 = vector.multi_reduction <add>, %80, %cst_35 [1] : vector<16x16xf32> to vector<16xf32>
    %82 = vector.shape_cast %81 : vector<16xf32> to vector<16x1xf32>
    %83 = tpu.reciprocal %82 {approx = true} : vector<16x1xf32> -> vector<16x1xf32>
    %84 = vector.broadcast %83 : vector<16x1xf32> to vector<16x16xf32>
    %85 = arith.mulf %80, %84 : vector<16x16xf32>
    %c0_36 = arith.constant 0 : index
    %c0_37 = arith.constant 0 : index
    %c0_38 = arith.constant 0 : index
    %c0_39 = arith.constant 0 : index
    %c0_40 = arith.constant 0 : index
    %86 = vector.load %arg20[%c0_36, %c0_37, %c0_38, %c0_39, %c0_40] : memref<2x1x4x16x16xf32, #tpu.memory_space<vmem>>, vector<1x1x1x16x16xf32>
    %87 = vector.shape_cast %86 : vector<1x1x1x16x16xf32> to vector<16x16xf32>
    %88 = vector.shape_cast %85 : vector<16x16xf32> to vector<1x1x1x16x16xf32>
    tpu.vector_store %arg20[%c0_36, %c0_37, %c0_38, %c0_39, %c0_40], %88 {strides = array<i32>} : memref<2x1x4x16x16xf32, #tpu.memory_space<vmem>>, vector<1x1x1x16x16xf32>,
    %89 = arith.truncf %85 : vector<16x16xf32> to vector<16x16xbf16>
    %90 = arith.truncf %68 : vector<16x8xf32> to vector<16x8xbf16>
    %cst_41 = arith.constant dense<0.000000e+00> : vector<16x8xf32>
    %91 = tpu.matmul %89, %90, %cst_41 {dimension_numbers = #tpu.dot_dimension_numbers<[1], [0], [0], [1], [0, 0, 1, 1], [], []>} : vector<16x16xbf16>, vector<16x8xbf16>, vector<16x8xf32> -> vector<16x8xf32>
    %92 = vector.extract_strided_slice %61 {offsets = [0, 8], sizes = [16, 8], strides = [1, 1]} : vector<16x32xf32> to vector<16x8xf32>
    %93 = vector.extract_strided_slice %62 {offsets = [0, 8], sizes = [16, 8], strides = [1, 1]} : vector<16x32xf32> to vector<16x8xf32>
    %94 = vector.extract_strided_slice %63 {offsets = [0, 8], sizes = [16, 8], strides = [1, 1]} : vector<16x32xf32> to vector<16x8xf32>
    %95 = arith.truncf %92 : vector<16x8xf32> to vector<16x8xbf16>
    %96 = arith.truncf %93 : vector<16x8xf32> to vector<16x8xbf16>
    %cst_42 = arith.constant dense<0.000000e+00> : vector<16x16xf32>
    %97 = tpu.matmul %95, %96, %cst_42 {dimension_numbers = #tpu.dot_dimension_numbers<[1], [1], [0], [0], [0, 0, 1, 0], [], []>} : vector<16x8xbf16>, vector<16x8xbf16>, vector<16x16xf32> -> vector<16x16xf32>
    %cst_43 = arith.constant 5.000000e-01 : f32
    %98 = vector.broadcast %cst_43 : f32 to vector<16x16xf32>
    %99 = arith.cmpf ogt, %54, %98 : vector<16x16xf32>
    %cst_44 = arith.constant -1.000000e+09 : f32
    %100 = vector.broadcast %cst_44 : f32 to vector<16x16xf32>
    %101 = arith.select %99, %97, %100 : vector<16x16xi1>, vector<16x16xf32>
    %cst_45 = arith.constant dense<0xFF800000> : vector<16xf32>
    %102 = vector.multi_reduction <maximumf>, %101, %cst_45 [1] : vector<16x16xf32> to vector<16xf32>
    %103 = vector.shape_cast %102 : vector<16xf32> to vector<16x1xf32>
    %104 = vector.broadcast %103 : vector<16x1xf32> to vector<16x16xf32>
    %105 = arith.subf %101, %104 : vector<16x16xf32>
    %106 = math.exp %105 : vector<16x16xf32>
    %cst_46 = arith.constant dense<0.000000e+00> : vector<16xf32>
    %107 = vector.multi_reduction <add>, %106, %cst_46 [1] : vector<16x16xf32> to vector<16xf32>
    %108 = vector.shape_cast %107 : vector<16xf32> to vector<16x1xf32>
    %109 = tpu.reciprocal %108 {approx = true} : vector<16x1xf32> -> vector<16x1xf32>
    %110 = vector.broadcast %109 : vector<16x1xf32> to vector<16x16xf32>
    %111 = arith.mulf %106, %110 : vector<16x16xf32>
    %c0_47 = arith.constant 0 : index
    %c0_48 = arith.constant 0 : index
    %c1 = arith.constant 1 : index
    %c0_49 = arith.constant 0 : index
    %c0_50 = arith.constant 0 : index
    %112 = vector.load %arg20[%c0_47, %c0_48, %c1, %c0_49, %c0_50] : memref<2x1x4x16x16xf32, #tpu.memory_space<vmem>>, vector<1x1x1x16x16xf32>
    %113 = vector.shape_cast %112 : vector<1x1x1x16x16xf32> to vector<16x16xf32>
    %114 = vector.shape_cast %111 : vector<16x16xf32> to vector<1x1x1x16x16xf32>
    tpu.vector_store %arg20[%c0_47, %c0_48, %c1, %c0_49, %c0_50], %114 {strides = array<i32>} : memref<2x1x4x16x16xf32, #tpu.memory_space<vmem>>, vector<1x1x1x16x16xf32>,
    %115 = arith.truncf %111 : vector<16x16xf32> to vector<16x16xbf16>
    %116 = arith.truncf %94 : vector<16x8xf32> to vector<16x8xbf16>
    %cst_51 = arith.constant dense<0.000000e+00> : vector<16x8xf32>
    %117 = tpu.matmul %115, %116, %cst_51 {dimension_numbers = #tpu.dot_dimension_numbers<[1], [0], [0], [1], [0, 0, 1, 1], [], []>} : vector<16x16xbf16>, vector<16x8xbf16>, vector<16x8xf32> -> vector<16x8xf32>
    %118 = vector.extract_strided_slice %61 {offsets = [0, 16], sizes = [16, 8], strides = [1, 1]} : vector<16x32xf32> to vector<16x8xf32>
    %119 = vector.extract_strided_slice %62 {offsets = [0, 16], sizes = [16, 8], strides = [1, 1]} : vector<16x32xf32> to vector<16x8xf32>
    %120 = vector.extract_strided_slice %63 {offsets = [0, 16], sizes = [16, 8], strides = [1, 1]} : vector<16x32xf32> to vector<16x8xf32>
    %121 = arith.truncf %118 : vector<16x8xf32> to vector<16x8xbf16>
    %122 = arith.truncf %119 : vector<16x8xf32> to vector<16x8xbf16>
    %cst_52 = arith.constant dense<0.000000e+00> : vector<16x16xf32>
    %123 = tpu.matmul %121, %122, %cst_52 {dimension_numbers = #tpu.dot_dimension_numbers<[1], [1], [0], [0], [0, 0, 1, 0], [], []>} : vector<16x8xbf16>, vector<16x8xbf16>, vector<16x16xf32> -> vector<16x16xf32>
    %cst_53 = arith.constant 5.000000e-01 : f32
    %124 = vector.broadcast %cst_53 : f32 to vector<16x16xf32>
    %125 = arith.cmpf ogt, %54, %124 : vector<16x16xf32>
    %cst_54 = arith.constant -1.000000e+09 : f32
    %126 = vector.broadcast %cst_54 : f32 to vector<16x16xf32>
    %127 = arith.select %125, %123, %126 : vector<16x16xi1>, vector<16x16xf32>
    %cst_55 = arith.constant dense<0xFF800000> : vector<16xf32>
    %128 = vector.multi_reduction <maximumf>, %127, %cst_55 [1] : vector<16x16xf32> to vector<16xf32>
    %129 = vector.shape_cast %128 : vector<16xf32> to vector<16x1xf32>
    %130 = vector.broadcast %129 : vector<16x1xf32> to vector<16x16xf32>
    %131 = arith.subf %127, %130 : vector<16x16xf32>
    %132 = math.exp %131 : vector<16x16xf32>
    %cst_56 = arith.constant dense<0.000000e+00> : vector<16xf32>
    %133 = vector.multi_reduction <add>, %132, %cst_56 [1] : vector<16x16xf32> to vector<16xf32>
    %134 = vector.shape_cast %133 : vector<16xf32> to vector<16x1xf32>
    %135 = tpu.reciprocal %134 {approx = true} : vector<16x1xf32> -> vector<16x1xf32>
    %136 = vector.broadcast %135 : vector<16x1xf32> to vector<16x16xf32>
    %137 = arith.mulf %132, %136 : vector<16x16xf32>
    %c0_57 = arith.constant 0 : index
    %c0_58 = arith.constant 0 : index
    %c2 = arith.constant 2 : index
    %c0_59 = arith.constant 0 : index
    %c0_60 = arith.constant 0 : index
    %138 = vector.load %arg20[%c0_57, %c0_58, %c2, %c0_59, %c0_60] : memref<2x1x4x16x16xf32, #tpu.memory_space<vmem>>, vector<1x1x1x16x16xf32>
    %139 = vector.shape_cast %138 : vector<1x1x1x16x16xf32> to vector<16x16xf32>
    %140 = vector.shape_cast %137 : vector<16x16xf32> to vector<1x1x1x16x16xf32>
    tpu.vector_store %arg20[%c0_57, %c0_58, %c2, %c0_59, %c0_60], %140 {strides = array<i32>} : memref<2x1x4x16x16xf32, #tpu.memory_space<vmem>>, vector<1x1x1x16x16xf32>,
    %141 = arith.truncf %137 : vector<16x16xf32> to vector<16x16xbf16>
    %142 = arith.truncf %120 : vector<16x8xf32> to vector<16x8xbf16>
    %cst_61 = arith.constant dense<0.000000e+00> : vector<16x8xf32>
    %143 = tpu.matmul %141, %142, %cst_61 {dimension_numbers = #tpu.dot_dimension_numbers<[1], [0], [0], [1], [0, 0, 1, 1], [], []>} : vector<16x16xbf16>, vector<16x8xbf16>, vector<16x8xf32> -> vector<16x8xf32>
    %144 = vector.extract_strided_slice %61 {offsets = [0, 24], sizes = [16, 8], strides = [1, 1]} : vector<16x32xf32> to vector<16x8xf32>
    %145 = vector.extract_strided_slice %62 {offsets = [0, 24], sizes = [16, 8], strides = [1, 1]} : vector<16x32xf32> to vector<16x8xf32>
    %146 = vector.extract_strided_slice %63 {offsets = [0, 24], sizes = [16, 8], strides = [1, 1]} : vector<16x32xf32> to vector<16x8xf32>
    %147 = arith.truncf %144 : vector<16x8xf32> to vector<16x8xbf16>
    %148 = arith.truncf %145 : vector<16x8xf32> to vector<16x8xbf16>
    %cst_62 = arith.constant dense<0.000000e+00> : vector<16x16xf32>
    %149 = tpu.matmul %147, %148, %cst_62 {dimension_numbers = #tpu.dot_dimension_numbers<[1], [1], [0], [0], [0, 0, 1, 0], [], []>} : vector<16x8xbf16>, vector<16x8xbf16>, vector<16x16xf32> -> vector<16x16xf32>
    %cst_63 = arith.constant 5.000000e-01 : f32
    %150 = vector.broadcast %cst_63 : f32 to vector<16x16xf32>
    %151 = arith.cmpf ogt, %54, %150 : vector<16x16xf32>
    %cst_64 = arith.constant -1.000000e+09 : f32
    %152 = vector.broadcast %cst_64 : f32 to vector<16x16xf32>
    %153 = arith.select %151, %149, %152 : vector<16x16xi1>, vector<16x16xf32>
    %cst_65 = arith.constant dense<0xFF800000> : vector<16xf32>
    %154 = vector.multi_reduction <maximumf>, %153, %cst_65 [1] : vector<16x16xf32> to vector<16xf32>
    %155 = vector.shape_cast %154 : vector<16xf32> to vector<16x1xf32>
    %156 = vector.broadcast %155 : vector<16x1xf32> to vector<16x16xf32>
    %157 = arith.subf %153, %156 : vector<16x16xf32>
    %158 = math.exp %157 : vector<16x16xf32>
    %cst_66 = arith.constant dense<0.000000e+00> : vector<16xf32>
    %159 = vector.multi_reduction <add>, %158, %cst_66 [1] : vector<16x16xf32> to vector<16xf32>
    %160 = vector.shape_cast %159 : vector<16xf32> to vector<16x1xf32>
    %161 = tpu.reciprocal %160 {approx = true} : vector<16x1xf32> -> vector<16x1xf32>
    %162 = vector.broadcast %161 : vector<16x1xf32> to vector<16x16xf32>
    %163 = arith.mulf %158, %162 : vector<16x16xf32>
    %c0_67 = arith.constant 0 : index
    %c0_68 = arith.constant 0 : index
    %c3 = arith.constant 3 : index
    %c0_69 = arith.constant 0 : index
    %c0_70 = arith.constant 0 : index
    %164 = vector.load %arg20[%c0_67, %c0_68, %c3, %c0_69, %c0_70] : memref<2x1x4x16x16xf32, #tpu.memory_space<vmem>>, vector<1x1x1x16x16xf32>
    %165 = vector.shape_cast %164 : vector<1x1x1x16x16xf32> to vector<16x16xf32>
    %166 = vector.shape_cast %163 : vector<16x16xf32> to vector<1x1x1x16x16xf32>
    tpu.vector_store %arg20[%c0_67, %c0_68, %c3, %c0_69, %c0_70], %166 {strides = array<i32>} : memref<2x1x4x16x16xf32, #tpu.memory_space<vmem>>, vector<1x1x1x16x16xf32>,
    %167 = arith.truncf %163 : vector<16x16xf32> to vector<16x16xbf16>
    %168 = arith.truncf %146 : vector<16x8xf32> to vector<16x8xbf16>
    %cst_71 = arith.constant dense<0.000000e+00> : vector<16x8xf32>
    %169 = tpu.matmul %167, %168, %cst_71 {dimension_numbers = #tpu.dot_dimension_numbers<[1], [0], [0], [1], [0, 0, 1, 1], [], []>} : vector<16x16xbf16>, vector<16x8xbf16>, vector<16x8xf32> -> vector<16x8xf32>
    %170 = tpu.concatenate %91, %117, %143, %169 in 1 : vector<16x8xf32>, vector<16x8xf32>, vector<16x8xf32>, vector<16x8xf32> -> vector<16x32xf32>
    %171 = arith.truncf %170 : vector<16x32xf32> to vector<16x32xbf16>
    %cst_72 = arith.constant dense<0.000000e+00> : vector<16x32xf32>
    %172 = tpu.matmul %171, %65, %cst_72 {dimension_numbers = #tpu.dot_dimension_numbers<[1], [0], [0], [1], [0, 0, 1, 1], [], []>} : vector<16x32xbf16>, vector<32x32xbf16>, vector<16x32xf32> -> vector<16x32xf32>
    %173 = arith.addf %172, %50 : vector<16x32xf32>
    %c0_73 = arith.constant 0 : index
    %c0_74 = arith.constant 0 : index
    %c0_75 = arith.constant 0 : index
    %174 = vector.load %arg11[%c0_73, %c0_74, %c0_75] : memref<2x1x32xf32, #tpu.memory_space<vmem>>, vector<1x1x32xf32>
    %175 = vector.shape_cast %174 : vector<1x1x32xf32> to vector<1x32xf32>
    %c0_76 = arith.constant 0 : index
    %c0_77 = arith.constant 0 : index
    %c0_78 = arith.constant 0 : index
    %176 = vector.load %arg12[%c0_76, %c0_77, %c0_78] : memref<2x1x32xf32, #tpu.memory_space<vmem>>, vector<1x1x32xf32>
    %177 = vector.shape_cast %176 : vector<1x1x32xf32> to vector<1x32xf32>
    %cst_79 = arith.constant dense<0.000000e+00> : vector<16xf32>
    %178 = vector.multi_reduction <add>, %173, %cst_79 [1] : vector<16x32xf32> to vector<16xf32>
    %179 = vector.shape_cast %178 : vector<16xf32> to vector<16x1xf32>
    %cst_80 = arith.constant 3.200000e+01 : f32
    %180 = vector.broadcast %cst_80 : f32 to vector<16x1xf32>
    %181 = arith.divf %179, %180 : vector<16x1xf32>
    %182 = vector.broadcast %181 : vector<16x1xf32> to vector<16x32xf32>
    %183 = arith.subf %173, %182 : vector<16x32xf32>
    %184 = arith.mulf %183, %183 : vector<16x32xf32>
    %cst_81 = arith.constant dense<0.000000e+00> : vector<16xf32>
    %185 = vector.multi_reduction <add>, %184, %cst_81 [1] : vector<16x32xf32> to vector<16xf32>
    %186 = vector.shape_cast %185 : vector<16xf32> to vector<16x1xf32>
    %cst_82 = arith.constant 3.200000e+01 : f32
    %187 = vector.broadcast %cst_82 : f32 to vector<16x1xf32>
    %188 = arith.divf %186, %187 : vector<16x1xf32>
    %189 = vector.broadcast %181 : vector<16x1xf32> to vector<16x32xf32>
    %190 = arith.subf %173, %189 : vector<16x32xf32>
    %cst_83 = arith.constant 9.99999997E-7 : f32
    %191 = vector.broadcast %cst_83 : f32 to vector<16x1xf32>
    %192 = arith.addf %188, %191 : vector<16x1xf32>
    %193 = math.rsqrt %192 : vector<16x1xf32>
    %194 = vector.broadcast %193 : vector<16x1xf32> to vector<16x32xf32>
    %195 = arith.mulf %190, %194 : vector<16x32xf32>
    %196 = vector.broadcast %175 : vector<1x32xf32> to vector<16x32xf32>
    %197 = arith.mulf %195, %196 : vector<16x32xf32>
    %198 = vector.broadcast %177 : vector<1x32xf32> to vector<16x32xf32>
    %199 = arith.addf %197, %198 : vector<16x32xf32>
    %c0_84 = arith.constant 0 : index
    %c0_85 = arith.constant 0 : index
    %c0_86 = arith.constant 0 : index
    %200 = vector.load %arg13[%c0_84, %c0_85, %c0_86] : memref<2x32x64xbf16, #tpu.memory_space<vmem>>, vector<1x32x64xbf16>
    %201 = vector.shape_cast %200 : vector<1x32x64xbf16> to vector<32x64xbf16>
    %202 = arith.truncf %199 : vector<16x32xf32> to vector<16x32xbf16>
    %cst_87 = arith.constant dense<0.000000e+00> : vector<16x64xf32>
    %203 = tpu.matmul %202, %201, %cst_87 {dimension_numbers = #tpu.dot_dimension_numbers<[1], [0], [0], [1], [0, 0, 1, 1], [], []>} : vector<16x32xbf16>, vector<32x64xbf16>, vector<16x64xf32> -> vector<16x64xf32>
    %c0_88 = arith.constant 0 : index
    %c0_89 = arith.constant 0 : index
    %c0_90 = arith.constant 0 : index
    %204 = vector.load %arg14[%c0_88, %c0_89, %c0_90] : memref<2x1x64xf32, #tpu.memory_space<vmem>>, vector<1x1x64xf32>
    %205 = vector.shape_cast %204 : vector<1x1x64xf32> to vector<1x64xf32>
    %206 = vector.broadcast %205 : vector<1x64xf32> to vector<16x64xf32>
    %207 = arith.addf %203, %206 : vector<16x64xf32>
    %cst_91 = arith.constant 0.000000e+00 : f32
    %208 = vector.broadcast %cst_91 : f32 to vector<16x64xf32>
    %209 = arith.maximumf %207, %208 : vector<16x64xf32>
    %c0_92 = arith.constant 0 : index
    %c0_93 = arith.constant 0 : index
    %c0_94 = arith.constant 0 : index
    %210 = vector.load %arg15[%c0_92, %c0_93, %c0_94] : memref<2x64x32xbf16, #tpu.memory_space<vmem>>, vector<1x64x32xbf16>
    %211 = vector.shape_cast %210 : vector<1x64x32xbf16> to vector<64x32xbf16>
    %212 = arith.truncf %209 : vector<16x64xf32> to vector<16x64xbf16>
    %cst_95 = arith.constant dense<0.000000e+00> : vector<16x32xf32>
    %213 = tpu.matmul %212, %211, %cst_95 {dimension_numbers = #tpu.dot_dimension_numbers<[1], [0], [0], [1], [0, 0, 1, 1], [], []>} : vector<16x64xbf16>, vector<64x32xbf16>, vector<16x32xf32> -> vector<16x32xf32>
    %c0_96 = arith.constant 0 : index
    %c0_97 = arith.constant 0 : index
    %c0_98 = arith.constant 0 : index
    %214 = vector.load %arg16[%c0_96, %c0_97, %c0_98] : memref<2x1x32xf32, #tpu.memory_space<vmem>>, vector<1x1x32xf32>
    %215 = vector.shape_cast %214 : vector<1x1x32xf32> to vector<1x32xf32>
    %216 = vector.broadcast %215 : vector<1x32xf32> to vector<16x32xf32>
    %217 = arith.addf %213, %216 : vector<16x32xf32>
    %218 = arith.addf %217, %199 : vector<16x32xf32>
    %c0_99 = arith.constant 0 : index
    %c0_100 = arith.constant 0 : index
    %c0_101 = arith.constant 0 : index
    %219 = vector.load %arg17[%c0_99, %c0_100, %c0_101] : memref<2x1x32xf32, #tpu.memory_space<vmem>>, vector<1x1x32xf32>
    %220 = vector.shape_cast %219 : vector<1x1x32xf32> to vector<1x32xf32>
    %c0_102 = arith.constant 0 : index
    %c0_103 = arith.constant 0 : index
    %c0_104 = arith.constant 0 : index
    %221 = vector.load %arg18[%c0_102, %c0_103, %c0_104] : memref<2x1x32xf32, #tpu.memory_space<vmem>>, vector<1x1x32xf32>
    %222 = vector.shape_cast %221 : vector<1x1x32xf32> to vector<1x32xf32>
    %cst_105 = arith.constant dense<0.000000e+00> : vector<16xf32>
    %223 = vector.multi_reduction <add>, %218, %cst_105 [1] : vector<16x32xf32> to vector<16xf32>
    %224 = vector.shape_cast %223 : vector<16xf32> to vector<16x1xf32>
    %cst_106 = arith.constant 3.200000e+01 : f32
    %225 = vector.broadcast %cst_106 : f32 to vector<16x1xf32>
    %226 = arith.divf %224, %225 : vector<16x1xf32>
    %227 = vector.broadcast %226 : vector<16x1xf32> to vector<16x32xf32>
    %228 = arith.subf %218, %227 : vector<16x32xf32>
    %229 = arith.mulf %228, %228 : vector<16x32xf32>
    %cst_107 = arith.constant dense<0.000000e+00> : vector<16xf32>
    %230 = vector.multi_reduction <add>, %229, %cst_107 [1] : vector<16x32xf32> to vector<16xf32>
    %231 = vector.shape_cast %230 : vector<16xf32> to vector<16x1xf32>
    %cst_108 = arith.constant 3.200000e+01 : f32
    %232 = vector.broadcast %cst_108 : f32 to vector<16x1xf32>
    %233 = arith.divf %231, %232 : vector<16x1xf32>
    %234 = vector.broadcast %226 : vector<16x1xf32> to vector<16x32xf32>
    %235 = arith.subf %218, %234 : vector<16x32xf32>
    %cst_109 = arith.constant 9.99999997E-7 : f32
    %236 = vector.broadcast %cst_109 : f32 to vector<16x1xf32>
    %237 = arith.addf %233, %236 : vector<16x1xf32>
    %238 = math.rsqrt %237 : vector<16x1xf32>
    %239 = vector.broadcast %238 : vector<16x1xf32> to vector<16x32xf32>
    %240 = arith.mulf %235, %239 : vector<16x32xf32>
    %241 = vector.broadcast %220 : vector<1x32xf32> to vector<16x32xf32>
    %242 = arith.mulf %240, %241 : vector<16x32xf32>
    %243 = vector.broadcast %222 : vector<1x32xf32> to vector<16x32xf32>
    %244 = arith.addf %242, %243 : vector<16x32xf32>
    %c1_110 = arith.constant 1 : index
    %c0_111 = arith.constant 0 : index
    %c0_112 = arith.constant 0 : index
    %245 = vector.load %arg9[%c1_110, %c0_111, %c0_112] : memref<2x32x96xbf16, #tpu.memory_space<vmem>>, vector<1x32x96xbf16>
    %246 = vector.shape_cast %245 : vector<1x32x96xbf16> to vector<32x96xbf16>
    %247 = arith.truncf %244 : vector<16x32xf32> to vector<16x32xbf16>
    %cst_113 = arith.constant dense<0.000000e+00> : vector<16x96xf32>
    %248 = tpu.matmul %247, %246, %cst_113 {dimension_numbers = #tpu.dot_dimension_numbers<[1], [0], [0], [1], [0, 0, 1, 1], [], []>} : vector<16x32xbf16>, vector<32x96xbf16>, vector<16x96xf32> -> vector<16x96xf32>
    %249 = vector.extract_strided_slice %248 {offsets = [0, 0], sizes = [16, 32], strides = [1, 1]} : vector<16x96xf32> to vector<16x32xf32>
    %cst_114 = arith.constant 0.353553385 : f32
    %250 = vector.broadcast %cst_114 : f32 to vector<16x32xf32>
    %251 = arith.mulf %249, %250 : vector<16x32xf32>
    %252 = vector.extract_strided_slice %248 {offsets = [0, 32], sizes = [16, 32], strides = [1, 1]} : vector<16x96xf32> to vector<16x32xf32>
    %253 = vector.extract_strided_slice %248 {offsets = [0, 64], sizes = [16, 32], strides = [1, 1]} : vector<16x96xf32> to vector<16x32xf32>
    %c1_115 = arith.constant 1 : index
    %c0_116 = arith.constant 0 : index
    %c0_117 = arith.constant 0 : index
    %254 = vector.load %arg10[%c1_115, %c0_116, %c0_117] : memref<2x32x32xbf16, #tpu.memory_space<vmem>>, vector<1x32x32xbf16>
    %255 = vector.shape_cast %254 : vector<1x32x32xbf16> to vector<32x32xbf16>
    %256 = vector.extract_strided_slice %251 {offsets = [0, 0], sizes = [16, 8], strides = [1, 1]} : vector<16x32xf32> to vector<16x8xf32>
    %257 = vector.extract_strided_slice %252 {offsets = [0, 0], sizes = [16, 8], strides = [1, 1]} : vector<16x32xf32> to vector<16x8xf32>
    %258 = vector.extract_strided_slice %253 {offsets = [0, 0], sizes = [16, 8], strides = [1, 1]} : vector<16x32xf32> to vector<16x8xf32>
    %259 = arith.truncf %256 : vector<16x8xf32> to vector<16x8xbf16>
    %260 = arith.truncf %257 : vector<16x8xf32> to vector<16x8xbf16>
    %cst_118 = arith.constant dense<0.000000e+00> : vector<16x16xf32>
    %261 = tpu.matmul %259, %260, %cst_118 {dimension_numbers = #tpu.dot_dimension_numbers<[1], [1], [0], [0], [0, 0, 1, 0], [], []>} : vector<16x8xbf16>, vector<16x8xbf16>, vector<16x16xf32> -> vector<16x16xf32>
    %cst_119 = arith.constant 5.000000e-01 : f32
    %262 = vector.broadcast %cst_119 : f32 to vector<16x16xf32>
    %263 = arith.cmpf ogt, %54, %262 : vector<16x16xf32>
    %cst_120 = arith.constant -1.000000e+09 : f32
    %264 = vector.broadcast %cst_120 : f32 to vector<16x16xf32>
    %265 = arith.select %263, %261, %264 : vector<16x16xi1>, vector<16x16xf32>
    %cst_121 = arith.constant dense<0xFF800000> : vector<16xf32>
    %266 = vector.multi_reduction <maximumf>, %265, %cst_121 [1] : vector<16x16xf32> to vector<16xf32>
    %267 = vector.shape_cast %266 : vector<16xf32> to vector<16x1xf32>
    %268 = vector.broadcast %267 : vector<16x1xf32> to vector<16x16xf32>
    %269 = arith.subf %265, %268 : vector<16x16xf32>
    %270 = math.exp %269 : vector<16x16xf32>
    %cst_122 = arith.constant dense<0.000000e+00> : vector<16xf32>
    %271 = vector.multi_reduction <add>, %270, %cst_122 [1] : vector<16x16xf32> to vector<16xf32>
    %272 = vector.shape_cast %271 : vector<16xf32> to vector<16x1xf32>
    %273 = tpu.reciprocal %272 {approx = true} : vector<16x1xf32> -> vector<16x1xf32>
    %274 = vector.broadcast %273 : vector<16x1xf32> to vector<16x16xf32>
    %275 = arith.mulf %270, %274 : vector<16x16xf32>
    %c1_123 = arith.constant 1 : index
    %c0_124 = arith.constant 0 : index
    %c0_125 = arith.constant 0 : index
    %c0_126 = arith.constant 0 : index
    %c0_127 = arith.constant 0 : index
    %276 = vector.load %arg20[%c1_123, %c0_124, %c0_125, %c0_126, %c0_127] : memref<2x1x4x16x16xf32, #tpu.memory_space<vmem>>, vector<1x1x1x16x16xf32>
    %277 = vector.shape_cast %276 : vector<1x1x1x16x16xf32> to vector<16x16xf32>
    %278 = vector.shape_cast %275 : vector<16x16xf32> to vector<1x1x1x16x16xf32>
    tpu.vector_store %arg20[%c1_123, %c0_124, %c0_125, %c0_126, %c0_127], %278 {strides = array<i32>} : memref<2x1x4x16x16xf32, #tpu.memory_space<vmem>>, vector<1x1x1x16x16xf32>,
    %279 = arith.truncf %275 : vector<16x16xf32> to vector<16x16xbf16>
    %280 = arith.truncf %258 : vector<16x8xf32> to vector<16x8xbf16>
    %cst_128 = arith.constant dense<0.000000e+00> : vector<16x8xf32>
    %281 = tpu.matmul %279, %280, %cst_128 {dimension_numbers = #tpu.dot_dimension_numbers<[1], [0], [0], [1], [0, 0, 1, 1], [], []>} : vector<16x16xbf16>, vector<16x8xbf16>, vector<16x8xf32> -> vector<16x8xf32>
    %282 = vector.extract_strided_slice %251 {offsets = [0, 8], sizes = [16, 8], strides = [1, 1]} : vector<16x32xf32> to vector<16x8xf32>
    %283 = vector.extract_strided_slice %252 {offsets = [0, 8], sizes = [16, 8], strides = [1, 1]} : vector<16x32xf32> to vector<16x8xf32>
    %284 = vector.extract_strided_slice %253 {offsets = [0, 8], sizes = [16, 8], strides = [1, 1]} : vector<16x32xf32> to vector<16x8xf32>
    %285 = arith.truncf %282 : vector<16x8xf32> to vector<16x8xbf16>
    %286 = arith.truncf %283 : vector<16x8xf32> to vector<16x8xbf16>
    %cst_129 = arith.constant dense<0.000000e+00> : vector<16x16xf32>
    %287 = tpu.matmul %285, %286, %cst_129 {dimension_numbers = #tpu.dot_dimension_numbers<[1], [1], [0], [0], [0, 0, 1, 0], [], []>} : vector<16x8xbf16>, vector<16x8xbf16>, vector<16x16xf32> -> vector<16x16xf32>
    %cst_130 = arith.constant 5.000000e-01 : f32
    %288 = vector.broadcast %cst_130 : f32 to vector<16x16xf32>
    %289 = arith.cmpf ogt, %54, %288 : vector<16x16xf32>
    %cst_131 = arith.constant -1.000000e+09 : f32
    %290 = vector.broadcast %cst_131 : f32 to vector<16x16xf32>
    %291 = arith.select %289, %287, %290 : vector<16x16xi1>, vector<16x16xf32>
    %cst_132 = arith.constant dense<0xFF800000> : vector<16xf32>
    %292 = vector.multi_reduction <maximumf>, %291, %cst_132 [1] : vector<16x16xf32> to vector<16xf32>
    %293 = vector.shape_cast %292 : vector<16xf32> to vector<16x1xf32>
    %294 = vector.broadcast %293 : vector<16x1xf32> to vector<16x16xf32>
    %295 = arith.subf %291, %294 : vector<16x16xf32>
    %296 = math.exp %295 : vector<16x16xf32>
    %cst_133 = arith.constant dense<0.000000e+00> : vector<16xf32>
    %297 = vector.multi_reduction <add>, %296, %cst_133 [1] : vector<16x16xf32> to vector<16xf32>
    %298 = vector.shape_cast %297 : vector<16xf32> to vector<16x1xf32>
    %299 = tpu.reciprocal %298 {approx = true} : vector<16x1xf32> -> vector<16x1xf32>
    %300 = vector.broadcast %299 : vector<16x1xf32> to vector<16x16xf32>
    %301 = arith.mulf %296, %300 : vector<16x16xf32>
    %c1_134 = arith.constant 1 : index
    %c0_135 = arith.constant 0 : index
    %c1_136 = arith.constant 1 : index
    %c0_137 = arith.constant 0 : index
    %c0_138 = arith.constant 0 : index
    %302 = vector.load %arg20[%c1_134, %c0_135, %c1_136, %c0_137, %c0_138] : memref<2x1x4x16x16xf32, #tpu.memory_space<vmem>>, vector<1x1x1x16x16xf32>
    %303 = vector.shape_cast %302 : vector<1x1x1x16x16xf32> to vector<16x16xf32>
    %304 = vector.shape_cast %301 : vector<16x16xf32> to vector<1x1x1x16x16xf32>
    tpu.vector_store %arg20[%c1_134, %c0_135, %c1_136, %c0_137, %c0_138], %304 {strides = array<i32>} : memref<2x1x4x16x16xf32, #tpu.memory_space<vmem>>, vector<1x1x1x16x16xf32>,
    %305 = arith.truncf %301 : vector<16x16xf32> to vector<16x16xbf16>
    %306 = arith.truncf %284 : vector<16x8xf32> to vector<16x8xbf16>
    %cst_139 = arith.constant dense<0.000000e+00> : vector<16x8xf32>
    %307 = tpu.matmul %305, %306, %cst_139 {dimension_numbers = #tpu.dot_dimension_numbers<[1], [0], [0], [1], [0, 0, 1, 1], [], []>} : vector<16x16xbf16>, vector<16x8xbf16>, vector<16x8xf32> -> vector<16x8xf32>
    %308 = vector.extract_strided_slice %251 {offsets = [0, 16], sizes = [16, 8], strides = [1, 1]} : vector<16x32xf32> to vector<16x8xf32>
    %309 = vector.extract_strided_slice %252 {offsets = [0, 16], sizes = [16, 8], strides = [1, 1]} : vector<16x32xf32> to vector<16x8xf32>
    %310 = vector.extract_strided_slice %253 {offsets = [0, 16], sizes = [16, 8], strides = [1, 1]} : vector<16x32xf32> to vector<16x8xf32>
    %311 = arith.truncf %308 : vector<16x8xf32> to vector<16x8xbf16>
    %312 = arith.truncf %309 : vector<16x8xf32> to vector<16x8xbf16>
    %cst_140 = arith.constant dense<0.000000e+00> : vector<16x16xf32>
    %313 = tpu.matmul %311, %312, %cst_140 {dimension_numbers = #tpu.dot_dimension_numbers<[1], [1], [0], [0], [0, 0, 1, 0], [], []>} : vector<16x8xbf16>, vector<16x8xbf16>, vector<16x16xf32> -> vector<16x16xf32>
    %cst_141 = arith.constant 5.000000e-01 : f32
    %314 = vector.broadcast %cst_141 : f32 to vector<16x16xf32>
    %315 = arith.cmpf ogt, %54, %314 : vector<16x16xf32>
    %cst_142 = arith.constant -1.000000e+09 : f32
    %316 = vector.broadcast %cst_142 : f32 to vector<16x16xf32>
    %317 = arith.select %315, %313, %316 : vector<16x16xi1>, vector<16x16xf32>
    %cst_143 = arith.constant dense<0xFF800000> : vector<16xf32>
    %318 = vector.multi_reduction <maximumf>, %317, %cst_143 [1] : vector<16x16xf32> to vector<16xf32>
    %319 = vector.shape_cast %318 : vector<16xf32> to vector<16x1xf32>
    %320 = vector.broadcast %319 : vector<16x1xf32> to vector<16x16xf32>
    %321 = arith.subf %317, %320 : vector<16x16xf32>
    %322 = math.exp %321 : vector<16x16xf32>
    %cst_144 = arith.constant dense<0.000000e+00> : vector<16xf32>
    %323 = vector.multi_reduction <add>, %322, %cst_144 [1] : vector<16x16xf32> to vector<16xf32>
    %324 = vector.shape_cast %323 : vector<16xf32> to vector<16x1xf32>
    %325 = tpu.reciprocal %324 {approx = true} : vector<16x1xf32> -> vector<16x1xf32>
    %326 = vector.broadcast %325 : vector<16x1xf32> to vector<16x16xf32>
    %327 = arith.mulf %322, %326 : vector<16x16xf32>
    %c1_145 = arith.constant 1 : index
    %c0_146 = arith.constant 0 : index
    %c2_147 = arith.constant 2 : index
    %c0_148 = arith.constant 0 : index
    %c0_149 = arith.constant 0 : index
    %328 = vector.load %arg20[%c1_145, %c0_146, %c2_147, %c0_148, %c0_149] : memref<2x1x4x16x16xf32, #tpu.memory_space<vmem>>, vector<1x1x1x16x16xf32>
    %329 = vector.shape_cast %328 : vector<1x1x1x16x16xf32> to vector<16x16xf32>
    %330 = vector.shape_cast %327 : vector<16x16xf32> to vector<1x1x1x16x16xf32>
    tpu.vector_store %arg20[%c1_145, %c0_146, %c2_147, %c0_148, %c0_149], %330 {strides = array<i32>} : memref<2x1x4x16x16xf32, #tpu.memory_space<vmem>>, vector<1x1x1x16x16xf32>,
    %331 = arith.truncf %327 : vector<16x16xf32> to vector<16x16xbf16>
    %332 = arith.truncf %310 : vector<16x8xf32> to vector<16x8xbf16>
    %cst_150 = arith.constant dense<0.000000e+00> : vector<16x8xf32>
    %333 = tpu.matmul %331, %332, %cst_150 {dimension_numbers = #tpu.dot_dimension_numbers<[1], [0], [0], [1], [0, 0, 1, 1], [], []>} : vector<16x16xbf16>, vector<16x8xbf16>, vector<16x8xf32> -> vector<16x8xf32>
    %334 = vector.extract_strided_slice %251 {offsets = [0, 24], sizes = [16, 8], strides = [1, 1]} : vector<16x32xf32> to vector<16x8xf32>
    %335 = vector.extract_strided_slice %252 {offsets = [0, 24], sizes = [16, 8], strides = [1, 1]} : vector<16x32xf32> to vector<16x8xf32>
    %336 = vector.extract_strided_slice %253 {offsets = [0, 24], sizes = [16, 8], strides = [1, 1]} : vector<16x32xf32> to vector<16x8xf32>
    %337 = arith.truncf %334 : vector<16x8xf32> to vector<16x8xbf16>
    %338 = arith.truncf %335 : vector<16x8xf32> to vector<16x8xbf16>
    %cst_151 = arith.constant dense<0.000000e+00> : vector<16x16xf32>
    %339 = tpu.matmul %337, %338, %cst_151 {dimension_numbers = #tpu.dot_dimension_numbers<[1], [1], [0], [0], [0, 0, 1, 0], [], []>} : vector<16x8xbf16>, vector<16x8xbf16>, vector<16x16xf32> -> vector<16x16xf32>
    %cst_152 = arith.constant 5.000000e-01 : f32
    %340 = vector.broadcast %cst_152 : f32 to vector<16x16xf32>
    %341 = arith.cmpf ogt, %54, %340 : vector<16x16xf32>
    %cst_153 = arith.constant -1.000000e+09 : f32
    %342 = vector.broadcast %cst_153 : f32 to vector<16x16xf32>
    %343 = arith.select %341, %339, %342 : vector<16x16xi1>, vector<16x16xf32>
    %cst_154 = arith.constant dense<0xFF800000> : vector<16xf32>
    %344 = vector.multi_reduction <maximumf>, %343, %cst_154 [1] : vector<16x16xf32> to vector<16xf32>
    %345 = vector.shape_cast %344 : vector<16xf32> to vector<16x1xf32>
    %346 = vector.broadcast %345 : vector<16x1xf32> to vector<16x16xf32>
    %347 = arith.subf %343, %346 : vector<16x16xf32>
    %348 = math.exp %347 : vector<16x16xf32>
    %cst_155 = arith.constant dense<0.000000e+00> : vector<16xf32>
    %349 = vector.multi_reduction <add>, %348, %cst_155 [1] : vector<16x16xf32> to vector<16xf32>
    %350 = vector.shape_cast %349 : vector<16xf32> to vector<16x1xf32>
    %351 = tpu.reciprocal %350 {approx = true} : vector<16x1xf32> -> vector<16x1xf32>
    %352 = vector.broadcast %351 : vector<16x1xf32> to vector<16x16xf32>
    %353 = arith.mulf %348, %352 : vector<16x16xf32>
    %c1_156 = arith.constant 1 : index
    %c0_157 = arith.constant 0 : index
    %c3_158 = arith.constant 3 : index
    %c0_159 = arith.constant 0 : index
    %c0_160 = arith.constant 0 : index
    %354 = vector.load %arg20[%c1_156, %c0_157, %c3_158, %c0_159, %c0_160] : memref<2x1x4x16x16xf32, #tpu.memory_space<vmem>>, vector<1x1x1x16x16xf32>
    %355 = vector.shape_cast %354 : vector<1x1x1x16x16xf32> to vector<16x16xf32>
    %356 = vector.shape_cast %353 : vector<16x16xf32> to vector<1x1x1x16x16xf32>
    tpu.vector_store %arg20[%c1_156, %c0_157, %c3_158, %c0_159, %c0_160], %356 {strides = array<i32>} : memref<2x1x4x16x16xf32, #tpu.memory_space<vmem>>, vector<1x1x1x16x16xf32>,
    %357 = arith.truncf %353 : vector<16x16xf32> to vector<16x16xbf16>
    %358 = arith.truncf %336 : vector<16x8xf32> to vector<16x8xbf16>
    %cst_161 = arith.constant dense<0.000000e+00> : vector<16x8xf32>
    %359 = tpu.matmul %357, %358, %cst_161 {dimension_numbers = #tpu.dot_dimension_numbers<[1], [0], [0], [1], [0, 0, 1, 1], [], []>} : vector<16x16xbf16>, vector<16x8xbf16>, vector<16x8xf32> -> vector<16x8xf32>
    %360 = tpu.concatenate %281, %307, %333, %359 in 1 : vector<16x8xf32>, vector<16x8xf32>, vector<16x8xf32>, vector<16x8xf32> -> vector<16x32xf32>
    %361 = arith.truncf %360 : vector<16x32xf32> to vector<16x32xbf16>
    %cst_162 = arith.constant dense<0.000000e+00> : vector<16x32xf32>
    %362 = tpu.matmul %361, %255, %cst_162 {dimension_numbers = #tpu.dot_dimension_numbers<[1], [0], [0], [1], [0, 0, 1, 1], [], []>} : vector<16x32xbf16>, vector<32x32xbf16>, vector<16x32xf32> -> vector<16x32xf32>
    %363 = arith.addf %362, %244 : vector<16x32xf32>
    %c1_163 = arith.constant 1 : index
    %c0_164 = arith.constant 0 : index
    %c0_165 = arith.constant 0 : index
    %364 = vector.load %arg11[%c1_163, %c0_164, %c0_165] : memref<2x1x32xf32, #tpu.memory_space<vmem>>, vector<1x1x32xf32>
    %365 = vector.shape_cast %364 : vector<1x1x32xf32> to vector<1x32xf32>
    %c1_166 = arith.constant 1 : index
    %c0_167 = arith.constant 0 : index
    %c0_168 = arith.constant 0 : index
    %366 = vector.load %arg12[%c1_166, %c0_167, %c0_168] : memref<2x1x32xf32, #tpu.memory_space<vmem>>, vector<1x1x32xf32>
    %367 = vector.shape_cast %366 : vector<1x1x32xf32> to vector<1x32xf32>
    %cst_169 = arith.constant dense<0.000000e+00> : vector<16xf32>
    %368 = vector.multi_reduction <add>, %363, %cst_169 [1] : vector<16x32xf32> to vector<16xf32>
    %369 = vector.shape_cast %368 : vector<16xf32> to vector<16x1xf32>
    %cst_170 = arith.constant 3.200000e+01 : f32
    %370 = vector.broadcast %cst_170 : f32 to vector<16x1xf32>
    %371 = arith.divf %369, %370 : vector<16x1xf32>
    %372 = vector.broadcast %371 : vector<16x1xf32> to vector<16x32xf32>
    %373 = arith.subf %363, %372 : vector<16x32xf32>
    %374 = arith.mulf %373, %373 : vector<16x32xf32>
    %cst_171 = arith.constant dense<0.000000e+00> : vector<16xf32>
    %375 = vector.multi_reduction <add>, %374, %cst_171 [1] : vector<16x32xf32> to vector<16xf32>
    %376 = vector.shape_cast %375 : vector<16xf32> to vector<16x1xf32>
    %cst_172 = arith.constant 3.200000e+01 : f32
    %377 = vector.broadcast %cst_172 : f32 to vector<16x1xf32>
    %378 = arith.divf %376, %377 : vector<16x1xf32>
    %379 = vector.broadcast %371 : vector<16x1xf32> to vector<16x32xf32>
    %380 = arith.subf %363, %379 : vector<16x32xf32>
    %cst_173 = arith.constant 9.99999997E-7 : f32
    %381 = vector.broadcast %cst_173 : f32 to vector<16x1xf32>
    %382 = arith.addf %378, %381 : vector<16x1xf32>
    %383 = math.rsqrt %382 : vector<16x1xf32>
    %384 = vector.broadcast %383 : vector<16x1xf32> to vector<16x32xf32>
    %385 = arith.mulf %380, %384 : vector<16x32xf32>
    %386 = vector.broadcast %365 : vector<1x32xf32> to vector<16x32xf32>
    %387 = arith.mulf %385, %386 : vector<16x32xf32>
    %388 = vector.broadcast %367 : vector<1x32xf32> to vector<16x32xf32>
    %389 = arith.addf %387, %388 : vector<16x32xf32>
    %c1_174 = arith.constant 1 : index
    %c0_175 = arith.constant 0 : index
    %c0_176 = arith.constant 0 : index
    %390 = vector.load %arg13[%c1_174, %c0_175, %c0_176] : memref<2x32x64xbf16, #tpu.memory_space<vmem>>, vector<1x32x64xbf16>
    %391 = vector.shape_cast %390 : vector<1x32x64xbf16> to vector<32x64xbf16>
    %392 = arith.truncf %389 : vector<16x32xf32> to vector<16x32xbf16>
    %cst_177 = arith.constant dense<0.000000e+00> : vector<16x64xf32>
    %393 = tpu.matmul %392, %391, %cst_177 {dimension_numbers = #tpu.dot_dimension_numbers<[1], [0], [0], [1], [0, 0, 1, 1], [], []>} : vector<16x32xbf16>, vector<32x64xbf16>, vector<16x64xf32> -> vector<16x64xf32>
    %c1_178 = arith.constant 1 : index
    %c0_179 = arith.constant 0 : index
    %c0_180 = arith.constant 0 : index
    %394 = vector.load %arg14[%c1_178, %c0_179, %c0_180] : memref<2x1x64xf32, #tpu.memory_space<vmem>>, vector<1x1x64xf32>
    %395 = vector.shape_cast %394 : vector<1x1x64xf32> to vector<1x64xf32>
    %396 = vector.broadcast %395 : vector<1x64xf32> to vector<16x64xf32>
    %397 = arith.addf %393, %396 : vector<16x64xf32>
    %cst_181 = arith.constant 0.000000e+00 : f32
    %398 = vector.broadcast %cst_181 : f32 to vector<16x64xf32>
    %399 = arith.maximumf %397, %398 : vector<16x64xf32>
    %c1_182 = arith.constant 1 : index
    %c0_183 = arith.constant 0 : index
    %c0_184 = arith.constant 0 : index
    %400 = vector.load %arg15[%c1_182, %c0_183, %c0_184] : memref<2x64x32xbf16, #tpu.memory_space<vmem>>, vector<1x64x32xbf16>
    %401 = vector.shape_cast %400 : vector<1x64x32xbf16> to vector<64x32xbf16>
    %402 = arith.truncf %399 : vector<16x64xf32> to vector<16x64xbf16>
    %cst_185 = arith.constant dense<0.000000e+00> : vector<16x32xf32>
    %403 = tpu.matmul %402, %401, %cst_185 {dimension_numbers = #tpu.dot_dimension_numbers<[1], [0], [0], [1], [0, 0, 1, 1], [], []>} : vector<16x64xbf16>, vector<64x32xbf16>, vector<16x32xf32> -> vector<16x32xf32>
    %c1_186 = arith.constant 1 : index
    %c0_187 = arith.constant 0 : index
    %c0_188 = arith.constant 0 : index
    %404 = vector.load %arg16[%c1_186, %c0_187, %c0_188] : memref<2x1x32xf32, #tpu.memory_space<vmem>>, vector<1x1x32xf32>
    %405 = vector.shape_cast %404 : vector<1x1x32xf32> to vector<1x32xf32>
    %406 = vector.broadcast %405 : vector<1x32xf32> to vector<16x32xf32>
    %407 = arith.addf %403, %406 : vector<16x32xf32>
    %408 = arith.addf %407, %389 : vector<16x32xf32>
    %c1_189 = arith.constant 1 : index
    %c0_190 = arith.constant 0 : index
    %c0_191 = arith.constant 0 : index
    %409 = vector.load %arg17[%c1_189, %c0_190, %c0_191] : memref<2x1x32xf32, #tpu.memory_space<vmem>>, vector<1x1x32xf32>
    %410 = vector.shape_cast %409 : vector<1x1x32xf32> to vector<1x32xf32>
    %c1_192 = arith.constant 1 : index
    %c0_193 = arith.constant 0 : index
    %c0_194 = arith.constant 0 : index
    %411 = vector.load %arg18[%c1_192, %c0_193, %c0_194] : memref<2x1x32xf32, #tpu.memory_space<vmem>>, vector<1x1x32xf32>
    %412 = vector.shape_cast %411 : vector<1x1x32xf32> to vector<1x32xf32>
    %cst_195 = arith.constant dense<0.000000e+00> : vector<16xf32>
    %413 = vector.multi_reduction <add>, %408, %cst_195 [1] : vector<16x32xf32> to vector<16xf32>
    %414 = vector.shape_cast %413 : vector<16xf32> to vector<16x1xf32>
    %cst_196 = arith.constant 3.200000e+01 : f32
    %415 = vector.broadcast %cst_196 : f32 to vector<16x1xf32>
    %416 = arith.divf %414, %415 : vector<16x1xf32>
    %417 = vector.broadcast %416 : vector<16x1xf32> to vector<16x32xf32>
    %418 = arith.subf %408, %417 : vector<16x32xf32>
    %419 = arith.mulf %418, %418 : vector<16x32xf32>
    %cst_197 = arith.constant dense<0.000000e+00> : vector<16xf32>
    %420 = vector.multi_reduction <add>, %419, %cst_197 [1] : vector<16x32xf32> to vector<16xf32>
    %421 = vector.shape_cast %420 : vector<16xf32> to vector<16x1xf32>
    %cst_198 = arith.constant 3.200000e+01 : f32
    %422 = vector.broadcast %cst_198 : f32 to vector<16x1xf32>
    %423 = arith.divf %421, %422 : vector<16x1xf32>
    %424 = vector.broadcast %416 : vector<16x1xf32> to vector<16x32xf32>
    %425 = arith.subf %408, %424 : vector<16x32xf32>
    %cst_199 = arith.constant 9.99999997E-7 : f32
    %426 = vector.broadcast %cst_199 : f32 to vector<16x1xf32>
    %427 = arith.addf %423, %426 : vector<16x1xf32>
    %428 = math.rsqrt %427 : vector<16x1xf32>
    %429 = vector.broadcast %428 : vector<16x1xf32> to vector<16x32xf32>
    %430 = arith.mulf %425, %429 : vector<16x32xf32>
    %431 = vector.broadcast %410 : vector<1x32xf32> to vector<16x32xf32>
    %432 = arith.mulf %430, %431 : vector<16x32xf32>
    %433 = vector.broadcast %412 : vector<1x32xf32> to vector<16x32xf32>
    %434 = arith.addf %432, %433 : vector<16x32xf32>
    %c0_200 = arith.constant 0 : index
    %c0_201 = arith.constant 0 : index
    %c0_202 = arith.constant 0 : index
    %435 = vector.load %arg19[%c0_200, %c0_201, %c0_202] : memref<1x16x32xf32, #tpu.memory_space<vmem>>, vector<1x16x32xf32>
    %436 = vector.shape_cast %435 : vector<1x16x32xf32> to vector<16x32xf32>
    %437 = vector.shape_cast %434 : vector<16x32xf32> to vector<1x16x32xf32>
    tpu.vector_store %arg19[%c0_200, %c0_201, %c0_202], %437 {strides = array<i32>} : memref<1x16x32xf32, #tpu.memory_space<vmem>>, vector<1x16x32xf32>,
    return
  }
  func.func @transform_0(%arg0: i32) -> (i32, i32, i32) {
    %c0_i32 = arith.constant 0 : i32
    %c0_i32_0 = arith.constant 0 : i32
    %c0_i32_1 = arith.constant 0 : i32
    return %arg0, %c0_i32, %c0_i32_0 : i32, i32, i32
  }
  func.func @transform_1(%arg0: i32) -> (i32, i32, i32) {
    %c0_i32 = arith.constant 0 : i32
    %c0_i32_0 = arith.constant 0 : i32
    %c0_i32_1 = arith.constant 0 : i32
    return %arg0, %c0_i32, %c0_i32_0 : i32, i32, i32
  }
  func.func @transform_2(%arg0: i32) -> (i32, i32) {
    %c0_i32 = arith.constant 0 : i32
    %c0_i32_0 = arith.constant 0 : i32
    %c0_i32_1 = arith.constant 0 : i32
    return %c0_i32, %c0_i32_0 : i32, i32
  }
  func.func @transform_3(%arg0: i32) -> (i32, i32) {
    %c0_i32 = arith.constant 0 : i32
    %c0_i32_0 = arith.constant 0 : i32
    %c0_i32_1 = arith.constant 0 : i32
    return %c0_i32, %c0_i32_0 : i32, i32
  }
  func.func @transform_4(%arg0: i32) -> (i32, i32) {
    %c0_i32 = arith.constant 0 : i32
    %c0_i32_0 = arith.constant 0 : i32
    %c0_i32_1 = arith.constant 0 : i32
    return %c0_i32, %c0_i32_0 : i32, i32
  }
  func.func @transform_5(%arg0: i32) -> (i32, i32) {
    %c0_i32 = arith.constant 0 : i32
    %c0_i32_0 = arith.constant 0 : i32
    %c0_i32_1 = arith.constant 0 : i32
    return %c0_i32, %c0_i32_0 : i32, i32
  }
  func.func @transform_6(%arg0: i32) -> (i32, i32) {
    %c0_i32 = arith.constant 0 : i32
    %c0_i32_0 = arith.constant 0 : i32
    %c0_i32_1 = arith.constant 0 : i32
    return %c0_i32, %c0_i32_0 : i32, i32
  }
  func.func @transform_7(%arg0: i32) -> (i32, i32) {
    %c0_i32 = arith.constant 0 : i32
    %c0_i32_0 = arith.constant 0 : i32
    %c0_i32_1 = arith.constant 0 : i32
    return %c0_i32, %c0_i32_0 : i32, i32
  }
  func.func @transform_8(%arg0: i32) -> (i32, i32, i32) {
    %c0_i32 = arith.constant 0 : i32
    %c0_i32_0 = arith.constant 0 : i32
    %c0_i32_1 = arith.constant 0 : i32
    %c0_i32_2 = arith.constant 0 : i32
    return %c0_i32, %c0_i32_0, %c0_i32_1 : i32, i32, i32
  }
  func.func @transform_9(%arg0: i32) -> (i32, i32, i32) {
    %c0_i32 = arith.constant 0 : i32
    %c0_i32_0 = arith.constant 0 : i32
    %c0_i32_1 = arith.constant 0 : i32
    %c0_i32_2 = arith.constant 0 : i32
    return %c0_i32, %c0_i32_0, %c0_i32_1 : i32, i32, i32
  }
  func.func @transform_10(%arg0: i32) -> (i32, i32, i32) {
    %c0_i32 = arith.constant 0 : i32
    %c0_i32_0 = arith.constant 0 : i32
    %c0_i32_1 = arith.constant 0 : i32
    %c0_i32_2 = arith.constant 0 : i32
    return %c0_i32, %c0_i32_0, %c0_i32_1 : i32, i32, i32
  }
  func.func @transform_11(%arg0: i32) -> (i32, i32, i32) {
    %c0_i32 = arith.constant 0 : i32
    %c0_i32_0 = arith.constant 0 : i32
    %c0_i32_1 = arith.constant 0 : i32
    %c0_i32_2 = arith.constant 0 : i32
    return %c0_i32, %c0_i32_0, %c0_i32_1 : i32, i32, i32
  }
  func.func @transform_12(%arg0: i32) -> (i32, i32, i32) {
    %c0_i32 = arith.constant 0 : i32
    %c0_i32_0 = arith.constant 0 : i32
    %c0_i32_1 = arith.constant 0 : i32
    %c0_i32_2 = arith.constant 0 : i32
    return %c0_i32, %c0_i32_0, %c0_i32_1 : i32, i32, i32
  }
  func.func @transform_13(%arg0: i32) -> (i32, i32, i32) {
    %c0_i32 = arith.constant 0 : i32
    %c0_i32_0 = arith.constant 0 : i32
    %c0_i32_1 = arith.constant 0 : i32
    %c0_i32_2 = arith.constant 0 : i32
    return %c0_i32, %c0_i32_0, %c0_i32_1 : i32, i32, i32
  }
  func.func @transform_14(%arg0: i32) -> (i32, i32, i32) {
    %c0_i32 = arith.constant 0 : i32
    %c0_i32_0 = arith.constant 0 : i32
    %c0_i32_1 = arith.constant 0 : i32
    %c0_i32_2 = arith.constant 0 : i32
    return %c0_i32, %c0_i32_0, %c0_i32_1 : i32, i32, i32
  }
  func.func @transform_15(%arg0: i32) -> (i32, i32, i32) {
    %c0_i32 = arith.constant 0 : i32
    %c0_i32_0 = arith.constant 0 : i32
    %c0_i32_1 = arith.constant 0 : i32
    %c0_i32_2 = arith.constant 0 : i32
    return %c0_i32, %c0_i32_0, %c0_i32_1 : i32, i32, i32
  }
  func.func @transform_16(%arg0: i32) -> (i32, i32, i32) {
    %c0_i32 = arith.constant 0 : i32
    %c0_i32_0 = arith.constant 0 : i32
    %c0_i32_1 = arith.constant 0 : i32
    %c0_i32_2 = arith.constant 0 : i32
    return %c0_i32, %c0_i32_0, %c0_i32_1 : i32, i32, i32
  }
  func.func @transform_17(%arg0: i32) -> (i32, i32, i32) {
    %c0_i32 = arith.constant 0 : i32
    %c0_i32_0 = arith.constant 0 : i32
    %c0_i32_1 = arith.constant 0 : i32
    %c0_i32_2 = arith.constant 0 : i32
    return %c0_i32, %c0_i32_0, %c0_i32_1 : i32, i32, i32
  }
  func.func @transform_18(%arg0: i32) -> (i32, i32, i32) {
    %c0_i32 = arith.constant 0 : i32
    %c0_i32_0 = arith.constant 0 : i32
    %c0_i32_1 = arith.constant 0 : i32
    return %arg0, %c0_i32, %c0_i32_0 : i32, i32, i32
  }
  func.func @transform_19(%arg0: i32) -> (i32, i32, i32, i32, i32) {
    %c0_i32 = arith.constant 0 : i32
    %c0_i32_0 = arith.constant 0 : i32
    %c0_i32_1 = arith.constant 0 : i32
    %c0_i32_2 = arith.constant 0 : i32
    %c0_i32_3 = arith.constant 0 : i32
    return %c0_i32, %arg0, %c0_i32_0, %c0_i32_1, %c0_i32_2 : i32, i32, i32, i32, i32
  }
}

module attributes {stable_mosaic.version = 11 : i64} {
  func.func @_decoder_kernel(%arg0: i32, %arg1: memref<1x8x34xf32, #tpu.memory_space<vmem>>, %arg2: memref<1x16x32xf32, #tpu.memory_space<vmem>>, %arg3: memref<1x8x8xf32, #tpu.memory_space<vmem>>, %arg4: memref<1x1x16xf32, #tpu.memory_space<vmem>>, %arg5: memref<2x32xf32, #tpu.memory_space<vmem>>, %arg6: memref<1x32xf32, #tpu.memory_space<vmem>>, %arg7: memref<32x32xbf16, #tpu.memory_space<vmem>>, %arg8: memref<1x32xf32, #tpu.memory_space<vmem>>, %arg9: memref<1x32xf32, #tpu.memory_space<vmem>>, %arg10: memref<1x32xf32, #tpu.memory_space<vmem>>, %arg11: memref<2x32x96xbf16, #tpu.memory_space<vmem>>, %arg12: memref<2x32x32xbf16, #tpu.memory_space<vmem>>, %arg13: memref<2x1x32xf32, #tpu.memory_space<vmem>>, %arg14: memref<2x1x32xf32, #tpu.memory_space<vmem>>, %arg15: memref<2x32x32xbf16, #tpu.memory_space<vmem>>, %arg16: memref<2x32x64xbf16, #tpu.memory_space<vmem>>, %arg17: memref<2x32x32xbf16, #tpu.memory_space<vmem>>, %arg18: memref<2x1x32xf32, #tpu.memory_space<vmem>>, %arg19: memref<2x1x32xf32, #tpu.memory_space<vmem>>, %arg20: memref<2x32x64xbf16, #tpu.memory_space<vmem>>, %arg21: memref<2x1x64xf32, #tpu.memory_space<vmem>>, %arg22: memref<2x64x32xbf16, #tpu.memory_space<vmem>>, %arg23: memref<2x1x32xf32, #tpu.memory_space<vmem>>, %arg24: memref<2x1x32xf32, #tpu.memory_space<vmem>>, %arg25: memref<2x1x32xf32, #tpu.memory_space<vmem>>, %arg26: memref<1x8x32xf32, #tpu.memory_space<vmem>>, %arg27: memref<2x1x4x8x16xf32, #tpu.memory_space<vmem>>) attributes {dimension_semantics = [#tpu.dimension_semantics<parallel>], iteration_bounds = array<i64: 2>, scalar_prefetch = 0 : i64, scratch_operands = 0 : i64, tpu.core_type = #tpu.core_type<tc>, window_params = [{transform_indices = @transform_0, window_bounds = array<i64: 1, 8, 34>}, {transform_indices = @transform_1, window_bounds = array<i64: 1, 16, 32>}, {transform_indices = @transform_2, window_bounds = array<i64: 1, 8, 8>}, {transform_indices = @transform_3, window_bounds = array<i64: 1, 1, 16>}, {pipeline_mode = #tpu.pipeline_mode<synchronous>, transform_indices = @transform_4, window_bounds = array<i64: 2, 32>}, {pipeline_mode = #tpu.pipeline_mode<synchronous>, transform_indices = @transform_5, window_bounds = array<i64: 1, 32>}, {pipeline_mode = #tpu.pipeline_mode<synchronous>, transform_indices = @transform_6, window_bounds = array<i64: 32, 32>}, {pipeline_mode = #tpu.pipeline_mode<synchronous>, transform_indices = @transform_7, window_bounds = array<i64: 1, 32>}, {pipeline_mode = #tpu.pipeline_mode<synchronous>, transform_indices = @transform_8, window_bounds = array<i64: 1, 32>}, {pipeline_mode = #tpu.pipeline_mode<synchronous>, transform_indices = @transform_9, window_bounds = array<i64: 1, 32>}, {pipeline_mode = #tpu.pipeline_mode<synchronous>, transform_indices = @transform_10, window_bounds = array<i64: 2, 32, 96>}, {pipeline_mode = #tpu.pipeline_mode<synchronous>, transform_indices = @transform_11, window_bounds = array<i64: 2, 32, 32>}, {pipeline_mode = #tpu.pipeline_mode<synchronous>, transform_indices = @transform_12, window_bounds = array<i64: 2, 1, 32>}, {pipeline_mode = #tpu.pipeline_mode<synchronous>, transform_indices = @transform_13, window_bounds = array<i64: 2, 1, 32>}, {pipeline_mode = #tpu.pipeline_mode<synchronous>, transform_indices = @transform_14, window_bounds = array<i64: 2, 32, 32>}, {pipeline_mode = #tpu.pipeline_mode<synchronous>, transform_indices = @transform_15, window_bounds = array<i64: 2, 32, 64>}, {pipeline_mode = #tpu.pipeline_mode<synchronous>, transform_indices = @transform_16, window_bounds = array<i64: 2, 32, 32>}, {pipeline_mode = #tpu.pipeline_mode<synchronous>, transform_indices = @transform_17, window_bounds = array<i64: 2, 1, 32>}, {pipeline_mode = #tpu.pipeline_mode<synchronous>, transform_indices = @transform_18, window_bounds = array<i64: 2, 1, 32>}, {pipeline_mode = #tpu.pipeline_mode<synchronous>, transform_indices = @transform_19, window_bounds = array<i64: 2, 32, 64>}, {pipeline_mode = #tpu.pipeline_mode<synchronous>, transform_indices = @transform_20, window_bounds = array<i64: 2, 1, 64>}, {pipeline_mode = #tpu.pipeline_mode<synchronous>, transform_indices = @transform_21, window_bounds = array<i64: 2, 64, 32>}, {pipeline_mode = #tpu.pipeline_mode<synchronous>, transform_indices = @transform_22, window_bounds = array<i64: 2, 1, 32>}, {pipeline_mode = #tpu.pipeline_mode<synchronous>, transform_indices = @transform_23, window_bounds = array<i64: 2, 1, 32>}, {pipeline_mode = #tpu.pipeline_mode<synchronous>, transform_indices = @transform_24, window_bounds = array<i64: 2, 1, 32>}, {transform_indices = @transform_25, window_bounds = array<i64: 1, 8, 32>}, {transform_indices = @transform_26, window_bounds = array<i64: 2, 1, 4, 8, 16>}]} {
    %c0 = arith.constant 0 : index
    %c0_0 = arith.constant 0 : index
    %c0_1 = arith.constant 0 : index
    %0 = vector.load %arg1[%c0, %c0_0, %c0_1] : memref<1x8x34xf32, #tpu.memory_space<vmem>>, vector<1x8x34xf32>
    %1 = vector.shape_cast %0 : vector<1x8x34xf32> to vector<8x34xf32>
    %c0_2 = arith.constant 0 : index
    %c0_3 = arith.constant 0 : index
    %c0_4 = arith.constant 0 : index
    %2 = vector.load %arg2[%c0_2, %c0_3, %c0_4] : memref<1x16x32xf32, #tpu.memory_space<vmem>>, vector<1x16x32xf32>
    %3 = vector.shape_cast %2 : vector<1x16x32xf32> to vector<16x32xf32>
    %c0_5 = arith.constant 0 : index
    %c0_6 = arith.constant 0 : index
    %4 = vector.load %arg5[%c0_5, %c0_6] : memref<2x32xf32, #tpu.memory_space<vmem>>, vector<2x32xf32>
    %c0_7 = arith.constant 0 : index
    %c0_8 = arith.constant 0 : index
    %5 = vector.load %arg6[%c0_7, %c0_8] : memref<1x32xf32, #tpu.memory_space<vmem>>, vector<1x32xf32>
    %c0_9 = arith.constant 0 : index
    %c0_10 = arith.constant 0 : index
    %6 = vector.load %arg7[%c0_9, %c0_10] : memref<32x32xbf16, #tpu.memory_space<vmem>>, vector<32x32xbf16>
    %c0_11 = arith.constant 0 : index
    %c0_12 = arith.constant 0 : index
    %7 = vector.load %arg8[%c0_11, %c0_12] : memref<1x32xf32, #tpu.memory_space<vmem>>, vector<1x32xf32>
    %8 = vector.extract_strided_slice %1 {offsets = [0, 0], sizes = [8, 1], strides = [1, 1]} : vector<8x34xf32> to vector<8x1xf32>
    %9 = vector.extract_strided_slice %1 {offsets = [0, 1], sizes = [8, 1], strides = [1, 1]} : vector<8x34xf32> to vector<8x1xf32>
    %10 = vector.extract_strided_slice %1 {offsets = [0, 2], sizes = [8, 32], strides = [1, 1]} : vector<8x34xf32> to vector<8x32xf32>
    %11 = vector.extract_strided_slice %4 {offsets = [0, 0], sizes = [1, 32], strides = [1, 1]} : vector<2x32xf32> to vector<1x32xf32>
    %12 = vector.broadcast %8 : vector<8x1xf32> to vector<8x32xf32>
    %13 = vector.broadcast %11 : vector<1x32xf32> to vector<8x32xf32>
    %14 = arith.mulf %12, %13 : vector<8x32xf32>
    %15 = vector.extract_strided_slice %4 {offsets = [1, 0], sizes = [1, 32], strides = [1, 1]} : vector<2x32xf32> to vector<1x32xf32>
    %16 = vector.broadcast %9 : vector<8x1xf32> to vector<8x32xf32>
    %17 = vector.broadcast %15 : vector<1x32xf32> to vector<8x32xf32>
    %18 = arith.mulf %16, %17 : vector<8x32xf32>
    %19 = arith.addf %14, %18 : vector<8x32xf32>
    %20 = vector.broadcast %5 : vector<1x32xf32> to vector<8x32xf32>
    %21 = arith.addf %19, %20 : vector<8x32xf32>
    %cst = arith.constant 0.000000e+00 : f32
    %22 = vector.broadcast %cst : f32 to vector<8x32xf32>
    %23 = arith.maximumf %21, %22 : vector<8x32xf32>
    %24 = arith.truncf %23 : vector<8x32xf32> to vector<8x32xbf16>
    %cst_13 = arith.constant dense<0.000000e+00> : vector<8x32xf32>
    %25 = tpu.matmul %24, %6, %cst_13 {dimension_numbers = #tpu.dot_dimension_numbers<[1], [0], [0], [1], [0, 0, 1, 1], [], []>} : vector<8x32xbf16>, vector<32x32xbf16>, vector<8x32xf32> -> vector<8x32xf32>
    %26 = vector.broadcast %7 : vector<1x32xf32> to vector<8x32xf32>
    %27 = arith.addf %25, %26 : vector<8x32xf32>
    %28 = arith.addf %10, %27 : vector<8x32xf32>
    %c0_14 = arith.constant 0 : index
    %c0_15 = arith.constant 0 : index
    %29 = vector.load %arg9[%c0_14, %c0_15] : memref<1x32xf32, #tpu.memory_space<vmem>>, vector<1x32xf32>
    %c0_16 = arith.constant 0 : index
    %c0_17 = arith.constant 0 : index
    %30 = vector.load %arg10[%c0_16, %c0_17] : memref<1x32xf32, #tpu.memory_space<vmem>>, vector<1x32xf32>
    %cst_18 = arith.constant dense<0.000000e+00> : vector<8xf32>
    %31 = vector.multi_reduction <add>, %28, %cst_18 [1] : vector<8x32xf32> to vector<8xf32>
    %32 = vector.shape_cast %31 : vector<8xf32> to vector<8x1xf32>
    %cst_19 = arith.constant 3.200000e+01 : f32
    %33 = vector.broadcast %cst_19 : f32 to vector<8x1xf32>
    %34 = arith.divf %32, %33 : vector<8x1xf32>
    %35 = vector.broadcast %34 : vector<8x1xf32> to vector<8x32xf32>
    %36 = arith.subf %28, %35 : vector<8x32xf32>
    %37 = arith.mulf %36, %36 : vector<8x32xf32>
    %cst_20 = arith.constant dense<0.000000e+00> : vector<8xf32>
    %38 = vector.multi_reduction <add>, %37, %cst_20 [1] : vector<8x32xf32> to vector<8xf32>
    %39 = vector.shape_cast %38 : vector<8xf32> to vector<8x1xf32>
    %cst_21 = arith.constant 3.200000e+01 : f32
    %40 = vector.broadcast %cst_21 : f32 to vector<8x1xf32>
    %41 = arith.divf %39, %40 : vector<8x1xf32>
    %42 = vector.broadcast %34 : vector<8x1xf32> to vector<8x32xf32>
    %43 = arith.subf %28, %42 : vector<8x32xf32>
    %cst_22 = arith.constant 9.99999997E-7 : f32
    %44 = vector.broadcast %cst_22 : f32 to vector<8x1xf32>
    %45 = arith.addf %41, %44 : vector<8x1xf32>
    %46 = math.rsqrt %45 : vector<8x1xf32>
    %47 = vector.broadcast %46 : vector<8x1xf32> to vector<8x32xf32>
    %48 = arith.mulf %43, %47 : vector<8x32xf32>
    %49 = vector.broadcast %29 : vector<1x32xf32> to vector<8x32xf32>
    %50 = arith.mulf %48, %49 : vector<8x32xf32>
    %51 = vector.broadcast %30 : vector<1x32xf32> to vector<8x32xf32>
    %52 = arith.addf %50, %51 : vector<8x32xf32>
    %c0_23 = arith.constant 0 : index
    %c0_24 = arith.constant 0 : index
    %c0_25 = arith.constant 0 : index
    %53 = vector.load %arg3[%c0_23, %c0_24, %c0_25] : memref<1x8x8xf32, #tpu.memory_space<vmem>>, vector<1x8x8xf32>
    %54 = vector.shape_cast %53 : vector<1x8x8xf32> to vector<8x8xf32>
    %c0_26 = arith.constant 0 : index
    %c0_27 = arith.constant 0 : index
    %c0_28 = arith.constant 0 : index
    %55 = vector.load %arg4[%c0_26, %c0_27, %c0_28] : memref<1x1x16xf32, #tpu.memory_space<vmem>>, vector<1x1x16xf32>
    %56 = vector.shape_cast %55 : vector<1x1x16xf32> to vector<1x16xf32>
    %57 = vector.shape_cast %56 : vector<1x16xf32> to vector<1x16xf32>
    %58 = vector.broadcast %57 : vector<1x16xf32> to vector<8x16xf32>
    %c0_29 = arith.constant 0 : index
    %c0_30 = arith.constant 0 : index
    %c0_31 = arith.constant 0 : index
    %59 = vector.load %arg11[%c0_29, %c0_30, %c0_31] : memref<2x32x96xbf16, #tpu.memory_space<vmem>>, vector<1x32x96xbf16>
    %60 = vector.shape_cast %59 : vector<1x32x96xbf16> to vector<32x96xbf16>
    %61 = arith.truncf %52 : vector<8x32xf32> to vector<8x32xbf16>
    %cst_32 = arith.constant dense<0.000000e+00> : vector<8x96xf32>
    %62 = tpu.matmul %61, %60, %cst_32 {dimension_numbers = #tpu.dot_dimension_numbers<[1], [0], [0], [1], [0, 0, 1, 1], [], []>} : vector<8x32xbf16>, vector<32x96xbf16>, vector<8x96xf32> -> vector<8x96xf32>
    %63 = vector.extract_strided_slice %62 {offsets = [0, 0], sizes = [8, 32], strides = [1, 1]} : vector<8x96xf32> to vector<8x32xf32>
    %cst_33 = arith.constant 0.353553385 : f32
    %64 = vector.broadcast %cst_33 : f32 to vector<8x32xf32>
    %65 = arith.mulf %63, %64 : vector<8x32xf32>
    %66 = vector.extract_strided_slice %62 {offsets = [0, 32], sizes = [8, 32], strides = [1, 1]} : vector<8x96xf32> to vector<8x32xf32>
    %67 = vector.extract_strided_slice %62 {offsets = [0, 64], sizes = [8, 32], strides = [1, 1]} : vector<8x96xf32> to vector<8x32xf32>
    %c0_34 = arith.constant 0 : index
    %c0_35 = arith.constant 0 : index
    %c0_36 = arith.constant 0 : index
    %68 = vector.load %arg12[%c0_34, %c0_35, %c0_36] : memref<2x32x32xbf16, #tpu.memory_space<vmem>>, vector<1x32x32xbf16>
    %69 = vector.shape_cast %68 : vector<1x32x32xbf16> to vector<32x32xbf16>
    %70 = vector.extract_strided_slice %65 {offsets = [0, 0], sizes = [8, 8], strides = [1, 1]} : vector<8x32xf32> to vector<8x8xf32>
    %71 = vector.extract_strided_slice %66 {offsets = [0, 0], sizes = [8, 8], strides = [1, 1]} : vector<8x32xf32> to vector<8x8xf32>
    %72 = vector.extract_strided_slice %67 {offsets = [0, 0], sizes = [8, 8], strides = [1, 1]} : vector<8x32xf32> to vector<8x8xf32>
    %73 = arith.truncf %70 : vector<8x8xf32> to vector<8x8xbf16>
    %74 = arith.truncf %71 : vector<8x8xf32> to vector<8x8xbf16>
    %cst_37 = arith.constant dense<0.000000e+00> : vector<8x8xf32>
    %75 = tpu.matmul %73, %74, %cst_37 {dimension_numbers = #tpu.dot_dimension_numbers<[1], [1], [0], [0], [0, 0, 1, 0], [], []>} : vector<8x8xbf16>, vector<8x8xbf16>, vector<8x8xf32> -> vector<8x8xf32>
    %cst_38 = arith.constant 5.000000e-01 : f32
    %76 = vector.broadcast %cst_38 : f32 to vector<8x8xf32>
    %77 = arith.cmpf ogt, %54, %76 : vector<8x8xf32>
    %cst_39 = arith.constant -1.000000e+09 : f32
    %78 = vector.broadcast %cst_39 : f32 to vector<8x8xf32>
    %79 = arith.select %77, %75, %78 : vector<8x8xi1>, vector<8x8xf32>
    %cst_40 = arith.constant dense<0xFF800000> : vector<8xf32>
    %80 = vector.multi_reduction <maximumf>, %79, %cst_40 [1] : vector<8x8xf32> to vector<8xf32>
    %81 = vector.shape_cast %80 : vector<8xf32> to vector<8x1xf32>
    %82 = vector.broadcast %81 : vector<8x1xf32> to vector<8x8xf32>
    %83 = arith.subf %79, %82 : vector<8x8xf32>
    %84 = math.exp %83 : vector<8x8xf32>
    %cst_41 = arith.constant dense<0.000000e+00> : vector<8xf32>
    %85 = vector.multi_reduction <add>, %84, %cst_41 [1] : vector<8x8xf32> to vector<8xf32>
    %86 = vector.shape_cast %85 : vector<8xf32> to vector<8x1xf32>
    %87 = tpu.reciprocal %86 {approx = true} : vector<8x1xf32> -> vector<8x1xf32>
    %88 = vector.broadcast %87 : vector<8x1xf32> to vector<8x8xf32>
    %89 = arith.mulf %84, %88 : vector<8x8xf32>
    %90 = arith.truncf %89 : vector<8x8xf32> to vector<8x8xbf16>
    %91 = arith.truncf %72 : vector<8x8xf32> to vector<8x8xbf16>
    %cst_42 = arith.constant dense<0.000000e+00> : vector<8x8xf32>
    %92 = tpu.matmul %90, %91, %cst_42 {dimension_numbers = #tpu.dot_dimension_numbers<[1], [0], [0], [1], [0, 0, 1, 1], [], []>} : vector<8x8xbf16>, vector<8x8xbf16>, vector<8x8xf32> -> vector<8x8xf32>
    %93 = vector.extract_strided_slice %65 {offsets = [0, 8], sizes = [8, 8], strides = [1, 1]} : vector<8x32xf32> to vector<8x8xf32>
    %94 = vector.extract_strided_slice %66 {offsets = [0, 8], sizes = [8, 8], strides = [1, 1]} : vector<8x32xf32> to vector<8x8xf32>
    %95 = vector.extract_strided_slice %67 {offsets = [0, 8], sizes = [8, 8], strides = [1, 1]} : vector<8x32xf32> to vector<8x8xf32>
    %96 = arith.truncf %93 : vector<8x8xf32> to vector<8x8xbf16>
    %97 = arith.truncf %94 : vector<8x8xf32> to vector<8x8xbf16>
    %cst_43 = arith.constant dense<0.000000e+00> : vector<8x8xf32>
    %98 = tpu.matmul %96, %97, %cst_43 {dimension_numbers = #tpu.dot_dimension_numbers<[1], [1], [0], [0], [0, 0, 1, 0], [], []>} : vector<8x8xbf16>, vector<8x8xbf16>, vector<8x8xf32> -> vector<8x8xf32>
    %cst_44 = arith.constant 5.000000e-01 : f32
    %99 = vector.broadcast %cst_44 : f32 to vector<8x8xf32>
    %100 = arith.cmpf ogt, %54, %99 : vector<8x8xf32>
    %cst_45 = arith.constant -1.000000e+09 : f32
    %101 = vector.broadcast %cst_45 : f32 to vector<8x8xf32>
    %102 = arith.select %100, %98, %101 : vector<8x8xi1>, vector<8x8xf32>
    %cst_46 = arith.constant dense<0xFF800000> : vector<8xf32>
    %103 = vector.multi_reduction <maximumf>, %102, %cst_46 [1] : vector<8x8xf32> to vector<8xf32>
    %104 = vector.shape_cast %103 : vector<8xf32> to vector<8x1xf32>
    %105 = vector.broadcast %104 : vector<8x1xf32> to vector<8x8xf32>
    %106 = arith.subf %102, %105 : vector<8x8xf32>
    %107 = math.exp %106 : vector<8x8xf32>
    %cst_47 = arith.constant dense<0.000000e+00> : vector<8xf32>
    %108 = vector.multi_reduction <add>, %107, %cst_47 [1] : vector<8x8xf32> to vector<8xf32>
    %109 = vector.shape_cast %108 : vector<8xf32> to vector<8x1xf32>
    %110 = tpu.reciprocal %109 {approx = true} : vector<8x1xf32> -> vector<8x1xf32>
    %111 = vector.broadcast %110 : vector<8x1xf32> to vector<8x8xf32>
    %112 = arith.mulf %107, %111 : vector<8x8xf32>
    %113 = arith.truncf %112 : vector<8x8xf32> to vector<8x8xbf16>
    %114 = arith.truncf %95 : vector<8x8xf32> to vector<8x8xbf16>
    %cst_48 = arith.constant dense<0.000000e+00> : vector<8x8xf32>
    %115 = tpu.matmul %113, %114, %cst_48 {dimension_numbers = #tpu.dot_dimension_numbers<[1], [0], [0], [1], [0, 0, 1, 1], [], []>} : vector<8x8xbf16>, vector<8x8xbf16>, vector<8x8xf32> -> vector<8x8xf32>
    %116 = vector.extract_strided_slice %65 {offsets = [0, 16], sizes = [8, 8], strides = [1, 1]} : vector<8x32xf32> to vector<8x8xf32>
    %117 = vector.extract_strided_slice %66 {offsets = [0, 16], sizes = [8, 8], strides = [1, 1]} : vector<8x32xf32> to vector<8x8xf32>
    %118 = vector.extract_strided_slice %67 {offsets = [0, 16], sizes = [8, 8], strides = [1, 1]} : vector<8x32xf32> to vector<8x8xf32>
    %119 = arith.truncf %116 : vector<8x8xf32> to vector<8x8xbf16>
    %120 = arith.truncf %117 : vector<8x8xf32> to vector<8x8xbf16>
    %cst_49 = arith.constant dense<0.000000e+00> : vector<8x8xf32>
    %121 = tpu.matmul %119, %120, %cst_49 {dimension_numbers = #tpu.dot_dimension_numbers<[1], [1], [0], [0], [0, 0, 1, 0], [], []>} : vector<8x8xbf16>, vector<8x8xbf16>, vector<8x8xf32> -> vector<8x8xf32>
    %cst_50 = arith.constant 5.000000e-01 : f32
    %122 = vector.broadcast %cst_50 : f32 to vector<8x8xf32>
    %123 = arith.cmpf ogt, %54, %122 : vector<8x8xf32>
    %cst_51 = arith.constant -1.000000e+09 : f32
    %124 = vector.broadcast %cst_51 : f32 to vector<8x8xf32>
    %125 = arith.select %123, %121, %124 : vector<8x8xi1>, vector<8x8xf32>
    %cst_52 = arith.constant dense<0xFF800000> : vector<8xf32>
    %126 = vector.multi_reduction <maximumf>, %125, %cst_52 [1] : vector<8x8xf32> to vector<8xf32>
    %127 = vector.shape_cast %126 : vector<8xf32> to vector<8x1xf32>
    %128 = vector.broadcast %127 : vector<8x1xf32> to vector<8x8xf32>
    %129 = arith.subf %125, %128 : vector<8x8xf32>
    %130 = math.exp %129 : vector<8x8xf32>
    %cst_53 = arith.constant dense<0.000000e+00> : vector<8xf32>
    %131 = vector.multi_reduction <add>, %130, %cst_53 [1] : vector<8x8xf32> to vector<8xf32>
    %132 = vector.shape_cast %131 : vector<8xf32> to vector<8x1xf32>
    %133 = tpu.reciprocal %132 {approx = true} : vector<8x1xf32> -> vector<8x1xf32>
    %134 = vector.broadcast %133 : vector<8x1xf32> to vector<8x8xf32>
    %135 = arith.mulf %130, %134 : vector<8x8xf32>
    %136 = arith.truncf %135 : vector<8x8xf32> to vector<8x8xbf16>
    %137 = arith.truncf %118 : vector<8x8xf32> to vector<8x8xbf16>
    %cst_54 = arith.constant dense<0.000000e+00> : vector<8x8xf32>
    %138 = tpu.matmul %136, %137, %cst_54 {dimension_numbers = #tpu.dot_dimension_numbers<[1], [0], [0], [1], [0, 0, 1, 1], [], []>} : vector<8x8xbf16>, vector<8x8xbf16>, vector<8x8xf32> -> vector<8x8xf32>
    %139 = vector.extract_strided_slice %65 {offsets = [0, 24], sizes = [8, 8], strides = [1, 1]} : vector<8x32xf32> to vector<8x8xf32>
    %140 = vector.extract_strided_slice %66 {offsets = [0, 24], sizes = [8, 8], strides = [1, 1]} : vector<8x32xf32> to vector<8x8xf32>
    %141 = vector.extract_strided_slice %67 {offsets = [0, 24], sizes = [8, 8], strides = [1, 1]} : vector<8x32xf32> to vector<8x8xf32>
    %142 = arith.truncf %139 : vector<8x8xf32> to vector<8x8xbf16>
    %143 = arith.truncf %140 : vector<8x8xf32> to vector<8x8xbf16>
    %cst_55 = arith.constant dense<0.000000e+00> : vector<8x8xf32>
    %144 = tpu.matmul %142, %143, %cst_55 {dimension_numbers = #tpu.dot_dimension_numbers<[1], [1], [0], [0], [0, 0, 1, 0], [], []>} : vector<8x8xbf16>, vector<8x8xbf16>, vector<8x8xf32> -> vector<8x8xf32>
    %cst_56 = arith.constant 5.000000e-01 : f32
    %145 = vector.broadcast %cst_56 : f32 to vector<8x8xf32>
    %146 = arith.cmpf ogt, %54, %145 : vector<8x8xf32>
    %cst_57 = arith.constant -1.000000e+09 : f32
    %147 = vector.broadcast %cst_57 : f32 to vector<8x8xf32>
    %148 = arith.select %146, %144, %147 : vector<8x8xi1>, vector<8x8xf32>
    %cst_58 = arith.constant dense<0xFF800000> : vector<8xf32>
    %149 = vector.multi_reduction <maximumf>, %148, %cst_58 [1] : vector<8x8xf32> to vector<8xf32>
    %150 = vector.shape_cast %149 : vector<8xf32> to vector<8x1xf32>
    %151 = vector.broadcast %150 : vector<8x1xf32> to vector<8x8xf32>
    %152 = arith.subf %148, %151 : vector<8x8xf32>
    %153 = math.exp %152 : vector<8x8xf32>
    %cst_59 = arith.constant dense<0.000000e+00> : vector<8xf32>
    %154 = vector.multi_reduction <add>, %153, %cst_59 [1] : vector<8x8xf32> to vector<8xf32>
    %155 = vector.shape_cast %154 : vector<8xf32> to vector<8x1xf32>
    %156 = tpu.reciprocal %155 {approx = true} : vector<8x1xf32> -> vector<8x1xf32>
    %157 = vector.broadcast %156 : vector<8x1xf32> to vector<8x8xf32>
    %158 = arith.mulf %153, %157 : vector<8x8xf32>
    %159 = arith.truncf %158 : vector<8x8xf32> to vector<8x8xbf16>
    %160 = arith.truncf %141 : vector<8x8xf32> to vector<8x8xbf16>
    %cst_60 = arith.constant dense<0.000000e+00> : vector<8x8xf32>
    %161 = tpu.matmul %159, %160, %cst_60 {dimension_numbers = #tpu.dot_dimension_numbers<[1], [0], [0], [1], [0, 0, 1, 1], [], []>} : vector<8x8xbf16>, vector<8x8xbf16>, vector<8x8xf32> -> vector<8x8xf32>
    %162 = tpu.concatenate %92, %115, %138, %161 in 1 : vector<8x8xf32>, vector<8x8xf32>, vector<8x8xf32>, vector<8x8xf32> -> vector<8x32xf32>
    %163 = arith.truncf %162 : vector<8x32xf32> to vector<8x32xbf16>
    %cst_61 = arith.constant dense<0.000000e+00> : vector<8x32xf32>
    %164 = tpu.matmul %163, %69, %cst_61 {dimension_numbers = #tpu.dot_dimension_numbers<[1], [0], [0], [1], [0, 0, 1, 1], [], []>} : vector<8x32xbf16>, vector<32x32xbf16>, vector<8x32xf32> -> vector<8x32xf32>
    %165 = arith.addf %164, %52 : vector<8x32xf32>
    %c0_62 = arith.constant 0 : index
    %c0_63 = arith.constant 0 : index
    %c0_64 = arith.constant 0 : index
    %166 = vector.load %arg13[%c0_62, %c0_63, %c0_64] : memref<2x1x32xf32, #tpu.memory_space<vmem>>, vector<1x1x32xf32>
    %167 = vector.shape_cast %166 : vector<1x1x32xf32> to vector<1x32xf32>
    %c0_65 = arith.constant 0 : index
    %c0_66 = arith.constant 0 : index
    %c0_67 = arith.constant 0 : index
    %168 = vector.load %arg14[%c0_65, %c0_66, %c0_67] : memref<2x1x32xf32, #tpu.memory_space<vmem>>, vector<1x1x32xf32>
    %169 = vector.shape_cast %168 : vector<1x1x32xf32> to vector<1x32xf32>
    %cst_68 = arith.constant dense<0.000000e+00> : vector<8xf32>
    %170 = vector.multi_reduction <add>, %165, %cst_68 [1] : vector<8x32xf32> to vector<8xf32>
    %171 = vector.shape_cast %170 : vector<8xf32> to vector<8x1xf32>
    %cst_69 = arith.constant 3.200000e+01 : f32
    %172 = vector.broadcast %cst_69 : f32 to vector<8x1xf32>
    %173 = arith.divf %171, %172 : vector<8x1xf32>
    %174 = vector.broadcast %173 : vector<8x1xf32> to vector<8x32xf32>
    %175 = arith.subf %165, %174 : vector<8x32xf32>
    %176 = arith.mulf %175, %175 : vector<8x32xf32>
    %cst_70 = arith.constant dense<0.000000e+00> : vector<8xf32>
    %177 = vector.multi_reduction <add>, %176, %cst_70 [1] : vector<8x32xf32> to vector<8xf32>
    %178 = vector.shape_cast %177 : vector<8xf32> to vector<8x1xf32>
    %cst_71 = arith.constant 3.200000e+01 : f32
    %179 = vector.broadcast %cst_71 : f32 to vector<8x1xf32>
    %180 = arith.divf %178, %179 : vector<8x1xf32>
    %181 = vector.broadcast %173 : vector<8x1xf32> to vector<8x32xf32>
    %182 = arith.subf %165, %181 : vector<8x32xf32>
    %cst_72 = arith.constant 9.99999997E-7 : f32
    %183 = vector.broadcast %cst_72 : f32 to vector<8x1xf32>
    %184 = arith.addf %180, %183 : vector<8x1xf32>
    %185 = math.rsqrt %184 : vector<8x1xf32>
    %186 = vector.broadcast %185 : vector<8x1xf32> to vector<8x32xf32>
    %187 = arith.mulf %182, %186 : vector<8x32xf32>
    %188 = vector.broadcast %167 : vector<1x32xf32> to vector<8x32xf32>
    %189 = arith.mulf %187, %188 : vector<8x32xf32>
    %190 = vector.broadcast %169 : vector<1x32xf32> to vector<8x32xf32>
    %191 = arith.addf %189, %190 : vector<8x32xf32>
    %c0_73 = arith.constant 0 : index
    %c0_74 = arith.constant 0 : index
    %c0_75 = arith.constant 0 : index
    %192 = vector.load %arg15[%c0_73, %c0_74, %c0_75] : memref<2x32x32xbf16, #tpu.memory_space<vmem>>, vector<1x32x32xbf16>
    %193 = vector.shape_cast %192 : vector<1x32x32xbf16> to vector<32x32xbf16>
    %194 = arith.truncf %191 : vector<8x32xf32> to vector<8x32xbf16>
    %cst_76 = arith.constant dense<0.000000e+00> : vector<8x32xf32>
    %195 = tpu.matmul %194, %193, %cst_76 {dimension_numbers = #tpu.dot_dimension_numbers<[1], [0], [0], [1], [0, 0, 1, 1], [], []>} : vector<8x32xbf16>, vector<32x32xbf16>, vector<8x32xf32> -> vector<8x32xf32>
    %cst_77 = arith.constant 0.353553385 : f32
    %196 = vector.broadcast %cst_77 : f32 to vector<8x32xf32>
    %197 = arith.mulf %195, %196 : vector<8x32xf32>
    %c0_78 = arith.constant 0 : index
    %c0_79 = arith.constant 0 : index
    %c0_80 = arith.constant 0 : index
    %198 = vector.load %arg16[%c0_78, %c0_79, %c0_80] : memref<2x32x64xbf16, #tpu.memory_space<vmem>>, vector<1x32x64xbf16>
    %199 = vector.shape_cast %198 : vector<1x32x64xbf16> to vector<32x64xbf16>
    %200 = arith.truncf %3 : vector<16x32xf32> to vector<16x32xbf16>
    %cst_81 = arith.constant dense<0.000000e+00> : vector<16x64xf32>
    %201 = tpu.matmul %200, %199, %cst_81 {dimension_numbers = #tpu.dot_dimension_numbers<[1], [0], [0], [1], [0, 0, 1, 1], [], []>} : vector<16x32xbf16>, vector<32x64xbf16>, vector<16x64xf32> -> vector<16x64xf32>
    %202 = vector.extract_strided_slice %201 {offsets = [0, 0], sizes = [16, 32], strides = [1, 1]} : vector<16x64xf32> to vector<16x32xf32>
    %203 = vector.extract_strided_slice %201 {offsets = [0, 32], sizes = [16, 32], strides = [1, 1]} : vector<16x64xf32> to vector<16x32xf32>
    %c0_82 = arith.constant 0 : index
    %c0_83 = arith.constant 0 : index
    %c0_84 = arith.constant 0 : index
    %204 = vector.load %arg17[%c0_82, %c0_83, %c0_84] : memref<2x32x32xbf16, #tpu.memory_space<vmem>>, vector<1x32x32xbf16>
    %205 = vector.shape_cast %204 : vector<1x32x32xbf16> to vector<32x32xbf16>
    %206 = vector.extract_strided_slice %197 {offsets = [0, 0], sizes = [8, 8], strides = [1, 1]} : vector<8x32xf32> to vector<8x8xf32>
    %207 = vector.extract_strided_slice %202 {offsets = [0, 0], sizes = [16, 8], strides = [1, 1]} : vector<16x32xf32> to vector<16x8xf32>
    %208 = vector.extract_strided_slice %203 {offsets = [0, 0], sizes = [16, 8], strides = [1, 1]} : vector<16x32xf32> to vector<16x8xf32>
    %209 = arith.truncf %206 : vector<8x8xf32> to vector<8x8xbf16>
    %210 = arith.truncf %207 : vector<16x8xf32> to vector<16x8xbf16>
    %cst_85 = arith.constant dense<0.000000e+00> : vector<8x16xf32>
    %211 = tpu.matmul %209, %210, %cst_85 {dimension_numbers = #tpu.dot_dimension_numbers<[1], [1], [0], [0], [0, 0, 1, 0], [], []>} : vector<8x8xbf16>, vector<16x8xbf16>, vector<8x16xf32> -> vector<8x16xf32>
    %cst_86 = arith.constant 5.000000e-01 : f32
    %212 = vector.broadcast %cst_86 : f32 to vector<8x16xf32>
    %213 = arith.cmpf ogt, %58, %212 : vector<8x16xf32>
    %cst_87 = arith.constant -1.000000e+09 : f32
    %214 = vector.broadcast %cst_87 : f32 to vector<8x16xf32>
    %215 = arith.select %213, %211, %214 : vector<8x16xi1>, vector<8x16xf32>
    %cst_88 = arith.constant dense<0xFF800000> : vector<8xf32>
    %216 = vector.multi_reduction <maximumf>, %215, %cst_88 [1] : vector<8x16xf32> to vector<8xf32>
    %217 = vector.shape_cast %216 : vector<8xf32> to vector<8x1xf32>
    %218 = vector.broadcast %217 : vector<8x1xf32> to vector<8x16xf32>
    %219 = arith.subf %215, %218 : vector<8x16xf32>
    %220 = math.exp %219 : vector<8x16xf32>
    %cst_89 = arith.constant dense<0.000000e+00> : vector<8xf32>
    %221 = vector.multi_reduction <add>, %220, %cst_89 [1] : vector<8x16xf32> to vector<8xf32>
    %222 = vector.shape_cast %221 : vector<8xf32> to vector<8x1xf32>
    %223 = tpu.reciprocal %222 {approx = true} : vector<8x1xf32> -> vector<8x1xf32>
    %224 = vector.broadcast %223 : vector<8x1xf32> to vector<8x16xf32>
    %225 = arith.mulf %220, %224 : vector<8x16xf32>
    %c0_90 = arith.constant 0 : index
    %c0_91 = arith.constant 0 : index
    %c0_92 = arith.constant 0 : index
    %c0_93 = arith.constant 0 : index
    %c0_94 = arith.constant 0 : index
    %226 = vector.load %arg27[%c0_90, %c0_91, %c0_92, %c0_93, %c0_94] : memref<2x1x4x8x16xf32, #tpu.memory_space<vmem>>, vector<1x1x1x8x16xf32>
    %227 = vector.shape_cast %226 : vector<1x1x1x8x16xf32> to vector<8x16xf32>
    %228 = vector.shape_cast %225 : vector<8x16xf32> to vector<1x1x1x8x16xf32>
    tpu.vector_store %arg27[%c0_90, %c0_91, %c0_92, %c0_93, %c0_94], %228 {strides = array<i32>} : memref<2x1x4x8x16xf32, #tpu.memory_space<vmem>>, vector<1x1x1x8x16xf32>,
    %229 = arith.truncf %225 : vector<8x16xf32> to vector<8x16xbf16>
    %230 = arith.truncf %208 : vector<16x8xf32> to vector<16x8xbf16>
    %cst_95 = arith.constant dense<0.000000e+00> : vector<8x8xf32>
    %231 = tpu.matmul %229, %230, %cst_95 {dimension_numbers = #tpu.dot_dimension_numbers<[1], [0], [0], [1], [0, 0, 1, 1], [], []>} : vector<8x16xbf16>, vector<16x8xbf16>, vector<8x8xf32> -> vector<8x8xf32>
    %232 = vector.extract_strided_slice %197 {offsets = [0, 8], sizes = [8, 8], strides = [1, 1]} : vector<8x32xf32> to vector<8x8xf32>
    %233 = vector.extract_strided_slice %202 {offsets = [0, 8], sizes = [16, 8], strides = [1, 1]} : vector<16x32xf32> to vector<16x8xf32>
    %234 = vector.extract_strided_slice %203 {offsets = [0, 8], sizes = [16, 8], strides = [1, 1]} : vector<16x32xf32> to vector<16x8xf32>
    %235 = arith.truncf %232 : vector<8x8xf32> to vector<8x8xbf16>
    %236 = arith.truncf %233 : vector<16x8xf32> to vector<16x8xbf16>
    %cst_96 = arith.constant dense<0.000000e+00> : vector<8x16xf32>
    %237 = tpu.matmul %235, %236, %cst_96 {dimension_numbers = #tpu.dot_dimension_numbers<[1], [1], [0], [0], [0, 0, 1, 0], [], []>} : vector<8x8xbf16>, vector<16x8xbf16>, vector<8x16xf32> -> vector<8x16xf32>
    %cst_97 = arith.constant 5.000000e-01 : f32
    %238 = vector.broadcast %cst_97 : f32 to vector<8x16xf32>
    %239 = arith.cmpf ogt, %58, %238 : vector<8x16xf32>
    %cst_98 = arith.constant -1.000000e+09 : f32
    %240 = vector.broadcast %cst_98 : f32 to vector<8x16xf32>
    %241 = arith.select %239, %237, %240 : vector<8x16xi1>, vector<8x16xf32>
    %cst_99 = arith.constant dense<0xFF800000> : vector<8xf32>
    %242 = vector.multi_reduction <maximumf>, %241, %cst_99 [1] : vector<8x16xf32> to vector<8xf32>
    %243 = vector.shape_cast %242 : vector<8xf32> to vector<8x1xf32>
    %244 = vector.broadcast %243 : vector<8x1xf32> to vector<8x16xf32>
    %245 = arith.subf %241, %244 : vector<8x16xf32>
    %246 = math.exp %245 : vector<8x16xf32>
    %cst_100 = arith.constant dense<0.000000e+00> : vector<8xf32>
    %247 = vector.multi_reduction <add>, %246, %cst_100 [1] : vector<8x16xf32> to vector<8xf32>
    %248 = vector.shape_cast %247 : vector<8xf32> to vector<8x1xf32>
    %249 = tpu.reciprocal %248 {approx = true} : vector<8x1xf32> -> vector<8x1xf32>
    %250 = vector.broadcast %249 : vector<8x1xf32> to vector<8x16xf32>
    %251 = arith.mulf %246, %250 : vector<8x16xf32>
    %c0_101 = arith.constant 0 : index
    %c0_102 = arith.constant 0 : index
    %c1 = arith.constant 1 : index
    %c0_103 = arith.constant 0 : index
    %c0_104 = arith.constant 0 : index
    %252 = vector.load %arg27[%c0_101, %c0_102, %c1, %c0_103, %c0_104] : memref<2x1x4x8x16xf32, #tpu.memory_space<vmem>>, vector<1x1x1x8x16xf32>
    %253 = vector.shape_cast %252 : vector<1x1x1x8x16xf32> to vector<8x16xf32>
    %254 = vector.shape_cast %251 : vector<8x16xf32> to vector<1x1x1x8x16xf32>
    tpu.vector_store %arg27[%c0_101, %c0_102, %c1, %c0_103, %c0_104], %254 {strides = array<i32>} : memref<2x1x4x8x16xf32, #tpu.memory_space<vmem>>, vector<1x1x1x8x16xf32>,
    %255 = arith.truncf %251 : vector<8x16xf32> to vector<8x16xbf16>
    %256 = arith.truncf %234 : vector<16x8xf32> to vector<16x8xbf16>
    %cst_105 = arith.constant dense<0.000000e+00> : vector<8x8xf32>
    %257 = tpu.matmul %255, %256, %cst_105 {dimension_numbers = #tpu.dot_dimension_numbers<[1], [0], [0], [1], [0, 0, 1, 1], [], []>} : vector<8x16xbf16>, vector<16x8xbf16>, vector<8x8xf32> -> vector<8x8xf32>
    %258 = vector.extract_strided_slice %197 {offsets = [0, 16], sizes = [8, 8], strides = [1, 1]} : vector<8x32xf32> to vector<8x8xf32>
    %259 = vector.extract_strided_slice %202 {offsets = [0, 16], sizes = [16, 8], strides = [1, 1]} : vector<16x32xf32> to vector<16x8xf32>
    %260 = vector.extract_strided_slice %203 {offsets = [0, 16], sizes = [16, 8], strides = [1, 1]} : vector<16x32xf32> to vector<16x8xf32>
    %261 = arith.truncf %258 : vector<8x8xf32> to vector<8x8xbf16>
    %262 = arith.truncf %259 : vector<16x8xf32> to vector<16x8xbf16>
    %cst_106 = arith.constant dense<0.000000e+00> : vector<8x16xf32>
    %263 = tpu.matmul %261, %262, %cst_106 {dimension_numbers = #tpu.dot_dimension_numbers<[1], [1], [0], [0], [0, 0, 1, 0], [], []>} : vector<8x8xbf16>, vector<16x8xbf16>, vector<8x16xf32> -> vector<8x16xf32>
    %cst_107 = arith.constant 5.000000e-01 : f32
    %264 = vector.broadcast %cst_107 : f32 to vector<8x16xf32>
    %265 = arith.cmpf ogt, %58, %264 : vector<8x16xf32>
    %cst_108 = arith.constant -1.000000e+09 : f32
    %266 = vector.broadcast %cst_108 : f32 to vector<8x16xf32>
    %267 = arith.select %265, %263, %266 : vector<8x16xi1>, vector<8x16xf32>
    %cst_109 = arith.constant dense<0xFF800000> : vector<8xf32>
    %268 = vector.multi_reduction <maximumf>, %267, %cst_109 [1] : vector<8x16xf32> to vector<8xf32>
    %269 = vector.shape_cast %268 : vector<8xf32> to vector<8x1xf32>
    %270 = vector.broadcast %269 : vector<8x1xf32> to vector<8x16xf32>
    %271 = arith.subf %267, %270 : vector<8x16xf32>
    %272 = math.exp %271 : vector<8x16xf32>
    %cst_110 = arith.constant dense<0.000000e+00> : vector<8xf32>
    %273 = vector.multi_reduction <add>, %272, %cst_110 [1] : vector<8x16xf32> to vector<8xf32>
    %274 = vector.shape_cast %273 : vector<8xf32> to vector<8x1xf32>
    %275 = tpu.reciprocal %274 {approx = true} : vector<8x1xf32> -> vector<8x1xf32>
    %276 = vector.broadcast %275 : vector<8x1xf32> to vector<8x16xf32>
    %277 = arith.mulf %272, %276 : vector<8x16xf32>
    %c0_111 = arith.constant 0 : index
    %c0_112 = arith.constant 0 : index
    %c2 = arith.constant 2 : index
    %c0_113 = arith.constant 0 : index
    %c0_114 = arith.constant 0 : index
    %278 = vector.load %arg27[%c0_111, %c0_112, %c2, %c0_113, %c0_114] : memref<2x1x4x8x16xf32, #tpu.memory_space<vmem>>, vector<1x1x1x8x16xf32>
    %279 = vector.shape_cast %278 : vector<1x1x1x8x16xf32> to vector<8x16xf32>
    %280 = vector.shape_cast %277 : vector<8x16xf32> to vector<1x1x1x8x16xf32>
    tpu.vector_store %arg27[%c0_111, %c0_112, %c2, %c0_113, %c0_114], %280 {strides = array<i32>} : memref<2x1x4x8x16xf32, #tpu.memory_space<vmem>>, vector<1x1x1x8x16xf32>,
    %281 = arith.truncf %277 : vector<8x16xf32> to vector<8x16xbf16>
    %282 = arith.truncf %260 : vector<16x8xf32> to vector<16x8xbf16>
    %cst_115 = arith.constant dense<0.000000e+00> : vector<8x8xf32>
    %283 = tpu.matmul %281, %282, %cst_115 {dimension_numbers = #tpu.dot_dimension_numbers<[1], [0], [0], [1], [0, 0, 1, 1], [], []>} : vector<8x16xbf16>, vector<16x8xbf16>, vector<8x8xf32> -> vector<8x8xf32>
    %284 = vector.extract_strided_slice %197 {offsets = [0, 24], sizes = [8, 8], strides = [1, 1]} : vector<8x32xf32> to vector<8x8xf32>
    %285 = vector.extract_strided_slice %202 {offsets = [0, 24], sizes = [16, 8], strides = [1, 1]} : vector<16x32xf32> to vector<16x8xf32>
    %286 = vector.extract_strided_slice %203 {offsets = [0, 24], sizes = [16, 8], strides = [1, 1]} : vector<16x32xf32> to vector<16x8xf32>
    %287 = arith.truncf %284 : vector<8x8xf32> to vector<8x8xbf16>
    %288 = arith.truncf %285 : vector<16x8xf32> to vector<16x8xbf16>
    %cst_116 = arith.constant dense<0.000000e+00> : vector<8x16xf32>
    %289 = tpu.matmul %287, %288, %cst_116 {dimension_numbers = #tpu.dot_dimension_numbers<[1], [1], [0], [0], [0, 0, 1, 0], [], []>} : vector<8x8xbf16>, vector<16x8xbf16>, vector<8x16xf32> -> vector<8x16xf32>
    %cst_117 = arith.constant 5.000000e-01 : f32
    %290 = vector.broadcast %cst_117 : f32 to vector<8x16xf32>
    %291 = arith.cmpf ogt, %58, %290 : vector<8x16xf32>
    %cst_118 = arith.constant -1.000000e+09 : f32
    %292 = vector.broadcast %cst_118 : f32 to vector<8x16xf32>
    %293 = arith.select %291, %289, %292 : vector<8x16xi1>, vector<8x16xf32>
    %cst_119 = arith.constant dense<0xFF800000> : vector<8xf32>
    %294 = vector.multi_reduction <maximumf>, %293, %cst_119 [1] : vector<8x16xf32> to vector<8xf32>
    %295 = vector.shape_cast %294 : vector<8xf32> to vector<8x1xf32>
    %296 = vector.broadcast %295 : vector<8x1xf32> to vector<8x16xf32>
    %297 = arith.subf %293, %296 : vector<8x16xf32>
    %298 = math.exp %297 : vector<8x16xf32>
    %cst_120 = arith.constant dense<0.000000e+00> : vector<8xf32>
    %299 = vector.multi_reduction <add>, %298, %cst_120 [1] : vector<8x16xf32> to vector<8xf32>
    %300 = vector.shape_cast %299 : vector<8xf32> to vector<8x1xf32>
    %301 = tpu.reciprocal %300 {approx = true} : vector<8x1xf32> -> vector<8x1xf32>
    %302 = vector.broadcast %301 : vector<8x1xf32> to vector<8x16xf32>
    %303 = arith.mulf %298, %302 : vector<8x16xf32>
    %c0_121 = arith.constant 0 : index
    %c0_122 = arith.constant 0 : index
    %c3 = arith.constant 3 : index
    %c0_123 = arith.constant 0 : index
    %c0_124 = arith.constant 0 : index
    %304 = vector.load %arg27[%c0_121, %c0_122, %c3, %c0_123, %c0_124] : memref<2x1x4x8x16xf32, #tpu.memory_space<vmem>>, vector<1x1x1x8x16xf32>
    %305 = vector.shape_cast %304 : vector<1x1x1x8x16xf32> to vector<8x16xf32>
    %306 = vector.shape_cast %303 : vector<8x16xf32> to vector<1x1x1x8x16xf32>
    tpu.vector_store %arg27[%c0_121, %c0_122, %c3, %c0_123, %c0_124], %306 {strides = array<i32>} : memref<2x1x4x8x16xf32, #tpu.memory_space<vmem>>, vector<1x1x1x8x16xf32>,
    %307 = arith.truncf %303 : vector<8x16xf32> to vector<8x16xbf16>
    %308 = arith.truncf %286 : vector<16x8xf32> to vector<16x8xbf16>
    %cst_125 = arith.constant dense<0.000000e+00> : vector<8x8xf32>
    %309 = tpu.matmul %307, %308, %cst_125 {dimension_numbers = #tpu.dot_dimension_numbers<[1], [0], [0], [1], [0, 0, 1, 1], [], []>} : vector<8x16xbf16>, vector<16x8xbf16>, vector<8x8xf32> -> vector<8x8xf32>
    %310 = tpu.concatenate %231, %257, %283, %309 in 1 : vector<8x8xf32>, vector<8x8xf32>, vector<8x8xf32>, vector<8x8xf32> -> vector<8x32xf32>
    %311 = arith.truncf %310 : vector<8x32xf32> to vector<8x32xbf16>
    %cst_126 = arith.constant dense<0.000000e+00> : vector<8x32xf32>
    %312 = tpu.matmul %311, %205, %cst_126 {dimension_numbers = #tpu.dot_dimension_numbers<[1], [0], [0], [1], [0, 0, 1, 1], [], []>} : vector<8x32xbf16>, vector<32x32xbf16>, vector<8x32xf32> -> vector<8x32xf32>
    %313 = arith.addf %312, %191 : vector<8x32xf32>
    %c0_127 = arith.constant 0 : index
    %c0_128 = arith.constant 0 : index
    %c0_129 = arith.constant 0 : index
    %314 = vector.load %arg18[%c0_127, %c0_128, %c0_129] : memref<2x1x32xf32, #tpu.memory_space<vmem>>, vector<1x1x32xf32>
    %315 = vector.shape_cast %314 : vector<1x1x32xf32> to vector<1x32xf32>
    %c0_130 = arith.constant 0 : index
    %c0_131 = arith.constant 0 : index
    %c0_132 = arith.constant 0 : index
    %316 = vector.load %arg19[%c0_130, %c0_131, %c0_132] : memref<2x1x32xf32, #tpu.memory_space<vmem>>, vector<1x1x32xf32>
    %317 = vector.shape_cast %316 : vector<1x1x32xf32> to vector<1x32xf32>
    %cst_133 = arith.constant dense<0.000000e+00> : vector<8xf32>
    %318 = vector.multi_reduction <add>, %313, %cst_133 [1] : vector<8x32xf32> to vector<8xf32>
    %319 = vector.shape_cast %318 : vector<8xf32> to vector<8x1xf32>
    %cst_134 = arith.constant 3.200000e+01 : f32
    %320 = vector.broadcast %cst_134 : f32 to vector<8x1xf32>
    %321 = arith.divf %319, %320 : vector<8x1xf32>
    %322 = vector.broadcast %321 : vector<8x1xf32> to vector<8x32xf32>
    %323 = arith.subf %313, %322 : vector<8x32xf32>
    %324 = arith.mulf %323, %323 : vector<8x32xf32>
    %cst_135 = arith.constant dense<0.000000e+00> : vector<8xf32>
    %325 = vector.multi_reduction <add>, %324, %cst_135 [1] : vector<8x32xf32> to vector<8xf32>
    %326 = vector.shape_cast %325 : vector<8xf32> to vector<8x1xf32>
    %cst_136 = arith.constant 3.200000e+01 : f32
    %327 = vector.broadcast %cst_136 : f32 to vector<8x1xf32>
    %328 = arith.divf %326, %327 : vector<8x1xf32>
    %329 = vector.broadcast %321 : vector<8x1xf32> to vector<8x32xf32>
    %330 = arith.subf %313, %329 : vector<8x32xf32>
    %cst_137 = arith.constant 9.99999997E-7 : f32
    %331 = vector.broadcast %cst_137 : f32 to vector<8x1xf32>
    %332 = arith.addf %328, %331 : vector<8x1xf32>
    %333 = math.rsqrt %332 : vector<8x1xf32>
    %334 = vector.broadcast %333 : vector<8x1xf32> to vector<8x32xf32>
    %335 = arith.mulf %330, %334 : vector<8x32xf32>
    %336 = vector.broadcast %315 : vector<1x32xf32> to vector<8x32xf32>
    %337 = arith.mulf %335, %336 : vector<8x32xf32>
    %338 = vector.broadcast %317 : vector<1x32xf32> to vector<8x32xf32>
    %339 = arith.addf %337, %338 : vector<8x32xf32>
    %c0_138 = arith.constant 0 : index
    %c0_139 = arith.constant 0 : index
    %c0_140 = arith.constant 0 : index
    %340 = vector.load %arg20[%c0_138, %c0_139, %c0_140] : memref<2x32x64xbf16, #tpu.memory_space<vmem>>, vector<1x32x64xbf16>
    %341 = vector.shape_cast %340 : vector<1x32x64xbf16> to vector<32x64xbf16>
    %342 = arith.truncf %339 : vector<8x32xf32> to vector<8x32xbf16>
    %cst_141 = arith.constant dense<0.000000e+00> : vector<8x64xf32>
    %343 = tpu.matmul %342, %341, %cst_141 {dimension_numbers = #tpu.dot_dimension_numbers<[1], [0], [0], [1], [0, 0, 1, 1], [], []>} : vector<8x32xbf16>, vector<32x64xbf16>, vector<8x64xf32> -> vector<8x64xf32>
    %c0_142 = arith.constant 0 : index
    %c0_143 = arith.constant 0 : index
    %c0_144 = arith.constant 0 : index
    %344 = vector.load %arg21[%c0_142, %c0_143, %c0_144] : memref<2x1x64xf32, #tpu.memory_space<vmem>>, vector<1x1x64xf32>
    %345 = vector.shape_cast %344 : vector<1x1x64xf32> to vector<1x64xf32>
    %346 = vector.broadcast %345 : vector<1x64xf32> to vector<8x64xf32>
    %347 = arith.addf %343, %346 : vector<8x64xf32>
    %cst_145 = arith.constant 0.000000e+00 : f32
    %348 = vector.broadcast %cst_145 : f32 to vector<8x64xf32>
    %349 = arith.maximumf %347, %348 : vector<8x64xf32>
    %c0_146 = arith.constant 0 : index
    %c0_147 = arith.constant 0 : index
    %c0_148 = arith.constant 0 : index
    %350 = vector.load %arg22[%c0_146, %c0_147, %c0_148] : memref<2x64x32xbf16, #tpu.memory_space<vmem>>, vector<1x64x32xbf16>
    %351 = vector.shape_cast %350 : vector<1x64x32xbf16> to vector<64x32xbf16>
    %352 = arith.truncf %349 : vector<8x64xf32> to vector<8x64xbf16>
    %cst_149 = arith.constant dense<0.000000e+00> : vector<8x32xf32>
    %353 = tpu.matmul %352, %351, %cst_149 {dimension_numbers = #tpu.dot_dimension_numbers<[1], [0], [0], [1], [0, 0, 1, 1], [], []>} : vector<8x64xbf16>, vector<64x32xbf16>, vector<8x32xf32> -> vector<8x32xf32>
    %c0_150 = arith.constant 0 : index
    %c0_151 = arith.constant 0 : index
    %c0_152 = arith.constant 0 : index
    %354 = vector.load %arg23[%c0_150, %c0_151, %c0_152] : memref<2x1x32xf32, #tpu.memory_space<vmem>>, vector<1x1x32xf32>
    %355 = vector.shape_cast %354 : vector<1x1x32xf32> to vector<1x32xf32>
    %356 = vector.broadcast %355 : vector<1x32xf32> to vector<8x32xf32>
    %357 = arith.addf %353, %356 : vector<8x32xf32>
    %358 = arith.addf %357, %339 : vector<8x32xf32>
    %c0_153 = arith.constant 0 : index
    %c0_154 = arith.constant 0 : index
    %c0_155 = arith.constant 0 : index
    %359 = vector.load %arg24[%c0_153, %c0_154, %c0_155] : memref<2x1x32xf32, #tpu.memory_space<vmem>>, vector<1x1x32xf32>
    %360 = vector.shape_cast %359 : vector<1x1x32xf32> to vector<1x32xf32>
    %c0_156 = arith.constant 0 : index
    %c0_157 = arith.constant 0 : index
    %c0_158 = arith.constant 0 : index
    %361 = vector.load %arg25[%c0_156, %c0_157, %c0_158] : memref<2x1x32xf32, #tpu.memory_space<vmem>>, vector<1x1x32xf32>
    %362 = vector.shape_cast %361 : vector<1x1x32xf32> to vector<1x32xf32>
    %cst_159 = arith.constant dense<0.000000e+00> : vector<8xf32>
    %363 = vector.multi_reduction <add>, %358, %cst_159 [1] : vector<8x32xf32> to vector<8xf32>
    %364 = vector.shape_cast %363 : vector<8xf32> to vector<8x1xf32>
    %cst_160 = arith.constant 3.200000e+01 : f32
    %365 = vector.broadcast %cst_160 : f32 to vector<8x1xf32>
    %366 = arith.divf %364, %365 : vector<8x1xf32>
    %367 = vector.broadcast %366 : vector<8x1xf32> to vector<8x32xf32>
    %368 = arith.subf %358, %367 : vector<8x32xf32>
    %369 = arith.mulf %368, %368 : vector<8x32xf32>
    %cst_161 = arith.constant dense<0.000000e+00> : vector<8xf32>
    %370 = vector.multi_reduction <add>, %369, %cst_161 [1] : vector<8x32xf32> to vector<8xf32>
    %371 = vector.shape_cast %370 : vector<8xf32> to vector<8x1xf32>
    %cst_162 = arith.constant 3.200000e+01 : f32
    %372 = vector.broadcast %cst_162 : f32 to vector<8x1xf32>
    %373 = arith.divf %371, %372 : vector<8x1xf32>
    %374 = vector.broadcast %366 : vector<8x1xf32> to vector<8x32xf32>
    %375 = arith.subf %358, %374 : vector<8x32xf32>
    %cst_163 = arith.constant 9.99999997E-7 : f32
    %376 = vector.broadcast %cst_163 : f32 to vector<8x1xf32>
    %377 = arith.addf %373, %376 : vector<8x1xf32>
    %378 = math.rsqrt %377 : vector<8x1xf32>
    %379 = vector.broadcast %378 : vector<8x1xf32> to vector<8x32xf32>
    %380 = arith.mulf %375, %379 : vector<8x32xf32>
    %381 = vector.broadcast %360 : vector<1x32xf32> to vector<8x32xf32>
    %382 = arith.mulf %380, %381 : vector<8x32xf32>
    %383 = vector.broadcast %362 : vector<1x32xf32> to vector<8x32xf32>
    %384 = arith.addf %382, %383 : vector<8x32xf32>
    %c1_164 = arith.constant 1 : index
    %c0_165 = arith.constant 0 : index
    %c0_166 = arith.constant 0 : index
    %385 = vector.load %arg11[%c1_164, %c0_165, %c0_166] : memref<2x32x96xbf16, #tpu.memory_space<vmem>>, vector<1x32x96xbf16>
    %386 = vector.shape_cast %385 : vector<1x32x96xbf16> to vector<32x96xbf16>
    %387 = arith.truncf %384 : vector<8x32xf32> to vector<8x32xbf16>
    %cst_167 = arith.constant dense<0.000000e+00> : vector<8x96xf32>
    %388 = tpu.matmul %387, %386, %cst_167 {dimension_numbers = #tpu.dot_dimension_numbers<[1], [0], [0], [1], [0, 0, 1, 1], [], []>} : vector<8x32xbf16>, vector<32x96xbf16>, vector<8x96xf32> -> vector<8x96xf32>
    %389 = vector.extract_strided_slice %388 {offsets = [0, 0], sizes = [8, 32], strides = [1, 1]} : vector<8x96xf32> to vector<8x32xf32>
    %cst_168 = arith.constant 0.353553385 : f32
    %390 = vector.broadcast %cst_168 : f32 to vector<8x32xf32>
    %391 = arith.mulf %389, %390 : vector<8x32xf32>
    %392 = vector.extract_strided_slice %388 {offsets = [0, 32], sizes = [8, 32], strides = [1, 1]} : vector<8x96xf32> to vector<8x32xf32>
    %393 = vector.extract_strided_slice %388 {offsets = [0, 64], sizes = [8, 32], strides = [1, 1]} : vector<8x96xf32> to vector<8x32xf32>
    %c1_169 = arith.constant 1 : index
    %c0_170 = arith.constant 0 : index
    %c0_171 = arith.constant 0 : index
    %394 = vector.load %arg12[%c1_169, %c0_170, %c0_171] : memref<2x32x32xbf16, #tpu.memory_space<vmem>>, vector<1x32x32xbf16>
    %395 = vector.shape_cast %394 : vector<1x32x32xbf16> to vector<32x32xbf16>
    %396 = vector.extract_strided_slice %391 {offsets = [0, 0], sizes = [8, 8], strides = [1, 1]} : vector<8x32xf32> to vector<8x8xf32>
    %397 = vector.extract_strided_slice %392 {offsets = [0, 0], sizes = [8, 8], strides = [1, 1]} : vector<8x32xf32> to vector<8x8xf32>
    %398 = vector.extract_strided_slice %393 {offsets = [0, 0], sizes = [8, 8], strides = [1, 1]} : vector<8x32xf32> to vector<8x8xf32>
    %399 = arith.truncf %396 : vector<8x8xf32> to vector<8x8xbf16>
    %400 = arith.truncf %397 : vector<8x8xf32> to vector<8x8xbf16>
    %cst_172 = arith.constant dense<0.000000e+00> : vector<8x8xf32>
    %401 = tpu.matmul %399, %400, %cst_172 {dimension_numbers = #tpu.dot_dimension_numbers<[1], [1], [0], [0], [0, 0, 1, 0], [], []>} : vector<8x8xbf16>, vector<8x8xbf16>, vector<8x8xf32> -> vector<8x8xf32>
    %cst_173 = arith.constant 5.000000e-01 : f32
    %402 = vector.broadcast %cst_173 : f32 to vector<8x8xf32>
    %403 = arith.cmpf ogt, %54, %402 : vector<8x8xf32>
    %cst_174 = arith.constant -1.000000e+09 : f32
    %404 = vector.broadcast %cst_174 : f32 to vector<8x8xf32>
    %405 = arith.select %403, %401, %404 : vector<8x8xi1>, vector<8x8xf32>
    %cst_175 = arith.constant dense<0xFF800000> : vector<8xf32>
    %406 = vector.multi_reduction <maximumf>, %405, %cst_175 [1] : vector<8x8xf32> to vector<8xf32>
    %407 = vector.shape_cast %406 : vector<8xf32> to vector<8x1xf32>
    %408 = vector.broadcast %407 : vector<8x1xf32> to vector<8x8xf32>
    %409 = arith.subf %405, %408 : vector<8x8xf32>
    %410 = math.exp %409 : vector<8x8xf32>
    %cst_176 = arith.constant dense<0.000000e+00> : vector<8xf32>
    %411 = vector.multi_reduction <add>, %410, %cst_176 [1] : vector<8x8xf32> to vector<8xf32>
    %412 = vector.shape_cast %411 : vector<8xf32> to vector<8x1xf32>
    %413 = tpu.reciprocal %412 {approx = true} : vector<8x1xf32> -> vector<8x1xf32>
    %414 = vector.broadcast %413 : vector<8x1xf32> to vector<8x8xf32>
    %415 = arith.mulf %410, %414 : vector<8x8xf32>
    %416 = arith.truncf %415 : vector<8x8xf32> to vector<8x8xbf16>
    %417 = arith.truncf %398 : vector<8x8xf32> to vector<8x8xbf16>
    %cst_177 = arith.constant dense<0.000000e+00> : vector<8x8xf32>
    %418 = tpu.matmul %416, %417, %cst_177 {dimension_numbers = #tpu.dot_dimension_numbers<[1], [0], [0], [1], [0, 0, 1, 1], [], []>} : vector<8x8xbf16>, vector<8x8xbf16>, vector<8x8xf32> -> vector<8x8xf32>
    %419 = vector.extract_strided_slice %391 {offsets = [0, 8], sizes = [8, 8], strides = [1, 1]} : vector<8x32xf32> to vector<8x8xf32>
    %420 = vector.extract_strided_slice %392 {offsets = [0, 8], sizes = [8, 8], strides = [1, 1]} : vector<8x32xf32> to vector<8x8xf32>
    %421 = vector.extract_strided_slice %393 {offsets = [0, 8], sizes = [8, 8], strides = [1, 1]} : vector<8x32xf32> to vector<8x8xf32>
    %422 = arith.truncf %419 : vector<8x8xf32> to vector<8x8xbf16>
    %423 = arith.truncf %420 : vector<8x8xf32> to vector<8x8xbf16>
    %cst_178 = arith.constant dense<0.000000e+00> : vector<8x8xf32>
    %424 = tpu.matmul %422, %423, %cst_178 {dimension_numbers = #tpu.dot_dimension_numbers<[1], [1], [0], [0], [0, 0, 1, 0], [], []>} : vector<8x8xbf16>, vector<8x8xbf16>, vector<8x8xf32> -> vector<8x8xf32>
    %cst_179 = arith.constant 5.000000e-01 : f32
    %425 = vector.broadcast %cst_179 : f32 to vector<8x8xf32>
    %426 = arith.cmpf ogt, %54, %425 : vector<8x8xf32>
    %cst_180 = arith.constant -1.000000e+09 : f32
    %427 = vector.broadcast %cst_180 : f32 to vector<8x8xf32>
    %428 = arith.select %426, %424, %427 : vector<8x8xi1>, vector<8x8xf32>
    %cst_181 = arith.constant dense<0xFF800000> : vector<8xf32>
    %429 = vector.multi_reduction <maximumf>, %428, %cst_181 [1] : vector<8x8xf32> to vector<8xf32>
    %430 = vector.shape_cast %429 : vector<8xf32> to vector<8x1xf32>
    %431 = vector.broadcast %430 : vector<8x1xf32> to vector<8x8xf32>
    %432 = arith.subf %428, %431 : vector<8x8xf32>
    %433 = math.exp %432 : vector<8x8xf32>
    %cst_182 = arith.constant dense<0.000000e+00> : vector<8xf32>
    %434 = vector.multi_reduction <add>, %433, %cst_182 [1] : vector<8x8xf32> to vector<8xf32>
    %435 = vector.shape_cast %434 : vector<8xf32> to vector<8x1xf32>
    %436 = tpu.reciprocal %435 {approx = true} : vector<8x1xf32> -> vector<8x1xf32>
    %437 = vector.broadcast %436 : vector<8x1xf32> to vector<8x8xf32>
    %438 = arith.mulf %433, %437 : vector<8x8xf32>
    %439 = arith.truncf %438 : vector<8x8xf32> to vector<8x8xbf16>
    %440 = arith.truncf %421 : vector<8x8xf32> to vector<8x8xbf16>
    %cst_183 = arith.constant dense<0.000000e+00> : vector<8x8xf32>
    %441 = tpu.matmul %439, %440, %cst_183 {dimension_numbers = #tpu.dot_dimension_numbers<[1], [0], [0], [1], [0, 0, 1, 1], [], []>} : vector<8x8xbf16>, vector<8x8xbf16>, vector<8x8xf32> -> vector<8x8xf32>
    %442 = vector.extract_strided_slice %391 {offsets = [0, 16], sizes = [8, 8], strides = [1, 1]} : vector<8x32xf32> to vector<8x8xf32>
    %443 = vector.extract_strided_slice %392 {offsets = [0, 16], sizes = [8, 8], strides = [1, 1]} : vector<8x32xf32> to vector<8x8xf32>
    %444 = vector.extract_strided_slice %393 {offsets = [0, 16], sizes = [8, 8], strides = [1, 1]} : vector<8x32xf32> to vector<8x8xf32>
    %445 = arith.truncf %442 : vector<8x8xf32> to vector<8x8xbf16>
    %446 = arith.truncf %443 : vector<8x8xf32> to vector<8x8xbf16>
    %cst_184 = arith.constant dense<0.000000e+00> : vector<8x8xf32>
    %447 = tpu.matmul %445, %446, %cst_184 {dimension_numbers = #tpu.dot_dimension_numbers<[1], [1], [0], [0], [0, 0, 1, 0], [], []>} : vector<8x8xbf16>, vector<8x8xbf16>, vector<8x8xf32> -> vector<8x8xf32>
    %cst_185 = arith.constant 5.000000e-01 : f32
    %448 = vector.broadcast %cst_185 : f32 to vector<8x8xf32>
    %449 = arith.cmpf ogt, %54, %448 : vector<8x8xf32>
    %cst_186 = arith.constant -1.000000e+09 : f32
    %450 = vector.broadcast %cst_186 : f32 to vector<8x8xf32>
    %451 = arith.select %449, %447, %450 : vector<8x8xi1>, vector<8x8xf32>
    %cst_187 = arith.constant dense<0xFF800000> : vector<8xf32>
    %452 = vector.multi_reduction <maximumf>, %451, %cst_187 [1] : vector<8x8xf32> to vector<8xf32>
    %453 = vector.shape_cast %452 : vector<8xf32> to vector<8x1xf32>
    %454 = vector.broadcast %453 : vector<8x1xf32> to vector<8x8xf32>
    %455 = arith.subf %451, %454 : vector<8x8xf32>
    %456 = math.exp %455 : vector<8x8xf32>
    %cst_188 = arith.constant dense<0.000000e+00> : vector<8xf32>
    %457 = vector.multi_reduction <add>, %456, %cst_188 [1] : vector<8x8xf32> to vector<8xf32>
    %458 = vector.shape_cast %457 : vector<8xf32> to vector<8x1xf32>
    %459 = tpu.reciprocal %458 {approx = true} : vector<8x1xf32> -> vector<8x1xf32>
    %460 = vector.broadcast %459 : vector<8x1xf32> to vector<8x8xf32>
    %461 = arith.mulf %456, %460 : vector<8x8xf32>
    %462 = arith.truncf %461 : vector<8x8xf32> to vector<8x8xbf16>
    %463 = arith.truncf %444 : vector<8x8xf32> to vector<8x8xbf16>
    %cst_189 = arith.constant dense<0.000000e+00> : vector<8x8xf32>
    %464 = tpu.matmul %462, %463, %cst_189 {dimension_numbers = #tpu.dot_dimension_numbers<[1], [0], [0], [1], [0, 0, 1, 1], [], []>} : vector<8x8xbf16>, vector<8x8xbf16>, vector<8x8xf32> -> vector<8x8xf32>
    %465 = vector.extract_strided_slice %391 {offsets = [0, 24], sizes = [8, 8], strides = [1, 1]} : vector<8x32xf32> to vector<8x8xf32>
    %466 = vector.extract_strided_slice %392 {offsets = [0, 24], sizes = [8, 8], strides = [1, 1]} : vector<8x32xf32> to vector<8x8xf32>
    %467 = vector.extract_strided_slice %393 {offsets = [0, 24], sizes = [8, 8], strides = [1, 1]} : vector<8x32xf32> to vector<8x8xf32>
    %468 = arith.truncf %465 : vector<8x8xf32> to vector<8x8xbf16>
    %469 = arith.truncf %466 : vector<8x8xf32> to vector<8x8xbf16>
    %cst_190 = arith.constant dense<0.000000e+00> : vector<8x8xf32>
    %470 = tpu.matmul %468, %469, %cst_190 {dimension_numbers = #tpu.dot_dimension_numbers<[1], [1], [0], [0], [0, 0, 1, 0], [], []>} : vector<8x8xbf16>, vector<8x8xbf16>, vector<8x8xf32> -> vector<8x8xf32>
    %cst_191 = arith.constant 5.000000e-01 : f32
    %471 = vector.broadcast %cst_191 : f32 to vector<8x8xf32>
    %472 = arith.cmpf ogt, %54, %471 : vector<8x8xf32>
    %cst_192 = arith.constant -1.000000e+09 : f32
    %473 = vector.broadcast %cst_192 : f32 to vector<8x8xf32>
    %474 = arith.select %472, %470, %473 : vector<8x8xi1>, vector<8x8xf32>
    %cst_193 = arith.constant dense<0xFF800000> : vector<8xf32>
    %475 = vector.multi_reduction <maximumf>, %474, %cst_193 [1] : vector<8x8xf32> to vector<8xf32>
    %476 = vector.shape_cast %475 : vector<8xf32> to vector<8x1xf32>
    %477 = vector.broadcast %476 : vector<8x1xf32> to vector<8x8xf32>
    %478 = arith.subf %474, %477 : vector<8x8xf32>
    %479 = math.exp %478 : vector<8x8xf32>
    %cst_194 = arith.constant dense<0.000000e+00> : vector<8xf32>
    %480 = vector.multi_reduction <add>, %479, %cst_194 [1] : vector<8x8xf32> to vector<8xf32>
    %481 = vector.shape_cast %480 : vector<8xf32> to vector<8x1xf32>
    %482 = tpu.reciprocal %481 {approx = true} : vector<8x1xf32> -> vector<8x1xf32>
    %483 = vector.broadcast %482 : vector<8x1xf32> to vector<8x8xf32>
    %484 = arith.mulf %479, %483 : vector<8x8xf32>
    %485 = arith.truncf %484 : vector<8x8xf32> to vector<8x8xbf16>
    %486 = arith.truncf %467 : vector<8x8xf32> to vector<8x8xbf16>
    %cst_195 = arith.constant dense<0.000000e+00> : vector<8x8xf32>
    %487 = tpu.matmul %485, %486, %cst_195 {dimension_numbers = #tpu.dot_dimension_numbers<[1], [0], [0], [1], [0, 0, 1, 1], [], []>} : vector<8x8xbf16>, vector<8x8xbf16>, vector<8x8xf32> -> vector<8x8xf32>
    %488 = tpu.concatenate %418, %441, %464, %487 in 1 : vector<8x8xf32>, vector<8x8xf32>, vector<8x8xf32>, vector<8x8xf32> -> vector<8x32xf32>
    %489 = arith.truncf %488 : vector<8x32xf32> to vector<8x32xbf16>
    %cst_196 = arith.constant dense<0.000000e+00> : vector<8x32xf32>
    %490 = tpu.matmul %489, %395, %cst_196 {dimension_numbers = #tpu.dot_dimension_numbers<[1], [0], [0], [1], [0, 0, 1, 1], [], []>} : vector<8x32xbf16>, vector<32x32xbf16>, vector<8x32xf32> -> vector<8x32xf32>
    %491 = arith.addf %490, %384 : vector<8x32xf32>
    %c1_197 = arith.constant 1 : index
    %c0_198 = arith.constant 0 : index
    %c0_199 = arith.constant 0 : index
    %492 = vector.load %arg13[%c1_197, %c0_198, %c0_199] : memref<2x1x32xf32, #tpu.memory_space<vmem>>, vector<1x1x32xf32>
    %493 = vector.shape_cast %492 : vector<1x1x32xf32> to vector<1x32xf32>
    %c1_200 = arith.constant 1 : index
    %c0_201 = arith.constant 0 : index
    %c0_202 = arith.constant 0 : index
    %494 = vector.load %arg14[%c1_200, %c0_201, %c0_202] : memref<2x1x32xf32, #tpu.memory_space<vmem>>, vector<1x1x32xf32>
    %495 = vector.shape_cast %494 : vector<1x1x32xf32> to vector<1x32xf32>
    %cst_203 = arith.constant dense<0.000000e+00> : vector<8xf32>
    %496 = vector.multi_reduction <add>, %491, %cst_203 [1] : vector<8x32xf32> to vector<8xf32>
    %497 = vector.shape_cast %496 : vector<8xf32> to vector<8x1xf32>
    %cst_204 = arith.constant 3.200000e+01 : f32
    %498 = vector.broadcast %cst_204 : f32 to vector<8x1xf32>
    %499 = arith.divf %497, %498 : vector<8x1xf32>
    %500 = vector.broadcast %499 : vector<8x1xf32> to vector<8x32xf32>
    %501 = arith.subf %491, %500 : vector<8x32xf32>
    %502 = arith.mulf %501, %501 : vector<8x32xf32>
    %cst_205 = arith.constant dense<0.000000e+00> : vector<8xf32>
    %503 = vector.multi_reduction <add>, %502, %cst_205 [1] : vector<8x32xf32> to vector<8xf32>
    %504 = vector.shape_cast %503 : vector<8xf32> to vector<8x1xf32>
    %cst_206 = arith.constant 3.200000e+01 : f32
    %505 = vector.broadcast %cst_206 : f32 to vector<8x1xf32>
    %506 = arith.divf %504, %505 : vector<8x1xf32>
    %507 = vector.broadcast %499 : vector<8x1xf32> to vector<8x32xf32>
    %508 = arith.subf %491, %507 : vector<8x32xf32>
    %cst_207 = arith.constant 9.99999997E-7 : f32
    %509 = vector.broadcast %cst_207 : f32 to vector<8x1xf32>
    %510 = arith.addf %506, %509 : vector<8x1xf32>
    %511 = math.rsqrt %510 : vector<8x1xf32>
    %512 = vector.broadcast %511 : vector<8x1xf32> to vector<8x32xf32>
    %513 = arith.mulf %508, %512 : vector<8x32xf32>
    %514 = vector.broadcast %493 : vector<1x32xf32> to vector<8x32xf32>
    %515 = arith.mulf %513, %514 : vector<8x32xf32>
    %516 = vector.broadcast %495 : vector<1x32xf32> to vector<8x32xf32>
    %517 = arith.addf %515, %516 : vector<8x32xf32>
    %c1_208 = arith.constant 1 : index
    %c0_209 = arith.constant 0 : index
    %c0_210 = arith.constant 0 : index
    %518 = vector.load %arg15[%c1_208, %c0_209, %c0_210] : memref<2x32x32xbf16, #tpu.memory_space<vmem>>, vector<1x32x32xbf16>
    %519 = vector.shape_cast %518 : vector<1x32x32xbf16> to vector<32x32xbf16>
    %520 = arith.truncf %517 : vector<8x32xf32> to vector<8x32xbf16>
    %cst_211 = arith.constant dense<0.000000e+00> : vector<8x32xf32>
    %521 = tpu.matmul %520, %519, %cst_211 {dimension_numbers = #tpu.dot_dimension_numbers<[1], [0], [0], [1], [0, 0, 1, 1], [], []>} : vector<8x32xbf16>, vector<32x32xbf16>, vector<8x32xf32> -> vector<8x32xf32>
    %cst_212 = arith.constant 0.353553385 : f32
    %522 = vector.broadcast %cst_212 : f32 to vector<8x32xf32>
    %523 = arith.mulf %521, %522 : vector<8x32xf32>
    %c1_213 = arith.constant 1 : index
    %c0_214 = arith.constant 0 : index
    %c0_215 = arith.constant 0 : index
    %524 = vector.load %arg16[%c1_213, %c0_214, %c0_215] : memref<2x32x64xbf16, #tpu.memory_space<vmem>>, vector<1x32x64xbf16>
    %525 = vector.shape_cast %524 : vector<1x32x64xbf16> to vector<32x64xbf16>
    %526 = arith.truncf %3 : vector<16x32xf32> to vector<16x32xbf16>
    %cst_216 = arith.constant dense<0.000000e+00> : vector<16x64xf32>
    %527 = tpu.matmul %526, %525, %cst_216 {dimension_numbers = #tpu.dot_dimension_numbers<[1], [0], [0], [1], [0, 0, 1, 1], [], []>} : vector<16x32xbf16>, vector<32x64xbf16>, vector<16x64xf32> -> vector<16x64xf32>
    %528 = vector.extract_strided_slice %527 {offsets = [0, 0], sizes = [16, 32], strides = [1, 1]} : vector<16x64xf32> to vector<16x32xf32>
    %529 = vector.extract_strided_slice %527 {offsets = [0, 32], sizes = [16, 32], strides = [1, 1]} : vector<16x64xf32> to vector<16x32xf32>
    %c1_217 = arith.constant 1 : index
    %c0_218 = arith.constant 0 : index
    %c0_219 = arith.constant 0 : index
    %530 = vector.load %arg17[%c1_217, %c0_218, %c0_219] : memref<2x32x32xbf16, #tpu.memory_space<vmem>>, vector<1x32x32xbf16>
    %531 = vector.shape_cast %530 : vector<1x32x32xbf16> to vector<32x32xbf16>
    %532 = vector.extract_strided_slice %523 {offsets = [0, 0], sizes = [8, 8], strides = [1, 1]} : vector<8x32xf32> to vector<8x8xf32>
    %533 = vector.extract_strided_slice %528 {offsets = [0, 0], sizes = [16, 8], strides = [1, 1]} : vector<16x32xf32> to vector<16x8xf32>
    %534 = vector.extract_strided_slice %529 {offsets = [0, 0], sizes = [16, 8], strides = [1, 1]} : vector<16x32xf32> to vector<16x8xf32>
    %535 = arith.truncf %532 : vector<8x8xf32> to vector<8x8xbf16>
    %536 = arith.truncf %533 : vector<16x8xf32> to vector<16x8xbf16>
    %cst_220 = arith.constant dense<0.000000e+00> : vector<8x16xf32>
    %537 = tpu.matmul %535, %536, %cst_220 {dimension_numbers = #tpu.dot_dimension_numbers<[1], [1], [0], [0], [0, 0, 1, 0], [], []>} : vector<8x8xbf16>, vector<16x8xbf16>, vector<8x16xf32> -> vector<8x16xf32>
    %cst_221 = arith.constant 5.000000e-01 : f32
    %538 = vector.broadcast %cst_221 : f32 to vector<8x16xf32>
    %539 = arith.cmpf ogt, %58, %538 : vector<8x16xf32>
    %cst_222 = arith.constant -1.000000e+09 : f32
    %540 = vector.broadcast %cst_222 : f32 to vector<8x16xf32>
    %541 = arith.select %539, %537, %540 : vector<8x16xi1>, vector<8x16xf32>
    %cst_223 = arith.constant dense<0xFF800000> : vector<8xf32>
    %542 = vector.multi_reduction <maximumf>, %541, %cst_223 [1] : vector<8x16xf32> to vector<8xf32>
    %543 = vector.shape_cast %542 : vector<8xf32> to vector<8x1xf32>
    %544 = vector.broadcast %543 : vector<8x1xf32> to vector<8x16xf32>
    %545 = arith.subf %541, %544 : vector<8x16xf32>
    %546 = math.exp %545 : vector<8x16xf32>
    %cst_224 = arith.constant dense<0.000000e+00> : vector<8xf32>
    %547 = vector.multi_reduction <add>, %546, %cst_224 [1] : vector<8x16xf32> to vector<8xf32>
    %548 = vector.shape_cast %547 : vector<8xf32> to vector<8x1xf32>
    %549 = tpu.reciprocal %548 {approx = true} : vector<8x1xf32> -> vector<8x1xf32>
    %550 = vector.broadcast %549 : vector<8x1xf32> to vector<8x16xf32>
    %551 = arith.mulf %546, %550 : vector<8x16xf32>
    %c1_225 = arith.constant 1 : index
    %c0_226 = arith.constant 0 : index
    %c0_227 = arith.constant 0 : index
    %c0_228 = arith.constant 0 : index
    %c0_229 = arith.constant 0 : index
    %552 = vector.load %arg27[%c1_225, %c0_226, %c0_227, %c0_228, %c0_229] : memref<2x1x4x8x16xf32, #tpu.memory_space<vmem>>, vector<1x1x1x8x16xf32>
    %553 = vector.shape_cast %552 : vector<1x1x1x8x16xf32> to vector<8x16xf32>
    %554 = vector.shape_cast %551 : vector<8x16xf32> to vector<1x1x1x8x16xf32>
    tpu.vector_store %arg27[%c1_225, %c0_226, %c0_227, %c0_228, %c0_229], %554 {strides = array<i32>} : memref<2x1x4x8x16xf32, #tpu.memory_space<vmem>>, vector<1x1x1x8x16xf32>,
    %555 = arith.truncf %551 : vector<8x16xf32> to vector<8x16xbf16>
    %556 = arith.truncf %534 : vector<16x8xf32> to vector<16x8xbf16>
    %cst_230 = arith.constant dense<0.000000e+00> : vector<8x8xf32>
    %557 = tpu.matmul %555, %556, %cst_230 {dimension_numbers = #tpu.dot_dimension_numbers<[1], [0], [0], [1], [0, 0, 1, 1], [], []>} : vector<8x16xbf16>, vector<16x8xbf16>, vector<8x8xf32> -> vector<8x8xf32>
    %558 = vector.extract_strided_slice %523 {offsets = [0, 8], sizes = [8, 8], strides = [1, 1]} : vector<8x32xf32> to vector<8x8xf32>
    %559 = vector.extract_strided_slice %528 {offsets = [0, 8], sizes = [16, 8], strides = [1, 1]} : vector<16x32xf32> to vector<16x8xf32>
    %560 = vector.extract_strided_slice %529 {offsets = [0, 8], sizes = [16, 8], strides = [1, 1]} : vector<16x32xf32> to vector<16x8xf32>
    %561 = arith.truncf %558 : vector<8x8xf32> to vector<8x8xbf16>
    %562 = arith.truncf %559 : vector<16x8xf32> to vector<16x8xbf16>
    %cst_231 = arith.constant dense<0.000000e+00> : vector<8x16xf32>
    %563 = tpu.matmul %561, %562, %cst_231 {dimension_numbers = #tpu.dot_dimension_numbers<[1], [1], [0], [0], [0, 0, 1, 0], [], []>} : vector<8x8xbf16>, vector<16x8xbf16>, vector<8x16xf32> -> vector<8x16xf32>
    %cst_232 = arith.constant 5.000000e-01 : f32
    %564 = vector.broadcast %cst_232 : f32 to vector<8x16xf32>
    %565 = arith.cmpf ogt, %58, %564 : vector<8x16xf32>
    %cst_233 = arith.constant -1.000000e+09 : f32
    %566 = vector.broadcast %cst_233 : f32 to vector<8x16xf32>
    %567 = arith.select %565, %563, %566 : vector<8x16xi1>, vector<8x16xf32>
    %cst_234 = arith.constant dense<0xFF800000> : vector<8xf32>
    %568 = vector.multi_reduction <maximumf>, %567, %cst_234 [1] : vector<8x16xf32> to vector<8xf32>
    %569 = vector.shape_cast %568 : vector<8xf32> to vector<8x1xf32>
    %570 = vector.broadcast %569 : vector<8x1xf32> to vector<8x16xf32>
    %571 = arith.subf %567, %570 : vector<8x16xf32>
    %572 = math.exp %571 : vector<8x16xf32>
    %cst_235 = arith.constant dense<0.000000e+00> : vector<8xf32>
    %573 = vector.multi_reduction <add>, %572, %cst_235 [1] : vector<8x16xf32> to vector<8xf32>
    %574 = vector.shape_cast %573 : vector<8xf32> to vector<8x1xf32>
    %575 = tpu.reciprocal %574 {approx = true} : vector<8x1xf32> -> vector<8x1xf32>
    %576 = vector.broadcast %575 : vector<8x1xf32> to vector<8x16xf32>
    %577 = arith.mulf %572, %576 : vector<8x16xf32>
    %c1_236 = arith.constant 1 : index
    %c0_237 = arith.constant 0 : index
    %c1_238 = arith.constant 1 : index
    %c0_239 = arith.constant 0 : index
    %c0_240 = arith.constant 0 : index
    %578 = vector.load %arg27[%c1_236, %c0_237, %c1_238, %c0_239, %c0_240] : memref<2x1x4x8x16xf32, #tpu.memory_space<vmem>>, vector<1x1x1x8x16xf32>
    %579 = vector.shape_cast %578 : vector<1x1x1x8x16xf32> to vector<8x16xf32>
    %580 = vector.shape_cast %577 : vector<8x16xf32> to vector<1x1x1x8x16xf32>
    tpu.vector_store %arg27[%c1_236, %c0_237, %c1_238, %c0_239, %c0_240], %580 {strides = array<i32>} : memref<2x1x4x8x16xf32, #tpu.memory_space<vmem>>, vector<1x1x1x8x16xf32>,
    %581 = arith.truncf %577 : vector<8x16xf32> to vector<8x16xbf16>
    %582 = arith.truncf %560 : vector<16x8xf32> to vector<16x8xbf16>
    %cst_241 = arith.constant dense<0.000000e+00> : vector<8x8xf32>
    %583 = tpu.matmul %581, %582, %cst_241 {dimension_numbers = #tpu.dot_dimension_numbers<[1], [0], [0], [1], [0, 0, 1, 1], [], []>} : vector<8x16xbf16>, vector<16x8xbf16>, vector<8x8xf32> -> vector<8x8xf32>
    %584 = vector.extract_strided_slice %523 {offsets = [0, 16], sizes = [8, 8], strides = [1, 1]} : vector<8x32xf32> to vector<8x8xf32>
    %585 = vector.extract_strided_slice %528 {offsets = [0, 16], sizes = [16, 8], strides = [1, 1]} : vector<16x32xf32> to vector<16x8xf32>
    %586 = vector.extract_strided_slice %529 {offsets = [0, 16], sizes = [16, 8], strides = [1, 1]} : vector<16x32xf32> to vector<16x8xf32>
    %587 = arith.truncf %584 : vector<8x8xf32> to vector<8x8xbf16>
    %588 = arith.truncf %585 : vector<16x8xf32> to vector<16x8xbf16>
    %cst_242 = arith.constant dense<0.000000e+00> : vector<8x16xf32>
    %589 = tpu.matmul %587, %588, %cst_242 {dimension_numbers = #tpu.dot_dimension_numbers<[1], [1], [0], [0], [0, 0, 1, 0], [], []>} : vector<8x8xbf16>, vector<16x8xbf16>, vector<8x16xf32> -> vector<8x16xf32>
    %cst_243 = arith.constant 5.000000e-01 : f32
    %590 = vector.broadcast %cst_243 : f32 to vector<8x16xf32>
    %591 = arith.cmpf ogt, %58, %590 : vector<8x16xf32>
    %cst_244 = arith.constant -1.000000e+09 : f32
    %592 = vector.broadcast %cst_244 : f32 to vector<8x16xf32>
    %593 = arith.select %591, %589, %592 : vector<8x16xi1>, vector<8x16xf32>
    %cst_245 = arith.constant dense<0xFF800000> : vector<8xf32>
    %594 = vector.multi_reduction <maximumf>, %593, %cst_245 [1] : vector<8x16xf32> to vector<8xf32>
    %595 = vector.shape_cast %594 : vector<8xf32> to vector<8x1xf32>
    %596 = vector.broadcast %595 : vector<8x1xf32> to vector<8x16xf32>
    %597 = arith.subf %593, %596 : vector<8x16xf32>
    %598 = math.exp %597 : vector<8x16xf32>
    %cst_246 = arith.constant dense<0.000000e+00> : vector<8xf32>
    %599 = vector.multi_reduction <add>, %598, %cst_246 [1] : vector<8x16xf32> to vector<8xf32>
    %600 = vector.shape_cast %599 : vector<8xf32> to vector<8x1xf32>
    %601 = tpu.reciprocal %600 {approx = true} : vector<8x1xf32> -> vector<8x1xf32>
    %602 = vector.broadcast %601 : vector<8x1xf32> to vector<8x16xf32>
    %603 = arith.mulf %598, %602 : vector<8x16xf32>
    %c1_247 = arith.constant 1 : index
    %c0_248 = arith.constant 0 : index
    %c2_249 = arith.constant 2 : index
    %c0_250 = arith.constant 0 : index
    %c0_251 = arith.constant 0 : index
    %604 = vector.load %arg27[%c1_247, %c0_248, %c2_249, %c0_250, %c0_251] : memref<2x1x4x8x16xf32, #tpu.memory_space<vmem>>, vector<1x1x1x8x16xf32>
    %605 = vector.shape_cast %604 : vector<1x1x1x8x16xf32> to vector<8x16xf32>
    %606 = vector.shape_cast %603 : vector<8x16xf32> to vector<1x1x1x8x16xf32>
    tpu.vector_store %arg27[%c1_247, %c0_248, %c2_249, %c0_250, %c0_251], %606 {strides = array<i32>} : memref<2x1x4x8x16xf32, #tpu.memory_space<vmem>>, vector<1x1x1x8x16xf32>,
    %607 = arith.truncf %603 : vector<8x16xf32> to vector<8x16xbf16>
    %608 = arith.truncf %586 : vector<16x8xf32> to vector<16x8xbf16>
    %cst_252 = arith.constant dense<0.000000e+00> : vector<8x8xf32>
    %609 = tpu.matmul %607, %608, %cst_252 {dimension_numbers = #tpu.dot_dimension_numbers<[1], [0], [0], [1], [0, 0, 1, 1], [], []>} : vector<8x16xbf16>, vector<16x8xbf16>, vector<8x8xf32> -> vector<8x8xf32>
    %610 = vector.extract_strided_slice %523 {offsets = [0, 24], sizes = [8, 8], strides = [1, 1]} : vector<8x32xf32> to vector<8x8xf32>
    %611 = vector.extract_strided_slice %528 {offsets = [0, 24], sizes = [16, 8], strides = [1, 1]} : vector<16x32xf32> to vector<16x8xf32>
    %612 = vector.extract_strided_slice %529 {offsets = [0, 24], sizes = [16, 8], strides = [1, 1]} : vector<16x32xf32> to vector<16x8xf32>
    %613 = arith.truncf %610 : vector<8x8xf32> to vector<8x8xbf16>
    %614 = arith.truncf %611 : vector<16x8xf32> to vector<16x8xbf16>
    %cst_253 = arith.constant dense<0.000000e+00> : vector<8x16xf32>
    %615 = tpu.matmul %613, %614, %cst_253 {dimension_numbers = #tpu.dot_dimension_numbers<[1], [1], [0], [0], [0, 0, 1, 0], [], []>} : vector<8x8xbf16>, vector<16x8xbf16>, vector<8x16xf32> -> vector<8x16xf32>
    %cst_254 = arith.constant 5.000000e-01 : f32
    %616 = vector.broadcast %cst_254 : f32 to vector<8x16xf32>
    %617 = arith.cmpf ogt, %58, %616 : vector<8x16xf32>
    %cst_255 = arith.constant -1.000000e+09 : f32
    %618 = vector.broadcast %cst_255 : f32 to vector<8x16xf32>
    %619 = arith.select %617, %615, %618 : vector<8x16xi1>, vector<8x16xf32>
    %cst_256 = arith.constant dense<0xFF800000> : vector<8xf32>
    %620 = vector.multi_reduction <maximumf>, %619, %cst_256 [1] : vector<8x16xf32> to vector<8xf32>
    %621 = vector.shape_cast %620 : vector<8xf32> to vector<8x1xf32>
    %622 = vector.broadcast %621 : vector<8x1xf32> to vector<8x16xf32>
    %623 = arith.subf %619, %622 : vector<8x16xf32>
    %624 = math.exp %623 : vector<8x16xf32>
    %cst_257 = arith.constant dense<0.000000e+00> : vector<8xf32>
    %625 = vector.multi_reduction <add>, %624, %cst_257 [1] : vector<8x16xf32> to vector<8xf32>
    %626 = vector.shape_cast %625 : vector<8xf32> to vector<8x1xf32>
    %627 = tpu.reciprocal %626 {approx = true} : vector<8x1xf32> -> vector<8x1xf32>
    %628 = vector.broadcast %627 : vector<8x1xf32> to vector<8x16xf32>
    %629 = arith.mulf %624, %628 : vector<8x16xf32>
    %c1_258 = arith.constant 1 : index
    %c0_259 = arith.constant 0 : index
    %c3_260 = arith.constant 3 : index
    %c0_261 = arith.constant 0 : index
    %c0_262 = arith.constant 0 : index
    %630 = vector.load %arg27[%c1_258, %c0_259, %c3_260, %c0_261, %c0_262] : memref<2x1x4x8x16xf32, #tpu.memory_space<vmem>>, vector<1x1x1x8x16xf32>
    %631 = vector.shape_cast %630 : vector<1x1x1x8x16xf32> to vector<8x16xf32>
    %632 = vector.shape_cast %629 : vector<8x16xf32> to vector<1x1x1x8x16xf32>
    tpu.vector_store %arg27[%c1_258, %c0_259, %c3_260, %c0_261, %c0_262], %632 {strides = array<i32>} : memref<2x1x4x8x16xf32, #tpu.memory_space<vmem>>, vector<1x1x1x8x16xf32>,
    %633 = arith.truncf %629 : vector<8x16xf32> to vector<8x16xbf16>
    %634 = arith.truncf %612 : vector<16x8xf32> to vector<16x8xbf16>
    %cst_263 = arith.constant dense<0.000000e+00> : vector<8x8xf32>
    %635 = tpu.matmul %633, %634, %cst_263 {dimension_numbers = #tpu.dot_dimension_numbers<[1], [0], [0], [1], [0, 0, 1, 1], [], []>} : vector<8x16xbf16>, vector<16x8xbf16>, vector<8x8xf32> -> vector<8x8xf32>
    %636 = tpu.concatenate %557, %583, %609, %635 in 1 : vector<8x8xf32>, vector<8x8xf32>, vector<8x8xf32>, vector<8x8xf32> -> vector<8x32xf32>
    %637 = arith.truncf %636 : vector<8x32xf32> to vector<8x32xbf16>
    %cst_264 = arith.constant dense<0.000000e+00> : vector<8x32xf32>
    %638 = tpu.matmul %637, %531, %cst_264 {dimension_numbers = #tpu.dot_dimension_numbers<[1], [0], [0], [1], [0, 0, 1, 1], [], []>} : vector<8x32xbf16>, vector<32x32xbf16>, vector<8x32xf32> -> vector<8x32xf32>
    %639 = arith.addf %638, %517 : vector<8x32xf32>
    %c1_265 = arith.constant 1 : index
    %c0_266 = arith.constant 0 : index
    %c0_267 = arith.constant 0 : index
    %640 = vector.load %arg18[%c1_265, %c0_266, %c0_267] : memref<2x1x32xf32, #tpu.memory_space<vmem>>, vector<1x1x32xf32>
    %641 = vector.shape_cast %640 : vector<1x1x32xf32> to vector<1x32xf32>
    %c1_268 = arith.constant 1 : index
    %c0_269 = arith.constant 0 : index
    %c0_270 = arith.constant 0 : index
    %642 = vector.load %arg19[%c1_268, %c0_269, %c0_270] : memref<2x1x32xf32, #tpu.memory_space<vmem>>, vector<1x1x32xf32>
    %643 = vector.shape_cast %642 : vector<1x1x32xf32> to vector<1x32xf32>
    %cst_271 = arith.constant dense<0.000000e+00> : vector<8xf32>
    %644 = vector.multi_reduction <add>, %639, %cst_271 [1] : vector<8x32xf32> to vector<8xf32>
    %645 = vector.shape_cast %644 : vector<8xf32> to vector<8x1xf32>
    %cst_272 = arith.constant 3.200000e+01 : f32
    %646 = vector.broadcast %cst_272 : f32 to vector<8x1xf32>
    %647 = arith.divf %645, %646 : vector<8x1xf32>
    %648 = vector.broadcast %647 : vector<8x1xf32> to vector<8x32xf32>
    %649 = arith.subf %639, %648 : vector<8x32xf32>
    %650 = arith.mulf %649, %649 : vector<8x32xf32>
    %cst_273 = arith.constant dense<0.000000e+00> : vector<8xf32>
    %651 = vector.multi_reduction <add>, %650, %cst_273 [1] : vector<8x32xf32> to vector<8xf32>
    %652 = vector.shape_cast %651 : vector<8xf32> to vector<8x1xf32>
    %cst_274 = arith.constant 3.200000e+01 : f32
    %653 = vector.broadcast %cst_274 : f32 to vector<8x1xf32>
    %654 = arith.divf %652, %653 : vector<8x1xf32>
    %655 = vector.broadcast %647 : vector<8x1xf32> to vector<8x32xf32>
    %656 = arith.subf %639, %655 : vector<8x32xf32>
    %cst_275 = arith.constant 9.99999997E-7 : f32
    %657 = vector.broadcast %cst_275 : f32 to vector<8x1xf32>
    %658 = arith.addf %654, %657 : vector<8x1xf32>
    %659 = math.rsqrt %658 : vector<8x1xf32>
    %660 = vector.broadcast %659 : vector<8x1xf32> to vector<8x32xf32>
    %661 = arith.mulf %656, %660 : vector<8x32xf32>
    %662 = vector.broadcast %641 : vector<1x32xf32> to vector<8x32xf32>
    %663 = arith.mulf %661, %662 : vector<8x32xf32>
    %664 = vector.broadcast %643 : vector<1x32xf32> to vector<8x32xf32>
    %665 = arith.addf %663, %664 : vector<8x32xf32>
    %c1_276 = arith.constant 1 : index
    %c0_277 = arith.constant 0 : index
    %c0_278 = arith.constant 0 : index
    %666 = vector.load %arg20[%c1_276, %c0_277, %c0_278] : memref<2x32x64xbf16, #tpu.memory_space<vmem>>, vector<1x32x64xbf16>
    %667 = vector.shape_cast %666 : vector<1x32x64xbf16> to vector<32x64xbf16>
    %668 = arith.truncf %665 : vector<8x32xf32> to vector<8x32xbf16>
    %cst_279 = arith.constant dense<0.000000e+00> : vector<8x64xf32>
    %669 = tpu.matmul %668, %667, %cst_279 {dimension_numbers = #tpu.dot_dimension_numbers<[1], [0], [0], [1], [0, 0, 1, 1], [], []>} : vector<8x32xbf16>, vector<32x64xbf16>, vector<8x64xf32> -> vector<8x64xf32>
    %c1_280 = arith.constant 1 : index
    %c0_281 = arith.constant 0 : index
    %c0_282 = arith.constant 0 : index
    %670 = vector.load %arg21[%c1_280, %c0_281, %c0_282] : memref<2x1x64xf32, #tpu.memory_space<vmem>>, vector<1x1x64xf32>
    %671 = vector.shape_cast %670 : vector<1x1x64xf32> to vector<1x64xf32>
    %672 = vector.broadcast %671 : vector<1x64xf32> to vector<8x64xf32>
    %673 = arith.addf %669, %672 : vector<8x64xf32>
    %cst_283 = arith.constant 0.000000e+00 : f32
    %674 = vector.broadcast %cst_283 : f32 to vector<8x64xf32>
    %675 = arith.maximumf %673, %674 : vector<8x64xf32>
    %c1_284 = arith.constant 1 : index
    %c0_285 = arith.constant 0 : index
    %c0_286 = arith.constant 0 : index
    %676 = vector.load %arg22[%c1_284, %c0_285, %c0_286] : memref<2x64x32xbf16, #tpu.memory_space<vmem>>, vector<1x64x32xbf16>
    %677 = vector.shape_cast %676 : vector<1x64x32xbf16> to vector<64x32xbf16>
    %678 = arith.truncf %675 : vector<8x64xf32> to vector<8x64xbf16>
    %cst_287 = arith.constant dense<0.000000e+00> : vector<8x32xf32>
    %679 = tpu.matmul %678, %677, %cst_287 {dimension_numbers = #tpu.dot_dimension_numbers<[1], [0], [0], [1], [0, 0, 1, 1], [], []>} : vector<8x64xbf16>, vector<64x32xbf16>, vector<8x32xf32> -> vector<8x32xf32>
    %c1_288 = arith.constant 1 : index
    %c0_289 = arith.constant 0 : index
    %c0_290 = arith.constant 0 : index
    %680 = vector.load %arg23[%c1_288, %c0_289, %c0_290] : memref<2x1x32xf32, #tpu.memory_space<vmem>>, vector<1x1x32xf32>
    %681 = vector.shape_cast %680 : vector<1x1x32xf32> to vector<1x32xf32>
    %682 = vector.broadcast %681 : vector<1x32xf32> to vector<8x32xf32>
    %683 = arith.addf %679, %682 : vector<8x32xf32>
    %684 = arith.addf %683, %665 : vector<8x32xf32>
    %c1_291 = arith.constant 1 : index
    %c0_292 = arith.constant 0 : index
    %c0_293 = arith.constant 0 : index
    %685 = vector.load %arg24[%c1_291, %c0_292, %c0_293] : memref<2x1x32xf32, #tpu.memory_space<vmem>>, vector<1x1x32xf32>
    %686 = vector.shape_cast %685 : vector<1x1x32xf32> to vector<1x32xf32>
    %c1_294 = arith.constant 1 : index
    %c0_295 = arith.constant 0 : index
    %c0_296 = arith.constant 0 : index
    %687 = vector.load %arg25[%c1_294, %c0_295, %c0_296] : memref<2x1x32xf32, #tpu.memory_space<vmem>>, vector<1x1x32xf32>
    %688 = vector.shape_cast %687 : vector<1x1x32xf32> to vector<1x32xf32>
    %cst_297 = arith.constant dense<0.000000e+00> : vector<8xf32>
    %689 = vector.multi_reduction <add>, %684, %cst_297 [1] : vector<8x32xf32> to vector<8xf32>
    %690 = vector.shape_cast %689 : vector<8xf32> to vector<8x1xf32>
    %cst_298 = arith.constant 3.200000e+01 : f32
    %691 = vector.broadcast %cst_298 : f32 to vector<8x1xf32>
    %692 = arith.divf %690, %691 : vector<8x1xf32>
    %693 = vector.broadcast %692 : vector<8x1xf32> to vector<8x32xf32>
    %694 = arith.subf %684, %693 : vector<8x32xf32>
    %695 = arith.mulf %694, %694 : vector<8x32xf32>
    %cst_299 = arith.constant dense<0.000000e+00> : vector<8xf32>
    %696 = vector.multi_reduction <add>, %695, %cst_299 [1] : vector<8x32xf32> to vector<8xf32>
    %697 = vector.shape_cast %696 : vector<8xf32> to vector<8x1xf32>
    %cst_300 = arith.constant 3.200000e+01 : f32
    %698 = vector.broadcast %cst_300 : f32 to vector<8x1xf32>
    %699 = arith.divf %697, %698 : vector<8x1xf32>
    %700 = vector.broadcast %692 : vector<8x1xf32> to vector<8x32xf32>
    %701 = arith.subf %684, %700 : vector<8x32xf32>
    %cst_301 = arith.constant 9.99999997E-7 : f32
    %702 = vector.broadcast %cst_301 : f32 to vector<8x1xf32>
    %703 = arith.addf %699, %702 : vector<8x1xf32>
    %704 = math.rsqrt %703 : vector<8x1xf32>
    %705 = vector.broadcast %704 : vector<8x1xf32> to vector<8x32xf32>
    %706 = arith.mulf %701, %705 : vector<8x32xf32>
    %707 = vector.broadcast %686 : vector<1x32xf32> to vector<8x32xf32>
    %708 = arith.mulf %706, %707 : vector<8x32xf32>
    %709 = vector.broadcast %688 : vector<1x32xf32> to vector<8x32xf32>
    %710 = arith.addf %708, %709 : vector<8x32xf32>
    %c0_302 = arith.constant 0 : index
    %c0_303 = arith.constant 0 : index
    %c0_304 = arith.constant 0 : index
    %711 = vector.load %arg26[%c0_302, %c0_303, %c0_304] : memref<1x8x32xf32, #tpu.memory_space<vmem>>, vector<1x8x32xf32>
    %712 = vector.shape_cast %711 : vector<1x8x32xf32> to vector<8x32xf32>
    %713 = vector.shape_cast %710 : vector<8x32xf32> to vector<1x8x32xf32>
    tpu.vector_store %arg26[%c0_302, %c0_303, %c0_304], %713 {strides = array<i32>} : memref<1x8x32xf32, #tpu.memory_space<vmem>>, vector<1x8x32xf32>,
    return
  }
  func.func @transform_0(%arg0: i32) -> (i32, i32, i32) {
    %c0_i32 = arith.constant 0 : i32
    %c0_i32_0 = arith.constant 0 : i32
    %c0_i32_1 = arith.constant 0 : i32
    return %arg0, %c0_i32, %c0_i32_0 : i32, i32, i32
  }
  func.func @transform_1(%arg0: i32) -> (i32, i32, i32) {
    %c0_i32 = arith.constant 0 : i32
    %c0_i32_0 = arith.constant 0 : i32
    %c0_i32_1 = arith.constant 0 : i32
    return %arg0, %c0_i32, %c0_i32_0 : i32, i32, i32
  }
  func.func @transform_2(%arg0: i32) -> (i32, i32, i32) {
    %c0_i32 = arith.constant 0 : i32
    %c0_i32_0 = arith.constant 0 : i32
    %c0_i32_1 = arith.constant 0 : i32
    return %arg0, %c0_i32, %c0_i32_0 : i32, i32, i32
  }
  func.func @transform_3(%arg0: i32) -> (i32, i32, i32) {
    %c0_i32 = arith.constant 0 : i32
    %c0_i32_0 = arith.constant 0 : i32
    %c0_i32_1 = arith.constant 0 : i32
    return %arg0, %c0_i32, %c0_i32_0 : i32, i32, i32
  }
  func.func @transform_4(%arg0: i32) -> (i32, i32) {
    %c0_i32 = arith.constant 0 : i32
    %c0_i32_0 = arith.constant 0 : i32
    %c0_i32_1 = arith.constant 0 : i32
    return %c0_i32, %c0_i32_0 : i32, i32
  }
  func.func @transform_5(%arg0: i32) -> (i32, i32) {
    %c0_i32 = arith.constant 0 : i32
    %c0_i32_0 = arith.constant 0 : i32
    %c0_i32_1 = arith.constant 0 : i32
    return %c0_i32, %c0_i32_0 : i32, i32
  }
  func.func @transform_6(%arg0: i32) -> (i32, i32) {
    %c0_i32 = arith.constant 0 : i32
    %c0_i32_0 = arith.constant 0 : i32
    %c0_i32_1 = arith.constant 0 : i32
    return %c0_i32, %c0_i32_0 : i32, i32
  }
  func.func @transform_7(%arg0: i32) -> (i32, i32) {
    %c0_i32 = arith.constant 0 : i32
    %c0_i32_0 = arith.constant 0 : i32
    %c0_i32_1 = arith.constant 0 : i32
    return %c0_i32, %c0_i32_0 : i32, i32
  }
  func.func @transform_8(%arg0: i32) -> (i32, i32) {
    %c0_i32 = arith.constant 0 : i32
    %c0_i32_0 = arith.constant 0 : i32
    %c0_i32_1 = arith.constant 0 : i32
    return %c0_i32, %c0_i32_0 : i32, i32
  }
  func.func @transform_9(%arg0: i32) -> (i32, i32) {
    %c0_i32 = arith.constant 0 : i32
    %c0_i32_0 = arith.constant 0 : i32
    %c0_i32_1 = arith.constant 0 : i32
    return %c0_i32, %c0_i32_0 : i32, i32
  }
  func.func @transform_10(%arg0: i32) -> (i32, i32, i32) {
    %c0_i32 = arith.constant 0 : i32
    %c0_i32_0 = arith.constant 0 : i32
    %c0_i32_1 = arith.constant 0 : i32
    %c0_i32_2 = arith.constant 0 : i32
    return %c0_i32, %c0_i32_0, %c0_i32_1 : i32, i32, i32
  }
  func.func @transform_11(%arg0: i32) -> (i32, i32, i32) {
    %c0_i32 = arith.constant 0 : i32
    %c0_i32_0 = arith.constant 0 : i32
    %c0_i32_1 = arith.constant 0 : i32
    %c0_i32_2 = arith.constant 0 : i32
    return %c0_i32, %c0_i32_0, %c0_i32_1 : i32, i32, i32
  }
  func.func @transform_12(%arg0: i32) -> (i32, i32, i32) {
    %c0_i32 = arith.constant 0 : i32
    %c0_i32_0 = arith.constant 0 : i32
    %c0_i32_1 = arith.constant 0 : i32
    %c0_i32_2 = arith.constant 0 : i32
    return %c0_i32, %c0_i32_0, %c0_i32_1 : i32, i32, i32
  }
  func.func @transform_13(%arg0: i32) -> (i32, i32, i32) {
    %c0_i32 = arith.constant 0 : i32
    %c0_i32_0 = arith.constant 0 : i32
    %c0_i32_1 = arith.constant 0 : i32
    %c0_i32_2 = arith.constant 0 : i32
    return %c0_i32, %c0_i32_0, %c0_i32_1 : i32, i32, i32
  }
  func.func @transform_14(%arg0: i32) -> (i32, i32, i32) {
    %c0_i32 = arith.constant 0 : i32
    %c0_i32_0 = arith.constant 0 : i32
    %c0_i32_1 = arith.constant 0 : i32
    %c0_i32_2 = arith.constant 0 : i32
    return %c0_i32, %c0_i32_0, %c0_i32_1 : i32, i32, i32
  }
  func.func @transform_15(%arg0: i32) -> (i32, i32, i32) {
    %c0_i32 = arith.constant 0 : i32
    %c0_i32_0 = arith.constant 0 : i32
    %c0_i32_1 = arith.constant 0 : i32
    %c0_i32_2 = arith.constant 0 : i32
    return %c0_i32, %c0_i32_0, %c0_i32_1 : i32, i32, i32
  }
  func.func @transform_16(%arg0: i32) -> (i32, i32, i32) {
    %c0_i32 = arith.constant 0 : i32
    %c0_i32_0 = arith.constant 0 : i32
    %c0_i32_1 = arith.constant 0 : i32
    %c0_i32_2 = arith.constant 0 : i32
    return %c0_i32, %c0_i32_0, %c0_i32_1 : i32, i32, i32
  }
  func.func @transform_17(%arg0: i32) -> (i32, i32, i32) {
    %c0_i32 = arith.constant 0 : i32
    %c0_i32_0 = arith.constant 0 : i32
    %c0_i32_1 = arith.constant 0 : i32
    %c0_i32_2 = arith.constant 0 : i32
    return %c0_i32, %c0_i32_0, %c0_i32_1 : i32, i32, i32
  }
  func.func @transform_18(%arg0: i32) -> (i32, i32, i32) {
    %c0_i32 = arith.constant 0 : i32
    %c0_i32_0 = arith.constant 0 : i32
    %c0_i32_1 = arith.constant 0 : i32
    %c0_i32_2 = arith.constant 0 : i32
    return %c0_i32, %c0_i32_0, %c0_i32_1 : i32, i32, i32
  }
  func.func @transform_19(%arg0: i32) -> (i32, i32, i32) {
    %c0_i32 = arith.constant 0 : i32
    %c0_i32_0 = arith.constant 0 : i32
    %c0_i32_1 = arith.constant 0 : i32
    %c0_i32_2 = arith.constant 0 : i32
    return %c0_i32, %c0_i32_0, %c0_i32_1 : i32, i32, i32
  }
  func.func @transform_20(%arg0: i32) -> (i32, i32, i32) {
    %c0_i32 = arith.constant 0 : i32
    %c0_i32_0 = arith.constant 0 : i32
    %c0_i32_1 = arith.constant 0 : i32
    %c0_i32_2 = arith.constant 0 : i32
    return %c0_i32, %c0_i32_0, %c0_i32_1 : i32, i32, i32
  }
  func.func @transform_21(%arg0: i32) -> (i32, i32, i32) {
    %c0_i32 = arith.constant 0 : i32
    %c0_i32_0 = arith.constant 0 : i32
    %c0_i32_1 = arith.constant 0 : i32
    %c0_i32_2 = arith.constant 0 : i32
    return %c0_i32, %c0_i32_0, %c0_i32_1 : i32, i32, i32
  }
  func.func @transform_22(%arg0: i32) -> (i32, i32, i32) {
    %c0_i32 = arith.constant 0 : i32
    %c0_i32_0 = arith.constant 0 : i32
    %c0_i32_1 = arith.constant 0 : i32
    %c0_i32_2 = arith.constant 0 : i32
    return %c0_i32, %c0_i32_0, %c0_i32_1 : i32, i32, i32
  }
  func.func @transform_23(%arg0: i32) -> (i32, i32, i32) {
    %c0_i32 = arith.constant 0 : i32
    %c0_i32_0 = arith.constant 0 : i32
    %c0_i32_1 = arith.constant 0 : i32
    %c0_i32_2 = arith.constant 0 : i32
    return %c0_i32, %c0_i32_0, %c0_i32_1 : i32, i32, i32
  }
  func.func @transform_24(%arg0: i32) -> (i32, i32, i32) {
    %c0_i32 = arith.constant 0 : i32
    %c0_i32_0 = arith.constant 0 : i32
    %c0_i32_1 = arith.constant 0 : i32
    %c0_i32_2 = arith.constant 0 : i32
    return %c0_i32, %c0_i32_0, %c0_i32_1 : i32, i32, i32
  }
  func.func @transform_25(%arg0: i32) -> (i32, i32, i32) {
    %c0_i32 = arith.constant 0 : i32
    %c0_i32_0 = arith.constant 0 : i32
    %c0_i32_1 = arith.constant 0 : i32
    return %arg0, %c0_i32, %c0_i32_0 : i32, i32, i32
  }
  func.func @transform_26(%arg0: i32) -> (i32, i32, i32, i32, i32) {
    %c0_i32 = arith.constant 0 : i32
    %c0_i32_0 = arith.constant 0 : i32
    %c0_i32_1 = arith.constant 0 : i32
    %c0_i32_2 = arith.constant 0 : i32
    %c0_i32_3 = arith.constant 0 : i32
    return %c0_i32, %arg0, %c0_i32_0, %c0_i32_1, %c0_i32_2 : i32, i32, i32, i32, i32
  }
}

</mosaic_0001>

<bundles_post_ra>
// kernel: transformer_s_forward.2
= control target key start
LH: loop header
LB: loop body
LE: loop exit
PB: predicated region body
PF: predicated region fallthrough
CT: control target
= control target key end

     0   :  { %s4072_s0 = inlined_call_operand.vmem [shape: f32[2,16,34], index: 0, kind: input, shape index: {}]   ;;  %s4073_s1 = inlined_call_operand.vmem [shape: f32[2,1,16], index: 1, kind: input, shape index: {}]   ;;  %s4074_s2 = inlined_call_operand.vmem [shape: f32[2,32], index: 2, kind: input, shape index: {}]   ;;  %s4075_s3 = inlined_call_operand.vmem [shape: f32[1,32], index: 3, kind: input, shape index: {}]   ;;  %s4076_s4 = inlined_call_operand.vmem [shape: bf16[32,32], index: 4, kind: input, shape index: {}]   ;;  %s4077_s5 = inlined_call_operand.vmem [shape: f32[1,32], index: 5, kind: input, shape index: {}]   ;;  %s4078_s6 = inlined_call_operand.vmem [shape: f32[1,32], index: 6, kind: input, shape index: {}]   ;;  %s4079_s7 = inlined_call_operand.vmem [shape: f32[1,32], index: 7, kind: input, shape index: {}]   ;;  %s4080_s8 = inlined_call_operand.vmem [shape: bf16[2,32,96], index: 8, kind: input, shape index: {}]   ;;  %s4081_s9 = inlined_call_operand.vmem [shape: bf16[2,32,32], index: 9, kind: input, shape index: {}]   ;;  %s4082_s10 = inlined_call_operand.vmem [shape: f32[2,1,32], index: 10, kind: input, shape index: {}]   ;;  %s4083_s11 = inlined_call_operand.vmem [shape: f32[2,1,32], index: 11, kind: input, shape index: {}]   ;;  %s4084_s12 = inlined_call_operand.vmem [shape: bf16[2,32,64], index: 12, kind: input, shape index: {}]   ;;  %s4085_s13 = inlined_call_operand.vmem [shape: f32[2,1,64], index: 13, kind: input, shape index: {}]   ;;  %s4086_s14 = inlined_call_operand.vmem [shape: bf16[2,64,32], index: 14, kind: input, shape index: {}]   ;;  %s4087_s15 = inlined_call_operand.vmem [shape: f32[2,1,32], index: 15, kind: input, shape index: {}]   ;;  %s4088_s16 = inlined_call_operand.vmem [shape: f32[2,1,32], index: 16, kind: input, shape index: {}]   ;;  %s4089_s17 = inlined_call_operand.vmem [shape: f32[2,1,32], index: 17, kind: input, shape index: {}]   ;;  %s4090_s18 = inlined_call_operand.vmem [shape: f32[2,16,32], index: 18, kind: output, shape index: {0}]   ;;  %s4091_s19 = inlined_call_operand.vmem [shape: f32[2,2,4,16,16], index: 19, kind: output, shape index: {1}]  }
   0x1   :  { %4108 = sst [smem:[#allocation3_spill]] %s4072_s0 }
   0x2   :  { %4109 = sst [smem:[#allocation4_spill]] %s4073_s1 }
   0x3   :  { %4110 = sst [smem:[#allocation5_spill]] %s4074_s2 }
   0x4   :  { %4111 = sst [smem:[#allocation6_spill]] %s4075_s3 }
   0x5   :  { %4112 = sst [smem:[#allocation7_spill]] %s4076_s4 }
   0x6   :  { %s3539_s0 = smov 0   ;;  %s3541_s30 = smov 0  }
   0x7   :  { %s3543_s20 = smov 0  }
   0x8 LB: > { %s3552_s21 = sadd.s32 4294967295, %s3417_s20   ;;  %s3554_s1 = sadd.s32 1, %s3417_s20   ;;  %s3417_s20 = sphi %s3543_s20, %s4136_s20   ;;  %s3413_s30 = sphi %s3541_s30, %s4135_s30   ;;  %s3409_s0 = sphi %s3539_s0, %s4134_s0  }
   0x9   : > { %s448_s22 = ssub.s32 %s3417_s20, %s3554_s1  ;;  %s451_s2 = sadd.s32 1, %s3413_s30 }
   0xa   : > { %p449_p0 = scmp.eq.s32.totalorder %s448_s22, 0  ;;  %p461_p1 = scmp.ne.s32.totalorder %s3413_s30, %s3409_s0 }
   0xb   : > { %p462_p2 = scmp.eq.s32.totalorder %s3552_s21, 1  ;;  %p2855_p3 = scmp.ge.s32.totalorder %s3417_s20, 1 }
   0xc   : > { %s3562_s23 = scalar_select %p449_p0, %s3413_s30, %s451_s2  }
   0xd   : > { %p3564_p4 = por %p462_p2, %p461_p1  ;;  %p548_p5 = scmp.lt.s32.totalorder %s3417_s20, 3 }
   0xf   : > { %p549_p6 = pnand %p2855_p3, %p548_p5 }
  0x10   : > { %p611_p7 = scmp.lt.s32.totalorder (!%p549_p6), %s3552_s21, 1  ;;  %v3419_v0 = vmov (!%p549_p6), 1   ;;  %v3420_v1 = vmov (!%p549_p6), 0   ;;  %s4114_s28 = sld [smem:[#allocation3_spill]] (!%p549_p6)  ;;  %v3421_v5 = vmov (!%p549_p6), 0.0   ;;  %vm3422_vm0 = vmmov (!%p549_p6), 0  }
  0x11   : > { %552 = sbr.rel (%p549_p6) target bundleno = 6207 (0x183f), region = 92  ;;  %3257 = vset.pattern.permute.xlu1 (!%p549_p6), %v3419_v0  ;;  %3256 = vset.pattern.permute.xlu0 (!%p549_p6), %v3420_v1  ;;  %s4115_s4 = sld [smem:[#allocation7_spill]] (!%p549_p6)  ;;  %v644_v7 = vlaneseq (!%p549_p6)  ;;  %vm695_vm1 = vcmask (!%p549_p6), 261120   ;;  %v2862_v30 = vld [vmem:[%s4077_s5] ss:$0 sm:$0xff] (!%p549_p6)  ;;  %v3292_v60 = vld [vmem:[%s4080_s8 + $0x8] sm:$0xff] (!%p549_p6)  }
  0x12   : > { %3036 = vmatprep.subr.bf16.mxu0 (!%p549_p6), %v3421_v5  ;;  %3044 = vmatprep.subr.bf16.mxu1 (!%p549_p6), %v3421_v5  ;;  %s4117_s2 = sld [smem:[#allocation6_spill]] (!%p549_p6)  ;;  %v2867_v57 = vld [vmem:[%s4079_s7] ss:$0 sm:$0xff] (!%p549_p6)  ;;  %s4099_s20 = smov (!%p549_p6), 120   ;;  %vm897_vm2 = vcmask (!%p549_p6), 64512   ;;  %vm948_vm4 = vcmask (!%p549_p6), 130048  }
  0x13   : > { %3040 = vmatprep.mubr.msk.bf16.mxu0 (!%p549_p6), %vm3422_vm0, %v3421_v5  ;;  %3048 = vmatprep.mubr.msk.bf16.mxu1 (!%p549_p6), %vm3422_vm0, %v3421_v5  ;;  %v645_v8 = vshrl.u32 (!%p549_p6), %v644_v7, 7  ;;  %v2866_v58 = vld [vmem:[%s4078_s6] ss:$0 sm:$0xff] (!%p549_p6)  ;;  %s4097_s22 = smov (!%p549_p6), 72   ;;  %s4095_s26 = smov (!%p549_p6), 104   ;;  %vm1428_vm5 = vcmask (!%p549_p6), 195584  }
  0x14   : > { %v3291_v59 = vld [vmem:[%s4080_s8] sm:$0xff] (!%p549_p6)   ;;  %s4101_s27 = smov (!%p549_p6), 56   ;;  %vm1650_vm6 = vcmask (!%p549_p6), 523264  }
  0x15   : > { %v660_v9 = vsub.s32 (!%p549_p6), 1, %v645_v8  ;;  %v646_v10 = vsub.s32 (!%p549_p6), 0, %v645_v8  ;;  %3045 = vmatpush3.bf16.msra.mxu1 (!%p549_p6), %v3291_v59 }
  0x16   : > { %3046 = vmatprep.subr.bf16.mxu1 (!%p549_p6), %v3421_v5 }
  0x17   : > { %v3289_v4 = vld [vmem:[%s4115_s4] sm:$0xff] (!%p549_p6)   ;;  %v3290_v6 = vld [vmem:[%s4115_s4 + $0x8] sm:$0xff] (!%p549_p6)   ;;  %s4118_s4 = smov (!%p549_p6), 126  }
  0x18   : > { %s3570_s25 = scalar_select %p611_p7, %s3552_s21, 1  ;;  %3037 = vmatpush3.bf16.msra.mxu0 %v3289_v4  ;;  %v2861_v19 = vld [vmem:[%s4117_s2] ss:$0 sm:$0xff] }
  0x19   : > { %3038 = vmatprep.subr.bf16.mxu0 %v3421_v5  ;;  %3047 = vmatpush3.bf16.msra.mxu1 %v3292_v60  ;;  %s4096_s2 = smov 112  }
  0x1a   : > { %s4092_s3 = sshll.u32 %s3570_s25, 4  ;;  %3058 = vmatprep.subr.bf16.mxu1 %v3421_v5 }
  0x1b   : > { %s615_s29 = scalar_lea.vmem %s4114_s28, %s4092_s3  ;;  %s3423_s28 = smov 2  }
  0x1c   : > { %v625_v2 = vld [vmem:[%s615_s29] sm:$0xff]  ;;  %v626_v3 = vld [vmem:[%s615_s29 + $0x8] sm:$0xff]  ;;  %3039 = vmatpush3.bf16.msra.mxu0 %v3290_v6  ;;  %s4116_s29 = sld [smem:[#allocation5_spill]]  ;;  %s3425_s3 = smov 88  }
  0x1d   : > { %651 = vperm.xlu1 %3257, %v625_v2   ;;  %636 = vperm.xlu0 %3256, %v625_v2  }
  0x1e   : > { %3052 = vmatprep.subr.bf16.mxu0 %v3421_v5 }
  0x21   : > { %655 = vperm.xlu1 %3257, %v626_v3   ;;  %641 = vperm.xlu0 %3256, %v626_v3  }
  0x22   : > { %v627_v11 = vld [vmem:[%s4116_s29] sm:$0x3]  ;;  %s4093_s29 = smov 126  }
  0x23   : > { %v661_v12 = vrot.slane %v627_v11, %v660_v9  ;;  %v647_v13 = vrot.slane %v627_v11, %v646_v10 }
  0x25   : > { %3288 = vset.pattern.permute.xlu0 %v3419_v0 }
  0x9c   : > { %v652_v14 = vpop.permute.xlu1 %651  ;;  %v637_v15 = vpop.permute.xlu0 %636 }
  0x9d   : > { %v662_v16 = vmul.f32 %v661_v12, %v652_v14  ;;  %v648_v17 = vmul.f32 %v647_v13, %v637_v15 }
  0x9f   : > { %v664_v18 = vadd.f32 %v662_v16, %v648_v17 }
  0xa0   : > { %v656_v20 = vpop.permute.xlu1 %655  ;;  %v642_v21 = vpop.permute.xlu0 %641 }
  0xa1   : > { %v663_v22 = vmul.f32 %v661_v12, %v656_v20  ;;  %v649_v23 = vmul.f32 %v647_v13, %v642_v21  ;;  %v672_v24 = vadd.f32 %v2861_v19, %v664_v18 }
  0xa3   : > { %v665_v25 = vadd.f32 %v663_v22, %v649_v23  ;;  %v674_v27 = vmax.f32 %v672_v24, 0.0 }
  0xa5   : > { %v673_v26 = vadd.f32 %v2861_v19, %v665_v25 }
  0xa7   : > { %v675_v28 = vmax.f32 %v673_v26, 0.0 }
  0xa9   : > { %v676_v29 = vpack.c.bf16 %v675_v28, %v674_v27 }
  0xab   : > { %3041 = vmatmul.mubr.msk.bf16.vlgmr.msra.gmra.mrb[0].mxu0 %vm695_vm1, %v676_v29 }
  0xac   : > { %3054 = vmatprep.mubr.msk.bf16.mxu0 %vm3422_vm0, %v3421_v5 }
 0x17e   : > { %v733_v31 = vpop.f32.mrb[0].mxu0 }
 0x17f   : > { %v734_v32 = vadd.f32 %v2862_v30, %v733_v31  ;;  %v3042_v33 = vpop.f32.mrb[1].mxu0 }
 0x180   : > { %v736_v34 = vpop.f32.mrb[2].mxu0 }
 0x181   : > { %v737_v35 = vadd.f32 %v2862_v30, %v736_v34  ;;  %742 = vrot.lane.b32.xlu0 %v734_v32, %s3423_s28  ;;  %v3043_v36 = vpop.f32.mrb[3].mxu0 }
 0x183   : > { %744 = vrot.lane.b32.xlu1 %v737_v35, %s3423_s28 }
 0x1f3   : > { %v743_v37 = vpop.permute.xlu0 %742 }
 0x1f4   : > { %v748_v38 = vadd.f32 %v743_v37, %v625_v2 }
 0x1f5   : > { %v745_v39 = vpop.permute.xlu1 %744 }
 0x1f6   : > { %v749_v40 = vadd.f32 %v745_v39, %v626_v3  ;;  %754 = vrot.lane.b32.xlu0 %v748_v38, %s4093_s29 }
 0x1f8   : > { %756 = vrot.lane.b32.xlu1 %v749_v40, %s4093_s29 }
 0x268   : > { %v755_v41 = vpop.permute.xlu0 %754 }
 0x269   : > { %v760_v42 = vsel %vm695_vm1, %v755_v41, 0.0 }
 0x26a   : > { %761 = vadd.xlane.f32.xlu0 %v760_v42  ;;  %v757_v43 = vpop.permute.xlu1 %756 }
 0x26b   : > { %v763_v44 = vsel %vm695_vm1, %v757_v43, 0.0 }
 0x26c   : > { %764 = vadd.xlane.f32.xlu1 %v763_v44 }
 0x2f7   : > { %v762_v45 = vpop.xlane.xlu0 %761 }
 0x2f8   : > { %v767_v46 = vmul.f32 0.03125, %v762_v45 }
 0x2f9   : > { %v765_v47 = vpop.xlane.xlu1 %764 }
 0x2fa   : > { %v769_v48 = vsub.f32 %v748_v38, %v767_v46  ;;  %v768_v49 = vmul.f32 0.03125, %v765_v47 }
 0x2fc   : > { %v770_v50 = vsub.f32 %v749_v40, %v768_v49  ;;  %v771_v51 = vmul.f32 %v769_v48, %v769_v48 }
 0x2fe   : > { %775 = vrot.lane.b32.xlu0 %v771_v51, %s4093_s29  ;;  %v772_v52 = vmul.f32 %v770_v50, %v770_v50 }
 0x300   : > { %777 = vrot.lane.b32.xlu1 %v772_v52, %s4093_s29  ;;  %s4106_s29 = smov 80  }
 0x370   : > { %v776_v53 = vpop.permute.xlu0 %775 }
 0x371   : > { %v781_v54 = vsel %vm695_vm1, %v776_v53, 0.0 }
 0x372   : > { %782 = vadd.xlane.f32.xlu0 %v781_v54  ;;  %v778_v55 = vpop.permute.xlu1 %777 }
 0x373   : > { %v784_v56 = vsel %vm695_vm1, %v778_v55, 0.0 }
 0x374   : > { %785 = vadd.xlane.f32.xlu1 %v784_v56 }
 0x385   : > { %810 = vrot.lane.b32.xlu1 %v2867_v57, %s3423_s28 }
 0x388   : > { %800 = vrot.lane.b32.xlu0 %v2866_v58, %s3423_s28  ;;  %s4107_s28 = smov 96  }
 0x3ff   : > { %v783_v61 = vpop.xlane.xlu0 %782 }
 0x400   : > { %v787_v62 = vmul.f32 0.03125, %v783_v61 }
 0x401   : > { %v786_v63 = vpop.xlane.xlu1 %785 }
 0x402   : > { %v789_v0 = vadd.f32 1e-06, %v787_v62  ;;  %v788_v1 = vmul.f32 0.03125, %v786_v63 }
 0x403   : > { %v801_v4 = vpop.permute.xlu0 %800 }
 0x404   : > { %3311 = vrsqrt.f32 %v789_v0  ;;  %v790_v2 = vadd.f32 1e-06, %v788_v1 }
 0x405   : > { %v811_v10 = vpop.permute.xlu1 %810 }
 0x406   : > { %3313 = vrsqrt.f32 %v790_v2 }
 0x40e   : > { %v3312_v3 = vpop.eup %3311 }
 0x40f   : > { %v793_v6 = vmul.f32 %v3312_v3, %v769_v48 }
 0x410   : > { %v3314_v7 = vpop.eup %3313 }
 0x411   : > { %v794_v8 = vmul.f32 %v3314_v7, %v770_v50  ;;  %v803_v9 = vmul.f32 %v801_v4, %v793_v6 }
 0x413   : > { %v804_v11 = vmul.f32 %v801_v4, %v794_v8  ;;  %v3630_v12 = vadd.f32 %v811_v10, %v803_v9 }
 0x415   : > { %v3632_v13 = vadd.f32 %v811_v10, %v804_v11 }
 0x417   : > { %v826_v14 = vpack.c.bf16 %v3632_v13, %v3630_v12 }
 0x419   : > { %828 = vrot.lane.b32.xlu0 %v826_v14, %s4118_s4 }
 0x48b   : > { %v829_v15 = vpop.permute.xlu0 %828 }
 0x48c   : > { %3049 = vmatmul.mubr.msk.bf16.vlgmr.msra.gmra.mrb[0].mxu1 %vm695_vm1, %v829_v15 }
 0x48d   : > { %3060 = vmatprep.mubr.msk.bf16.mxu1 %vm3422_vm0, %v3421_v5 }
 0x55f   : > { %v879_v16 = vpop.f32.mrb[0].mxu1 }
 0x560   : > { %v3050_v17 = vpop.f32.mrb[1].mxu1  ;;  %v886_v19 = vmul.f32 0.35355338, %v879_v16 }
 0x561   : > { %v882_v18 = vpop.f32.mrb[2].mxu1 }
 0x562   : > { %v887_v20 = vmul.f32 0.35355338, %v882_v18  ;;  %v3640_v21 = vpack.c.bf16 %v882_v18, %v879_v16  ;;  %v3051_v22 = vpop.f32.mrb[3].mxu1 }
 0x564   : > { %v892_v23 = vpack.c.bf16 %v887_v20, %v886_v19  ;;  %1024 = vrot.lane.b32.xlu0 %v3640_v21, %s3425_s3  ;;  %895 = vrot.lane.b32.xlu1 %v3640_v21, %s4107_s28  ;;  %s4127_s28 = smov 48  }
 0x568   : > { %1150 = vrot.lane.b32.xlu0 %v3640_v21, %s4106_s29  ;;  %1022 = vrot.lane.b32.xlu1 %v892_v23, %s4099_s20  ;;  %s4128_s29 = smov 40  }
 0x56c   : > { %1276 = vrot.lane.b32.xlu0 %v3640_v21, %s4097_s22  ;;  %1148 = vrot.lane.b32.xlu1 %v892_v23, %s4096_s2  ;;  %s4119_s2 = sld [smem:[#allocation4_spill]] }
 0x570   : > { %1274 = vrot.lane.b32.xlu1 %v892_v23, %s4095_s26  ;;  %s4102_s26 = smov 40  }
 0x572   : > { %s618_s22 = scalar_lea.vmem %s4119_s2, %s3570_s25  ;;  %s4100_s2 = smov 48  }
 0x573   : > { %v3677_v35 = vld [vmem:[%s618_s22] ss:$0 sm:$0xff]  ;;  %s4098_s22 = smov 64  }
 0x574   : > { %vm945_vm3 = vcmp.gt.f32.partialorder %v3677_v35, 0.5 }
 0x5d6   : > { %v896_v24 = vpop.permute.xlu1 %895  ;;  %v1025_v26 = vpop.permute.xlu0 %1024 }
 0x5d7   : > { %v902_v25 = vsel %vm897_vm2, %v896_v24, 0  ;;  %v1030_v27 = vsel %vm897_vm2, %v1025_v26, 0 }
 0x5d8   : > { %3053 = vmatpush3.bf16.xpose.msra.mxu0 %v902_v25 }
 0x5d9   : > { %3064 = vmatprep.subr.bf16.mxu0 %v3421_v5 }
 0x5da   : > { %v1151_v28 = vpop.permute.xlu0 %1150  ;;  %v1023_v29 = vpop.permute.xlu1 %1022 }
 0x5db   : > { %v1156_v30 = vsel %vm897_vm2, %v1151_v28, 0 }
 0x5de   : > { %v1277_v31 = vpop.permute.xlu0 %1276  ;;  %v1149_v32 = vpop.permute.xlu1 %1148 }
 0x5df   : > { %3055 = vmatmul.mubr.msk.bf16.vlgmr.msra.gmra.mrb[4].mxu0 %vm897_vm2, %v892_v23  ;;  %v1282_v33 = vsel %vm897_vm2, %v1277_v31, 0 }
 0x5e0   : > { %3065 = vmatpush3.bf16.xpose.msra.mxu0 %v1030_v27  ;;  %3066 = vmatprep.mubr.msk.bf16.mxu0 %vm3422_vm0, %v3421_v5 }
 0x5e1   : > { %3076 = vmatprep.subr.bf16.mxu0 %v3421_v5 }
 0x5e2   : > { %v1275_v34 = vpop.permute.xlu1 %1274 }
 0x5e7   : > { %3067 = vmatmul.mubr.msk.bf16.vlgmr.msra.gmra.mrb[8].mxu0 %vm897_vm2, %v1023_v29 }
 0x5e8   : > { %3077 = vmatpush3.bf16.xpose.msra.mxu0 %v1156_v30  ;;  %3078 = vmatprep.mubr.msk.bf16.mxu0 %vm3422_vm0, %v3421_v5 }
 0x5e9   : > { %3088 = vmatprep.subr.bf16.mxu0 %v3421_v5 }
 0x5ef   : > { %3079 = vmatmul.mubr.msk.bf16.vlgmr.msra.gmra.mrb[12].mxu0 %vm897_vm2, %v1149_v32 }
 0x5f0   : > { %3089 = vmatpush3.bf16.xpose.msra.mxu0 %v1282_v33  ;;  %3090 = vmatprep.mubr.msk.bf16.mxu0 %vm3422_vm0, %v3421_v5 }
 0x5f1   : > { %3100 = vmatprep.subr.bf16.mxu0 %v3421_v5 }
 0x5f7   : > { %3091 = vmatmul.mubr.msk.bf16.vlgmr.msra.gmra.mrb[16].mxu0 %vm897_vm2, %v1275_v34 }
 0x5f8   : > { %3104 = vmatprep.mubr.msk.bf16.mxu0 %vm3422_vm0, %v3421_v5 }
 0x6b2   : > { %v938_v36 = vpop.f32.mrb[4].mxu0 }
 0x6b3   : > { %v946_v37 = vsel %vm945_vm3, %v938_v36, -1e+09  ;;  %v3056_v38 = vpop.f32.mrb[5].mxu0 }
 0x6b4   : > { %v941_v39 = vpop.f32.mrb[6].mxu0  ;;  %v949_v40 = vsel %vm948_vm4, %v946_v37, -inf }
 0x6b5   : > { %v947_v41 = vsel %vm945_vm3, %v941_v39, -1e+09  ;;  %950 = vmax.xlane.f32.xlu0 %v949_v40  ;;  %v3057_v42 = vpop.f32.mrb[7].mxu0 }
 0x6b6   : > { %v952_v43 = vsel %vm948_vm4, %v947_v41, -inf }
 0x6b7   : > { %953 = vmax.xlane.f32.xlu1 %v952_v43 }
 0x6ba   : > { %v1066_v44 = vpop.f32.mrb[8].mxu0 }
 0x6bb   : > { %v1073_v45 = vsel %vm945_vm3, %v1066_v44, -1e+09  ;;  %v3068_v46 = vpop.f32.mrb[9].mxu0 }
 0x6bc   : > { %v1069_v47 = vpop.f32.mrb[10].mxu0  ;;  %v1075_v48 = vsel %vm948_vm4, %v1073_v45, -inf }
 0x6bd   : > { %v1074_v49 = vsel %vm945_vm3, %v1069_v47, -1e+09  ;;  %1076 = vmax.xlane.f32.xlu0 %v1075_v48  ;;  %v3069_v50 = vpop.f32.mrb[11].mxu0 }
 0x6be   : > { %v1078_v51 = vsel %vm948_vm4, %v1074_v49, -inf }
 0x6c1   : > { %1079 = vmax.xlane.f32.xlu0 %v1078_v51 }
 0x6c2   : > { %v1192_v52 = vpop.f32.mrb[12].mxu0 }
 0x6c3   : > { %v1199_v53 = vsel %vm945_vm3, %v1192_v52, -1e+09  ;;  %v3080_v54 = vpop.f32.mrb[13].mxu0 }
 0x6c4   : > { %v1195_v55 = vpop.f32.mrb[14].mxu0  ;;  %v1201_v56 = vsel %vm948_vm4, %v1199_v53, -inf }
 0x6c5   : > { %v1200_v57 = vsel %vm945_vm3, %v1195_v55, -1e+09  ;;  %1202 = vmax.xlane.f32.xlu1 %v1201_v56  ;;  %v3081_v58 = vpop.f32.mrb[15].mxu0 }
 0x6c6   : > { %v1204_v59 = vsel %vm948_vm4, %v1200_v57, -inf }
 0x6c7   : > { %1205 = vmax.xlane.f32.xlu0 %v1204_v59 }
 0x6ca   : > { %v1318_v60 = vpop.f32.mrb[16].mxu0 }
 0x6cb   : > { %v1325_v61 = vsel %vm945_vm3, %v1318_v60, -1e+09  ;;  %v3092_v62 = vpop.f32.mrb[17].mxu0 }
 0x6cc   : > { %v1321_v63 = vpop.f32.mrb[18].mxu0  ;;  %v1327_v0 = vsel %vm948_vm4, %v1325_v61, -inf }
 0x6cd   : > { %v1326_v1 = vsel %vm945_vm3, %v1321_v63, -1e+09  ;;  %1328 = vmax.xlane.f32.xlu1 %v1327_v0  ;;  %v3093_v2 = vpop.f32.mrb[19].mxu0 }
 0x6ce   : > { %v1330_v3 = vsel %vm948_vm4, %v1326_v1, -inf }
 0x6cf   : > { %1331 = vmax.xlane.f32.xlu0 %v1330_v3 }
 0x6de   : > { %974 = vrot.lane.b32.xlu1 %v3640_v21, %s4098_s22  ;;  %s608_s22 = sand.u32 1, %s3409_s0   ;;  %s4104_s0 = smov 16  }
 0x6df   : > { %s2856_s20 = sshll.u32 %s608_s22, 7  ;;  %s4105_s22 = smov 8  }
 0x742   : > { %v951_v4 = vpop.xlane.xlu0 %950 }
 0x743   : > { %v955_v6 = vsub.f32 %v946_v37, %v951_v4 }
 0x744   : > { %v954_v7 = vpop.xlane.xlu1 %953 }
 0x745   : > { %v957_v8 = vmul.f32 1.442695, %v955_v6  ;;  %v956_v9 = vsub.f32 %v947_v41, %v954_v7 }
 0x747   : > { %3315 = vpow2.f32 %v957_v8  ;;  %v959_v10 = vmul.f32 1.442695, %v956_v9 }
 0x749   : > { %3317 = vpow2.f32 %v959_v10 }
 0x74a   : > { %v1077_v11 = vpop.xlane.xlu0 %1076 }
 0x74b   : > { %v1081_v14 = vsub.f32 %v1073_v45, %v1077_v11 }
 0x74d   : > { %v1083_v15 = vmul.f32 1.442695, %v1081_v14 }
 0x74e   : > { %v1080_v16 = vpop.xlane.xlu0 %1079 }
 0x74f   : > { %3319 = vpow2.f32 %v1083_v15  ;;  %v1082_v17 = vsub.f32 %v1074_v49, %v1080_v16 }
 0x751   : > { %v3316_v18 = vpop.eup %3315  ;;  %v1085_v19 = vmul.f32 1.442695, %v1082_v17 }
 0x752   : > { %v1203_v20 = vpop.xlane.xlu1 %1202  ;;  %v961_v22 = vsel %vm948_vm4, %v3316_v18, 0.0 }
 0x753   : > { %v3318_v23 = vpop.eup %3317  ;;  %3321 = vpow2.f32 %v1085_v19  ;;  %v1207_v24 = vsub.f32 %v1199_v53, %v1203_v20  ;;  %962 = vadd.xlane.f32.xlu1 %v961_v22 }
 0x754   : > { %v1206_v25 = vpop.xlane.xlu0 %1205  ;;  %v964_v26 = vsel %vm948_vm4, %v3318_v23, 0.0 }
 0x755   : > { %v1209_v27 = vmul.f32 1.442695, %v1207_v24  ;;  %v1208_v28 = vsub.f32 %v1200_v57, %v1206_v25  ;;  %965 = vadd.xlane.f32.xlu0 %v964_v26 }
 0x757   : > { %3323 = vpow2.f32 %v1209_v27  ;;  %v1211_v29 = vmul.f32 1.442695, %v1208_v28 }
 0x759   : > { %v3320_v30 = vpop.eup %3319  ;;  %3325 = vpow2.f32 %v1211_v29  ;;  %v3293_v29 = vld [vmem:[%s4081_s9] sm:$0xff]  }
 0x75a   : > { %v1329_v31 = vpop.xlane.xlu1 %1328  ;;  %v1087_v32 = vsel %vm948_vm4, %v3320_v30, 0.0  ;;  %3101 = vmatpush3.bf16.msra.mxu0 %v3293_v29 }
 0x75b   : > { %v1333_v33 = vsub.f32 %v1325_v61, %v1329_v31  ;;  %1088 = vadd.xlane.f32.xlu1 %v1087_v32  ;;  %3102 = vmatprep.subr.bf16.mxu0 %v3421_v5  ;;  %v3294_v32 = vld [vmem:[%s4081_s9 + $0x8] sm:$0xff]  }
 0x75c   : > { %v1332_v34 = vpop.xlane.xlu0 %1331 }
 0x75d   : > { %v3322_v36 = vpop.eup %3321  ;;  %v1335_v37 = vmul.f32 1.442695, %v1333_v33  ;;  %v1334_v38 = vsub.f32 %v1326_v1, %v1332_v34 }
 0x75e   : > { %v975_v39 = vpop.permute.xlu1 %974  ;;  %v1090_v40 = vsel %vm948_vm4, %v3322_v36, 0.0  ;;  %3103 = vmatpush3.bf16.msra.mxu0 %v3294_v32 }
 0x75f   : > { %3327 = vpow2.f32 %v1335_v37  ;;  %v1337_v41 = vmul.f32 1.442695, %v1334_v38  ;;  %3059 = vmatpush3.bf16.msra.mxu1 %v975_v39  ;;  %1091 = vadd.xlane.f32.xlu0 %v1090_v40 }
 0x760   : > { %3070 = vmatprep.subr.bf16.mxu1 %v3421_v5  ;;  %3116 = vmatprep.subr.bf16.mxu0 %v3421_v5 }
 0x761   : > { %v3324_v42 = vpop.eup %3323  ;;  %3329 = vpow2.f32 %v1337_v41 }
 0x762   : > { %v1213_v43 = vsel %vm948_vm4, %v3324_v42, 0.0 }
 0x763   : > { %v3326_v44 = vpop.eup %3325  ;;  %1214 = vadd.xlane.f32.xlu1 %v1213_v43 }
 0x764   : > { %v1216_v45 = vsel %vm948_vm4, %v3326_v44, 0.0 }
 0x765   : > { %1217 = vadd.xlane.f32.xlu0 %v1216_v45 }
 0x769   : > { %v3328_v46 = vpop.eup %3327 }
 0x76a   : > { %v1339_v47 = vsel %vm948_vm4, %v3328_v46, 0.0 }
 0x76b   : > { %v3714_v48 = vpop.eup %3329  ;;  %1340 = vadd.xlane.f32.xlu1 %v1339_v47 }
 0x76c   : > { %v1342_v49 = vsel %vm948_vm4, %v3714_v48, 0.0 }
 0x76d   : > { %1343 = vadd.xlane.f32.xlu0 %v1342_v49 }
 0x77c   : > { %1227 = vrot.lane.b32.xlu1 %v3640_v21, %s4100_s2  ;;  %s3725_s2 = scalar_lea.vmem [#allocation2], %s2856_s20  ;;  %s4103_s20 = smov 24  }
 0x780   : > { %1353 = vrot.lane.b32.xlu1 %v3640_v21, %s4102_s26  ;;  %s4122_s26 = smov 120  }
 0x783   : > { %1101 = vrot.lane.b32.xlu0 %v3640_v21, %s4101_s27  ;;  %s4123_s27 = smov 72  }
 0x7e0   : > { %v963_v50 = vpop.xlane.xlu1 %962 }
 0x7e1   : > { %3331 = vrcp.f32 %v963_v50 }
 0x7e2   : > { %v966_v51 = vpop.xlane.xlu0 %965 }
 0x7e3   : > { %3333 = vrcp.f32 %v966_v51 }
 0x7e8   : > { %v1089_v52 = vpop.xlane.xlu1 %1088 }
 0x7e9   : > { %3335 = vrcp.f32 %v1089_v52 }
 0x7eb   : > { %v3332_v53 = vpop.eup %3331 }
 0x7ec   : > { %v969_v54 = vmul.f32 %v3332_v53, %v3316_v18  ;;  %v1092_v55 = vpop.xlane.xlu0 %1091 }
 0x7ed   : > { %v3334_v56 = vpop.eup %3333  ;;  %3337 = vrcp.f32 %v1092_v55 }
 0x7ee   : > { %971 = vst.msk [vmem:[%s3725_s2] sm:$0xff] %vm948_vm4, %v969_v54  ;;  %v970_v21 = vmul.f32 %v3334_v56, %v3318_v23 }
 0x7f0   : > { %972 = vst.msk [vmem:[%s3725_s2 + $0x8] sm:$0xff] %vm948_vm4, %v970_v21  ;;  %v1215_v57 = vpop.xlane.xlu1 %1214  ;;  %v973_v58 = vpack.c.bf16 %v970_v21, %v969_v54 }
 0x7f1   : > { %3339 = vrcp.f32 %v1215_v57 }
 0x7f2   : > { %3061 = vmatmul.mubr.msk.bf16.vlgmr.msra.gmra.mrb[4].mxu1 %vm948_vm4, %v973_v58  ;;  %v1218_v59 = vpop.xlane.xlu0 %1217 }
 0x7f3   : > { %v3336_v60 = vpop.eup %3335  ;;  %3341 = vrcp.f32 %v1218_v59  ;;  %3072 = vmatprep.mubr.msk.bf16.mxu1 %vm3422_vm0, %v3421_v5 }
 0x7f4   : > { %v1095_v61 = vmul.f32 %v3336_v60, %v3320_v30 }
 0x7f6   : > { %2875 = vst.msk [vmem:[%s3725_s2 + $0x10] sm:$0xff] %vm948_vm4, %v1095_v61 }
 0x7f7   : > { %v3338_v62 = vpop.eup %3337 }
 0x7f8   : > { %v1096_v63 = vmul.f32 %v3338_v62, %v3322_v36  ;;  %v1341_v0 = vpop.xlane.xlu1 %1340 }
 0x7f9   : > { %3343 = vrcp.f32 %v1341_v0 }
 0x7fa   : > { %2876 = vst.msk [vmem:[%s3725_s2 + $0x18] sm:$0xff] %vm948_vm4, %v1096_v63  ;;  %v1344_v1 = vpop.xlane.xlu0 %1343  ;;  %v1100_v8 = vpack.c.bf16 %v1096_v63, %v1095_v61 }
 0x7fb   : > { %v3340_v2 = vpop.eup %3339  ;;  %3345 = vrcp.f32 %v1344_v1 }
 0x7fc   : > { %v1221_v3 = vmul.f32 %v3340_v2, %v3324_v42  ;;  %v1228_v9 = vpop.permute.xlu1 %1227 }
 0x7fd   : > { %v3342_v4 = vpop.eup %3341 }
 0x7fe   : > { %2879 = vst.msk [vmem:[%s3725_s2 + $0x20] sm:$0xff] %vm948_vm4, %v1221_v3  ;;  %v1222_v6 = vmul.f32 %v3342_v4, %v3326_v44  ;;  %v1102_v7 = vpop.permute.xlu0 %1101 }
 0x7ff   : > { %3071 = vmatpush3.bf16.msra.mxu1 %v1102_v7 }
 0x800   : > { %2880 = vst.msk [vmem:[%s3725_s2 + $0x28] sm:$0xff] %vm948_vm4, %v1222_v6  ;;  %3082 = vmatprep.subr.bf16.mxu1 %v3421_v5  ;;  %v1226_v16 = vpack.c.bf16 %v1222_v6, %v1221_v3  ;;  %v1354_v17 = vpop.permute.xlu1 %1353 }
 0x802   : > { %3073 = vmatmul.mubr.msk.bf16.vlgmr.msra.gmra.mrb[8].mxu1 %vm948_vm4, %v1100_v8 }
 0x803   : > { %v3344_v10 = vpop.eup %3343  ;;  %3083 = vmatpush3.bf16.msra.mxu1 %v1228_v9  ;;  %3084 = vmatprep.mubr.msk.bf16.mxu1 %vm3422_vm0, %v3421_v5 }
 0x804   : > { %v1347_v11 = vmul.f32 %v3344_v10, %v3328_v46  ;;  %3094 = vmatprep.subr.bf16.mxu1 %v3421_v5 }
 0x805   : > { %v3346_v14 = vpop.eup %3345 }
 0x806   : > { %2883 = vst.msk [vmem:[%s3725_s2 + $0x30] sm:$0xff] %vm948_vm4, %v1347_v11  ;;  %v1348_v15 = vmul.f32 %v3346_v14, %v3714_v48  ;;  %v3295_v14 = vld [vmem:[%s4084_s12] sm:$0xff]  }
 0x808   : > { %2884 = vst.msk [vmem:[%s3725_s2 + $0x38] sm:$0xff] %vm948_vm4, %v1348_v15  ;;  %v1352_v18 = vpack.c.bf16 %v1348_v15, %v1347_v11  ;;  %v3296_v15 = vld [vmem:[%s4084_s12 + $0x8] sm:$0xff]  }
 0x80a   : > { %3085 = vmatmul.mubr.msk.bf16.vlgmr.msra.gmra.mrb[12].mxu1 %vm948_vm4, %v1226_v16  ;;  %v3297_v16 = vld [vmem:[%s4086_s14] sm:$0xff]  }
 0x80b   : > { %3095 = vmatpush3.bf16.msra.mxu1 %v1354_v17  ;;  %3096 = vmatprep.mubr.msk.bf16.mxu1 %vm3422_vm0, %v3421_v5  ;;  %v3298_v17 = vld [vmem:[%s4086_s14 + $0x8] sm:$0xff]  }
 0x80c   : > { %3108 = vmatprep.subr.bf16.mxu1 %v3421_v5 }
 0x812   : > { %3097 = vmatmul.mubr.msk.bf16.vlgmr.msra.gmra.mrb[16].mxu1 %vm948_vm4, %v1352_v18 }
 0x813   : > { %3112 = vmatprep.mubr.msk.bf16.mxu1 %vm3422_vm0, %v3421_v5  ;;  %3109 = vmatpush3.bf16.msra.mxu1 %v3295_v14 }
 0x814   : > { %3110 = vmatprep.subr.bf16.mxu1 %v3421_v5 }
 0x817   : > { %3111 = vmatpush3.bf16.msra.mxu1 %v3296_v15  ;;  %v2901_v15 = vld [vmem:[%s4088_s16] ss:$0 sm:$0xff] }
 0x818   : > { %3128 = vmatprep.subr.bf16.mxu1 %v3421_v5 }
 0x8c5   : > { %v1014_v19 = vpop.f32.mrb[4].mxu1 }
 0x8c6   : > { %v3062_v20 = vpop.f32.mrb[5].mxu1 }
 0x8c7   : > { %v1017_v22 = vpop.f32.mrb[6].mxu1 }
 0x8c8   : > { %v3063_v23 = vpop.f32.mrb[7].mxu1 }
 0x8d5   : > { %v1141_v24 = vpop.f32.mrb[8].mxu1 }
 0x8d6   : > { %v3074_v25 = vpop.f32.mrb[9].mxu1 }
 0x8d7   : > { %v1144_v26 = vpop.f32.mrb[10].mxu1 }
 0x8d8   : > { %v3258_v27 = vpack.i.bf16 %v1144_v26, %v1141_v24  ;;  %v3075_v28 = vpop.f32.mrb[11].mxu1  ;;  %v2889_v26 = vld [vmem:[%s4082_s10] ss:$0 sm:$0xff] }
 0x8da   : > { %3259 = vrot.lane.b32.xlu0 %v3258_v27, %s4105_s22  ;;  %s4124_s22 = smov 112  }
 0x8dd   : > { %v1267_v30 = vpop.f32.mrb[12].mxu1 }
 0x8de   : > { %v3086_v31 = vpop.f32.mrb[13].mxu1 }
 0x8df   : > { %v1270_v33 = vpop.f32.mrb[14].mxu1  ;;  %v2890_v31 = vld [vmem:[%s4083_s11] ss:$0 sm:$0xff] }
 0x8e0   : > { %v3263_v34 = vpack.i.bf16 %v1270_v33, %v1267_v30  ;;  %v3087_v36 = vpop.f32.mrb[15].mxu1 }
 0x8e2   : > { %3264 = vrot.lane.b32.xlu1 %v3263_v34, %s4104_s0  ;;  %s4125_s0 = smov 104  }
 0x8e5   : > { %v1393_v37 = vpop.f32.mrb[16].mxu1 }
 0x8e6   : > { %1446 = vrot.lane.b32.xlu1 %v3630_v12, %s4118_s4  ;;  %v3098_v38 = vpop.f32.mrb[17].mxu1 }
 0x8e7   : > { %v1396_v39 = vpop.f32.mrb[18].mxu1  ;;  %v3300_v38 = vld [vmem:[%s4086_s14 + $0x18] sm:$0xff]  }
 0x8e8   : > { %v3268_v40 = vpack.i.bf16 %v1396_v39, %v1393_v37  ;;  %v3099_v41 = vpop.f32.mrb[19].mxu1  ;;  %v3299_v37 = vld [vmem:[%s4086_s14 + $0x10] sm:$0xff]   ;;  %v2891_v39 = vld [vmem:[%s4085_s13] ss:$0 sm:$0xff] }
 0x8ea   : > { %3269 = vrot.lane.b32.xlu0 %v3268_v40, %s4103_s20  ;;  %s4120_s20 = smov 96  }
 0x8ee   : > { %1448 = vrot.lane.b32.xlu0 %v3632_v13, %s4118_s4  ;;  %s4121_s4 = smov 80  }
 0x94c   : > { %v3260_v42 = vpop.permute.xlu0 %3259 }
 0x94d   : > { %v3262_v44 = vunpack.i.h.bf16 %v3260_v42  ;;  %v3261_v45 = vunpack.i.l.bf16 %v3260_v42 }
 0x94f   : > { %v1425_v12 = vsel %vm897_vm2, %v1017_v22, %v3262_v44  ;;  %v1424_v49 = vsel %vm897_vm2, %v1014_v19, %v3261_v45 }
 0x954   : > { %v3265_v43 = vpop.permute.xlu1 %3264 }
 0x955   : > { %v3267_v46 = vunpack.i.h.bf16 %v3265_v43  ;;  %v3266_v47 = vunpack.i.l.bf16 %v3265_v43 }
 0x957   : > { %v1427_v52 = vsel %vm948_vm4, %v1425_v12, %v3267_v46  ;;  %v1426_v53 = vsel %vm948_vm4, %v1424_v49, %v3266_v47  ;;  %v2895_v12 = vld [vmem:[%s4087_s15] ss:$0 sm:$0xff] }
 0x958   : > { %v1447_v56 = vpop.permute.xlu1 %1446 }
 0x95c   : > { %v3270_v48 = vpop.permute.xlu0 %3269 }
 0x95d   : > { %v3272_v50 = vunpack.i.h.bf16 %v3270_v48  ;;  %v3271_v51 = vunpack.i.l.bf16 %v3270_v48 }
 0x95f   : > { %v1430_v13 = vsel %vm1428_vm5, %v1427_v52, %v3272_v50  ;;  %v1429_v54 = vsel %vm1428_vm5, %v1426_v53, %v3271_v51 }
 0x960   : > { %v1431_v55 = vpack.c.bf16 %v1430_v13, %v1429_v54  ;;  %v1449_v59 = vpop.permute.xlu0 %1448 }
 0x962   : > { %3105 = vmatmul.mubr.msk.bf16.vlgmr.msra.gmra.mrb[20].mxu0 %vm695_vm1, %v1431_v55 }
 0x963   : > { %3124 = vmatprep.mubr.msk.bf16.mxu0 %vm3422_vm0, %v3421_v5  ;;  %3117 = vmatpush3.bf16.msra.mxu0 %v3297_v16 }
 0x964   : > { %3118 = vmatprep.subr.bf16.mxu0 %v3421_v5 }
 0x967   : > { %3119 = vmatpush3.bf16.msra.mxu0 %v3298_v17 }
 0x968   : > { %3120 = vmatprep.subr.bf16.mxu0 %v3421_v5 }
 0x96b   : > { %3121 = vmatpush3.bf16.msra.mxu0 %v3299_v37 }
 0x96c   : > { %3122 = vmatprep.subr.bf16.mxu0 %v3421_v5 }
 0x96f   : > { %3123 = vmatpush3.bf16.msra.mxu0 %v3300_v38 }
 0x970   : > { %3142 = vmatprep.subr.bf16.mxu0 %v3421_v5 }
 0xa35   : > { %v1489_v21 = vpop.f32.mrb[20].mxu0 }
 0xa36   : > { %v1490_v57 = vadd.f32 %v1489_v21, %v1447_v56  ;;  %v3106_v58 = vpop.f32.mrb[21].mxu0 }
 0xa37   : > { %v1492_v60 = vpop.f32.mrb[22].mxu0 }
 0xa38   : > { %v1493_v61 = vadd.f32 %v1492_v60, %v1449_v59  ;;  %v3107_v62 = vpop.f32.mrb[23].mxu0  ;;  %v1498_v63 = vsel %vm695_vm1, %v1490_v57, 0.0 }
 0xa39   : > { %1499 = vadd.xlane.f32.xlu1 %v1498_v63 }
 0xa3a   : > { %v1501_v0 = vsel %vm695_vm1, %v1493_v61, 0.0 }
 0xa3b   : > { %1502 = vadd.xlane.f32.xlu0 %v1501_v0 }
 0xac6   : > { %v1500_v1 = vpop.xlane.xlu1 %1499 }
 0xac7   : > { %v1504_v2 = vmul.f32 0.03125, %v1500_v1 }
 0xac8   : > { %v1503_v3 = vpop.xlane.xlu0 %1502 }
 0xac9   : > { %v1506_v4 = vsub.f32 %v1490_v57, %v1504_v2  ;;  %v1505_v6 = vmul.f32 0.03125, %v1503_v3  ;;  %v3301_v3 = vld [vmem:[%s4080_s8 + $0x10] sm:$0xff]  }
 0xacb   : > { %v1507_v7 = vsub.f32 %v1493_v61, %v1505_v6  ;;  %v1508_v8 = vmul.f32 %v1506_v4, %v1506_v4 }
 0xacd   : > { %v1510_v9 = vsel %vm695_vm1, %v1508_v8, 0.0  ;;  %v1509_v10 = vmul.f32 %v1507_v7, %v1507_v7 }
 0xace   : > { %1511 = vadd.xlane.f32.xlu0 %v1510_v9 }
 0xacf   : > { %v1513_v11 = vsel %vm695_vm1, %v1509_v10, 0.0 }
 0xad0   : > { %1514 = vadd.xlane.f32.xlu1 %v1513_v11 }
 0xb5b   : > { %v1512_v18 = vpop.xlane.xlu0 %1511 }
 0xb5c   : > { %v1516_v19 = vmul.f32 0.03125, %v1512_v18 }
 0xb5d   : > { %v1515_v20 = vpop.xlane.xlu1 %1514 }
 0xb5e   : > { %v1518_v22 = vadd.f32 1e-06, %v1516_v19  ;;  %v1517_v23 = vmul.f32 0.03125, %v1515_v20  ;;  %v2902_v20 = vld [vmem:[%s4089_s17] ss:$0 sm:$0xff] }
 0xb60   : > { %3347 = vrsqrt.f32 %v1518_v22  ;;  %v1519_v24 = vadd.f32 1e-06, %v1517_v23 }
 0xb62   : > { %3349 = vrsqrt.f32 %v1519_v24 }
 0xb6a   : > { %v3348_v25 = vpop.eup %3347 }
 0xb6b   : > { %v1522_v27 = vmul.f32 %v3348_v25, %v1506_v4  ;;  %v3302_v4 = vld [vmem:[%s4080_s8 + $0x18] sm:$0xff]  }
 0xb6c   : > { %v3350_v28 = vpop.eup %3349 }
 0xb6d   : > { %v1530_v29 = vmul.f32 %v2889_v26, %v1522_v27  ;;  %v1523_v30 = vmul.f32 %v3350_v28, %v1507_v7 }
 0xb6f   : > { %v1531_v32 = vmul.f32 %v2889_v26, %v1523_v30  ;;  %v1538_v33 = vadd.f32 %v2890_v31, %v1530_v29 }
 0xb71   : > { %v1539_v34 = vadd.f32 %v2890_v31, %v1531_v32 }
 0xb73   : > { %v1544_v36 = vpack.c.bf16 %v1539_v34, %v1538_v33 }
 0xb75   : > { %3113 = vmatmul.mubr.msk.bf16.vlgmr.msra.gmra.mrb[20].mxu1 %vm695_vm1, %v1544_v36 }
 0xb76   : > { %3132 = vmatprep.mubr.msk.bf16.mxu1 %vm3422_vm0, %v3421_v5  ;;  %3129 = vmatpush3.bf16.msra.mxu1 %v3301_v3 }
 0xb77   : > { %3130 = vmatprep.subr.bf16.mxu1 %v3421_v5 }
 0xb7a   : > { %3131 = vmatpush3.bf16.msra.mxu1 %v3302_v4 }
 0xb7b   : > { %3136 = vmatprep.subr.bf16.mxu1 %v3421_v5 }
 0xc48   : > { %v1601_v40 = vpop.f32.mrb[20].mxu1 }
 0xc49   : > { %v1602_v41 = vadd.f32 %v2891_v39, %v1601_v40  ;;  %v3114_v42 = vpop.f32.mrb[21].mxu1 }
 0xc4a   : > { %v1604_v43 = vpop.f32.mrb[22].mxu1 }
 0xc4b   : > { %v1605_v44 = vadd.f32 %v2891_v39, %v1604_v43  ;;  %v3115_v45 = vpop.f32.mrb[23].mxu1  ;;  %v1608_v46 = vmax.f32 %v1602_v41, 0.0 }
 0xc4d   : > { %v1609_v47 = vmax.f32 %v1605_v44, 0.0 }
 0xc4f   : > { %v1618_v48 = vpack.c.bf16 %v1609_v47, %v1608_v46 }
 0xc51   : > { %3125 = vmatmul.mubr.msk.bf16.vlgmr.msra.gmra.mrb[24].mxu0 %vm1650_vm6, %v1618_v48 }
 0xc52   : > { %3144 = vmatprep.mubr.msk.bf16.mxu0 %vm3422_vm0, %v3421_v5 }
 0xd24   : > { %v1688_v49 = vpop.f32.mrb[24].mxu0 }
 0xd25   : > { %v1689_v50 = vadd.f32 %v2895_v12, %v1688_v49  ;;  %v3126_v51 = vpop.f32.mrb[25].mxu0 }
 0xd26   : > { %v1691_v52 = vpop.f32.mrb[26].mxu0 }
 0xd27   : > { %v1692_v53 = vadd.f32 %v2895_v12, %v1691_v52  ;;  %v3127_v13 = vpop.f32.mrb[27].mxu0  ;;  %v1695_v54 = vadd.f32 %v1689_v50, %v1538_v33 }
 0xd29   : > { %v1699_v55 = vsel %vm695_vm1, %v1695_v54, 0.0  ;;  %v1696_v56 = vadd.f32 %v1692_v53, %v1539_v34 }
 0xd2a   : > { %1700 = vadd.xlane.f32.xlu0 %v1699_v55 }
 0xd2b   : > { %v1702_v21 = vsel %vm695_vm1, %v1696_v56, 0.0 }
 0xd2c   : > { %1703 = vadd.xlane.f32.xlu1 %v1702_v21 }
 0xdb7   : > { %v1701_v57 = vpop.xlane.xlu0 %1700 }
 0xdb8   : > { %v1705_v58 = vmul.f32 0.03125, %v1701_v57 }
 0xdb9   : > { %v1704_v59 = vpop.xlane.xlu1 %1703 }
 0xdba   : > { %v1707_v60 = vsub.f32 %v1695_v54, %v1705_v58  ;;  %v1706_v61 = vmul.f32 0.03125, %v1704_v59 }
 0xdbc   : > { %v1708_v62 = vsub.f32 %v1696_v56, %v1706_v61  ;;  %v1709_v63 = vmul.f32 %v1707_v60, %v1707_v60 }
 0xdbe   : > { %v1711_v0 = vsel %vm695_vm1, %v1709_v63, 0.0  ;;  %v1710_v1 = vmul.f32 %v1708_v62, %v1708_v62 }
 0xdbf   : > { %1712 = vadd.xlane.f32.xlu0 %v1711_v0 }
 0xdc0   : > { %v1714_v2 = vsel %vm695_vm1, %v1710_v1, 0.0 }
 0xdc1   : > { %1715 = vadd.xlane.f32.xlu1 %v1714_v2 }
 0xe4c   : > { %v1713_v6 = vpop.xlane.xlu0 %1712 }
 0xe4d   : > { %v1717_v7 = vmul.f32 0.03125, %v1713_v6 }
 0xe4e   : > { %v1716_v8 = vpop.xlane.xlu1 %1715 }
 0xe4f   : > { %v1719_v9 = vadd.f32 1e-06, %v1717_v7  ;;  %v1718_v10 = vmul.f32 0.03125, %v1716_v8 }
 0xe51   : > { %3351 = vrsqrt.f32 %v1719_v9  ;;  %v1720_v11 = vadd.f32 1e-06, %v1718_v10 }
 0xe53   : > { %3353 = vrsqrt.f32 %v1720_v11 }
 0xe5b   : > { %v3352_v14 = vpop.eup %3351 }
 0xe5c   : > { %v1723_v16 = vmul.f32 %v3352_v14, %v1707_v60 }
 0xe5d   : > { %v3354_v17 = vpop.eup %3353 }
 0xe5e   : > { %v1731_v18 = vmul.f32 %v2901_v15, %v1723_v16  ;;  %v1724_v19 = vmul.f32 %v3354_v17, %v1708_v62 }
 0xe60   : > { %v1732_v22 = vmul.f32 %v2901_v15, %v1724_v19  ;;  %v3847_v23 = vadd.f32 %v2902_v20, %v1731_v18 }
 0xe62   : > { %v3849_v24 = vadd.f32 %v2902_v20, %v1732_v22 }
 0xe64   : > { %v1746_v25 = vpack.c.bf16 %v3849_v24, %v3847_v23 }
 0xe66   : > { %3133 = vmatmul.mubr.msk.bf16.vlgmr.msra.gmra.mrb[24].mxu1 %vm695_vm1, %v1746_v25 }
 0xe67   : > { %3138 = vmatprep.mubr.msk.bf16.mxu1 %vm3422_vm0, %v3421_v5 }
 0xf39   : > { %v1796_v26 = vpop.f32.mrb[24].mxu1 }
 0xf3a   : > { %v3134_v27 = vpop.f32.mrb[25].mxu1  ;;  %v1803_v29 = vmul.f32 0.35355338, %v1796_v26 }
 0xf3b   : > { %v1799_v28 = vpop.f32.mrb[26].mxu1 }
 0xf3c   : > { %v1804_v30 = vmul.f32 0.35355338, %v1799_v28  ;;  %v3856_v31 = vpack.c.bf16 %v1799_v28, %v1796_v26  ;;  %v3135_v32 = vpop.f32.mrb[27].mxu1 }
 0xf3e   : > { %v1810_v33 = vpack.c.bf16 %v1804_v30, %v1803_v29  ;;  %1940 = vrot.lane.b32.xlu1 %v3856_v31, %s3425_s3  ;;  %1813 = vrot.lane.b32.xlu0 %v3856_v31, %s4120_s20  ;;  %s4126_s3 = smov 64   ;;  %s4129_s20 = smov 56  }
 0xf42   : > { %2066 = vrot.lane.b32.xlu0 %v3856_v31, %s4121_s4  ;;  %1938 = vrot.lane.b32.xlu1 %v1810_v33, %s4122_s26 }
 0xf46   : > { %2192 = vrot.lane.b32.xlu0 %v3856_v31, %s4123_s27  ;;  %2064 = vrot.lane.b32.xlu1 %v1810_v33, %s4124_s22  ;;  %s4130_s27 = smov 8  }
 0xf4a   : > { %2190 = vrot.lane.b32.xlu1 %v1810_v33, %s4125_s0  ;;  %s4133_s0 = sshll.u32 %s3570_s25, 4  ;;  %s2972_s25 = sshll.u32 (%p3564_p4), %s3552_s21, 6 }
 0xf4b   : > { %s2674_s26 = scalar_lea.vmem (%p3564_p4), %s4091_s19, %s2972_s25 }
 0xfb0   : > { %v1814_v34 = vpop.permute.xlu0 %1813  ;;  %v1941_v37 = vpop.permute.xlu1 %1940 }
 0xfb1   : > { %v1819_v36 = vsel %vm897_vm2, %v1814_v34, 0  ;;  %v1946_v38 = vsel %vm897_vm2, %v1941_v37, 0 }
 0xfb2   : > { %3137 = vmatpush3.bf16.xpose.msra.mxu1 %v1819_v36 }
 0xfb3   : > { %3148 = vmatprep.subr.bf16.mxu1 %v3421_v5 }
 0xfb4   : > { %v2067_v39 = vpop.permute.xlu0 %2066  ;;  %v1939_v40 = vpop.permute.xlu1 %1938 }
 0xfb5   : > { %v2072_v41 = vsel %vm897_vm2, %v2067_v39, 0 }
 0xfb8   : > { %v2193_v42 = vpop.permute.xlu0 %2192  ;;  %v2065_v43 = vpop.permute.xlu1 %2064 }
 0xfb9   : > { %3139 = vmatmul.mubr.msk.bf16.vlgmr.msra.gmra.mrb[28].mxu1 %vm897_vm2, %v1810_v33  ;;  %v2198_v44 = vsel %vm897_vm2, %v2193_v42, 0 }
 0xfba   : > { %3149 = vmatpush3.bf16.xpose.msra.mxu1 %v1946_v38  ;;  %3150 = vmatprep.mubr.msk.bf16.mxu1 %vm3422_vm0, %v3421_v5 }
 0xfbb   : > { %3160 = vmatprep.subr.bf16.mxu1 %v3421_v5 }
 0xfbc   : > { %v2191_v45 = vpop.permute.xlu1 %2190 }
 0xfc1   : > { %3151 = vmatmul.mubr.msk.bf16.vlgmr.msra.gmra.mrb[32].mxu1 %vm897_vm2, %v1939_v40 }
 0xfc2   : > { %3161 = vmatpush3.bf16.xpose.msra.mxu1 %v2072_v41  ;;  %3162 = vmatprep.mubr.msk.bf16.mxu1 %vm3422_vm0, %v3421_v5 }
 0xfc3   : > { %3172 = vmatprep.subr.bf16.mxu1 %v3421_v5 }
 0xfc9   : > { %3163 = vmatmul.mubr.msk.bf16.vlgmr.msra.gmra.mrb[36].mxu1 %vm897_vm2, %v2065_v43 }
 0xfca   : > { %3173 = vmatpush3.bf16.xpose.msra.mxu1 %v2198_v44  ;;  %3174 = vmatprep.mubr.msk.bf16.mxu1 %vm3422_vm0, %v3421_v5 }
 0xfcb   : > { %3184 = vmatprep.subr.bf16.mxu1 %v3421_v5 }
 0xfd1   : > { %3175 = vmatmul.mubr.msk.bf16.vlgmr.msra.gmra.mrb[40].mxu1 %vm897_vm2, %v2191_v45 }
 0xfd2   : > { %3188 = vmatprep.mubr.msk.bf16.mxu1 %vm3422_vm0, %v3421_v5 }
0x108c   : > { %v1855_v46 = vpop.f32.mrb[28].mxu1 }
0x108d   : > { %v1862_v47 = vsel %vm945_vm3, %v1855_v46, -1e+09  ;;  %v3140_v48 = vpop.f32.mrb[29].mxu1 }
0x108e   : > { %v1858_v12 = vpop.f32.mrb[30].mxu1  ;;  %v1864_v49 = vsel %vm948_vm4, %v1862_v47, -inf }
0x108f   : > { %v1863_v50 = vsel %vm945_vm3, %v1858_v12, -1e+09  ;;  %1865 = vmax.xlane.f32.xlu0 %v1864_v49  ;;  %v3141_v51 = vpop.f32.mrb[31].mxu1 }
0x1090   : > { %v1867_v52 = vsel %vm948_vm4, %v1863_v50, -inf }
0x1091   : > { %1868 = vmax.xlane.f32.xlu1 %v1867_v52 }
0x1094   : > { %v1982_v53 = vpop.f32.mrb[32].mxu1 }
0x1095   : > { %v1989_v13 = vsel %vm945_vm3, %v1982_v53, -1e+09  ;;  %v3152_v54 = vpop.f32.mrb[33].mxu1 }
0x1096   : > { %v1985_v55 = vpop.f32.mrb[34].mxu1  ;;  %v1991_v56 = vsel %vm948_vm4, %v1989_v13, -inf }
0x1097   : > { %v1990_v21 = vsel %vm945_vm3, %v1985_v55, -1e+09  ;;  %1992 = vmax.xlane.f32.xlu0 %v1991_v56  ;;  %v3153_v57 = vpop.f32.mrb[35].mxu1 }
0x1098   : > { %v1994_v58 = vsel %vm948_vm4, %v1990_v21, -inf }
0x109b   : > { %1995 = vmax.xlane.f32.xlu0 %v1994_v58 }
0x109c   : > { %v2108_v59 = vpop.f32.mrb[36].mxu1 }
0x109d   : > { %v2115_v60 = vsel %vm945_vm3, %v2108_v59, -1e+09  ;;  %v3164_v61 = vpop.f32.mrb[37].mxu1 }
0x109e   : > { %v2111_v62 = vpop.f32.mrb[38].mxu1  ;;  %v2117_v63 = vsel %vm948_vm4, %v2115_v60, -inf }
0x109f   : > { %v2116_v0 = vsel %vm945_vm3, %v2111_v62, -1e+09  ;;  %2118 = vmax.xlane.f32.xlu1 %v2117_v63  ;;  %v3165_v1 = vpop.f32.mrb[39].mxu1 }
0x10a0   : > { %v2120_v2 = vsel %vm948_vm4, %v2116_v0, -inf }
0x10a1   : > { %2121 = vmax.xlane.f32.xlu0 %v2120_v2 }
0x10a4   : > { %v2234_v3 = vpop.f32.mrb[40].mxu1 }
0x10a5   : > { %v2241_v4 = vsel %vm945_vm3, %v2234_v3, -1e+09  ;;  %v3176_v6 = vpop.f32.mrb[41].mxu1 }
0x10a6   : > { %v2237_v7 = vpop.f32.mrb[42].mxu1  ;;  %v2243_v8 = vsel %vm948_vm4, %v2241_v4, -inf }
0x10a7   : > { %v2242_v9 = vsel %vm945_vm3, %v2237_v7, -1e+09  ;;  %2244 = vmax.xlane.f32.xlu1 %v2243_v8  ;;  %v3177_v10 = vpop.f32.mrb[43].mxu1 }
0x10a8   : > { %v2246_v11 = vsel %vm948_vm4, %v2242_v9, -inf }
0x10a9   : > { %2247 = vmax.xlane.f32.xlu0 %v2246_v11 }
0x10b8   : > { %1890 = vrot.lane.b32.xlu1 %v3856_v31, %s4126_s3  ;;  %s4131_s3 = smov 16  }
0x111c   : > { %v1866_v14 = vpop.xlane.xlu0 %1865 }
0x111d   : > { %v1870_v15 = vsub.f32 %v1862_v47, %v1866_v14 }
0x111e   : > { %v1869_v16 = vpop.xlane.xlu1 %1868 }
0x111f   : > { %v1872_v17 = vmul.f32 1.442695, %v1870_v15  ;;  %v1871_v18 = vsub.f32 %v1863_v50, %v1869_v16 }
0x1121   : > { %3355 = vpow2.f32 %v1872_v17  ;;  %v1874_v19 = vmul.f32 1.442695, %v1871_v18 }
0x1123   : > { %3357 = vpow2.f32 %v1874_v19 }
0x1124   : > { %v1993_v20 = vpop.xlane.xlu0 %1992 }
0x1125   : > { %v1997_v22 = vsub.f32 %v1989_v13, %v1993_v20 }
0x1127   : > { %v1999_v35 = vmul.f32 1.442695, %v1997_v22 }
0x1128   : > { %v1996_v25 = vpop.xlane.xlu0 %1995 }
0x1129   : > { %3359 = vpow2.f32 %v1999_v35  ;;  %v1998_v26 = vsub.f32 %v1990_v21, %v1996_v25 }
0x112b   : > { %v3356_v27 = vpop.eup %3355  ;;  %v2001_v28 = vmul.f32 1.442695, %v1998_v26 }
0x112c   : > { %v2119_v29 = vpop.xlane.xlu1 %2118  ;;  %v1876_v30 = vsel %vm948_vm4, %v3356_v27, 0.0 }
0x112d   : > { %v3358_v32 = vpop.eup %3357  ;;  %3361 = vpow2.f32 %v2001_v28  ;;  %v2123_v33 = vsub.f32 %v2115_v60, %v2119_v29  ;;  %1877 = vadd.xlane.f32.xlu1 %v1876_v30 }
0x112e   : > { %v2122_v34 = vpop.xlane.xlu0 %2121  ;;  %v1879_v36 = vsel %vm948_vm4, %v3358_v32, 0.0 }
0x112f   : > { %v2125_v37 = vmul.f32 1.442695, %v2123_v33  ;;  %v2124_v38 = vsub.f32 %v2116_v0, %v2122_v34  ;;  %1880 = vadd.xlane.f32.xlu0 %v1879_v36  ;;  %v3303_v36 = vld [vmem:[%s4081_s9 + $0x10] sm:$0xff]  }
0x1130   : > { %3185 = vmatpush3.bf16.msra.mxu1 %v3303_v36 }
0x1131   : > { %3363 = vpow2.f32 %v2125_v37  ;;  %v2127_v39 = vmul.f32 1.442695, %v2124_v38  ;;  %3186 = vmatprep.subr.bf16.mxu1 %v3421_v5 }
0x1133   : > { %v3360_v40 = vpop.eup %3359  ;;  %3365 = vpow2.f32 %v2127_v39 }
0x1134   : > { %v2245_v41 = vpop.xlane.xlu1 %2244  ;;  %v2003_v42 = vsel %vm948_vm4, %v3360_v40, 0.0 }
0x1135   : > { %v2249_v43 = vsub.f32 %v2241_v4, %v2245_v41  ;;  %2004 = vadd.xlane.f32.xlu1 %v2003_v42  ;;  %v3304_v41 = vld [vmem:[%s4081_s9 + $0x18] sm:$0xff]  }
0x1136   : > { %v2248_v44 = vpop.xlane.xlu0 %2247  ;;  %3187 = vmatpush3.bf16.msra.mxu1 %v3304_v41 }
0x1137   : > { %v3362_v45 = vpop.eup %3361  ;;  %v2251_v46 = vmul.f32 1.442695, %v2249_v43  ;;  %v2250_v47 = vsub.f32 %v2242_v9, %v2248_v44  ;;  %3200 = vmatprep.subr.bf16.mxu1 %v3421_v5 }
0x1138   : > { %v1891_v48 = vpop.permute.xlu1 %1890  ;;  %v2006_v12 = vsel %vm948_vm4, %v3362_v45, 0.0 }
0x1139   : > { %3367 = vpow2.f32 %v2251_v46  ;;  %v2253_v49 = vmul.f32 1.442695, %v2250_v47  ;;  %3143 = vmatpush3.bf16.msra.mxu0 %v1891_v48  ;;  %2007 = vadd.xlane.f32.xlu0 %v2006_v12 }
0x113a   : > { %3154 = vmatprep.subr.bf16.mxu0 %v3421_v5 }
0x113b   : > { %v3364_v50 = vpop.eup %3363  ;;  %3369 = vpow2.f32 %v2253_v49 }
0x113c   : > { %v2129_v51 = vsel %vm948_vm4, %v3364_v50, 0.0 }
0x113d   : > { %v3366_v52 = vpop.eup %3365  ;;  %2130 = vadd.xlane.f32.xlu1 %v2129_v51 }
0x113e   : > { %v2132_v53 = vsel %vm948_vm4, %v3366_v52, 0.0 }
0x113f   : > { %2133 = vadd.xlane.f32.xlu0 %v2132_v53 }
0x1143   : > { %v3368_v13 = vpop.eup %3367 }
0x1144   : > { %v2255_v54 = vsel %vm948_vm4, %v3368_v13, 0.0 }
0x1145   : > { %v3370_v55 = vpop.eup %3369  ;;  %2256 = vadd.xlane.f32.xlu1 %v2255_v54 }
0x1146   : > { %v2258_v56 = vsel %vm948_vm4, %v3370_v55, 0.0 }
0x1147   : > { %2259 = vadd.xlane.f32.xlu0 %v2258_v56 }
0x1156   : > { %2143 = vrot.lane.b32.xlu1 %v3856_v31, %s4127_s28  ;;  %s4132_s28 = smov 24  }
0x115a   : > { %2269 = vrot.lane.b32.xlu1 %v3856_v31, %s4128_s29  ;;  %s623_s29 = scalar_lea.vmem %s4090_s18, %s4133_s0 }
0x115d   : > { %2017 = vrot.lane.b32.xlu0 %v3856_v31, %s4129_s20 }
0x11ba   : > { %v1878_v21 = vpop.xlane.xlu1 %1877 }
0x11bb   : > { %3371 = vrcp.f32 %v1878_v21 }
0x11bc   : > { %v1881_v57 = vpop.xlane.xlu0 %1880 }
0x11bd   : > { %3373 = vrcp.f32 %v1881_v57 }
0x11c2   : > { %v2005_v58 = vpop.xlane.xlu1 %2004 }
0x11c3   : > { %3375 = vrcp.f32 %v2005_v58 }
0x11c5   : > { %v3372_v59 = vpop.eup %3371 }
0x11c6   : > { %v1884_v60 = vmul.f32 %v3372_v59, %v3356_v27  ;;  %v2008_v61 = vpop.xlane.xlu0 %2007 }
0x11c7   : > { %v3374_v62 = vpop.eup %3373  ;;  %3377 = vrcp.f32 %v2008_v61 }
0x11c8   : > { %2915 = vst.msk [vmem:[%s3725_s2 + $0x40] sm:$0xff] %vm948_vm4, %v1884_v60  ;;  %v1885_v63 = vmul.f32 %v3374_v62, %v3358_v32 }
0x11ca   : > { %2916 = vst.msk [vmem:[%s3725_s2 + $0x48] sm:$0xff] %vm948_vm4, %v1885_v63  ;;  %v2131_v0 = vpop.xlane.xlu1 %2130  ;;  %v1889_v31 = vpack.c.bf16 %v1885_v63, %v1884_v60 }
0x11cb   : > { %3379 = vrcp.f32 %v2131_v0 }
0x11cc   : > { %3145 = vmatmul.mubr.msk.bf16.vlgmr.msra.gmra.mrb[28].mxu0 %vm948_vm4, %v1889_v31  ;;  %v2134_v1 = vpop.xlane.xlu0 %2133 }
0x11cd   : > { %v3376_v2 = vpop.eup %3375  ;;  %3381 = vrcp.f32 %v2134_v1  ;;  %3156 = vmatprep.mubr.msk.bf16.mxu0 %vm3422_vm0, %v3421_v5 }
0x11ce   : > { %v2011_v3 = vmul.f32 %v3376_v2, %v3360_v40 }
0x11d0   : > { %2919 = vst.msk [vmem:[%s3725_s2 + $0x50] sm:$0xff] %vm948_vm4, %v2011_v3 }
0x11d1   : > { %v3378_v4 = vpop.eup %3377 }
0x11d2   : > { %v2012_v6 = vmul.f32 %v3378_v4, %v3362_v45  ;;  %v2257_v7 = vpop.xlane.xlu1 %2256 }
0x11d3   : > { %3383 = vrcp.f32 %v2257_v7 }
0x11d4   : > { %2920 = vst.msk [vmem:[%s3725_s2 + $0x58] sm:$0xff] %vm948_vm4, %v2012_v6  ;;  %v2260_v8 = vpop.xlane.xlu0 %2259  ;;  %v2016_v16 = vpack.c.bf16 %v2012_v6, %v2011_v3 }
0x11d5   : > { %v3380_v9 = vpop.eup %3379  ;;  %3385 = vrcp.f32 %v2260_v8 }
0x11d6   : > { %v2137_v10 = vmul.f32 %v3380_v9, %v3364_v50  ;;  %v2144_v17 = vpop.permute.xlu1 %2143 }
0x11d7   : > { %v3382_v11 = vpop.eup %3381 }
0x11d8   : > { %2923 = vst.msk [vmem:[%s3725_s2 + $0x60] sm:$0xff] %vm948_vm4, %v2137_v10  ;;  %v2138_v14 = vmul.f32 %v3382_v11, %v3366_v52  ;;  %v2018_v15 = vpop.permute.xlu0 %2017 }
0x11d9   : > { %3155 = vmatpush3.bf16.msra.mxu0 %v2018_v15 }
0x11da   : > { %2924 = vst.msk [vmem:[%s3725_s2 + $0x68] sm:$0xff] %vm948_vm4, %v2138_v14  ;;  %3166 = vmatprep.subr.bf16.mxu0 %v3421_v5  ;;  %v2142_v35 = vpack.c.bf16 %v2138_v14, %v2137_v10  ;;  %v2270_v25 = vpop.permute.xlu1 %2269 }
0x11dc   : > { %3157 = vmatmul.mubr.msk.bf16.vlgmr.msra.gmra.mrb[32].mxu0 %vm948_vm4, %v2016_v16 }
0x11dd   : > { %v3384_v18 = vpop.eup %3383  ;;  %3167 = vmatpush3.bf16.msra.mxu0 %v2144_v17  ;;  %3168 = vmatprep.mubr.msk.bf16.mxu0 %vm3422_vm0, %v3421_v5  ;;  %v3305_v17 = vld [vmem:[%s4084_s12 + $0x10] sm:$0xff]  }
0x11de   : > { %v2263_v19 = vmul.f32 %v3384_v18, %v3368_v13  ;;  %3178 = vmatprep.subr.bf16.mxu0 %v3421_v5  ;;  %v3306_v18 = vld [vmem:[%s4084_s12 + $0x18] sm:$0xff]  }
0x11df   : > { %v3386_v20 = vpop.eup %3385 }
0x11e0   : > { %2927 = vst.msk [vmem:[%s3725_s2 + $0x70] sm:$0xff] %vm948_vm4, %v2263_v19  ;;  %v2264_v22 = vmul.f32 %v3386_v20, %v3370_v55  ;;  %v3308_v20 = vld [vmem:[%s4086_s14 + $0x28] sm:$0xff]  }
0x11e2   : > { %2928 = vst.msk [vmem:[%s3725_s2 + $0x78] sm:$0xff] %vm948_vm4, %v2264_v22  ;;  %v2268_v26 = vpack.c.bf16 %v2264_v22, %v2263_v19  ;;  %v3307_v19 = vld [vmem:[%s4086_s14 + $0x20] sm:$0xff]  }
0x11e4   : > { %3169 = vmatmul.mubr.msk.bf16.vlgmr.msra.gmra.mrb[36].mxu0 %vm948_vm4, %v2142_v35 }
0x11e5   : > { %3179 = vmatpush3.bf16.msra.mxu0 %v2270_v25  ;;  %3180 = vmatprep.mubr.msk.bf16.mxu0 %vm3422_vm0, %v3421_v5 }
0x11e6   : > { %3192 = vmatprep.subr.bf16.mxu0 %v3421_v5 }
0x11ec   : > { %3181 = vmatmul.mubr.msk.bf16.vlgmr.msra.gmra.mrb[40].mxu0 %vm948_vm4, %v2268_v26 }
0x11ed   : > { %3196 = vmatprep.mubr.msk.bf16.mxu0 %vm3422_vm0, %v3421_v5  ;;  %3193 = vmatpush3.bf16.msra.mxu0 %v3305_v17  ;;  %v2964_v17 = vld [vmem:[%s4089_s17 + $0x1] ss:$0 sm:$0xff] }
0x11ee   : > { %3194 = vmatprep.subr.bf16.mxu0 %v3421_v5 }
0x11f1   : > { %3195 = vmatpush3.bf16.msra.mxu0 %v3306_v18 }
0x129f   : > { %v1930_v27 = vpop.f32.mrb[28].mxu0 }
0x12a0   : > { %v3146_v28 = vpop.f32.mrb[29].mxu0 }
0x12a1   : > { %v1933_v29 = vpop.f32.mrb[30].mxu0 }
0x12a2   : > { %v3147_v30 = vpop.f32.mrb[31].mxu0 }
0x12a3   : > { %v2935_v30 = vld [vmem:[%s4082_s10 + $0x1] ss:$0 sm:$0xff] }
0x12af   : > { %v2057_v32 = vpop.f32.mrb[32].mxu0 }
0x12b0   : > { %v3158_v33 = vpop.f32.mrb[33].mxu0 }
0x12b1   : > { %v2060_v34 = vpop.f32.mrb[34].mxu0 }
0x12b2   : > { %v3273_v37 = vpack.i.bf16 %v2060_v34, %v2057_v32  ;;  %v3159_v38 = vpop.f32.mrb[35].mxu0 }
0x12b4   : > { %3274 = vrot.lane.b32.xlu0 %v3273_v37, %s4130_s27  ;;  %v2936_v37 = vld [vmem:[%s4083_s11 + $0x1] ss:$0 sm:$0xff] }
0x12b7   : > { %v2183_v39 = vpop.f32.mrb[36].mxu0 }
0x12b8   : > { %v3170_v40 = vpop.f32.mrb[37].mxu0 }
0x12b9   : > { %v2186_v42 = vpop.f32.mrb[38].mxu0 }
0x12ba   : > { %v3278_v43 = vpack.i.bf16 %v2186_v42, %v2183_v39  ;;  %v3171_v44 = vpop.f32.mrb[39].mxu0  ;;  %v3309_v42 = vld [vmem:[%s4086_s14 + $0x30] sm:$0xff]  }
0x12bb   : > { %v2942_v44 = vld [vmem:[%s4085_s13 + $0x1] ss:$0 sm:$0xff] }
0x12bc   : > { %3279 = vrot.lane.b32.xlu1 %v3278_v43, %s4131_s3  ;;  %v3310_v43 = vld [vmem:[%s4086_s14 + $0x38] sm:$0xff]  }
0x12bf   : > { %v2309_v45 = vpop.f32.mrb[40].mxu0 }
0x12c0   : > { %v3182_v46 = vpop.f32.mrb[41].mxu0 }
0x12c1   : > { %v2312_v47 = vpop.f32.mrb[42].mxu0 }
0x12c2   : > { %v3283_v48 = vpack.i.bf16 %v2312_v47, %v2309_v45  ;;  %v3183_v12 = vpop.f32.mrb[43].mxu0 }
0x12c4   : > { %3284 = vrot.lane.b32.xlu0 %v3283_v48, %s4132_s28 }
0x1326   : > { %v3275_v49 = vpop.permute.xlu0 %3274 }
0x1327   : > { %v3277_v51 = vunpack.i.h.bf16 %v3275_v49  ;;  %v3276_v52 = vunpack.i.l.bf16 %v3275_v49 }
0x1329   : > { %v2341_v55 = vsel %vm897_vm2, %v1933_v29, %v3277_v51  ;;  %v2340_v56 = vsel %vm897_vm2, %v1930_v27, %v3276_v52 }
0x132e   : > { %v3280_v50 = vpop.permute.xlu1 %3279 }
0x132f   : > { %v3282_v53 = vunpack.i.h.bf16 %v3280_v50  ;;  %v3281_v13 = vunpack.i.l.bf16 %v3280_v50 }
0x1331   : > { %v2343_v58 = vsel %vm948_vm4, %v2341_v55, %v3282_v53  ;;  %v2342_v59 = vsel %vm948_vm4, %v2340_v56, %v3281_v13 }
0x1336   : > { %v3285_v54 = vpop.permute.xlu0 %3284 }
0x1337   : > { %v3287_v21 = vunpack.i.h.bf16 %v3285_v54  ;;  %v3286_v57 = vunpack.i.l.bf16 %v3285_v54 }
0x1339   : > { %v2345_v60 = vsel %vm1428_vm5, %v2343_v58, %v3287_v21  ;;  %v2344_v61 = vsel %vm1428_vm5, %v2342_v59, %v3286_v57 }
0x133a   : > { %v2346_v62 = vpack.c.bf16 %v2345_v60, %v2344_v61 }
0x133c   : > { %3189 = vmatmul.mubr.msk.bf16.vlgmr.msra.gmra.mrb[44].mxu1 %vm695_vm1, %v2346_v62 }
0x133d   : > { %3208 = vmatprep.mubr.msk.bf16.mxu1 %vm3422_vm0, %v3421_v5  ;;  %3201 = vmatpush3.bf16.msra.mxu1 %v3307_v19 }
0x133e   : > { %3202 = vmatprep.subr.bf16.mxu1 %v3421_v5 }
0x1341   : > { %3203 = vmatpush3.bf16.msra.mxu1 %v3308_v20 }
0x1342   : > { %3204 = vmatprep.subr.bf16.mxu1 %v3421_v5 }
0x1345   : > { %3205 = vmatpush3.bf16.msra.mxu1 %v3309_v42  ;;  %v2762_v42 = vld [vmem:[%s3725_s2 + $0x78] sm:$0xff] (%p3564_p4) }
0x1346   : > { %3206 = vmatprep.subr.bf16.mxu1 %v3421_v5  ;;  %v2955_v5 = vld [vmem:[%s4087_s15 + $0x1] ss:$0 sm:$0xff]  ;;  %2763 = vst [vmem:[%s2674_s26 + $0xb8] sm:$0xff] (%p3564_p4), %v2762_v42 }
0x1349   : > { %3207 = vmatpush3.bf16.msra.mxu1 %v3310_v43 }
0x140f   : > { %v2396_v63 = vpop.f32.mrb[44].mxu1 }
0x1410   : > { %v2397_v0 = vadd.f32 %v2396_v63, %v3847_v23  ;;  %v3190_v31 = vpop.f32.mrb[45].mxu1 }
0x1411   : > { %v2399_v1 = vpop.f32.mrb[46].mxu1 }
0x1412   : > { %v2400_v2 = vadd.f32 %v2399_v1, %v3849_v24  ;;  %v3191_v3 = vpop.f32.mrb[47].mxu1  ;;  %v2407_v4 = vsel %vm695_vm1, %v2397_v0, 0.0 }
0x1413   : > { %2408 = vadd.xlane.f32.xlu1 %v2407_v4 }
0x1414   : > { %v2410_v6 = vsel %vm695_vm1, %v2400_v2, 0.0 }
0x1415   : > { %2411 = vadd.xlane.f32.xlu0 %v2410_v6 }
0x14a0   : > { %v2409_v7 = vpop.xlane.xlu1 %2408 }
0x14a1   : > { %v2413_v8 = vmul.f32 0.03125, %v2409_v7 }
0x14a2   : > { %v2412_v9 = vpop.xlane.xlu0 %2411 }
0x14a3   : > { %v2415_v10 = vsub.f32 %v2397_v0, %v2413_v8  ;;  %v2414_v11 = vmul.f32 0.03125, %v2412_v9 }
0x14a5   : > { %v2416_v14 = vsub.f32 %v2400_v2, %v2414_v11  ;;  %v2417_v15 = vmul.f32 %v2415_v10, %v2415_v10 }
0x14a7   : > { %v2419_v23 = vsel %vm695_vm1, %v2417_v15, 0.0  ;;  %v2418_v16 = vmul.f32 %v2416_v14, %v2416_v14 }
0x14a8   : > { %2420 = vadd.xlane.f32.xlu0 %v2419_v23  ;;  %v2963_v23 = vld [vmem:[%s4088_s16 + $0x1] ss:$0 sm:$0xff] }
0x14a9   : > { %v2422_v24 = vsel %vm695_vm1, %v2418_v16, 0.0 }
0x14aa   : > { %2423 = vadd.xlane.f32.xlu1 %v2422_v24 }
0x1535   : > { %v2421_v22 = vpop.xlane.xlu0 %2420 }
0x1536   : > { %v2425_v35 = vmul.f32 0.03125, %v2421_v22 }
0x1537   : > { %v2424_v25 = vpop.xlane.xlu1 %2423 }
0x1538   : > { %v2427_v26 = vadd.f32 1e-06, %v2425_v35  ;;  %v2426_v27 = vmul.f32 0.03125, %v2424_v25  ;;  %v2732_v25 = vld [vmem:[%s3725_s2] sm:$0xff] (%p3564_p4) }
0x1539   : > { %2733 = vst [vmem:[%s2674_s26] sm:$0xff] (%p3564_p4), %v2732_v25 }
0x153a   : > { %3387 = vrsqrt.f32 %v2427_v26  ;;  %v2428_v28 = vadd.f32 1e-06, %v2426_v27  ;;  %v2734_v26 = vld [vmem:[%s3725_s2 + $0x8] sm:$0xff] (%p3564_p4)  ;;  %v2736_v27 = vld [vmem:[%s3725_s2 + $0x10] sm:$0xff] (%p3564_p4) }
0x153b   : > { %2735 = vst [vmem:[%s2674_s26 + $0x8] sm:$0xff] (%p3564_p4), %v2734_v26  ;;  %2737 = vst [vmem:[%s2674_s26 + $0x10] sm:$0xff] (%p3564_p4), %v2736_v27 }
0x153c   : > { %3389 = vrsqrt.f32 %v2428_v28  ;;  %v2738_v28 = vld [vmem:[%s3725_s2 + $0x18] sm:$0xff] (%p3564_p4) }
0x153d   : > { %2739 = vst [vmem:[%s2674_s26 + $0x18] sm:$0xff] (%p3564_p4), %v2738_v28 }
0x1544   : > { %v3388_v29 = vpop.eup %3387 }
0x1545   : > { %v2431_v32 = vmul.f32 %v3388_v29, %v2415_v10  ;;  %v2740_v29 = vld [vmem:[%s3725_s2 + $0x20] sm:$0xff] (%p3564_p4) }
0x1546   : > { %v3390_v33 = vpop.eup %3389  ;;  %2741 = vst [vmem:[%s2674_s26 + $0x20] sm:$0xff] (%p3564_p4), %v2740_v29 }
0x1547   : > { %v2439_v34 = vmul.f32 %v2935_v30, %v2431_v32  ;;  %v2432_v36 = vmul.f32 %v3390_v33, %v2416_v14  ;;  %v2744_v32 = vld [vmem:[%s3725_s2 + $0x30] sm:$0xff] (%p3564_p4)  ;;  %v2746_v33 = vld [vmem:[%s3725_s2 + $0x38] sm:$0xff] (%p3564_p4) }
0x1548   : > { %2745 = vst [vmem:[%s2674_s26 + $0x30] sm:$0xff] (%p3564_p4), %v2744_v32  ;;  %2747 = vst [vmem:[%s2674_s26 + $0x38] sm:$0xff] (%p3564_p4), %v2746_v33 }
0x1549   : > { %v2440_v38 = vmul.f32 %v2935_v30, %v2432_v36  ;;  %v2447_v39 = vadd.f32 %v2936_v37, %v2439_v34  ;;  %v2742_v30 = vld [vmem:[%s3725_s2 + $0x28] sm:$0xff] (%p3564_p4)  ;;  %v2748_v34 = vld [vmem:[%s3725_s2 + $0x40] sm:$0xff] (%p3564_p4) }
0x154a   : > { %2743 = vst [vmem:[%s2674_s26 + $0x28] sm:$0xff] (%p3564_p4), %v2742_v30  ;;  %2749 = vst [vmem:[%s2674_s26 + $0x80] sm:$0xff] (%p3564_p4), %v2748_v34  ;;  %v2750_v36 = vld [vmem:[%s3725_s2 + $0x48] sm:$0xff] (%p3564_p4) }
0x154b   : > { %v2448_v40 = vadd.f32 %v2936_v37, %v2440_v38  ;;  %v2752_v37 = vld [vmem:[%s3725_s2 + $0x50] sm:$0xff] (%p3564_p4)  ;;  %v2754_v38 = vld [vmem:[%s3725_s2 + $0x58] sm:$0xff] (%p3564_p4)  ;;  %2751 = vst [vmem:[%s2674_s26 + $0x88] sm:$0xff] (%p3564_p4), %v2750_v36 }
0x154c   : > { %2753 = vst [vmem:[%s2674_s26 + $0x90] sm:$0xff] (%p3564_p4), %v2752_v37  ;;  %2755 = vst [vmem:[%s2674_s26 + $0x98] sm:$0xff] (%p3564_p4), %v2754_v38 }
0x154d   : > { %v2454_v41 = vpack.c.bf16 %v2448_v40, %v2447_v39 }
0x154f   : > { %3197 = vmatmul.mubr.msk.bf16.vlgmr.msra.gmra.mrb[44].mxu0 %vm695_vm1, %v2454_v41  ;;  %v2760_v41 = vld [vmem:[%s3725_s2 + $0x70] sm:$0xff] (%p3564_p4) }
0x1550   : > { %2761 = vst [vmem:[%s2674_s26 + $0xb0] sm:$0xff] (%p3564_p4), %v2760_v41 }
0x1622   : > { %v2512_v45 = vpop.f32.mrb[44].mxu0 }
0x1623   : > { %v2513_v46 = vadd.f32 %v2942_v44, %v2512_v45  ;;  %v3198_v47 = vpop.f32.mrb[45].mxu0 }
0x1624   : > { %v2515_v48 = vpop.f32.mrb[46].mxu0 }
0x1625   : > { %v2516_v12 = vadd.f32 %v2942_v44, %v2515_v48  ;;  %v3199_v49 = vpop.f32.mrb[47].mxu0  ;;  %v2519_v50 = vmax.f32 %v2513_v46, 0.0 }
0x1627   : > { %v2520_v51 = vmax.f32 %v2516_v12, 0.0 }
0x1629   : > { %v2530_v52 = vpack.c.bf16 %v2520_v51, %v2519_v50 }
0x162b   : > { %3209 = vmatmul.mubr.msk.bf16.vlgmr.msra.gmra.mrb[48].mxu1 %vm1650_vm6, %v2530_v52 }
0x16fe   : > { %v2600_v53 = vpop.f32.mrb[48].mxu1 }
0x16ff   : > { %v2601_v13 = vadd.f32 %v2955_v5, %v2600_v53  ;;  %v3210_v54 = vpop.f32.mrb[49].mxu1 }
0x1700   : > { %v2603_v55 = vpop.f32.mrb[50].mxu1 }
0x1701   : > { %v2604_v56 = vadd.f32 %v2955_v5, %v2603_v55  ;;  %v3211_v21 = vpop.f32.mrb[51].mxu1  ;;  %v2607_v57 = vadd.f32 %v2601_v13, %v2447_v39  ;;  %v2756_v39 = vld [vmem:[%s3725_s2 + $0x60] sm:$0xff] (%p3564_p4) }
0x1702   : > { %2757 = vst [vmem:[%s2674_s26 + $0xa0] sm:$0xff] (%p3564_p4), %v2756_v39 }
0x1703   : > { %v2613_v58 = vsel %vm695_vm1, %v2607_v57, 0.0  ;;  %v2608_v59 = vadd.f32 %v2604_v56, %v2448_v40  ;;  %v2758_v40 = vld [vmem:[%s3725_s2 + $0x68] sm:$0xff] (%p3564_p4) }
0x1704   : > { %2614 = vadd.xlane.f32.xlu0 %v2613_v58  ;;  %2759 = vst [vmem:[%s2674_s26 + $0xa8] sm:$0xff] (%p3564_p4), %v2758_v40 }
0x1705   : > { %v2616_v60 = vsel %vm695_vm1, %v2608_v59, 0.0 }
0x1706   : > { %2617 = vadd.xlane.f32.xlu1 %v2616_v60 }
0x1791   : > { %v2615_v61 = vpop.xlane.xlu0 %2614 }
0x1792   : > { %v2619_v62 = vmul.f32 0.03125, %v2615_v61 }
0x1793   : > { %v2618_v63 = vpop.xlane.xlu1 %2617 }
0x1794   : > { %v2621_v0 = vsub.f32 %v2607_v57, %v2619_v62  ;;  %v2620_v31 = vmul.f32 0.03125, %v2618_v63 }
0x1796   : > { %v2622_v1 = vsub.f32 %v2608_v59, %v2620_v31  ;;  %v2623_v2 = vmul.f32 %v2621_v0, %v2621_v0 }
0x1798   : > { %v2625_v3 = vsel %vm695_vm1, %v2623_v2, 0.0  ;;  %v2624_v4 = vmul.f32 %v2622_v1, %v2622_v1 }
0x1799   : > { %2626 = vadd.xlane.f32.xlu0 %v2625_v3 }
0x179a   : > { %v2628_v6 = vsel %vm695_vm1, %v2624_v4, 0.0 }
0x179b   : > { %2629 = vadd.xlane.f32.xlu1 %v2628_v6 }
0x1826   : > { %v2627_v7 = vpop.xlane.xlu0 %2626 }
0x1827   : > { %v2631_v8 = vmul.f32 0.03125, %v2627_v7 }
0x1828   : > { %v2630_v9 = vpop.xlane.xlu1 %2629 }
0x1829   : > { %v2633_v10 = vadd.f32 1e-06, %v2631_v8  ;;  %v2632_v11 = vmul.f32 0.03125, %v2630_v9 }
0x182b   : > { %3391 = vrsqrt.f32 %v2633_v10  ;;  %v2634_v14 = vadd.f32 1e-06, %v2632_v11 }
0x182d   : > { %3393 = vrsqrt.f32 %v2634_v14 }
0x1835   : > { %v3392_v15 = vpop.eup %3391 }
0x1836   : > { %v2637_v16 = vmul.f32 %v3392_v15, %v2621_v0 }
0x1837   : > { %v3394_v24 = vpop.eup %3393 }
0x1838   : > { %v2645_v18 = vmul.f32 %v2963_v23, %v2637_v16  ;;  %v2638_v19 = vmul.f32 %v3394_v24, %v2622_v1  ;;  %2671 = sbr.rel (!%p3564_p4) target bundleno = 6207 (0x183f), region = 100 }
0x183a   : > { %v2653_v20 = vadd.f32 %v2964_v17, %v2645_v18  ;;  %v2646_v22 = vmul.f32 %v2963_v23, %v2638_v19 }
0x183c   : > { %2655 = vst.msk [vmem:[%s623_s29] sm:$0xff] %vm695_vm1, %v2653_v20  ;;  %v2654_v35 = vadd.f32 %v2964_v17, %v2646_v22 }
0x183e   : > { %2656 = vst.msk [vmem:[%s623_s29 + $0x8] sm:$0xff] %vm695_vm1, %v2654_v35 }
0x183f PF: > { %p27_p8 = scmp.ge.s32.totalorder %s3554_s1, 4   ;;  %s4134_s0 = smov %s3413_s30 }
0x1840   : > { %s4135_s30 = smov %s3562_s23  ;;  %s4136_s20 = smov %s3554_s1 }
0x1841   :  { %29 = sbr.rel (!%p27_p8) target bundleno = 8 (0x8), region = 192 }

// kernel: transformer_s_forward.3
= control target key start
LH: loop header
LB: loop body
LE: loop exit
PB: predicated region body
PF: predicated region fallthrough
CT: control target
= control target key end

     0   :  { %s5919_s0 = inlined_call_operand.vmem [shape: f32[2,8,34], index: 0, kind: input, shape index: {}]   ;;  %s5920_s1 = inlined_call_operand.vmem [shape: f32[2,16,32], index: 1, kind: input, shape index: {}]   ;;  %s5921_s2 = inlined_call_operand.vmem [shape: f32[2,8,8], index: 2, kind: input, shape index: {}]   ;;  %s5922_s3 = inlined_call_operand.vmem [shape: f32[2,1,16], index: 3, kind: input, shape index: {}]   ;;  %s5923_s4 = inlined_call_operand.vmem [shape: f32[2,32], index: 4, kind: input, shape index: {}]   ;;  %s5924_s5 = inlined_call_operand.vmem [shape: f32[1,32], index: 5, kind: input, shape index: {}]   ;;  %s5925_s6 = inlined_call_operand.vmem [shape: bf16[32,32], index: 6, kind: input, shape index: {}]   ;;  %s5926_s7 = inlined_call_operand.vmem [shape: f32[1,32], index: 7, kind: input, shape index: {}]   ;;  %s5927_s8 = inlined_call_operand.vmem [shape: f32[1,32], index: 8, kind: input, shape index: {}]   ;;  %s5928_s9 = inlined_call_operand.vmem [shape: f32[1,32], index: 9, kind: input, shape index: {}]   ;;  %s5929_s10 = inlined_call_operand.vmem [shape: bf16[2,32,96], index: 10, kind: input, shape index: {}]   ;;  %s5930_s11 = inlined_call_operand.vmem [shape: bf16[2,32,32], index: 11, kind: input, shape index: {}]   ;;  %s5931_s12 = inlined_call_operand.vmem [shape: f32[2,1,32], index: 12, kind: input, shape index: {}]   ;;  %s5932_s13 = inlined_call_operand.vmem [shape: f32[2,1,32], index: 13, kind: input, shape index: {}]   ;;  %s5933_s14 = inlined_call_operand.vmem [shape: bf16[2,32,32], index: 14, kind: input, shape index: {}]   ;;  %s5934_s15 = inlined_call_operand.vmem [shape: bf16[2,32,64], index: 15, kind: input, shape index: {}]   ;;  %s5935_s16 = inlined_call_operand.vmem [shape: bf16[2,32,32], index: 16, kind: input, shape index: {}]   ;;  %s5936_s17 = inlined_call_operand.vmem [shape: f32[2,1,32], index: 17, kind: input, shape index: {}]   ;;  %s5937_s18 = inlined_call_operand.vmem [shape: f32[2,1,32], index: 18, kind: input, shape index: {}]   ;;  %s5938_s19 = inlined_call_operand.vmem [shape: bf16[2,32,64], index: 19, kind: input, shape index: {}]   ;;  %s5939_s20 = inlined_call_operand.vmem [shape: f32[2,1,64], index: 20, kind: input, shape index: {}]   ;;  %s5940_s21 = inlined_call_operand.vmem [shape: bf16[2,64,32], index: 21, kind: input, shape index: {}]   ;;  %s5941_s22 = inlined_call_operand.vmem [shape: f32[2,1,32], index: 22, kind: input, shape index: {}]   ;;  %s5942_s23 = inlined_call_operand.vmem [shape: f32[2,1,32], index: 23, kind: input, shape index: {}]   ;;  %s5943_s24 = inlined_call_operand.vmem [shape: f32[2,1,32], index: 24, kind: input, shape index: {}]   ;;  %s5944_s25 = inlined_call_operand.hbm [shape: f32[2,8,32], index: 25, kind: output, shape index: {0}]   ;;  %s5945_s26 = inlined_call_operand.vmem [shape: f32[2,2,4,8,16], index: 26, kind: output, shape index: {1}]  }
   0x1   :  { %5991 = sst [smem:[#allocation17_spill]] %s5919_s0 }
   0x2   :  { %5992 = sst [smem:[#allocation18_spill]] %s5920_s1 }
   0x3   :  { %5993 = sst [smem:[#allocation19_spill]] %s5921_s2 }
   0x4   :  { %5994 = sst [smem:[#allocation20_spill]] %s5922_s3 }
   0x5   :  { %5995 = sst [smem:[#allocation21_spill]] %s5923_s4 }
   0x6   :  { %5996 = sst [smem:[#allocation22_spill]] %s5924_s5 }
   0x7   :  { %5997 = sst [smem:[#allocation23_spill]] %s5925_s6 }
   0x8   :  { %5998 = sst [smem:[#allocation24_spill]] %s5926_s7 }
   0x9   :  { %5999 = sst [smem:[#allocation25_spill]] %s5927_s8 }
   0xa   :  { %6000 = sst [smem:[#allocation26_spill]] %s5928_s9 }
   0xb   :  { %6001 = sst [smem:[#allocation27_spill]] %s5929_s10 }
   0xc   :  { %6002 = sst [smem:[#allocation28_spill]] %s5932_s13 }
   0xd   :  { %6003 = sst [smem:[#allocation29_spill]] %s5935_s16 }
   0xe   :  { %6004 = sst [smem:[#allocation30_spill]] %s5944_s25 }
   0xf   :  { %6005 = sst [smem:[#allocation31_spill]] %s5945_s26 }
  0x10   :  { %32 = vsyncpa [#allocation3], 0 }
  0x11   :  { %34 = vsyncpa [#allocation3 + $0x1], 0  ;;  %s5149_s27 = smov 0   ;;  %s5151_s3 = smov 0  }
  0x12   :  { %s5153_s7 = smov 0   ;;  %s5155_s28 = smov 0  }
  0x13 LB: > { %6006 = sst [smem:[#allocation6_spill]] %s4979_s27  ;;  %s5170_s8 = sadd.s32 4294967295, %s4991_s28   ;;  %s4991_s28 = sphi %s5155_s28, %s6060_s28   ;;  %s4987_s7 = sphi %s5153_s7, %s6063_s7   ;;  %s4983_s3 = sphi %s5151_s3, %s6062_s3   ;;  %s4979_s27 = sphi %s5149_s27, %s6061_s27  }
  0x14   : > { %6007 = sst [smem:[#allocation7_spill]] %s4983_s3  ;;  %s4155_s4 = sadd.s32 4294967294, %s4991_s28  }
  0x15   : > { %6008 = sst [smem:[#allocation8_spill]] %s4987_s7  ;;  %s5174_s29 = sadd.s32 1, %s4991_s28  }
  0x16   : > { %6009 = sst [smem:[#allocation9_spill]] %s4991_s28  ;;  %s592_s0 = sadd.s32 1, %s4987_s7 }
  0x17   : > { %6010 = sst [smem:[#allocation10_spill]] %s5170_s8  ;;  %s589_s9 = ssub.s32 %s4991_s28, %s5174_s29 }
  0x18   : > { %6011 = sst [smem:[#allocation11_spill]] %s5174_s29  ;;  %p602_p0 = scmp.ne.s32.totalorder %s4987_s7, %s4983_s3 }
  0x19   : > { %p590_p1 = scmp.eq.s32.totalorder %s589_s9, 0  ;;  %p603_p2 = scmp.eq.s32.totalorder %s5170_s8, 1 }
  0x1a   : > { %p608_p3 = scmp.ne.s32.totalorder %s4983_s3, %s4979_s27  ;;  %p609_p4 = scmp.eq.s32.totalorder %s4155_s4, 1 }
  0x1b   : > { %s5185_s30 = scalar_select %p590_p1, %s4987_s7, %s592_s0  }
  0x1c   : > { %p5187_p5 = por %p603_p2, %p602_p0  ;;  %p5191_p6 = por %p609_p4, %p608_p3 }
  0x1d   : > { %6012 = sst [smem:[#allocation12_spill]] %s5185_s30  ;;  %p4158_p7 = scmp.ge.s32.totalorder %s4991_s28, 1 }
  0x1e   : > { %s6013_s2 = scalar_select %p5187_p5, 1, 0 }
  0x1f   : > { %s6015_s5 = scalar_select %p5191_p6, 1, 0 }
  0x20   : > { %6014 = sst [smem:[#allocation13_spill]] %s6013_s2  ;;  %p744_p8 = scmp.lt.s32.totalorder %s4991_s28, 3 }
  0x21   : > { %6016 = sst [smem:[#allocation14_spill]] %s6015_s5 }
  0x22   : > { %p745_p9 = pnand %p4158_p7, %p744_p8 }
  0x24   : > { %748 = sbr.rel (%p745_p9) target bundleno = 9795 (0x2643), region = 120 }
  0x2b   : > { %p829_p10 = scmp.lt.s32.totalorder %s5170_s8, 1  ;;  %v4993_v0 = vmov 0   ;;  %s6017_s0 = sld [smem:[#allocation17_spill]]  ;;  %v4994_v2 = vmov 1   ;;  %v4995_v4 = vmov 0.0   ;;  %vm4996_vm0 = vmmov 0  }
  0x2c   : > { %4815 = vset.pattern.permute.xlu0 %v4993_v0  ;;  %s6018_s29 = sld [smem:[#allocation23_spill]]  ;;  %4436 = vmatprep.subr.bf16.mxu0 %v4995_v4  ;;  %v861_v6 = vlaneseq  ;;  %s6019_s4 = sld [smem:[#allocation21_spill]]  ;;  %vm903_vm1 = vcmask 261120   ;;  %vm1075_vm2 = vcmask 64512   ;;  %vm1141_vm4 = vcmask 1043456  }
  0x2d   : > { %s5199_s10 = scalar_select %p829_p10, %s5170_s8, 1  ;;  %4444 = vmatprep.subr.bf16.mxu1 %v4995_v4  ;;  %4440 = vmatprep.mubr.msk.bf16.mxu0 %vm4996_vm0, %v4995_v4  ;;  %vm1532_vm5 = vcmask 130048   ;;  %vm1534_vm6 = vcmask 195584   ;;  %vm2403_vm8 = vcmask 523264  }
  0x2e   : > { %4448 = vmatprep.mubr.msk.bf16.mxu1 %vm4996_vm0, %v4995_v4  ;;  %v862_v7 = vshrl.u32 %v861_v6, 7  ;;  %s6021_s30 = sld [smem:[#allocation24_spill]]  ;;  %s4998_s5 = smov 126  }
  0x2f   : > { %s5952_s6 = sshll.u32 %s5199_s10, 3  ;;  %s6022_s1 = sld [smem:[#allocation25_spill]] }
  0x30   : > { %v863_v8 = vsub.s32 0, %v862_v7  ;;  %v872_v9 = vsub.s32 1, %v862_v7  ;;  %s5955_s27 = smov 88   ;;  %s5957_s7 = smov 72  }
  0x31   : > { %s832_s9 = scalar_lea.vmem %s6017_s0, %s5952_s6  ;;  %s6023_s6 = sld [smem:[#allocation26_spill]] }
  0x32   : > { %v846_v1 = vld [vmem:[%s832_s9] sm:$0xff]  ;;  %v4818_v5 = vld [vmem:[%s6018_s29 + $0x8] sm:$0xff]   ;;  %s6020_s9 = sld [smem:[#allocation22_spill]]  ;;  %s6024_s0 = sld [smem:[#allocation27_spill]] }
  0x33   : > { %858 = vperm.xlu0 %4815, %v846_v1   ;;  %v4817_v3 = vld [vmem:[%s6018_s29] sm:$0xff]   ;;  %s5961_s29 = smov 96   ;;  %s6028_s13 = sld [smem:[#allocation28_spill]] }
  0x34   : > { %4437 = vmatpush3.bf16.msra.mxu0 %v4817_v3  ;;  %v849_v10 = vld [vmem:[%s6019_s4] sm:$0x3]  ;;  %s4997_s4 = smov 2   ;;  %s6039_s16 = sld [smem:[#allocation29_spill]] }
  0x35   : > { %4438 = vmatprep.subr.bf16.mxu0 %v4995_v4  ;;  %v864_v12 = vrot.slane %v849_v10, %v863_v8  ;;  %v873_v13 = vrot.slane %v849_v10, %v872_v9  ;;  %v4166_v22 = vld [vmem:[%s6021_s30] ss:$0 sm:$0xff]  ;;  %s5975_s30 = smov 112   ;;  %s6040_s28 = smov 8  }
  0x36   : > { %v4170_v32 = vld [vmem:[%s6022_s1] ss:$0 sm:$0xff]  ;;  %s6025_s1 = sshll.u32 %s5199_s10, 3  ;;  %s6041_s2 = smov 16  }
  0x37   : > { %4816 = vset.pattern.permute.xlu0 %v4994_v2  ;;  %v4171_v39 = vld [vmem:[%s6023_s6] ss:$0 sm:$0xff]  ;;  %s5959_s6 = smov 80   ;;  %s6045_s26 = smov 48  }
  0x38   : > { %867 = vperm.xlu0 %4816, %v846_v1   ;;  %4439 = vmatpush3.bf16.msra.mxu0 %v4818_v5  ;;  %v4165_v17 = vld [vmem:[%s6020_s9] ss:$0 sm:$0xff]  ;;  %v4820_v41 = vld [vmem:[%s6024_s0 + $0x8] sm:$0xff]   ;;  %s5967_s9 = smov 104   ;;  %s6047_s8 = sld [smem:[#allocation28_spill]] }
  0x39   : > { %4452 = vmatprep.subr.bf16.mxu0 %v4995_v4  ;;  %v4819_v40 = vld [vmem:[%s6024_s0] sm:$0xff]  }
  0x3a   : > { %4445 = vmatpush3.bf16.msra.mxu1 %v4819_v40 }
  0x3b   : > { %4446 = vmatprep.subr.bf16.mxu1 %v4995_v4 }
  0x3e   : > { %4447 = vmatpush3.bf16.msra.mxu1 %v4820_v41 }
  0x3f   : > { %4458 = vmatprep.subr.bf16.mxu1 %v4995_v4 }
  0xb2   : > { %v859_v11 = vpop.permute.xlu0 %858 }
  0xb3   : > { %v865_v15 = vmul.f32 %v864_v12, %v859_v11 }
  0xb7   : > { %v868_v14 = vpop.permute.xlu0 %867 }
  0xb8   : > { %v874_v16 = vmul.f32 %v873_v13, %v868_v14 }
  0xba   : > { %v875_v18 = vadd.f32 %v874_v16, %v865_v15 }
  0xbc   : > { %v882_v19 = vadd.f32 %v4165_v17, %v875_v18 }
  0xbe   : > { %v883_v20 = vmax.f32 %v882_v19, 0.0 }
  0xc0   : > { %v884_v21 = vpack.c.bf16 %v883_v20, %v883_v20 }
  0xc2   : > { %4441 = vmatmul.mubr.msk.bf16.vlgmr.msra.gmra.mrb[0].mxu0 %vm903_vm1, %v884_v21 }
  0xc3   : > { %4454 = vmatprep.mubr.msk.bf16.mxu0 %vm4996_vm0, %v4995_v4 }
 0x195   : > { %v941_v23 = vpop.f32.mrb[0].mxu0 }
 0x196   : > { %v942_v24 = vadd.f32 %v4166_v22, %v941_v23  ;;  %v4442_v25 = vpop.f32.mrb[1].mxu0 }
 0x197   : > { %v944_v26 = vpop.f32.mrb[2].mxu0 }
 0x198   : > { %948 = vrot.lane.b32.xlu1 %v942_v24, %s4997_s4  ;;  %v4443_v27 = vpop.f32.mrb[3].mxu0 }
 0x20a   : > { %v949_v28 = vpop.permute.xlu1 %948 }
 0x20b   : > { %v951_v29 = vadd.f32 %v949_v28, %v846_v1 }
 0x20d   : > { %955 = vrot.lane.b32.xlu1 %v951_v29, %s4998_s5 }
 0x27f   : > { %v956_v30 = vpop.permute.xlu1 %955 }
 0x280   : > { %v958_v31 = vsel %vm903_vm1, %v956_v30, 0.0 }
 0x281   : > { %959 = vadd.xlane.f32.xlu1 %v958_v31 }
 0x292   : > { %981 = vrot.lane.b32.xlu1 %v4170_v32, %s4997_s4 }
 0x30e   : > { %v960_v33 = vpop.xlane.xlu1 %959 }
 0x30f   : > { %v962_v34 = vmul.f32 0.03125, %v960_v33 }
 0x311   : > { %v963_v35 = vsub.f32 %v951_v29, %v962_v34 }
 0x312   : > { %v982_v46 = vpop.permute.xlu1 %981 }
 0x313   : > { %v964_v36 = vmul.f32 %v963_v35, %v963_v35 }
 0x315   : > { %966 = vrot.lane.b32.xlu0 %v964_v36, %s4998_s5 }
 0x387   : > { %v967_v37 = vpop.permute.xlu0 %966 }
 0x388   : > { %v969_v38 = vsel %vm903_vm1, %v967_v37, 0.0 }
 0x389   : > { %970 = vadd.xlane.f32.xlu0 %v969_v38 }
 0x39f   : > { %990 = vrot.lane.b32.xlu0 %v4171_v39, %s4997_s4  ;;  %s5977_s4 = smov 120  }
 0x416   : > { %v971_v42 = vpop.xlane.xlu0 %970 }
 0x417   : > { %v972_v43 = vmul.f32 0.03125, %v971_v42 }
 0x419   : > { %v973_v44 = vadd.f32 1e-06, %v972_v43 }
 0x41a   : > { %v991_v48 = vpop.permute.xlu0 %990 }
 0x41b   : > { %4851 = vrsqrt.f32 %v973_v44 }
 0x425   : > { %v4852_v45 = vpop.eup %4851 }
 0x426   : > { %v975_v47 = vmul.f32 %v4852_v45, %v963_v35 }
 0x428   : > { %v984_v49 = vmul.f32 %v982_v46, %v975_v47 }
 0x42a   : > { %v5251_v50 = vadd.f32 %v991_v48, %v984_v49 }
 0x42c   : > { %v1006_v51 = vpack.c.bf16 %v5251_v50, %v5251_v50 }
 0x42e   : > { %1008 = vrot.lane.b32.xlu1 %v1006_v51, %s4998_s5 }
 0x4a0   : > { %v1009_v52 = vpop.permute.xlu1 %1008 }
 0x4a1   : > { %4449 = vmatmul.mubr.msk.bf16.vlgmr.msra.gmra.mrb[0].mxu1 %vm903_vm1, %v1009_v52 }
 0x4a2   : > { %4460 = vmatprep.mubr.msk.bf16.mxu1 %vm4996_vm0, %v4995_v4 }
 0x574   : > { %v1059_v53 = vpop.f32.mrb[0].mxu1 }
 0x575   : > { %v1065_v54 = vmul.f32 0.35355338, %v1059_v53  ;;  %v5259_v55 = vpack.c.bf16 %v1059_v53, %v1059_v53  ;;  %v4450_v56 = vpop.f32.mrb[1].mxu1 }
 0x576   : > { %v1062_v57 = vpop.f32.mrb[2].mxu1 }
 0x577   : > { %1188 = vrot.lane.b32.xlu0 %v5259_v55, %s5955_s27  ;;  %1073 = vrot.lane.b32.xlu1 %v5259_v55, %s5961_s29  ;;  %v4451_v58 = vpop.f32.mrb[3].mxu1  ;;  %v1070_v59 = vpack.c.bf16 %v1065_v54, %v1065_v54  ;;  %s5966_s27 = smov 64  }
 0x57b   : > { %1299 = vrot.lane.b32.xlu0 %v5259_v55, %s5959_s6  ;;  %1186 = vrot.lane.b32.xlu1 %v1070_v59, %s5977_s4  ;;  %s6026_s6 = sld [smem:[#allocation19_spill]]  ;;  %s5466_s4 = sand.u32 1, %s4983_s3  }
 0x57c   : > { %6036 = sst [smem:[#allocation15_spill]] %s5466_s4  ;;  %s6042_s3 = smov 24  }
 0x57f   : > { %1410 = vrot.lane.b32.xlu0 %v5259_v55, %s5957_s7  ;;  %1297 = vrot.lane.b32.xlu1 %v1070_v59, %s5975_s30  ;;  %s5963_s7 = smov 40   ;;  %s4160_s30 = sshll.u32 %s5466_s4, 6 }
 0x581   : > { %s841_s29 = scalar_lea.vmem %s6026_s6, %s6025_s1  ;;  %s5964_s6 = smov 48  }
 0x582   : > { %v5297_v8 = vld [vmem:[%s841_s29] sm:$0xff]  ;;  %s5965_s29 = smov 56   ;;  %s5973_s1 = smov 8  }
 0x583   : > { %1408 = vrot.lane.b32.xlu1 %v1070_v59, %s5967_s9  ;;  %vm1122_vm3 = vcmp.gt.f32.partialorder %v5297_v8, 0.5  ;;  %s5971_s9 = smov 16  }
 0x5e9   : > { %v1074_v60 = vpop.permute.xlu1 %1073  ;;  %v1189_v62 = vpop.permute.xlu0 %1188 }
 0x5ea   : > { %v1080_v61 = vsel %vm1075_vm2, %v1074_v60, 0  ;;  %v1194_v63 = vsel %vm1075_vm2, %v1189_v62, 0 }
 0x5eb   : > { %4453 = vmatpush3.bf16.xpose.msra.mxu0 %v1080_v61 }
 0x5ec   : > { %4464 = vmatprep.subr.bf16.mxu0 %v4995_v4 }
 0x5ed   : > { %v1300_v0 = vpop.permute.xlu0 %1299  ;;  %v1187_v1 = vpop.permute.xlu1 %1186 }
 0x5ee   : > { %v1305_v2 = vsel %vm1075_vm2, %v1300_v0, 0 }
 0x5f1   : > { %v1411_v3 = vpop.permute.xlu0 %1410  ;;  %v1298_v5 = vpop.permute.xlu1 %1297 }
 0x5f2   : > { %4455 = vmatmul.mubr.msk.bf16.vlgmr.msra.gmra.mrb[4].mxu0 %vm1075_vm2, %v1070_v59  ;;  %v1416_v6 = vsel %vm1075_vm2, %v1411_v3, 0 }
 0x5f3   : > { %4465 = vmatpush3.bf16.xpose.msra.mxu0 %v1194_v63  ;;  %4466 = vmatprep.mubr.msk.bf16.mxu0 %vm4996_vm0, %v4995_v4 }
 0x5f4   : > { %4476 = vmatprep.subr.bf16.mxu0 %v4995_v4 }
 0x5f5   : > { %v1409_v7 = vpop.permute.xlu1 %1408 }
 0x5fa   : > { %4467 = vmatmul.mubr.msk.bf16.vlgmr.msra.gmra.mrb[8].mxu0 %vm1075_vm2, %v1187_v1 }
 0x5fb   : > { %4477 = vmatpush3.bf16.xpose.msra.mxu0 %v1305_v2  ;;  %4478 = vmatprep.mubr.msk.bf16.mxu0 %vm4996_vm0, %v4995_v4 }
 0x5fc   : > { %4488 = vmatprep.subr.bf16.mxu0 %v4995_v4 }
 0x602   : > { %4479 = vmatmul.mubr.msk.bf16.vlgmr.msra.gmra.mrb[12].mxu0 %vm1075_vm2, %v1298_v5 }
 0x603   : > { %4489 = vmatpush3.bf16.xpose.msra.mxu0 %v1416_v6  ;;  %4490 = vmatprep.mubr.msk.bf16.mxu0 %vm4996_vm0, %v4995_v4 }
 0x604   : > { %4500 = vmatprep.subr.bf16.mxu0 %v4995_v4 }
 0x60a   : > { %4491 = vmatmul.mubr.msk.bf16.vlgmr.msra.gmra.mrb[16].mxu0 %vm1075_vm2, %v1409_v7 }
 0x60b   : > { %4504 = vmatprep.mubr.msk.bf16.mxu0 %vm4996_vm0, %v4995_v4 }
 0x6c5   : > { %v1116_v9 = vpop.f32.mrb[4].mxu0 }
 0x6c6   : > { %v1123_v10 = vsel %vm1122_vm3, %v1116_v9, -1e+09  ;;  %v4456_v11 = vpop.f32.mrb[5].mxu0 }
 0x6c7   : > { %v1119_v12 = vpop.f32.mrb[6].mxu0  ;;  %v1124_v13 = vsel %vm1075_vm2, %v1123_v10, -inf }
 0x6c8   : > { %1125 = vmax.xlane.f32.xlu0 %v1124_v13  ;;  %v4457_v14 = vpop.f32.mrb[7].mxu0 }
 0x6cd   : > { %v1230_v15 = vpop.f32.mrb[8].mxu0 }
 0x6ce   : > { %v1236_v16 = vsel %vm1122_vm3, %v1230_v15, -1e+09  ;;  %v4468_v17 = vpop.f32.mrb[9].mxu0 }
 0x6cf   : > { %v1233_v18 = vpop.f32.mrb[10].mxu0  ;;  %v1237_v19 = vsel %vm1075_vm2, %v1236_v16, -inf }
 0x6d0   : > { %1238 = vmax.xlane.f32.xlu1 %v1237_v19  ;;  %v4469_v20 = vpop.f32.mrb[11].mxu0 }
 0x6d5   : > { %v1341_v21 = vpop.f32.mrb[12].mxu0 }
 0x6d6   : > { %v1347_v22 = vsel %vm1122_vm3, %v1341_v21, -1e+09  ;;  %v4480_v23 = vpop.f32.mrb[13].mxu0 }
 0x6d7   : > { %v1344_v24 = vpop.f32.mrb[14].mxu0  ;;  %v1348_v25 = vsel %vm1075_vm2, %v1347_v22, -inf }
 0x6d8   : > { %1349 = vmax.xlane.f32.xlu0 %v1348_v25  ;;  %v4481_v26 = vpop.f32.mrb[15].mxu0  ;;  %v4821_v24 = vld [vmem:[%s5930_s11] sm:$0xff]   ;;  %v4822_v25 = vld [vmem:[%s5930_s11 + $0x8] sm:$0xff]  }
 0x6d9   : > { %4501 = vmatpush3.bf16.msra.mxu0 %v4821_v24 }
 0x6da   : > { %4502 = vmatprep.subr.bf16.mxu0 %v4995_v4 }
 0x6dd   : > { %v1452_v27 = vpop.f32.mrb[16].mxu0  ;;  %4503 = vmatpush3.bf16.msra.mxu0 %v4822_v25 }
 0x6de   : > { %v1458_v28 = vsel %vm1122_vm3, %v1452_v27, -1e+09  ;;  %v4492_v29 = vpop.f32.mrb[17].mxu0  ;;  %4516 = vmatprep.subr.bf16.mxu0 %v4995_v4 }
 0x6df   : > { %v1455_v30 = vpop.f32.mrb[18].mxu0  ;;  %v1459_v31 = vsel %vm1075_vm2, %v1458_v28, -inf }
 0x6e0   : > { %1460 = vmax.xlane.f32.xlu0 %v1459_v31  ;;  %v4493_v32 = vpop.f32.mrb[19].mxu0 }
 0x755   : > { %v1126_v33 = vpop.xlane.xlu0 %1125 }
 0x756   : > { %v1127_v34 = vsub.f32 %v1123_v10, %v1126_v33 }
 0x758   : > { %v1128_v35 = vmul.f32 1.442695, %v1127_v34 }
 0x75a   : > { %4853 = vpow2.f32 %v1128_v35 }
 0x75d   : > { %v1239_v36 = vpop.xlane.xlu1 %1238 }
 0x75e   : > { %v1240_v37 = vsub.f32 %v1236_v16, %v1239_v36 }
 0x760   : > { %v1241_v38 = vmul.f32 1.442695, %v1240_v37 }
 0x762   : > { %4855 = vpow2.f32 %v1241_v38 }
 0x764   : > { %v4854_v39 = vpop.eup %4853 }
 0x765   : > { %v1130_v40 = vsel %vm1075_vm2, %v4854_v39, 0.0  ;;  %v1350_v41 = vpop.xlane.xlu0 %1349 }
 0x766   : > { %1131 = vadd.xlane.f32.xlu1 %v1130_v40  ;;  %v1351_v49 = vsub.f32 %v1347_v22, %v1350_v41 }
 0x768   : > { %v1352_v51 = vmul.f32 1.442695, %v1351_v49 }
 0x76c   : > { %v4856_v42 = vpop.eup %4855 }
 0x76d   : > { %v1461_v43 = vpop.xlane.xlu0 %1460  ;;  %v1243_v44 = vsel %vm1075_vm2, %v4856_v42, 0.0 }
 0x76e   : > { %v1462_v45 = vsub.f32 %v1458_v28, %v1461_v43  ;;  %1244 = vadd.xlane.f32.xlu0 %v1243_v44 }
 0x770   : > { %v1463_v46 = vmul.f32 1.442695, %v1462_v45 }
 0x772   : > { %4857 = vpow2.f32 %v1463_v46 }
 0x773   : > { %4859 = vpow2.f32 %v1352_v51 }
 0x777   : > { %1136 = vrot.lane.b32.xlu1 %v5259_v55, %s5966_s27  ;;  %s6034_s27 = smov 80  }
 0x77c   : > { %v4858_v47 = vpop.eup %4857 }
 0x77d   : > { %v1465_v48 = vsel %vm1075_vm2, %v4858_v47, 0.0  ;;  %v4860_v52 = vpop.eup %4859 }
 0x77e   : > { %1466 = vadd.xlane.f32.xlu0 %v1465_v48  ;;  %v1354_v53 = vsel %vm1075_vm2, %v4860_v52, 0.0 }
 0x794   : > { %1249 = vrot.lane.b32.xlu0 %v5259_v55, %s5965_s29  ;;  %s4321_s29 = sshll.u32 %s5199_s10, 4 }
 0x79b   : > { %1355 = vadd.xlane.f32.xlu1 %v1354_v53 }
 0x7ac   : > { %1360 = vrot.lane.b32.xlu1 %v5259_v55, %s5964_s6  ;;  %s5969_s6 = smov 24  }
 0x7b0   : > { %1471 = vrot.lane.b32.xlu1 %v5259_v55, %s5963_s7  ;;  %s6029_s7 = smov 120  }
 0x7f3   : > { %v1132_v54 = vpop.xlane.xlu1 %1131 }
 0x7f4   : > { %4861 = vrcp.f32 %v1132_v54  ;;  %v4824_v54 = vld [vmem:[%s5934_s15 + $0x8] sm:$0xff]  }
 0x7f7   : > { %v1137_v56 = vpop.permute.xlu1 %1136 }
 0x7f8   : > { %v1143_v57 = vsel %vm1141_vm4, %v1137_v56, 0 }
 0x7f9   : > { %4459 = vmatpush3.bf16.msra.mxu1 %v1143_v57 }
 0x7fa   : > { %4470 = vmatprep.subr.bf16.mxu1 %v4995_v4 }
 0x7fb   : > { %v1245_v59 = vpop.xlane.xlu0 %1244 }
 0x7fc   : > { %4863 = vrcp.f32 %v1245_v59  ;;  %v4825_v59 = vld [vmem:[%s5933_s14] sm:$0xff]  }
 0x7fe   : > { %v4862_v58 = vpop.eup %4861 }
 0x7ff   : > { %v1134_v60 = vmul.f32 %v4862_v58, %v4854_v39 }
 0x801   : > { %v1135_v61 = vpack.c.bf16 %v1134_v60, %v1134_v60  ;;  %v4826_v60 = vld [vmem:[%s5933_s14 + $0x8] sm:$0xff]  }
 0x803   : > { %4461 = vmatmul.mubr.msk.bf16.vlgmr.msra.gmra.mrb[4].mxu1 %vm1075_vm2, %v1135_v61 }
 0x804   : > { %4472 = vmatprep.mubr.msk.bf16.mxu1 %vm4996_vm0, %v4995_v4 }
 0x806   : > { %v4864_v55 = vpop.eup %4863 }
 0x807   : > { %v1247_v63 = vmul.f32 %v4864_v55, %v4856_v42 }
 0x809   : > { %v1248_v2 = vpack.c.bf16 %v1247_v63, %v1247_v63 }
 0x80b   : > { %v1467_v62 = vpop.xlane.xlu0 %1466 }
 0x80f   : > { %v1250_v0 = vpop.permute.xlu0 %1249 }
 0x810   : > { %v1255_v1 = vsel %vm1141_vm4, %v1250_v0, 0  ;;  %v4187_v0 = vld [vmem:[%s5931_s12] ss:$0 sm:$0xff] }
 0x811   : > { %4471 = vmatpush3.bf16.msra.mxu1 %v1255_v1 }
 0x812   : > { %4482 = vmatprep.subr.bf16.mxu1 %v4995_v4 }
 0x814   : > { %4473 = vmatmul.mubr.msk.bf16.vlgmr.msra.gmra.mrb[8].mxu1 %vm1075_vm2, %v1248_v2  ;;  %v4188_v2 = vld [vmem:[%s6028_s13] ss:$0 sm:$0xff]  ;;  %s6043_s13 = smov 64  }
 0x815   : > { %4484 = vmatprep.mubr.msk.bf16.mxu1 %vm4996_vm0, %v4995_v4 }
 0x828   : > { %v1356_v3 = vpop.xlane.xlu1 %1355 }
 0x829   : > { %4865 = vrcp.f32 %v1356_v3 }
 0x82a   : > { %4867 = vrcp.f32 %v1467_v62 }
 0x82c   : > { %v1361_v5 = vpop.permute.xlu1 %1360 }
 0x82d   : > { %v1366_v6 = vsel %vm1141_vm4, %v1361_v5, 0 }
 0x82e   : > { %4483 = vmatpush3.bf16.msra.mxu1 %v1366_v6 }
 0x82f   : > { %4494 = vmatprep.subr.bf16.mxu1 %v4995_v4 }
 0x830   : > { %v1472_v10 = vpop.permute.xlu1 %1471 }
 0x831   : > { %v1477_v13 = vsel %vm1141_vm4, %v1472_v10, 0 }
 0x833   : > { %v4866_v7 = vpop.eup %4865 }
 0x834   : > { %v1358_v9 = vmul.f32 %v4866_v7, %v4860_v52  ;;  %v4868_v12 = vpop.eup %4867 }
 0x835   : > { %v1469_v14 = vmul.f32 %v4868_v12, %v4858_v47  ;;  %v4823_v47 = vld [vmem:[%s5934_s15] sm:$0xff]  }
 0x836   : > { %v1359_v11 = vpack.c.bf16 %v1358_v9, %v1358_v9 }
 0x837   : > { %v1470_v15 = vpack.c.bf16 %v1469_v14, %v1469_v14 }
 0x838   : > { %4485 = vmatmul.mubr.msk.bf16.vlgmr.msra.gmra.mrb[12].mxu1 %vm1075_vm2, %v1359_v11 }
 0x839   : > { %4495 = vmatpush3.bf16.msra.mxu1 %v1477_v13  ;;  %4496 = vmatprep.mubr.msk.bf16.mxu1 %vm4996_vm0, %v4995_v4 }
 0x83a   : > { %4508 = vmatprep.subr.bf16.mxu1 %v4995_v4 }
 0x840   : > { %4497 = vmatmul.mubr.msk.bf16.vlgmr.msra.gmra.mrb[16].mxu1 %vm1075_vm2, %v1470_v15 }
 0x841   : > { %4512 = vmatprep.mubr.msk.bf16.mxu1 %vm4996_vm0, %v4995_v4  ;;  %4509 = vmatpush3.bf16.msra.mxu1 %v4825_v59 }
 0x842   : > { %4510 = vmatprep.subr.bf16.mxu1 %v4995_v4 }
 0x845   : > { %4511 = vmatpush3.bf16.msra.mxu1 %v4826_v60 }
 0x846   : > { %4524 = vmatprep.subr.bf16.mxu1 %v4995_v4 }
 0x8d6   : > { %v1179_v16 = vpop.f32.mrb[4].mxu1 }
 0x8d7   : > { %v4462_v17 = vpop.f32.mrb[5].mxu1 }
 0x8d8   : > { %v1182_v18 = vpop.f32.mrb[6].mxu1 }
 0x8d9   : > { %v4463_v19 = vpop.f32.mrb[7].mxu1 }
 0x8e7   : > { %v1291_v20 = vpop.f32.mrb[8].mxu1 }
 0x8e8   : > { %1520 = vrot.lane.b32.xlu0 %v1291_v20, %s5973_s1  ;;  %v4474_v21 = vpop.f32.mrb[9].mxu1 }
 0x8e9   : > { %v1294_v22 = vpop.f32.mrb[10].mxu1 }
 0x8ea   : > { %v4475_v23 = vpop.f32.mrb[11].mxu1 }
 0x90b   : > { %v1402_v26 = vpop.f32.mrb[12].mxu1 }
 0x90c   : > { %1524 = vrot.lane.b32.xlu1 %v1402_v26, %s5971_s9  ;;  %v4486_v27 = vpop.f32.mrb[13].mxu1  ;;  %s6027_s9 = sld [smem:[#allocation18_spill]] }
 0x90d   : > { %v1405_v28 = vpop.f32.mrb[14].mxu1 }
 0x90e   : > { %v4487_v29 = vpop.f32.mrb[15].mxu1 }
 0x910   : > { %1550 = vrot.lane.b32.xlu1 %v5251_v50, %s4998_s5  ;;  %s6030_s5 = smov 112  }
 0x912   : > { %s837_s1 = scalar_lea.vmem %s6027_s9, %s4321_s29  ;;  %s6032_s9 = sld [smem:[#allocation20_spill]] }
 0x913   : > { %v1513_v30 = vpop.f32.mrb[16].mxu1  ;;  %v847_v56 = vld [vmem:[%s837_s1] sm:$0xff]  ;;  %v848_v57 = vld [vmem:[%s837_s1 + $0x8] sm:$0xff]  ;;  %s6035_s29 = smov 72  }
 0x914   : > { %1528 = vrot.lane.b32.xlu0 %v1513_v30, %s5969_s6  ;;  %v4498_v31 = vpop.f32.mrb[17].mxu1  ;;  %v5376_v58 = vpack.c.bf16 %v848_v57, %v847_v56  ;;  %s6031_s6 = smov 104  }
 0x915   : > { %v1516_v32 = vpop.f32.mrb[18].mxu1 }
 0x916   : > { %v4499_v33 = vpop.f32.mrb[19].mxu1 }
 0x918   : > { %s844_s1 = scalar_lea.vmem %s6032_s9, %s5199_s10  ;;  %s6033_s10 = smov 96  }
 0x919   : > { %v5440_v29 = vld [vmem:[%s844_s1] ss:$0 sm:$0xff]  ;;  %s6037_s9 = smov 88   ;;  %s5472_s1 = scalar_lea.vmem [#allocation4], %s4160_s30 }
 0x91a   : > { %vm1799_vm7 = vcmp.gt.f32.partialorder %v5440_v29, 0.5  ;;  %6038 = sst [smem:[#allocation16_spill]] %s5472_s1  ;;  %s6046_s30 = smov 40  }
 0x95a   : > { %v1521_v34 = vpop.permute.xlu0 %1520 }
 0x95b   : > { %v1531_v36 = vsel %vm1075_vm2, %v1179_v16, %v1521_v34 }
 0x97e   : > { %v1525_v35 = vpop.permute.xlu1 %1524 }
 0x97f   : > { %v1533_v37 = vsel %vm1532_vm5, %v1531_v36, %v1525_v35 }
 0x982   : > { %v1551_v50 = vpop.permute.xlu1 %1550 }
 0x986   : > { %v1529_v38 = vpop.permute.xlu0 %1528 }
 0x987   : > { %v1535_v39 = vsel %vm1534_vm6, %v1533_v37, %v1529_v38 }
 0x988   : > { %v1536_v40 = vpack.c.bf16 %v1535_v39, %v1535_v39 }
 0x98a   : > { %4505 = vmatmul.mubr.msk.bf16.vlgmr.msra.gmra.mrb[20].mxu0 %vm903_vm1, %v1536_v40 }
 0x98b   : > { %4520 = vmatprep.mubr.msk.bf16.mxu0 %vm4996_vm0, %v4995_v4  ;;  %4517 = vmatpush3.bf16.msra.mxu0 %v4823_v47 }
 0x98c   : > { %4518 = vmatprep.subr.bf16.mxu0 %v4995_v4 }
 0x98f   : > { %4519 = vmatpush3.bf16.msra.mxu0 %v4824_v54 }
 0x990   : > { %4530 = vmatprep.subr.bf16.mxu0 %v4995_v4 }
 0x992   : > { %4521 = vmatmul.mubr.msk.bf16.vlgmr.msra.gmra.mrb[24].mxu0 %vm903_vm1, %v5376_v58 }
 0x993   : > { %4532 = vmatprep.mubr.msk.bf16.mxu0 %vm4996_vm0, %v4995_v4 }
 0xa5d   : > { %v1590_v41 = vpop.f32.mrb[20].mxu0 }
 0xa5e   : > { %v1591_v42 = vadd.f32 %v1590_v41, %v1551_v50  ;;  %v4506_v43 = vpop.f32.mrb[21].mxu0 }
 0xa5f   : > { %v1593_v44 = vpop.f32.mrb[22].mxu0 }
 0xa60   : > { %v4507_v45 = vpop.f32.mrb[23].mxu0  ;;  %v1598_v46 = vsel %vm903_vm1, %v1591_v42, 0.0 }
 0xa61   : > { %1599 = vadd.xlane.f32.xlu0 %v1598_v46 }
 0xa65   : > { %v1740_v7 = vpop.f32.mrb[24].mxu0 }
 0xa66   : > { %v4522_v9 = vpop.f32.mrb[25].mxu0 }
 0xa67   : > { %v1743_v10 = vpop.f32.mrb[26].mxu0 }
 0xa68   : > { %v5404_v11 = vpack.c.bf16 %v1743_v10, %v1740_v7  ;;  %v4523_v12 = vpop.f32.mrb[27].mxu0 }
 0xa6a   : > { %v1757_v13 = vsel %vm1075_vm2, %v5404_v11, 0 }
 0xa77   : > { %1864 = vrot.lane.b32.xlu0 %v5404_v11, %s6029_s7 }
 0xa7b   : > { %1975 = vrot.lane.b32.xlu0 %v5404_v11, %s6030_s5 }
 0xa7f   : > { %2086 = vrot.lane.b32.xlu0 %v5404_v11, %s6031_s6 }
 0xaee   : > { %v1600_v48 = vpop.xlane.xlu0 %1599 }
 0xaef   : > { %v1601_v49 = vmul.f32 0.03125, %v1600_v48 }
 0xaf1   : > { %v1602_v51 = vsub.f32 %v1591_v42, %v1601_v49 }
 0xaf2   : > { %v1865_v18 = vpop.permute.xlu0 %1864 }
 0xaf3   : > { %v1603_v52 = vmul.f32 %v1602_v51, %v1602_v51  ;;  %v1870_v21 = vsel %vm1075_vm2, %v1865_v18, 0 }
 0xaf5   : > { %v1604_v53 = vsel %vm903_vm1, %v1603_v52, 0.0 }
 0xaf6   : > { %1605 = vadd.xlane.f32.xlu1 %v1604_v53  ;;  %v1976_v22 = vpop.permute.xlu0 %1975 }
 0xaf7   : > { %v1981_v24 = vsel %vm1075_vm2, %v1976_v22, 0 }
 0xafa   : > { %v2087_v25 = vpop.permute.xlu0 %2086 }
 0xafb   : > { %v2092_v27 = vsel %vm1075_vm2, %v2087_v25, 0 }
 0xb83   : > { %v1606_v61 = vpop.xlane.xlu1 %1605 }
 0xb84   : > { %v1607_v55 = vmul.f32 0.03125, %v1606_v61 }
 0xb86   : > { %v1608_v62 = vadd.f32 1e-06, %v1607_v55 }
 0xb88   : > { %4869 = vrsqrt.f32 %v1608_v62 }
 0xb92   : > { %v4870_v63 = vpop.eup %4869 }
 0xb93   : > { %v1610_v1 = vmul.f32 %v4870_v63, %v1602_v51 }
 0xb95   : > { %v1617_v3 = vmul.f32 %v4187_v0, %v1610_v1 }
 0xb97   : > { %v5397_v5 = vadd.f32 %v4188_v2, %v1617_v3 }
 0xb99   : > { %v1629_v6 = vpack.c.bf16 %v5397_v5, %v5397_v5 }
 0xb9b   : > { %4513 = vmatmul.mubr.msk.bf16.vlgmr.msra.gmra.mrb[20].mxu1 %vm903_vm1, %v1629_v6 }
 0xb9c   : > { %4526 = vmatprep.mubr.msk.bf16.mxu1 %vm4996_vm0, %v4995_v4  ;;  %4525 = vmatpush3.bf16.xpose.msra.mxu1 %v1757_v13 }
 0xb9d   : > { %4536 = vmatprep.subr.bf16.mxu1 %v4995_v4 }
 0xc6e   : > { %v1679_v14 = vpop.f32.mrb[20].mxu1 }
 0xc6f   : > { %v1685_v15 = vmul.f32 0.35355338, %v1679_v14  ;;  %v4514_v16 = vpop.f32.mrb[21].mxu1 }
 0xc70   : > { %v1682_v17 = vpop.f32.mrb[22].mxu1 }
 0xc71   : > { %v1751_v19 = vpack.c.bf16 %v1685_v15, %v1685_v15  ;;  %v4515_v20 = vpop.f32.mrb[23].mxu1 }
 0xc73   : > { %1862 = vrot.lane.b32.xlu1 %v1751_v19, %s6029_s7  ;;  %4527 = vmatmul.mubr.msk.bf16.vlgmr.msra.gmra.mrb[24].mxu1 %vm1075_vm2, %v1751_v19 }
 0xc74   : > { %4537 = vmatpush3.bf16.xpose.msra.mxu1 %v1870_v21  ;;  %4538 = vmatprep.mubr.msk.bf16.mxu1 %vm4996_vm0, %v4995_v4 }
 0xc75   : > { %4548 = vmatprep.subr.bf16.mxu1 %v4995_v4 }
 0xc77   : > { %1973 = vrot.lane.b32.xlu1 %v1751_v19, %s6030_s5 }
 0xc7b   : > { %2084 = vrot.lane.b32.xlu1 %v1751_v19, %s6031_s6 }
 0xce5   : > { %v1863_v23 = vpop.permute.xlu1 %1862 }
 0xce6   : > { %4539 = vmatmul.mubr.msk.bf16.vlgmr.msra.gmra.mrb[28].mxu1 %vm1075_vm2, %v1863_v23 }
 0xce7   : > { %4549 = vmatpush3.bf16.xpose.msra.mxu1 %v1981_v24  ;;  %4550 = vmatprep.mubr.msk.bf16.mxu1 %vm4996_vm0, %v4995_v4 }
 0xce8   : > { %4560 = vmatprep.subr.bf16.mxu1 %v4995_v4 }
 0xce9   : > { %v1974_v26 = vpop.permute.xlu1 %1973 }
 0xced   : > { %v2085_v28 = vpop.permute.xlu1 %2084 }
 0xcee   : > { %4551 = vmatmul.mubr.msk.bf16.vlgmr.msra.gmra.mrb[32].mxu1 %vm1075_vm2, %v1974_v26 }
 0xcef   : > { %4561 = vmatpush3.bf16.xpose.msra.mxu1 %v2092_v27  ;;  %4562 = vmatprep.mubr.msk.bf16.mxu1 %vm4996_vm0, %v4995_v4 }
 0xcf0   : > { %4572 = vmatprep.subr.bf16.mxu1 %v4995_v4 }
 0xcf6   : > { %4563 = vmatmul.mubr.msk.bf16.vlgmr.msra.gmra.mrb[36].mxu1 %vm1075_vm2, %v2085_v28 }
 0xcf7   : > { %4576 = vmatprep.mubr.msk.bf16.mxu1 %vm4996_vm0, %v4995_v4 }
 0xd46   : > { %v1793_v30 = vpop.f32.mrb[24].mxu1 }
 0xd47   : > { %v1800_v31 = vsel %vm1799_vm7, %v1793_v30, -1e+09  ;;  %v4528_v32 = vpop.f32.mrb[25].mxu1 }
 0xd48   : > { %v1796_v33 = vpop.f32.mrb[26].mxu1  ;;  %v1801_v34 = vsel %vm1532_vm5, %v1800_v31, -inf }
 0xd49   : > { %1802 = vmax.xlane.f32.xlu0 %v1801_v34  ;;  %v4529_v35 = vpop.f32.mrb[27].mxu1 }
 0xdb9   : > { %v1906_v36 = vpop.f32.mrb[28].mxu1 }
 0xdba   : > { %v1912_v37 = vsel %vm1799_vm7, %v1906_v36, -1e+09  ;;  %v4540_v38 = vpop.f32.mrb[29].mxu1 }
 0xdbb   : > { %v1909_v39 = vpop.f32.mrb[30].mxu1  ;;  %v1913_v40 = vsel %vm1532_vm5, %v1912_v37, -inf }
 0xdbc   : > { %1914 = vmax.xlane.f32.xlu1 %v1913_v40  ;;  %v4541_v50 = vpop.f32.mrb[31].mxu1  ;;  %v4827_v39 = vld [vmem:[%s6039_s16] sm:$0xff]  }
 0xdbd   : > { %4573 = vmatpush3.bf16.msra.mxu1 %v4827_v39 }
 0xdbe   : > { %4574 = vmatprep.subr.bf16.mxu1 %v4995_v4 }
 0xdc1   : > { %v2017_v41 = vpop.f32.mrb[32].mxu1 }
 0xdc2   : > { %v2023_v42 = vsel %vm1799_vm7, %v2017_v41, -1e+09  ;;  %v4552_v43 = vpop.f32.mrb[33].mxu1 }
 0xdc3   : > { %v2020_v44 = vpop.f32.mrb[34].mxu1  ;;  %v2024_v45 = vsel %vm1532_vm5, %v2023_v42, -inf  ;;  %v4828_v43 = vld [vmem:[%s6039_s16 + $0x8] sm:$0xff]  }
 0xdc4   : > { %2025 = vmax.xlane.f32.xlu0 %v2024_v45  ;;  %v4553_v46 = vpop.f32.mrb[35].mxu1  ;;  %4575 = vmatpush3.bf16.msra.mxu1 %v4828_v43 }
 0xdc5   : > { %4588 = vmatprep.subr.bf16.mxu1 %v4995_v4 }
 0xdc9   : > { %v2128_v47 = vpop.f32.mrb[36].mxu1 }
 0xdca   : > { %v2134_v48 = vsel %vm1799_vm7, %v2128_v47, -1e+09  ;;  %v4564_v49 = vpop.f32.mrb[37].mxu1 }
 0xdcb   : > { %v2131_v51 = vpop.f32.mrb[38].mxu1  ;;  %v2135_v52 = vsel %vm1532_vm5, %v2134_v48, -inf }
 0xdcc   : > { %2136 = vmax.xlane.f32.xlu0 %v2135_v52  ;;  %v4565_v53 = vpop.f32.mrb[39].mxu1 }
 0xdd6   : > { %v1803_v54 = vpop.xlane.xlu0 %1802 }
 0xdd7   : > { %v1804_v56 = vsub.f32 %v1800_v31, %v1803_v54 }
 0xdd9   : > { %v1805_v57 = vmul.f32 1.442695, %v1804_v56 }
 0xddb   : > { %4871 = vpow2.f32 %v1805_v57 }
 0xde5   : > { %v4872_v59 = vpop.eup %4871 }
 0xde6   : > { %v1807_v60 = vsel %vm1532_vm5, %v4872_v59, 0.0 }
 0xde7   : > { %1808 = vadd.xlane.f32.xlu1 %v1807_v60 }
 0xdf8   : > { %1815 = vrot.lane.b32.xlu1 %v5404_v11, %s6033_s10 }
 0xe49   : > { %v1915_v61 = vpop.xlane.xlu1 %1914 }
 0xe4a   : > { %v1916_v55 = vsub.f32 %v1912_v37, %v1915_v61 }
 0xe4c   : > { %v1917_v62 = vmul.f32 1.442695, %v1916_v55 }
 0xe4e   : > { %4873 = vpow2.f32 %v1917_v62 }
 0xe51   : > { %v2026_v63 = vpop.xlane.xlu0 %2025 }
 0xe52   : > { %v2027_v0 = vsub.f32 %v2023_v42, %v2026_v63 }
 0xe54   : > { %v2028_v1 = vmul.f32 1.442695, %v2027_v0 }
 0xe56   : > { %4875 = vpow2.f32 %v2028_v1 }
 0xe58   : > { %v4874_v2 = vpop.eup %4873 }
 0xe59   : > { %v2137_v3 = vpop.xlane.xlu0 %2136  ;;  %v1919_v6 = vsel %vm1532_vm5, %v4874_v2, 0.0 }
 0xe5a   : > { %v2138_v7 = vsub.f32 %v2134_v48, %v2137_v3  ;;  %1920 = vadd.xlane.f32.xlu0 %v1919_v6 }
 0xe5c   : > { %v2139_v9 = vmul.f32 1.442695, %v2138_v7 }
 0xe5e   : > { %4877 = vpow2.f32 %v2139_v9 }
 0xe60   : > { %v4876_v10 = vpop.eup %4875 }
 0xe61   : > { %v2030_v12 = vsel %vm1532_vm5, %v4876_v10, 0.0 }
 0xe62   : > { %2031 = vadd.xlane.f32.xlu1 %v2030_v12  ;;  %v4829_v12 = vld [vmem:[%s5938_s19] sm:$0xff]  }
 0xe68   : > { %v4878_v13 = vpop.eup %4877 }
 0xe69   : > { %v2141_v14 = vsel %vm1532_vm5, %v4878_v13, 0.0 }
 0xe6a   : > { %2142 = vadd.xlane.f32.xlu0 %v2141_v14  ;;  %v4832_v14 = vld [vmem:[%s5940_s21 + $0x8] sm:$0xff]  }
 0xe73   : > { %2038 = vrot.lane.b32.xlu1 %v5404_v11, %s6034_s27 }
 0xe74   : > { %v1809_v15 = vpop.xlane.xlu1 %1808 }
 0xe75   : > { %4879 = vrcp.f32 %v1809_v15 }
 0xe77   : > { %2149 = vrot.lane.b32.xlu1 %v5404_v11, %s6035_s29 }
 0xe78   : > { %v1816_v16 = vpop.permute.xlu1 %1815 }
 0xe79   : > { %4531 = vmatpush3.bf16.msra.mxu0 %v1816_v16 }
 0xe7a   : > { %4542 = vmatprep.subr.bf16.mxu0 %v4995_v4 }
 0xe7f   : > { %v4880_v17 = vpop.eup %4879 }
 0xe80   : > { %v1811_v18 = vmul.f32 %v4880_v17, %v4872_v59  ;;  %1927 = vrot.lane.b32.xlu0 %v5404_v11, %s6037_s9 }
 0xe82   : > { %v1813_v19 = vpack.c.bf16 %v1811_v18, %v1811_v18  ;;  %1812 = vst.msk [vmem:[%s5472_s1] sm:$0xff] %vm1532_vm5, %v1811_v18 }
 0xe84   : > { %4533 = vmatmul.mubr.msk.bf16.vlgmr.msra.gmra.mrb[28].mxu0 %vm1532_vm5, %v1813_v19  ;;  %v4209_v19 = vld [vmem:[%s5936_s17] ss:$0 sm:$0xff] }
 0xe85   : > { %4544 = vmatprep.mubr.msk.bf16.mxu0 %vm4996_vm0, %v4995_v4 }
 0xee7   : > { %v1921_v20 = vpop.xlane.xlu0 %1920 }
 0xee8   : > { %4881 = vrcp.f32 %v1921_v20 }
 0xeef   : > { %v2032_v21 = vpop.xlane.xlu1 %2031 }
 0xef0   : > { %4883 = vrcp.f32 %v2032_v21  ;;  %v4210_v21 = vld [vmem:[%s5937_s18] ss:$0 sm:$0xff] }
 0xef2   : > { %v4882_v22 = vpop.eup %4881 }
 0xef3   : > { %v1923_v23 = vmul.f32 %v4882_v22, %v4874_v2  ;;  %v2039_v28 = vpop.permute.xlu1 %2038 }
 0xef5   : > { %4198 = vst.msk [vmem:[%s5472_s1 + $0x8] sm:$0xff] %vm1532_vm5, %v1923_v23  ;;  %v1926_v27 = vpack.c.bf16 %v1923_v23, %v1923_v23 }
 0xef7   : > { %v2143_v11 = vpop.xlane.xlu0 %2142  ;;  %v2150_v33 = vpop.permute.xlu1 %2149 }
 0xef8   : > { %4885 = vrcp.f32 %v2143_v11 }
 0xefa   : > { %v4884_v24 = vpop.eup %4883 }
 0xefb   : > { %v2034_v25 = vmul.f32 %v4884_v24, %v4876_v10  ;;  %v1928_v26 = vpop.permute.xlu0 %1927  ;;  %v4833_v24 = vld [vmem:[%s5940_s21 + $0x10] sm:$0xff]  }
 0xefc   : > { %4543 = vmatpush3.bf16.msra.mxu0 %v1928_v26  ;;  %v4211_v26 = vld [vmem:[%s5939_s20] ss:$0 sm:$0xff] }
 0xefd   : > { %4554 = vmatprep.subr.bf16.mxu0 %v4995_v4  ;;  %4201 = vst.msk [vmem:[%s5472_s1 + $0x10] sm:$0xff] %vm1532_vm5, %v2034_v25  ;;  %v2037_v32 = vpack.c.bf16 %v2034_v25, %v2034_v25  ;;  %v4834_v25 = vld [vmem:[%s5940_s21 + $0x18] sm:$0xff]  }
 0xeff   : > { %4545 = vmatmul.mubr.msk.bf16.vlgmr.msra.gmra.mrb[32].mxu0 %vm1532_vm5, %v1926_v27 }
 0xf00   : > { %4555 = vmatpush3.bf16.msra.mxu0 %v2039_v28  ;;  %4556 = vmatprep.mubr.msk.bf16.mxu0 %vm4996_vm0, %v4995_v4 }
 0xf01   : > { %4566 = vmatprep.subr.bf16.mxu0 %v4995_v4 }
 0xf02   : > { %v4886_v30 = vpop.eup %4885 }
 0xf03   : > { %v2145_v31 = vmul.f32 %v4886_v30, %v4878_v13  ;;  %v4831_v13 = vld [vmem:[%s5940_s21] sm:$0xff]  }
 0xf05   : > { %4204 = vst.msk [vmem:[%s5472_s1 + $0x18] sm:$0xff] %vm1532_vm5, %v2145_v31  ;;  %v2148_v34 = vpack.c.bf16 %v2145_v31, %v2145_v31  ;;  %s6044_s1 = smov 56  }
 0xf07   : > { %4557 = vmatmul.mubr.msk.bf16.vlgmr.msra.gmra.mrb[36].mxu0 %vm1532_vm5, %v2037_v32 }
 0xf08   : > { %4567 = vmatpush3.bf16.msra.mxu0 %v2150_v33  ;;  %4568 = vmatprep.mubr.msk.bf16.mxu0 %vm4996_vm0, %v4995_v4 }
 0xf09   : > { %4580 = vmatprep.subr.bf16.mxu0 %v4995_v4 }
 0xf0f   : > { %4569 = vmatmul.mubr.msk.bf16.vlgmr.msra.gmra.mrb[40].mxu0 %vm1532_vm5, %v2148_v34 }
 0xf10   : > { %4584 = vmatprep.mubr.msk.bf16.mxu0 %vm4996_vm0, %v4995_v4  ;;  %4581 = vmatpush3.bf16.msra.mxu0 %v4829_v12 }
 0xf11   : > { %4582 = vmatprep.subr.bf16.mxu0 %v4995_v4 }
 0xf57   : > { %v1855_v35 = vpop.f32.mrb[28].mxu0 }
 0xf58   : > { %v4534_v36 = vpop.f32.mrb[29].mxu0 }
 0xf59   : > { %v1858_v37 = vpop.f32.mrb[30].mxu0 }
 0xf5a   : > { %v4535_v38 = vpop.f32.mrb[31].mxu0 }
 0xfd2   : > { %v1967_v40 = vpop.f32.mrb[32].mxu0 }
 0xfd3   : > { %2196 = vrot.lane.b32.xlu0 %v1967_v40, %s6040_s28  ;;  %v4546_v50 = vpop.f32.mrb[33].mxu0 }
 0xfd4   : > { %v1970_v41 = vpop.f32.mrb[34].mxu0 }
 0xfd5   : > { %v4547_v42 = vpop.f32.mrb[35].mxu0 }
 0xfda   : > { %v2078_v44 = vpop.f32.mrb[36].mxu0 }
 0xfdb   : > { %2200 = vrot.lane.b32.xlu1 %v2078_v44, %s6041_s2  ;;  %v4558_v45 = vpop.f32.mrb[37].mxu0 }
 0xfdc   : > { %v2081_v46 = vpop.f32.mrb[38].mxu0 }
 0xfdd   : > { %v4559_v47 = vpop.f32.mrb[39].mxu0 }
 0xfde   : > { %v4835_v47 = vld [vmem:[%s6024_s0 + $0x10] sm:$0xff]  }
 0xfe2   : > { %v2189_v48 = vpop.f32.mrb[40].mxu0 }
 0xfe3   : > { %2204 = vrot.lane.b32.xlu0 %v2189_v48, %s6042_s3  ;;  %v4570_v49 = vpop.f32.mrb[41].mxu0  ;;  %v4836_v48 = vld [vmem:[%s6024_s0 + $0x18] sm:$0xff]  }
 0xfe4   : > { %v2192_v51 = vpop.f32.mrb[42].mxu0 }
 0xfe5   : > { %v4571_v52 = vpop.f32.mrb[43].mxu0 }
0x1045   : > { %v2197_v53 = vpop.permute.xlu0 %2196 }
0x1046   : > { %v2207_v56 = vsel %vm1075_vm2, %v1855_v35, %v2197_v53  ;;  %v4215_v35 = vld [vmem:[%s5941_s22] ss:$0 sm:$0xff] }
0x104d   : > { %v2201_v54 = vpop.permute.xlu1 %2200 }
0x104e   : > { %v2208_v57 = vsel %vm1532_vm5, %v2207_v56, %v2201_v54  ;;  %v4221_v54 = vld [vmem:[%s5942_s23] ss:$0 sm:$0xff] }
0x1055   : > { %v2205_v59 = vpop.permute.xlu0 %2204 }
0x1056   : > { %v2209_v60 = vsel %vm1534_vm6, %v2208_v57, %v2205_v59  ;;  %v4222_v57 = vld [vmem:[%s5943_s24] ss:$0 sm:$0xff] }
0x1057   : > { %v2210_v61 = vpack.c.bf16 %v2209_v60, %v2209_v60 }
0x1059   : > { %4577 = vmatmul.mubr.msk.bf16.vlgmr.msra.gmra.mrb[40].mxu1 %vm903_vm1, %v2210_v61 }
0x105a   : > { %4596 = vmatprep.mubr.msk.bf16.mxu1 %vm4996_vm0, %v4995_v4  ;;  %4589 = vmatpush3.bf16.msra.mxu1 %v4831_v13 }
0x105b   : > { %4590 = vmatprep.subr.bf16.mxu1 %v4995_v4 }
0x105e   : > { %4591 = vmatpush3.bf16.msra.mxu1 %v4832_v14 }
0x105f   : > { %4592 = vmatprep.subr.bf16.mxu1 %v4995_v4 }
0x1062   : > { %4593 = vmatpush3.bf16.msra.mxu1 %v4833_v24 }
0x1063   : > { %4594 = vmatprep.subr.bf16.mxu1 %v4995_v4 }
0x1066   : > { %4595 = vmatpush3.bf16.msra.mxu1 %v4834_v25 }
0x1067   : > { %4614 = vmatprep.subr.bf16.mxu1 %v4995_v4 }
0x112c   : > { %v2260_v55 = vpop.f32.mrb[40].mxu1 }
0x112d   : > { %v2261_v62 = vadd.f32 %v2260_v55, %v5397_v5  ;;  %v4578_v63 = vpop.f32.mrb[41].mxu1  ;;  %v4830_v5 = vld [vmem:[%s5938_s19 + $0x8] sm:$0xff]  }
0x112e   : > { %v2263_v0 = vpop.f32.mrb[42].mxu1  ;;  %4583 = vmatpush3.bf16.msra.mxu0 %v4830_v5 }
0x112f   : > { %v4579_v1 = vpop.f32.mrb[43].mxu1  ;;  %v2268_v2 = vsel %vm903_vm1, %v2261_v62, 0.0  ;;  %4600 = vmatprep.subr.bf16.mxu0 %v4995_v4 }
0x1130   : > { %2269 = vadd.xlane.f32.xlu1 %v2268_v2 }
0x11bd   : > { %v2270_v3 = vpop.xlane.xlu1 %2269 }
0x11be   : > { %v2271_v6 = vmul.f32 0.03125, %v2270_v3 }
0x11c0   : > { %v2272_v7 = vsub.f32 %v2261_v62, %v2271_v6 }
0x11c2   : > { %v2273_v9 = vmul.f32 %v2272_v7, %v2272_v7 }
0x11c4   : > { %v2274_v10 = vsel %vm903_vm1, %v2273_v9, 0.0 }
0x11c5   : > { %2275 = vadd.xlane.f32.xlu0 %v2274_v10 }
0x1252   : > { %v2276_v15 = vpop.xlane.xlu0 %2275 }
0x1253   : > { %v2277_v16 = vmul.f32 0.03125, %v2276_v15 }
0x1255   : > { %v2278_v17 = vadd.f32 1e-06, %v2277_v16 }
0x1257   : > { %4887 = vrsqrt.f32 %v2278_v17 }
0x1261   : > { %v4888_v18 = vpop.eup %4887 }
0x1262   : > { %v2280_v20 = vmul.f32 %v4888_v18, %v2272_v7 }
0x1264   : > { %v2287_v22 = vmul.f32 %v4209_v19, %v2280_v20 }
0x1266   : > { %v2294_v23 = vadd.f32 %v4210_v21, %v2287_v22 }
0x1268   : > { %v2299_v11 = vpack.c.bf16 %v2294_v23, %v2294_v23 }
0x126a   : > { %4585 = vmatmul.mubr.msk.bf16.vlgmr.msra.gmra.mrb[44].mxu0 %vm903_vm1, %v2299_v11 }
0x126b   : > { %4604 = vmatprep.mubr.msk.bf16.mxu0 %vm4996_vm0, %v4995_v4  ;;  %4601 = vmatpush3.bf16.msra.mxu0 %v4835_v47 }
0x126c   : > { %4602 = vmatprep.subr.bf16.mxu0 %v4995_v4 }
0x126f   : > { %4603 = vmatpush3.bf16.msra.mxu0 %v4836_v48 }
0x1270   : > { %4608 = vmatprep.subr.bf16.mxu0 %v4995_v4 }
0x133d   : > { %v2356_v27 = vpop.f32.mrb[44].mxu0 }
0x133e   : > { %v2357_v28 = vadd.f32 %v4211_v26, %v2356_v27  ;;  %v4586_v30 = vpop.f32.mrb[45].mxu0 }
0x133f   : > { %v2359_v31 = vpop.f32.mrb[46].mxu0 }
0x1340   : > { %v2362_v32 = vmax.f32 %v2357_v28, 0.0  ;;  %v4587_v33 = vpop.f32.mrb[47].mxu0 }
0x1342   : > { %v2371_v34 = vpack.c.bf16 %v2362_v32, %v2362_v32 }
0x1344   : > { %4597 = vmatmul.mubr.msk.bf16.vlgmr.msra.gmra.mrb[44].mxu1 %vm2403_vm8, %v2371_v34 }
0x1345   : > { %4616 = vmatprep.mubr.msk.bf16.mxu1 %vm4996_vm0, %v4995_v4 }
0x1417   : > { %v2441_v36 = vpop.f32.mrb[44].mxu1 }
0x1418   : > { %v2442_v37 = vadd.f32 %v4215_v35, %v2441_v36  ;;  %v4598_v38 = vpop.f32.mrb[45].mxu1 }
0x1419   : > { %v2444_v39 = vpop.f32.mrb[46].mxu1 }
0x141a   : > { %v4599_v40 = vpop.f32.mrb[47].mxu1  ;;  %v2447_v50 = vadd.f32 %v2442_v37, %v2294_v23 }
0x141c   : > { %v2450_v41 = vsel %vm903_vm1, %v2447_v50, 0.0 }
0x141d   : > { %2451 = vadd.xlane.f32.xlu0 %v2450_v41 }
0x14aa   : > { %v2452_v42 = vpop.xlane.xlu0 %2451 }
0x14ab   : > { %v2453_v43 = vmul.f32 0.03125, %v2452_v42 }
0x14ad   : > { %v2454_v44 = vsub.f32 %v2447_v50, %v2453_v43 }
0x14af   : > { %v2455_v45 = vmul.f32 %v2454_v44, %v2454_v44 }
0x14b1   : > { %v2456_v46 = vsel %vm903_vm1, %v2455_v45, 0.0 }
0x14b2   : > { %2457 = vadd.xlane.f32.xlu1 %v2456_v46 }
0x153f   : > { %v2458_v49 = vpop.xlane.xlu1 %2457 }
0x1540   : > { %v2459_v51 = vmul.f32 0.03125, %v2458_v49 }
0x1542   : > { %v2460_v52 = vadd.f32 1e-06, %v2459_v51 }
0x1544   : > { %4889 = vrsqrt.f32 %v2460_v52 }
0x154e   : > { %v4890_v53 = vpop.eup %4889 }
0x154f   : > { %v2462_v56 = vmul.f32 %v4890_v53, %v2454_v44 }
0x1551   : > { %v2469_v59 = vmul.f32 %v4221_v54, %v2462_v56 }
0x1553   : > { %v5575_v60 = vadd.f32 %v4222_v57, %v2469_v59 }
0x1555   : > { %v2482_v61 = vpack.c.bf16 %v5575_v60, %v5575_v60 }
0x1557   : > { %4605 = vmatmul.mubr.msk.bf16.vlgmr.msra.gmra.mrb[48].mxu0 %vm903_vm1, %v2482_v61 }
0x1558   : > { %4610 = vmatprep.mubr.msk.bf16.mxu0 %vm4996_vm0, %v4995_v4 }
0x162a   : > { %v2532_v55 = vpop.f32.mrb[48].mxu0 }
0x162b   : > { %v2538_v62 = vmul.f32 0.35355338, %v2532_v55  ;;  %v5582_v63 = vpack.c.bf16 %v2532_v55, %v2532_v55  ;;  %v4606_v0 = vpop.f32.mrb[49].mxu0 }
0x162c   : > { %v2535_v1 = vpop.f32.mrb[50].mxu0 }
0x162d   : > { %2659 = vrot.lane.b32.xlu1 %v5582_v63, %s6037_s9  ;;  %2547 = vrot.lane.b32.xlu0 %v5582_v63, %s6033_s10  ;;  %v4607_v2 = vpop.f32.mrb[51].mxu0  ;;  %v2544_v3 = vpack.c.bf16 %v2538_v62, %v2538_v62 }
0x1631   : > { %2770 = vrot.lane.b32.xlu0 %v5582_v63, %s6034_s27  ;;  %2657 = vrot.lane.b32.xlu1 %v2544_v3, %s6029_s7 }
0x1635   : > { %2881 = vrot.lane.b32.xlu0 %v5582_v63, %s6035_s29  ;;  %2768 = vrot.lane.b32.xlu1 %v2544_v3, %s6030_s5 }
0x1639   : > { %2879 = vrot.lane.b32.xlu1 %v2544_v3, %s6031_s6 }
0x169f   : > { %v2548_v6 = vpop.permute.xlu0 %2547  ;;  %v2660_v9 = vpop.permute.xlu1 %2659 }
0x16a0   : > { %v2553_v7 = vsel %vm1075_vm2, %v2548_v6, 0  ;;  %v2665_v10 = vsel %vm1075_vm2, %v2660_v9, 0 }
0x16a1   : > { %4609 = vmatpush3.bf16.xpose.msra.mxu0 %v2553_v7 }
0x16a2   : > { %4620 = vmatprep.subr.bf16.mxu0 %v4995_v4 }
0x16a3   : > { %v2771_v12 = vpop.permute.xlu0 %2770  ;;  %v2658_v5 = vpop.permute.xlu1 %2657 }
0x16a4   : > { %v2776_v13 = vsel %vm1075_vm2, %v2771_v12, 0 }
0x16a7   : > { %v2882_v14 = vpop.permute.xlu0 %2881  ;;  %v2769_v15 = vpop.permute.xlu1 %2768 }
0x16a8   : > { %4611 = vmatmul.mubr.msk.bf16.vlgmr.msra.gmra.mrb[52].mxu0 %vm1075_vm2, %v2544_v3  ;;  %v2887_v16 = vsel %vm1075_vm2, %v2882_v14, 0 }
0x16a9   : > { %4621 = vmatpush3.bf16.xpose.msra.mxu0 %v2665_v10  ;;  %4622 = vmatprep.mubr.msk.bf16.mxu0 %vm4996_vm0, %v4995_v4 }
0x16aa   : > { %4632 = vmatprep.subr.bf16.mxu0 %v4995_v4 }
0x16ab   : > { %v2880_v17 = vpop.permute.xlu1 %2879 }
0x16b0   : > { %4623 = vmatmul.mubr.msk.bf16.vlgmr.msra.gmra.mrb[56].mxu0 %vm1075_vm2, %v2658_v5 }
0x16b1   : > { %4633 = vmatpush3.bf16.xpose.msra.mxu0 %v2776_v13  ;;  %4634 = vmatprep.mubr.msk.bf16.mxu0 %vm4996_vm0, %v4995_v4 }
0x16b2   : > { %4644 = vmatprep.subr.bf16.mxu0 %v4995_v4 }
0x16b8   : > { %4635 = vmatmul.mubr.msk.bf16.vlgmr.msra.gmra.mrb[60].mxu0 %vm1075_vm2, %v2769_v15 }
0x16b9   : > { %4645 = vmatpush3.bf16.xpose.msra.mxu0 %v2887_v16  ;;  %4646 = vmatprep.mubr.msk.bf16.mxu0 %vm4996_vm0, %v4995_v4 }
0x16ba   : > { %4656 = vmatprep.subr.bf16.mxu0 %v4995_v4 }
0x16c0   : > { %4647 = vmatmul.mubr.msk.bf16.vlgmr.msra.gmra.mrb[64].mxu0 %vm1075_vm2, %v2880_v17 }
0x16c1   : > { %4660 = vmatprep.mubr.msk.bf16.mxu0 %vm4996_vm0, %v4995_v4 }
0x177b   : > { %v2589_v18 = vpop.f32.mrb[52].mxu0 }
0x177c   : > { %v2595_v19 = vsel %vm1122_vm3, %v2589_v18, -1e+09  ;;  %v4612_v20 = vpop.f32.mrb[53].mxu0 }
0x177d   : > { %v2592_v21 = vpop.f32.mrb[54].mxu0  ;;  %v2596_v22 = vsel %vm1075_vm2, %v2595_v19, -inf }
0x177e   : > { %2597 = vmax.xlane.f32.xlu0 %v2596_v22  ;;  %v4613_v23 = vpop.f32.mrb[55].mxu0 }
0x1783   : > { %v2701_v11 = vpop.f32.mrb[56].mxu0 }
0x1784   : > { %v2707_v24 = vsel %vm1122_vm3, %v2701_v11, -1e+09  ;;  %v4624_v25 = vpop.f32.mrb[57].mxu0 }
0x1785   : > { %v2704_v26 = vpop.f32.mrb[58].mxu0  ;;  %v2708_v27 = vsel %vm1075_vm2, %v2707_v24, -inf }
0x1786   : > { %2709 = vmax.xlane.f32.xlu1 %v2708_v27  ;;  %v4625_v28 = vpop.f32.mrb[59].mxu0 }
0x178b   : > { %v2812_v30 = vpop.f32.mrb[60].mxu0 }
0x178c   : > { %v2818_v31 = vsel %vm1122_vm3, %v2812_v30, -1e+09  ;;  %v4636_v32 = vpop.f32.mrb[61].mxu0 }
0x178d   : > { %v2815_v33 = vpop.f32.mrb[62].mxu0  ;;  %v2819_v34 = vsel %vm1075_vm2, %v2818_v31, -inf }
0x178e   : > { %2820 = vmax.xlane.f32.xlu0 %v2819_v34  ;;  %v4637_v35 = vpop.f32.mrb[63].mxu0  ;;  %v4837_v34 = vld [vmem:[%s5930_s11 + $0x10] sm:$0xff]  }
0x178f   : > { %4657 = vmatpush3.bf16.msra.mxu0 %v4837_v34  ;;  %v4838_v35 = vld [vmem:[%s5930_s11 + $0x18] sm:$0xff]  }
0x1790   : > { %4658 = vmatprep.subr.bf16.mxu0 %v4995_v4 }
0x1793   : > { %v2923_v36 = vpop.f32.mrb[64].mxu0  ;;  %4659 = vmatpush3.bf16.msra.mxu0 %v4838_v35 }
0x1794   : > { %v2929_v37 = vsel %vm1122_vm3, %v2923_v36, -1e+09  ;;  %v4648_v38 = vpop.f32.mrb[65].mxu0  ;;  %4672 = vmatprep.subr.bf16.mxu0 %v4995_v4 }
0x1795   : > { %v2926_v39 = vpop.f32.mrb[66].mxu0  ;;  %v2930_v40 = vsel %vm1075_vm2, %v2929_v37, -inf }
0x1796   : > { %2931 = vmax.xlane.f32.xlu0 %v2930_v40  ;;  %v4649_v50 = vpop.f32.mrb[67].mxu0 }
0x180b   : > { %v2598_v41 = vpop.xlane.xlu0 %2597 }
0x180c   : > { %v2599_v42 = vsub.f32 %v2595_v19, %v2598_v41 }
0x180e   : > { %v2600_v43 = vmul.f32 1.442695, %v2599_v42 }
0x1810   : > { %4891 = vpow2.f32 %v2600_v43 }
0x1813   : > { %v2710_v44 = vpop.xlane.xlu1 %2709 }
0x1814   : > { %v2711_v45 = vsub.f32 %v2707_v24, %v2710_v44 }
0x1816   : > { %v2712_v46 = vmul.f32 1.442695, %v2711_v45 }
0x1818   : > { %4893 = vpow2.f32 %v2712_v46 }
0x181a   : > { %v4892_v47 = vpop.eup %4891 }
0x181b   : > { %v2602_v48 = vsel %vm1075_vm2, %v4892_v47, 0.0  ;;  %v2821_v8 = vpop.xlane.xlu0 %2820 }
0x181c   : > { %2603 = vadd.xlane.f32.xlu1 %v2602_v48  ;;  %v2822_v59 = vsub.f32 %v2818_v31, %v2821_v8 }
0x181e   : > { %v2823_v61 = vmul.f32 1.442695, %v2822_v59 }
0x1822   : > { %v4894_v49 = vpop.eup %4893 }
0x1823   : > { %v2932_v51 = vpop.xlane.xlu0 %2931  ;;  %v2714_v52 = vsel %vm1075_vm2, %v4894_v49, 0.0 }
0x1824   : > { %v2933_v53 = vsub.f32 %v2929_v37, %v2932_v51  ;;  %2715 = vadd.xlane.f32.xlu0 %v2714_v52 }
0x1826   : > { %v2934_v54 = vmul.f32 1.442695, %v2933_v53 }
0x1828   : > { %4895 = vpow2.f32 %v2934_v54 }
0x1829   : > { %4897 = vpow2.f32 %v2823_v61 }
0x182d   : > { %2608 = vrot.lane.b32.xlu1 %v5582_v63, %s6043_s13 }
0x1832   : > { %v4896_v56 = vpop.eup %4895 }
0x1833   : > { %v2936_v57 = vsel %vm1075_vm2, %v4896_v56, 0.0  ;;  %v4898_v55 = vpop.eup %4897 }
0x1834   : > { %2937 = vadd.xlane.f32.xlu0 %v2936_v57  ;;  %v2825_v62 = vsel %vm1075_vm2, %v4898_v55, 0.0 }
0x184a   : > { %2720 = vrot.lane.b32.xlu0 %v5582_v63, %s6044_s1 }
0x1851   : > { %2826 = vadd.xlane.f32.xlu1 %v2825_v62 }
0x1862   : > { %2831 = vrot.lane.b32.xlu1 %v5582_v63, %s6045_s26 }
0x1866   : > { %2942 = vrot.lane.b32.xlu1 %v5582_v63, %s6046_s30 }
0x18a9   : > { %v2604_v0 = vpop.xlane.xlu1 %2603 }
0x18aa   : > { %4899 = vrcp.f32 %v2604_v0  ;;  %v4839_v0 = vld [vmem:[%s5934_s15 + $0x10] sm:$0xff]  }
0x18ad   : > { %v2609_v1 = vpop.permute.xlu1 %2608 }
0x18ae   : > { %v2614_v2 = vsel %vm1141_vm4, %v2609_v1, 0  ;;  %v4841_v1 = vld [vmem:[%s5933_s14 + $0x10] sm:$0xff]  }
0x18af   : > { %4615 = vmatpush3.bf16.msra.mxu1 %v2614_v2  ;;  %v4842_v2 = vld [vmem:[%s5933_s14 + $0x18] sm:$0xff]  }
0x18b0   : > { %4626 = vmatprep.subr.bf16.mxu1 %v4995_v4 }
0x18b1   : > { %v2716_v6 = vpop.xlane.xlu0 %2715 }
0x18b2   : > { %4901 = vrcp.f32 %v2716_v6 }
0x18b4   : > { %v4900_v3 = vpop.eup %4899 }
0x18b5   : > { %v2606_v7 = vmul.f32 %v4900_v3, %v4892_v47 }
0x18b7   : > { %v2607_v9 = vpack.c.bf16 %v2606_v7, %v2606_v7 }
0x18b9   : > { %4617 = vmatmul.mubr.msk.bf16.vlgmr.msra.gmra.mrb[48].mxu1 %vm1075_vm2, %v2607_v9  ;;  %v4247_v9 = vld [vmem:[%s5931_s12 + $0x1] ss:$0 sm:$0xff] }
0x18ba   : > { %4628 = vmatprep.mubr.msk.bf16.mxu1 %vm4996_vm0, %v4995_v4 }
0x18bc   : > { %v4902_v10 = vpop.eup %4901 }
0x18bd   : > { %v2718_v12 = vmul.f32 %v4902_v10, %v4894_v49 }
0x18bf   : > { %v2719_v14 = vpack.c.bf16 %v2718_v12, %v2718_v12 }
0x18c1   : > { %v2938_v63 = vpop.xlane.xlu0 %2937 }
0x18c5   : > { %v2721_v5 = vpop.permute.xlu0 %2720 }
0x18c6   : > { %v2726_v13 = vsel %vm1141_vm4, %v2721_v5, 0 }
0x18c7   : > { %4627 = vmatpush3.bf16.msra.mxu1 %v2726_v13 }
0x18c8   : > { %4638 = vmatprep.subr.bf16.mxu1 %v4995_v4 }
0x18ca   : > { %4629 = vmatmul.mubr.msk.bf16.vlgmr.msra.gmra.mrb[52].mxu1 %vm1075_vm2, %v2719_v14 }
0x18cb   : > { %4640 = vmatprep.mubr.msk.bf16.mxu1 %vm4996_vm0, %v4995_v4 }
0x18de   : > { %v2827_v15 = vpop.xlane.xlu1 %2826 }
0x18df   : > { %4903 = vrcp.f32 %v2827_v15 }
0x18e0   : > { %4905 = vrcp.f32 %v2938_v63  ;;  %v4248_v63 = vld [vmem:[%s6047_s8 + $0x1] ss:$0 sm:$0xff] }
0x18e2   : > { %v2832_v16 = vpop.permute.xlu1 %2831 }
0x18e3   : > { %v2837_v17 = vsel %vm1141_vm4, %v2832_v16, 0 }
0x18e4   : > { %4639 = vmatpush3.bf16.msra.mxu1 %v2837_v17 }
0x18e5   : > { %4650 = vmatprep.subr.bf16.mxu1 %v4995_v4 }
0x18e6   : > { %v2943_v20 = vpop.permute.xlu1 %2942 }
0x18e7   : > { %v2948_v23 = vsel %vm1141_vm4, %v2943_v20, 0 }
0x18e9   : > { %v4904_v18 = vpop.eup %4903 }
0x18ea   : > { %v2829_v19 = vmul.f32 %v4904_v18, %v4898_v55  ;;  %v4906_v22 = vpop.eup %4905 }
0x18eb   : > { %v2940_v11 = vmul.f32 %v4906_v22, %v4896_v56 }
0x18ec   : > { %v2830_v21 = vpack.c.bf16 %v2829_v19, %v2829_v19 }
0x18ed   : > { %v2941_v24 = vpack.c.bf16 %v2940_v11, %v2940_v11 }
0x18ee   : > { %4641 = vmatmul.mubr.msk.bf16.vlgmr.msra.gmra.mrb[56].mxu1 %vm1075_vm2, %v2830_v21 }
0x18ef   : > { %4651 = vmatpush3.bf16.msra.mxu1 %v2948_v23  ;;  %4652 = vmatprep.mubr.msk.bf16.mxu1 %vm4996_vm0, %v4995_v4 }
0x18f0   : > { %4664 = vmatprep.subr.bf16.mxu1 %v4995_v4 }
0x18f6   : > { %4653 = vmatmul.mubr.msk.bf16.vlgmr.msra.gmra.mrb[60].mxu1 %vm1075_vm2, %v2941_v24 }
0x18f7   : > { %4668 = vmatprep.mubr.msk.bf16.mxu1 %vm4996_vm0, %v4995_v4  ;;  %4665 = vmatpush3.bf16.msra.mxu1 %v4841_v1 }
0x18f8   : > { %4666 = vmatprep.subr.bf16.mxu1 %v4995_v4 }
0x18fb   : > { %4667 = vmatpush3.bf16.msra.mxu1 %v4842_v2 }
0x18fc   : > { %4680 = vmatprep.subr.bf16.mxu1 %v4995_v4 }
0x198c   : > { %v2650_v25 = vpop.f32.mrb[48].mxu1 }
0x198d   : > { %v4618_v26 = vpop.f32.mrb[49].mxu1 }
0x198e   : > { %v2653_v27 = vpop.f32.mrb[50].mxu1 }
0x198f   : > { %v4619_v28 = vpop.f32.mrb[51].mxu1 }
0x199d   : > { %v2762_v30 = vpop.f32.mrb[52].mxu1 }
0x199e   : > { %2991 = vrot.lane.b32.xlu0 %v2762_v30, %s6040_s28  ;;  %v4630_v31 = vpop.f32.mrb[53].mxu1 }
0x199f   : > { %v2765_v32 = vpop.f32.mrb[54].mxu1 }
0x19a0   : > { %v4631_v33 = vpop.f32.mrb[55].mxu1 }
0x19c1   : > { %v2873_v36 = vpop.f32.mrb[56].mxu1 }
0x19c2   : > { %2995 = vrot.lane.b32.xlu1 %v2873_v36, %s6041_s2  ;;  %v4642_v37 = vpop.f32.mrb[57].mxu1 }
0x19c3   : > { %v2876_v38 = vpop.f32.mrb[58].mxu1 }
0x19c4   : > { %v4643_v39 = vpop.f32.mrb[59].mxu1 }
0x19c9   : > { %v2984_v40 = vpop.f32.mrb[60].mxu1 }
0x19ca   : > { %2999 = vrot.lane.b32.xlu0 %v2984_v40, %s6042_s3  ;;  %v4654_v50 = vpop.f32.mrb[61].mxu1 }
0x19cb   : > { %v2987_v41 = vpop.f32.mrb[62].mxu1 }
0x19cc   : > { %v4655_v42 = vpop.f32.mrb[63].mxu1 }
0x1a10   : > { %v2992_v43 = vpop.permute.xlu0 %2991 }
0x1a11   : > { %v3002_v45 = vsel %vm1075_vm2, %v2650_v25, %v2992_v43 }
0x1a34   : > { %v2996_v44 = vpop.permute.xlu1 %2995 }
0x1a35   : > { %v3003_v46 = vsel %vm1532_vm5, %v3002_v45, %v2996_v44 }
0x1a3c   : > { %v3000_v47 = vpop.permute.xlu0 %2999 }
0x1a3d   : > { %v3004_v48 = vsel %vm1534_vm6, %v3003_v46, %v3000_v47 }
0x1a3e   : > { %v3005_v8 = vpack.c.bf16 %v3004_v48, %v3004_v48 }
0x1a40   : > { %4661 = vmatmul.mubr.msk.bf16.vlgmr.msra.gmra.mrb[68].mxu0 %vm903_vm1, %v3005_v8 }
0x1a41   : > { %4676 = vmatprep.mubr.msk.bf16.mxu0 %vm4996_vm0, %v4995_v4  ;;  %4673 = vmatpush3.bf16.msra.mxu0 %v4839_v0 }
0x1a42   : > { %4674 = vmatprep.subr.bf16.mxu0 %v4995_v4 }
0x1b13   : > { %v3055_v49 = vpop.f32.mrb[68].mxu0 }
0x1b14   : > { %v3056_v51 = vadd.f32 %v3055_v49, %v5575_v60  ;;  %v4662_v52 = vpop.f32.mrb[69].mxu0  ;;  %v4840_v60 = vld [vmem:[%s5934_s15 + $0x18] sm:$0xff]  }
0x1b15   : > { %v3058_v53 = vpop.f32.mrb[70].mxu0  ;;  %4675 = vmatpush3.bf16.msra.mxu0 %v4840_v60 }
0x1b16   : > { %v4663_v54 = vpop.f32.mrb[71].mxu0  ;;  %v3065_v56 = vsel %vm903_vm1, %v3056_v51, 0.0  ;;  %4686 = vmatprep.subr.bf16.mxu0 %v4995_v4 }
0x1b17   : > { %3066 = vadd.xlane.f32.xlu1 %v3065_v56 }
0x1b18   : > { %4677 = vmatmul.mubr.msk.bf16.vlgmr.msra.gmra.mrb[72].mxu0 %vm903_vm1, %v5376_v58 }
0x1b19   : > { %4688 = vmatprep.mubr.msk.bf16.mxu0 %vm4996_vm0, %v4995_v4 }
0x1ba4   : > { %v3067_v57 = vpop.xlane.xlu1 %3066 }
0x1ba5   : > { %v3068_v59 = vmul.f32 0.03125, %v3067_v57 }
0x1ba7   : > { %v3069_v61 = vsub.f32 %v3056_v51, %v3068_v59 }
0x1ba9   : > { %v3070_v55 = vmul.f32 %v3069_v61, %v3069_v61 }
0x1bab   : > { %v3071_v62 = vsel %vm903_vm1, %v3070_v55, 0.0 }
0x1bac   : > { %3072 = vadd.xlane.f32.xlu0 %v3071_v62 }
0x1beb   : > { %v3205_v14 = vpop.f32.mrb[72].mxu0 }
0x1bec   : > { %v4678_v15 = vpop.f32.mrb[73].mxu0 }
0x1bed   : > { %v3208_v16 = vpop.f32.mrb[74].mxu0 }
0x1bee   : > { %v5712_v17 = vpack.c.bf16 %v3208_v16, %v3205_v14  ;;  %v4679_v18 = vpop.f32.mrb[75].mxu0 }
0x1bf0   : > { %3330 = vrot.lane.b32.xlu0 %v5712_v17, %s6029_s7  ;;  %v3223_v19 = vsel %vm1075_vm2, %v5712_v17, 0 }
0x1c39   : > { %v3073_v3 = vpop.xlane.xlu0 %3072 }
0x1c3a   : > { %v3074_v6 = vmul.f32 0.03125, %v3073_v3 }
0x1c3c   : > { %v3075_v58 = vadd.f32 1e-06, %v3074_v6 }
0x1c3e   : > { %4907 = vrsqrt.f32 %v3075_v58 }
0x1c48   : > { %v4908_v7 = vpop.eup %4907 }
0x1c49   : > { %v3077_v10 = vmul.f32 %v4908_v7, %v3069_v61 }
0x1c4b   : > { %v3084_v12 = vmul.f32 %v4247_v9, %v3077_v10 }
0x1c4d   : > { %v5705_v5 = vadd.f32 %v4248_v63, %v3084_v12 }
0x1c4f   : > { %v3097_v13 = vpack.c.bf16 %v5705_v5, %v5705_v5 }
0x1c51   : > { %4669 = vmatmul.mubr.msk.bf16.vlgmr.msra.gmra.mrb[64].mxu1 %vm903_vm1, %v3097_v13 }
0x1c52   : > { %4682 = vmatprep.mubr.msk.bf16.mxu1 %vm4996_vm0, %v4995_v4  ;;  %4681 = vmatpush3.bf16.xpose.msra.mxu1 %v3223_v19 }
0x1c53   : > { %4692 = vmatprep.subr.bf16.mxu1 %v4995_v4 }
0x1c62   : > { %v3331_v23 = vpop.permute.xlu0 %3330 }
0x1c63   : > { %v3336_v26 = vsel %vm1075_vm2, %v3331_v23, 0 }
0x1d24   : > { %v3147_v20 = vpop.f32.mrb[64].mxu1 }
0x1d25   : > { %v3153_v21 = vmul.f32 0.35355338, %v3147_v20  ;;  %v4670_v22 = vpop.f32.mrb[65].mxu1 }
0x1d26   : > { %v3150_v11 = vpop.f32.mrb[66].mxu1 }
0x1d27   : > { %v3217_v24 = vpack.c.bf16 %v3153_v21, %v3153_v21  ;;  %v4671_v25 = vpop.f32.mrb[67].mxu1 }
0x1d29   : > { %3328 = vrot.lane.b32.xlu1 %v3217_v24, %s6029_s7  ;;  %3439 = vrot.lane.b32.xlu0 %v3217_v24, %s6030_s5  ;;  %s6048_s7 = sld [smem:[#allocation16_spill]] }
0x1d2a   : > { %4683 = vmatmul.mubr.msk.bf16.vlgmr.msra.gmra.mrb[68].mxu1 %vm1075_vm2, %v3217_v24 }
0x1d2b   : > { %4693 = vmatpush3.bf16.xpose.msra.mxu1 %v3336_v26  ;;  %4694 = vmatprep.mubr.msk.bf16.mxu1 %vm4996_vm0, %v4995_v4 }
0x1d2c   : > { %4704 = vmatprep.subr.bf16.mxu1 %v4995_v4 }
0x1d2d   : > { %3441 = vrot.lane.b32.xlu1 %v5712_v17, %s6030_s5  ;;  %3550 = vrot.lane.b32.xlu0 %v3217_v24, %s6031_s6 }
0x1d31   : > { %3552 = vrot.lane.b32.xlu1 %v5712_v17, %s6031_s6 }
0x1d9b   : > { %v3329_v27 = vpop.permute.xlu1 %3328  ;;  %v3440_v32 = vpop.permute.xlu0 %3439 }
0x1d9c   : > { %4695 = vmatmul.mubr.msk.bf16.vlgmr.msra.gmra.mrb[72].mxu1 %vm1075_vm2, %v3329_v27 }
0x1d9d   : > { %4706 = vmatprep.mubr.msk.bf16.mxu1 %vm4996_vm0, %v4995_v4 }
0x1d9f   : > { %v3442_v28 = vpop.permute.xlu1 %3441  ;;  %v3551_v34 = vpop.permute.xlu0 %3550 }
0x1da0   : > { %v3447_v30 = vsel %vm1075_vm2, %v3442_v28, 0 }
0x1da1   : > { %4705 = vmatpush3.bf16.xpose.msra.mxu1 %v3447_v30 }
0x1da2   : > { %4716 = vmatprep.subr.bf16.mxu1 %v4995_v4 }
0x1da3   : > { %v3553_v31 = vpop.permute.xlu1 %3552 }
0x1da4   : > { %v3558_v33 = vsel %vm1075_vm2, %v3553_v31, 0 }
0x1da8   : > { %4707 = vmatmul.mubr.msk.bf16.vlgmr.msra.gmra.mrb[76].mxu1 %vm1075_vm2, %v3440_v32 }
0x1da9   : > { %4717 = vmatpush3.bf16.xpose.msra.mxu1 %v3558_v33  ;;  %4718 = vmatprep.mubr.msk.bf16.mxu1 %vm4996_vm0, %v4995_v4 }
0x1daa   : > { %4728 = vmatprep.subr.bf16.mxu1 %v4995_v4 }
0x1db0   : > { %4719 = vmatmul.mubr.msk.bf16.vlgmr.msra.gmra.mrb[80].mxu1 %vm1075_vm2, %v3551_v34 }
0x1db1   : > { %4732 = vmatprep.mubr.msk.bf16.mxu1 %vm4996_vm0, %v4995_v4 }
0x1dfd   : > { %v3259_v35 = vpop.f32.mrb[68].mxu1 }
0x1dfe   : > { %v3265_v36 = vsel %vm1799_vm7, %v3259_v35, -1e+09  ;;  %v4684_v37 = vpop.f32.mrb[69].mxu1 }
0x1dff   : > { %v3262_v38 = vpop.f32.mrb[70].mxu1  ;;  %v3266_v39 = vsel %vm1532_vm5, %v3265_v36, -inf }
0x1e00   : > { %3267 = vmax.xlane.f32.xlu1 %v3266_v39  ;;  %v4685_v40 = vpop.f32.mrb[71].mxu1 }
0x1e6f   : > { %v3372_v50 = vpop.f32.mrb[72].mxu1 }
0x1e70   : > { %v3378_v41 = vsel %vm1799_vm7, %v3372_v50, -1e+09  ;;  %v4696_v42 = vpop.f32.mrb[73].mxu1 }
0x1e71   : > { %v3375_v43 = vpop.f32.mrb[74].mxu1  ;;  %v3379_v44 = vsel %vm1532_vm5, %v3378_v41, -inf }
0x1e72   : > { %3380 = vmax.xlane.f32.xlu0 %v3379_v44  ;;  %v4697_v45 = vpop.f32.mrb[75].mxu1 }
0x1e7b   : > { %v3483_v46 = vpop.f32.mrb[76].mxu1 }
0x1e7c   : > { %v3489_v47 = vsel %vm1799_vm7, %v3483_v46, -1e+09  ;;  %v4708_v48 = vpop.f32.mrb[77].mxu1 }
0x1e7d   : > { %v3486_v8 = vpop.f32.mrb[78].mxu1  ;;  %v3490_v49 = vsel %vm1532_vm5, %v3489_v47, -inf }
0x1e7e   : > { %3491 = vmax.xlane.f32.xlu0 %v3490_v49  ;;  %v4709_v51 = vpop.f32.mrb[79].mxu1 }
0x1e83   : > { %v3594_v52 = vpop.f32.mrb[80].mxu1 }
0x1e84   : > { %v3600_v53 = vsel %vm1799_vm7, %v3594_v52, -1e+09  ;;  %v4720_v54 = vpop.f32.mrb[81].mxu1 }
0x1e85   : > { %v3597_v56 = vpop.f32.mrb[82].mxu1  ;;  %v3601_v57 = vsel %vm1532_vm5, %v3600_v53, -inf }
0x1e86   : > { %3602 = vmax.xlane.f32.xlu1 %v3601_v57  ;;  %v4721_v59 = vpop.f32.mrb[83].mxu1 }
0x1e8d   : > { %v3268_v61 = vpop.xlane.xlu1 %3267 }
0x1e8e   : > { %v3269_v55 = vsub.f32 %v3265_v36, %v3268_v61 }
0x1e90   : > { %v3270_v62 = vmul.f32 1.442695, %v3269_v55 }
0x1e92   : > { %4909 = vpow2.f32 %v3270_v62 }
0x1e9c   : > { %v4910_v0 = vpop.eup %4909 }
0x1e9d   : > { %v3272_v60 = vsel %vm1532_vm5, %v4910_v0, 0.0 }
0x1e9e   : > { %3273 = vadd.xlane.f32.xlu0 %v3272_v60 }
0x1eff   : > { %v3381_v1 = vpop.xlane.xlu0 %3380 }
0x1f00   : > { %v3382_v2 = vsub.f32 %v3378_v41, %v3381_v1 }
0x1f02   : > { %v3383_v3 = vmul.f32 1.442695, %v3382_v2 }
0x1f04   : > { %4911 = vpow2.f32 %v3383_v3 }
0x1f0b   : > { %v3492_v29 = vpop.xlane.xlu0 %3491 }
0x1f0c   : > { %v3493_v6 = vsub.f32 %v3489_v47, %v3492_v29 }
0x1f0e   : > { %v4912_v58 = vpop.eup %4911  ;;  %v3494_v7 = vmul.f32 1.442695, %v3493_v6 }
0x1f0f   : > { %v3385_v9 = vsel %vm1532_vm5, %v4912_v58, 0.0 }
0x1f10   : > { %4913 = vpow2.f32 %v3494_v7  ;;  %3386 = vadd.xlane.f32.xlu1 %v3385_v9 }
0x1f13   : > { %v3603_v13 = vpop.xlane.xlu1 %3602 }
0x1f14   : > { %v3604_v14 = vsub.f32 %v3600_v53, %v3603_v13  ;;  %v4848_v13 = vld [vmem:[%s5940_s21 + $0x28] sm:$0xff]  }
0x1f16   : > { %v3605_v15 = vmul.f32 1.442695, %v3604_v14 }
0x1f1a   : > { %v4914_v10 = vpop.eup %4913 }
0x1f1b   : > { %v3496_v63 = vsel %vm1532_vm5, %v4914_v10, 0.0 }
0x1f1c   : > { %3497 = vadd.xlane.f32.xlu0 %v3496_v63  ;;  %v4845_v63 = vld [vmem:[%s5938_s19 + $0x10] sm:$0xff]  }
0x1f21   : > { %3393 = vrot.lane.b32.xlu1 %v5712_v17, %s6037_s9  ;;  %s6050_s9 = sld [smem:[#allocation15_spill]] }
0x1f27   : > { %s4159_s25 = sshll.u32 %s6050_s9, 3 }
0x1f28   : > { %s822_s8 = scalar_lea.vmem [#allocation2], %s4159_s25 }
0x1f2b   : > { %v3274_v12 = vpop.xlane.xlu0 %3273 }
0x1f2c   : > { %4915 = vrcp.f32 %v3274_v12  ;;  %v4847_v12 = vld [vmem:[%s5940_s21 + $0x20] sm:$0xff]  }
0x1f2d   : > { %4917 = vpow2.f32 %v3605_v15 }
0x1f32   : > { %3281 = vrot.lane.b32.xlu0 %v5712_v17, %s6033_s10  ;;  %s6049_s10 = sld [smem:[#allocation29_spill]] }
0x1f36   : > { %v4916_v16 = vpop.eup %4915  ;;  %3615 = vrot.lane.b32.xlu0 %v5712_v17, %s6035_s29  ;;  %s3952_s29 = scalar_lea.sflag [#allocation3], %s6050_s9 }
0x1f37   : > { %v3276_v18 = vmul.f32 %v4916_v16, %v4910_v0  ;;  %v4918_v19 = vpop.eup %4917 }
0x1f38   : > { %v3607_v20 = vsel %vm1532_vm5, %v4918_v19, 0.0  ;;  %v4843_v44 = vld [vmem:[%s6049_s10 + $0x10] sm:$0xff]   ;;  %v4844_v45 = vld [vmem:[%s6049_s10 + $0x18] sm:$0xff]   ;;  %s6053_s10 = sld [smem:[#allocation30_spill]] }
0x1f39   : > { %4268 = vst.msk [vmem:[%s6048_s7 + $0x20] sm:$0xff] %vm1532_vm5, %v3276_v18  ;;  %v3279_v25 = vpack.c.bf16 %v3276_v18, %v3276_v18  ;;  %4729 = vmatpush3.bf16.msra.mxu1 %v4843_v44 }
0x1f3a   : > { %4730 = vmatprep.subr.bf16.mxu1 %v4995_v4 }
0x1f3d   : > { %4731 = vmatpush3.bf16.msra.mxu1 %v4844_v45 }
0x1f3e   : > { %4744 = vmatprep.subr.bf16.mxu1 %v4995_v4 }
0x1f45   : > { %3608 = vadd.xlane.f32.xlu1 %v3607_v20 }
0x1f56   : > { %3504 = vrot.lane.b32.xlu1 %v5712_v17, %s6034_s27 }
0x1f9d   : > { %v3387_v21 = vpop.xlane.xlu1 %3386 }
0x1f9e   : > { %4919 = vrcp.f32 %v3387_v21  ;;  %v4285_v21 = vld [vmem:[%s5937_s18 + $0x1] ss:$0 sm:$0xff] }
0x1fa1   : > { %v3394_v26 = vpop.permute.xlu1 %3393 }
0x1fa8   : > { %v4920_v22 = vpop.eup %4919 }
0x1fa9   : > { %v3389_v23 = vmul.f32 %v4920_v22, %v4912_v58  ;;  %v3498_v11 = vpop.xlane.xlu0 %3497 }
0x1faa   : > { %4921 = vrcp.f32 %v3498_v11 }
0x1fab   : > { %4271 = vst.msk [vmem:[%s6048_s7 + $0x28] sm:$0xff] %vm1532_vm5, %v3389_v23  ;;  %v3392_v28 = vpack.c.bf16 %v3389_v23, %v3389_v23 }
0x1fad   : > { %v3282_v24 = vpop.permute.xlu0 %3281 }
0x1fae   : > { %4687 = vmatpush3.bf16.msra.mxu0 %v3282_v24  ;;  %v4849_v24 = vld [vmem:[%s5940_s21 + $0x30] sm:$0xff]  }
0x1faf   : > { %4698 = vmatprep.subr.bf16.mxu0 %v4995_v4 }
0x1fb1   : > { %4689 = vmatmul.mubr.msk.bf16.vlgmr.msra.gmra.mrb[76].mxu0 %vm1532_vm5, %v3279_v25  ;;  %v3616_v33 = vpop.permute.xlu0 %3615  ;;  %v4850_v25 = vld [vmem:[%s5940_s21 + $0x38] sm:$0xff]  }
0x1fb2   : > { %4699 = vmatpush3.bf16.msra.mxu0 %v3394_v26  ;;  %4700 = vmatprep.mubr.msk.bf16.mxu0 %vm4996_vm0, %v4995_v4  ;;  %v4291_v26 = vld [vmem:[%s5939_s20 + $0x1] ss:$0 sm:$0xff] }
0x1fb3   : > { %4710 = vmatprep.subr.bf16.mxu0 %v4995_v4 }
0x1fb4   : > { %v4922_v17 = vpop.eup %4921 }
0x1fb5   : > { %v3500_v27 = vmul.f32 %v4922_v17, %v4914_v10 }
0x1fb7   : > { %4274 = vst.msk [vmem:[%s6048_s7 + $0x30] sm:$0xff] %vm1532_vm5, %v3500_v27  ;;  %v3503_v32 = vpack.c.bf16 %v3500_v27, %v3500_v27 }
0x1fb9   : > { %4701 = vmatmul.mubr.msk.bf16.vlgmr.msra.gmra.mrb[80].mxu0 %vm1532_vm5, %v3392_v28 }
0x1fba   : > { %4712 = vmatprep.mubr.msk.bf16.mxu0 %vm4996_vm0, %v4995_v4 }
0x1fd2   : > { %v3609_v30 = vpop.xlane.xlu1 %3608 }
0x1fd3   : > { %4923 = vrcp.f32 %v3609_v30 }
0x1fd6   : > { %v3505_v31 = vpop.permute.xlu1 %3504 }
0x1fd7   : > { %4711 = vmatpush3.bf16.msra.mxu0 %v3505_v31 }
0x1fd8   : > { %4722 = vmatprep.subr.bf16.mxu0 %v4995_v4 }
0x1fda   : > { %4713 = vmatmul.mubr.msk.bf16.vlgmr.msra.gmra.mrb[84].mxu0 %vm1532_vm5, %v3503_v32 }
0x1fdb   : > { %4723 = vmatpush3.bf16.msra.mxu0 %v3616_v33  ;;  %4724 = vmatprep.mubr.msk.bf16.mxu0 %vm4996_vm0, %v4995_v4 }
0x1fdc   : > { %4736 = vmatprep.subr.bf16.mxu0 %v4995_v4 }
0x1fdd   : > { %v4924_v34 = vpop.eup %4923 }
0x1fde   : > { %v3611_v35 = vmul.f32 %v4924_v34, %v4918_v19  ;;  %v4284_v19 = vld [vmem:[%s5936_s17 + $0x1] ss:$0 sm:$0xff] }
0x1fe0   : > { %v3614_v36 = vpack.c.bf16 %v3611_v35, %v3611_v35  ;;  %4277 = vst.msk [vmem:[%s6048_s7 + $0x38] sm:$0xff] %vm1532_vm5, %v3611_v35  ;;  %s3969_s7 = sshll.u32 %s822_s8, 4  ;;  %s5863_s7 = int_to_ptr.vmem [resolvable:$true] %s3969_s7 }
0x1fe2   : > { %4725 = vmatmul.mubr.msk.bf16.vlgmr.msra.gmra.mrb[88].mxu0 %vm1532_vm5, %v3614_v36 }
0x1fe3   : > { %4740 = vmatprep.mubr.msk.bf16.mxu0 %vm4996_vm0, %v4995_v4  ;;  %4737 = vmatpush3.bf16.msra.mxu0 %v4845_v63 }
0x1fe4   : > { %4738 = vmatprep.subr.bf16.mxu0 %v4995_v4 }
0x2084   : > { %v3321_v37 = vpop.f32.mrb[76].mxu0 }
0x2085   : > { %v4690_v38 = vpop.f32.mrb[77].mxu0 }
0x2086   : > { %v3324_v39 = vpop.f32.mrb[78].mxu0 }
0x2087   : > { %v4691_v40 = vpop.f32.mrb[79].mxu0 }
0x208c   : > { %v3433_v50 = vpop.f32.mrb[80].mxu0 }
0x208d   : > { %3662 = vrot.lane.b32.xlu1 %v3433_v50, %s6040_s28  ;;  %v4702_v41 = vpop.f32.mrb[81].mxu0  ;;  %s4929_s28 = scalar_lea.vmem %s5863_s7, 128 }
0x208e   : > { %v3436_v42 = vpop.f32.mrb[82].mxu0  ;;  %p4930_p11 = scmp.ne.s32.totalorder %s5863_s7, %s4929_s28 }
0x208f   : > { %v4703_v43 = vpop.f32.mrb[83].mxu0 }
0x2090   : > { %p4931_p12 = pnand %p4930_p11, %p5187_p5 }
0x2092   : > { %p4932_p13 = pneg %p4931_p12 }
0x20ad   : > { %v3544_v46 = vpop.f32.mrb[84].mxu0 }
0x20ae   : > { %3666 = vrot.lane.b32.xlu0 %v3544_v46, %s6041_s2  ;;  %v4714_v47 = vpop.f32.mrb[85].mxu0  ;;  %s5013_s2 = smov [#allocation2]  }
0x20af   : > { %v3547_v48 = vpop.f32.mrb[86].mxu0 }
0x20b0   : > { %v4715_v8 = vpop.f32.mrb[87].mxu0 }
0x20b1   : > { %v4312_v8 = vld [vmem:[%s5942_s23 + $0x1] ss:$0 sm:$0xff] }
0x20b5   : > { %v3655_v49 = vpop.f32.mrb[88].mxu0 }
0x20b6   : > { %3670 = vrot.lane.b32.xlu1 %v3655_v49, %s6042_s3  ;;  %v4726_v51 = vpop.f32.mrb[89].mxu0  ;;  %s6051_s3 = sld [smem:[#allocation10_spill]] }
0x20b7   : > { %v3658_v52 = vpop.f32.mrb[90].mxu0  ;;  %v4313_v51 = vld [vmem:[%s5943_s24 + $0x1] ss:$0 sm:$0xff] }
0x20b8   : > { %v4727_v53 = vpop.f32.mrb[91].mxu0 }
0x20bc   : > { %s4316_s30 = sshll.u32 %s6051_s3, 7  ;;  %s4933_s3 = sshll.u32 %s5013_s2, 4  ;;  %s4934_s3 = int_to_ptr.vmem [resolvable:$false] %s4933_s3 }
0x20bd   : > { %s5861_s27 = scalar_lea.hbm %s6053_s10, %s4316_s30  ;;  %s4935_s25 = scalar_lea.vmem %s4934_s3, 256 }
0x20be   : > { %p4936_p0 = scmp.lt.s32.totalorder %s5863_s7, %s4934_s3  ;;  %p4937_p1 = scmp.lt.s32.totalorder %s4935_s25, %s4929_s28 }
0x20c0   : > { %p4938_p2 = por %p4937_p1, %p4936_p0 }
0x20c2   : > { %p4939_p3 = pnand %p4938_p2, %p4932_p13 }
0x20ff   : > { %v3663_v54 = vpop.permute.xlu1 %3662 }
0x2100   : > { %v3673_v57 = vsel %vm1075_vm2, %v3321_v37, %v3663_v54 }
0x2120   : > { %v3667_v56 = vpop.permute.xlu0 %3666 }
0x2121   : > { %v3674_v59 = vsel %vm1532_vm5, %v3673_v57, %v3667_v56 }
0x2128   : > { %v3671_v61 = vpop.permute.xlu1 %3670 }
0x2129   : > { %v3675_v55 = vsel %vm1534_vm6, %v3674_v59, %v3671_v61 }
0x212a   : > { %v3676_v62 = vpack.c.bf16 %v3675_v55, %v3675_v55 }
0x212c   : > { %4733 = vmatmul.mubr.msk.bf16.vlgmr.msra.gmra.mrb[84].mxu1 %vm903_vm1, %v3676_v62 }
0x212d   : > { %4752 = vmatprep.mubr.msk.bf16.mxu1 %vm4996_vm0, %v4995_v4  ;;  %4745 = vmatpush3.bf16.msra.mxu1 %v4847_v12 }
0x212e   : > { %4746 = vmatprep.subr.bf16.mxu1 %v4995_v4 }
0x2131   : > { %4747 = vmatpush3.bf16.msra.mxu1 %v4848_v13 }
0x2132   : > { %4748 = vmatprep.subr.bf16.mxu1 %v4995_v4 }
0x2135   : > { %4749 = vmatpush3.bf16.msra.mxu1 %v4849_v24 }
0x2136   : > { %4750 = vmatprep.subr.bf16.mxu1 %v4995_v4  ;;  %v4304_v4 = vld [vmem:[%s5941_s22 + $0x1] ss:$0 sm:$0xff] }
0x2139   : > { %4751 = vmatpush3.bf16.msra.mxu1 %v4850_v25 }
0x21ff   : > { %v3726_v0 = vpop.f32.mrb[84].mxu1 }
0x2200   : > { %v3727_v60 = vadd.f32 %v3726_v0, %v5705_v5  ;;  %v4734_v1 = vpop.f32.mrb[85].mxu1  ;;  %v4846_v5 = vld [vmem:[%s5938_s19 + $0x18] sm:$0xff]  }
0x2201   : > { %v3729_v2 = vpop.f32.mrb[86].mxu1  ;;  %4739 = vmatpush3.bf16.msra.mxu0 %v4846_v5 }
0x2202   : > { %v4735_v3 = vpop.f32.mrb[87].mxu1  ;;  %v3736_v29 = vsel %vm903_vm1, %v3727_v60, 0.0 }
0x2203   : > { %3737 = vadd.xlane.f32.xlu0 %v3736_v29 }
0x2290   : > { %v3738_v6 = vpop.xlane.xlu0 %3737 }
0x2291   : > { %v3739_v58 = vmul.f32 0.03125, %v3738_v6 }
0x2293   : > { %v3740_v7 = vsub.f32 %v3727_v60, %v3739_v58 }
0x2295   : > { %v3741_v9 = vmul.f32 %v3740_v7, %v3740_v7 }
0x2297   : > { %v3742_v10 = vsel %vm903_vm1, %v3741_v9, 0.0 }
0x2298   : > { %3743 = vadd.xlane.f32.xlu1 %v3742_v10 }
0x2325   : > { %v3744_v14 = vpop.xlane.xlu1 %3743 }
0x2326   : > { %v3745_v15 = vmul.f32 0.03125, %v3744_v14 }
0x2328   : > { %v3746_v16 = vadd.f32 1e-06, %v3745_v15 }
0x232a   : > { %4925 = vrsqrt.f32 %v3746_v16 }
0x2334   : > { %v4926_v18 = vpop.eup %4925 }
0x2335   : > { %v3748_v20 = vmul.f32 %v4926_v18, %v3740_v7 }
0x2337   : > { %v3755_v22 = vmul.f32 %v4284_v19, %v3748_v20 }
0x2339   : > { %v3762_v23 = vadd.f32 %v4285_v21, %v3755_v22 }
0x233b   : > { %v3768_v11 = vpack.c.bf16 %v3762_v23, %v3762_v23 }
0x233d   : > { %4741 = vmatmul.mubr.msk.bf16.vlgmr.msra.gmra.mrb[92].mxu0 %vm903_vm1, %v3768_v11 }
0x2410   : > { %v3826_v17 = vpop.f32.mrb[92].mxu0 }
0x2411   : > { %v3827_v27 = vadd.f32 %v4291_v26, %v3826_v17  ;;  %v4742_v28 = vpop.f32.mrb[93].mxu0 }
0x2412   : > { %v3829_v30 = vpop.f32.mrb[94].mxu0 }
0x2413   : > { %v3832_v31 = vmax.f32 %v3827_v27, 0.0  ;;  %v4743_v32 = vpop.f32.mrb[95].mxu0 }
0x2415   : > { %v3842_v33 = vpack.c.bf16 %v3832_v31, %v3832_v31 }
0x2417   : > { %4753 = vmatmul.mubr.msk.bf16.vlgmr.msra.gmra.mrb[88].mxu1 %vm2403_vm8, %v3842_v33 }
0x24ea   : > { %v3912_v34 = vpop.f32.mrb[88].mxu1 }
0x24eb   : > { %v3913_v35 = vadd.f32 %v4304_v4, %v3912_v34  ;;  %v4754_v36 = vpop.f32.mrb[89].mxu1 }
0x24ec   : > { %v3915_v37 = vpop.f32.mrb[90].mxu1 }
0x24ed   : > { %v3918_v38 = vadd.f32 %v3913_v35, %v3762_v23  ;;  %v4755_v39 = vpop.f32.mrb[91].mxu1 }
0x24ef   : > { %v3923_v40 = vsel %vm903_vm1, %v3918_v38, 0.0 }
0x24f0   : > { %3924 = vadd.xlane.f32.xlu0 %v3923_v40 }
0x257d   : > { %v3925_v50 = vpop.xlane.xlu0 %3924 }
0x257e   : > { %v3926_v41 = vmul.f32 0.03125, %v3925_v50 }
0x2580   : > { %v3927_v42 = vsub.f32 %v3918_v38, %v3926_v41 }
0x2582   : > { %v3928_v43 = vmul.f32 %v3927_v42, %v3927_v42 }
0x2584   : > { %v3929_v44 = vsel %vm903_vm1, %v3928_v43, 0.0 }
0x2585   : > { %3930 = vadd.xlane.f32.xlu0 %v3929_v44 }
0x2612   : > { %v3931_v45 = vpop.xlane.xlu0 %3930 }
0x2613   : > { %v3932_v46 = vmul.f32 0.03125, %v3931_v45 }
0x2615   : > { %v3933_v47 = vadd.f32 1e-06, %v3932_v46 }
0x2617   : > { %4927 = vrsqrt.f32 %v3933_v47 }
0x2621   : > { %v4928_v48 = vpop.eup %4927 }
0x2622   : > { %v3935_v49 = vmul.f32 %v4928_v48, %v3927_v42 }
0x2624   : > { %v3942_v52 = vmul.f32 %v4312_v8, %v3935_v49 }
0x2626   : > { %v3949_v53 = vadd.f32 %v4313_v51, %v3942_v52 }
0x2628   : > { %3950 = vst.msk [vmem:[%s822_s8] sm:$0xff] %vm903_vm1, %v3949_v53 }
0x2629   : > { %4942 = shalt.err (!%p4939_p3)
}
0x262a   : > { %s4943_s9 = scalar_lea.hbm %s5861_s27, 128  ;;  %s4947_s1 = scalar_lea.hbm %s6053_s10, 256 }
0x262b   : > { %p4944_p4 = scmp.ne.s32.totalorder %s5861_s27, %s4943_s9  ;;  %p4948_p9 = scmp.lt.u32.totalorder %s5861_s27, %s6053_s10 }
0x262c   : > { %p4949_p10 = scmp.lt.u32.totalorder %s4947_s1, %s4943_s9  ;;  %p4951_p12 = scmp.lt.u32.totalorder %s4943_s9, %s5861_s27 }
0x262d   : > { %p4945_p7 = pnand %p4944_p4, %p5187_p5 }
0x262e   : > { %p4950_p11 = por %p4949_p10, %p4948_p9 }
0x262f   : > { %p4946_p8 = pneg %p4945_p7 }
0x2630   : > { %p4952_p13 = por %p4951_p12, %p4950_p11 }
0x2632   : > { %p4953_p0 = pnand %p4952_p13, %p4946_p8 }
0x2634   : > { %4956 = shalt.err (!%p4953_p0)
}
0x2635   : > { %4756 = dma.vmem_to_hbm [thread:$0]  (%p5187_p5), %s5863_s7, 128, %s5861_s27, %s3952_s29  }
0x2636   : > { %3975 = sbr.rel (!%p5187_p5) target bundleno = 9795 (0x2643), region = 128  ;;  %s6054_s8 = sld [smem:[#allocation10_spill]] (%p5187_p5) }
0x2637   : > { %s6055_s5 = sld [smem:[#allocation16_spill]] (%p5187_p5)  ;;  %s6056_s3 = sld [smem:[#allocation31_spill]] (%p5187_p5) }
0x263c   : > { %s4322_s6 = sshll.u32 (%p5187_p5), %s6054_s8, 5 }
0x263d   : > { %v4020_v54 = vld [vmem:[%s6055_s5] sm:$0xff]  ;;  %v4022_v56 = vld [vmem:[%s6055_s5 + $0x8] sm:$0xff]  ;;  %v4024_v57 = vld [vmem:[%s6055_s5 + $0x10] sm:$0xff]  ;;  %s3978_s7 = scalar_lea.vmem %s6056_s3, %s4322_s6 }
0x263e   : > { %v4026_v59 = vld [vmem:[%s6055_s5 + $0x18] sm:$0xff]  ;;  %v4028_v61 = vld [vmem:[%s6055_s5 + $0x20] sm:$0xff]  ;;  %v4030_v55 = vld [vmem:[%s6055_s5 + $0x28] sm:$0xff]  ;;  %4021 = vst [vmem:[%s3978_s7] sm:$0xff] %v4020_v54 }
0x263f   : > { %4023 = vst [vmem:[%s3978_s7 + $0x8] sm:$0xff] %v4022_v56  ;;  %4025 = vst [vmem:[%s3978_s7 + $0x10] sm:$0xff] %v4024_v57  ;;  %v4032_v62 = vld [vmem:[%s6055_s5 + $0x30] sm:$0xff]  ;;  %v4034_v0 = vld [vmem:[%s6055_s5 + $0x38] sm:$0xff] }
0x2640   : > { %4027 = vst [vmem:[%s3978_s7 + $0x18] sm:$0xff] %v4026_v59  ;;  %4029 = vst [vmem:[%s3978_s7 + $0x40] sm:$0xff] %v4028_v61 }
0x2641   : > { %4031 = vst [vmem:[%s3978_s7 + $0x48] sm:$0xff] %v4030_v55  ;;  %4033 = vst [vmem:[%s3978_s7 + $0x50] sm:$0xff] %v4032_v62 }
0x2642   : > { %4035 = vst [vmem:[%s3978_s7 + $0x58] sm:$0xff] %v4034_v0 }
0x2643 PF: > { %s6057_s16 = sld [smem:[#allocation9_spill]]  ;;  %s6058_s27 = sld [smem:[#allocation6_spill]] }
0x2649   : > { %p4762_p5 = scmp.ge.s32.totalorder %s6057_s16, 2  ;;  %s4047_s25 = sand.u32 1, %s6058_s27  }
0x264a   : > { %s4048_s9 = scalar_lea.sflag [#allocation3], %s4047_s25 }
0x264b   : > { %p4759_p1 = pnand %p4762_p5, %p5191_p6 }
0x264d   : > { %4974 = dma.done.wait (!%p4759_p1), %s4048_s9, 128  }
0x264e   : > { %4976 = vsyncadd (!%p4759_p1), %s4048_s9, 4294967168  ;;  %s6060_s28 = sld [smem:[#allocation11_spill]]  ;;  %s6061_s27 = sld [smem:[#allocation7_spill]] }
0x264f   : > { %s6062_s3 = sld [smem:[#allocation8_spill]]  ;;  %s6063_s7 = sld [smem:[#allocation12_spill]] }
0x2654   : > { %p37_p2 = scmp.ge.s32.totalorder %s6060_s28, 4  }
0x2656   :  { %39 = sbr.rel (!%p37_p2) target bundleno = 19 (0x13), region = 236 }
0x265d   :  { %4060 = vsyncpa [#allocation3], 1 }
0x265e   :  { %4062 = vsyncpa [#allocation3 + $0x1], 1 }

</bundles_post_ra>
